<compile_context>
chip_gen: v5e
topology: v5e:2x2
jax: 0.10.0
libtpu: 0.0.40
codegen_flags: <defaults>
</compile_context>

<pallas_src>
import jax
import jax.numpy as jnp
from jax.experimental import pallas as pl
from jax.experimental.pallas import tpu as pltpu

DIM = 3        # input point dimension
Z_DIM = 8      # latent z dimension
C_DIM = 8      # conditioning code dimension
HIDDEN = 32    # hidden size
N_BLOCKS = 5   # CResnetBlockConv1d blocks
NCBN = 2 * N_BLOCKS + 1   # 11 conditional batch norms total
EPS = 1e-5     # BatchNorm1d eps


# --------------------------------------------------------------------------- #
# Kernel
# --------------------------------------------------------------------------- #
def decoder_kernel(
    p_ref,      # (B, D, T)     points, channels-first
    z_ref,      # (B, Z, 1)
    c_ref,      # (B, C, 1)
    wgb_ref,    # (22H, C)      packed CBN gamma/beta conv weights
    bgb_ref,    # (22H, 1)      packed CBN gamma/beta conv biases
    wp_ref,     # (H, D)        fc_p weight
    wz_ref,     # (H, Z)        fc_z weight
    bpz_ref,    # (H, 1)        fc_p bias + fc_z bias (folded)
    wblk_ref,   # (2*NB, H, H)  fc_0 / fc_1 weights, interleaved per block
    bblk_ref,   # (2*NB, H, 1)  fc_0 / fc_1 biases
    wo_ref,     # (1, H)        fc_out weight
    bo_ref,     # (1, 1)        fc_out bias
    out_ref,    # (B, 1, T)     lane-dense output slab
):
    f32 = jnp.float32
    H = HIDDEN
    B, _, T = p_ref.shape
    inv_n = 1.0 / (B * T)

    def bmm(w, x):
        # (O, Hin) @ (B, Hin, T) -> (B, O, T): batched MXU matmuls, N = T lane-dense.
        wb = jnp.broadcast_to(w, (B,) + w.shape)
        return jnp.einsum('boh,bht->bot', wb, x, preferred_element_type=f32)

    def splat(w, v, bias):
        # (M, K) @ (B, K, 1) + (M, 1) -> (B, M, 1): per-(batch,row) lane-splat vector,
        # produced directly in broadcastable layout (M on sublanes, lane dim = 1).
        wb = jnp.broadcast_to(w, (B,) + w.shape)
        return jnp.einsum('bmk,bkx->bmx', wb, v, preferred_element_type=f32) + bias

    # All 22 CBN gamma/beta projections in ONE matmul, off the activation chain.
    # Rows [k*H:(k+1)*H]      -> gamma of CBN k
    # Rows [(NCBN+k)*H : ...] -> beta  of CBN k
    GB = splat(wgb_ref[...], c_ref[...], bgb_ref[...])            # (B, 22H, 1)

    def cbn_relu(x, k):
        # Per-channel batch statistics over (B, T): XLU lane reductions + tiny
        # cross-slab sums (no ones-vector matmuls, no padded constants).
        ss = jnp.sum(x * x, axis=2, keepdims=True)                 # (B, H, 1)
        s = jnp.sum(x, axis=2, keepdims=True)                      # (B, H, 1)
        mu = jnp.sum(s, axis=0, keepdims=True) * inv_n             # (1, H, 1)
        ex2 = jnp.sum(ss, axis=0, keepdims=True) * inv_n           # (1, H, 1)
        var = jnp.maximum(ex2 - mu * mu, 0.0)
        rstd = jax.lax.rsqrt(var + EPS)                            # (1, H, 1)  (EUP)
        gamma = GB[:, k * H:(k + 1) * H, :]                        # (B, H, 1)
        beta = GB[:, (NCBN + k) * H:(NCBN + k + 1) * H, :]         # (B, H, 1)
        # Fold CBN into y = a*x + b with per-(batch, channel) splat coefficients.
        a = gamma * rstd                                           # (B, H, 1)
        b = beta - mu * a                                          # (B, H, 1)
        return jnp.maximum(a * x + b, 0.0)                         # CBN + ReLU

    # fc_p (Conv1d(dim, H, 1)); fc_z (Linear(Z, H)) + folded biases as a single splat.
    net = bmm(wp_ref[...], p_ref[...])                             # (B, H, T)
    net = net + splat(wz_ref[...], z_ref[...], bpz_ref[...])       # + (B, H, 1)

    # 5 CResnetBlockConv1d blocks (statically unrolled, identity shortcuts).
    for blk in range(N_BLOCKS):
        h = cbn_relu(net, 2 * blk)
        h = bmm(wblk_ref[2 * blk], h) + bblk_ref[2 * blk]
        d = cbn_relu(h, 2 * blk + 1)
        net = net + (bmm(wblk_ref[2 * blk + 1], d) + bblk_ref[2 * blk + 1])

    # Final CBN -> ReLU -> fc_out (Conv1d(H, 1, 1)), stored lane-dense as (B, 1, T).
    o = cbn_relu(net, 2 * N_BLOCKS)
    out_ref[...] = bmm(wo_ref[...], o) + bo_ref[...]


# --------------------------------------------------------------------------- #
# Wrapper: weight packing / pre-orientation (pure layout plumbing, outside kernel)
# --------------------------------------------------------------------------- #
def _vmem_limit_bytes():
    # ~75% of the chip's VMEM, capped; falls back to a v7x-safe 48 MiB.
    try:
        cap = int(pltpu.get_tpu_info().vmem_capacity_bytes)
    except Exception:
        cap = 64 * 1024 * 1024
    return min((cap * 3) // 4, 112 * 1024 * 1024)


VMEM_LIMIT = _vmem_limit_bytes()


def pack_inputs(p, z, c, params):
    H, NB = HIDDEN, N_BLOCKS

    pT = jnp.transpose(p, (0, 2, 1))                               # (B, D, T)
    z3 = z[:, :, None]                                             # (B, Z, 1)
    c3 = c[:, :, None]                                             # (B, C, 1)

    # CBN order: k = 2*blk -> block.bn_0, k = 2*blk+1 -> block.bn_1, k = 2*NB -> final bn.
    gw = [w for blk in range(NB)
          for w in (params["bn0_gw"][blk], params["bn1_gw"][blk])] + [params["bnf_gw"]]
    gb = [b for blk in range(NB)
          for b in (params["bn0_gb"][blk], params["bn1_gb"][blk])] + [params["bnf_gb"]]
    bw = [w for blk in range(NB)
          for w in (params["bn0_bw"][blk], params["bn1_bw"][blk])] + [params["bnf_bw"]]
    bb = [b for blk in range(NB)
          for b in (params["bn0_bb"][blk], params["bn1_bb"][blk])] + [params["bnf_bb"]]
    w_gb = jnp.concatenate(gw + bw, axis=0)                        # (22H, C)
    b_gb = jnp.concatenate(gb + bb, axis=0).reshape(-1, 1)         # (22H, 1)

    w_p = params["fcp_w"]                                          # (H, D)
    w_z = params["fcz_w"]                                          # (H, Z)
    b_pz = (params["fcp_b"] + params["fcz_b"]).reshape(H, 1)       # folded bias

    w_blk = jnp.stack([w for blk in range(NB)
                       for w in (params["fc0_w"][blk], params["fc1_w"][blk])], axis=0)
    b_blk = jnp.stack([b for blk in range(NB)
                       for b in (params["fc0_b"][blk], params["fc1_b"][blk])],
                      axis=0).reshape(2 * NB, H, 1)

    w_out = params["fco_w"]                                        # (1, H)
    b_out = params["fco_b"].reshape(1, 1)

    return (pT, z3, c3, w_gb, b_gb, w_p, w_z, b_pz, w_blk, b_blk, w_out, b_out)


@jax.jit
def decoder_forward(p, z, c, params):
    B, T, _ = p.shape
    args = pack_inputs(p, z, c, params)
    out = pl.pallas_call(
        decoder_kernel,
        out_shape=jax.ShapeDtypeStruct((B, 1, T), jnp.float32),
        in_specs=[pl.BlockSpec(memory_space=pltpu.MemorySpace.VMEM)] * len(args),
        out_specs=pl.BlockSpec(memory_space=pltpu.MemorySpace.VMEM),
        compiler_params=pltpu.CompilerParams(vmem_limit_bytes=VMEM_LIMIT),
    )(*args)
    return out.reshape(B, T)


# --------------------------------------------------------------------------- #
# Synthetic parameters (PyTorch-convention shapes) and plain-JAX reference
# --------------------------------------------------------------------------- #
def make_params(key):
    keys = iter(jax.random.split(key, 32))

    def r(shape, scale=0.2):
        return scale * jax.random.normal(next(keys), shape, dtype=jnp.float32)

    H, C, Z, D, NB = HIDDEN, C_DIM, Z_DIM, DIM, N_BLOCKS
    return dict(
        fcp_w=r((H, D)), fcp_b=r((H,)),                 # fc_p: Conv1d(dim, H, 1)
        fcz_w=r((H, Z)), fcz_b=r((H,)),                 # fc_z: Linear(Z, H)
        bn0_gw=r((NB, H, C)), bn0_gb=r((NB, H)),        # block.bn_0 conv_gamma
        bn0_bw=r((NB, H, C)), bn0_bb=r((NB, H)),        # block.bn_0 conv_beta
        bn1_gw=r((NB, H, C)), bn1_gb=r((NB, H)),        # block.bn_1 conv_gamma
        bn1_bw=r((NB, H, C)), bn1_bb=r((NB, H)),        # block.bn_1 conv_beta
        fc0_w=r((NB, H, H)), fc0_b=r((NB, H)),          # block.fc_0
        fc1_w=r((NB, H, H)), fc1_b=r((NB, H)),          # block.fc_1
        bnf_gw=r((H, C)), bnf_gb=r((H,)),               # final bn conv_gamma
        bnf_bw=r((H, C)), bnf_bb=r((H,)),               # final bn conv_beta
        fco_w=r((1, H)), fco_b=r((1,)),                 # fc_out: Conv1d(H, 1, 1)
    )


def reference(p, z, c, params):
    # Plain-JAX reference mirroring the PyTorch forward (training-mode BatchNorm1d).
    def conv1x1(x, w, b):
        return jnp.einsum("btc,oc->bto", x, w) + b.reshape(1, 1, -1)

    def cbn(x, c_, gw, gb, bw, bb):
        gamma = c_ @ gw.T + gb.reshape(1, -1)
        beta = c_ @ bw.T + bb.reshape(1, -1)
        mu = x.mean(axis=(0, 1), keepdims=True)
        var = ((x - mu) ** 2).mean(axis=(0, 1), keepdims=True)
        return gamma[:, None, :] * ((x - mu) / jnp.sqrt(var + EPS)) + beta[:, None, :]

    net = conv1x1(p, params["fcp_w"], params["fcp_b"])
    net = net + (z @ params["fcz_w"].T + params["fcz_b"].reshape(1, -1))[:, None, :]
    for blk in range(N_BLOCKS):
        h = jax.nn.relu(cbn(net, c, params["bn0_gw"][blk], params["bn0_gb"][blk],
                            params["bn0_bw"][blk], params["bn0_bb"][blk]))
        h = conv1x1(h, params["fc0_w"][blk], params["fc0_b"][blk])
        d = jax.nn.relu(cbn(h, c, params["bn1_gw"][blk], params["bn1_gb"][blk],
                            params["bn1_bw"][blk], params["bn1_bb"][blk]))
        net = net + conv1x1(d, params["fc1_w"][blk], params["fc1_b"][blk])
    o = jax.nn.relu(cbn(net, c, params["bnf_gw"], params["bnf_gb"],
                        params["bnf_bw"], params["bnf_bb"]))
    o = conv1x1(o, params["fco_w"], params["fco_b"])
    return o[..., 0]


if __name__ == "__main__":
    key = jax.random.PRNGKey(0)
    kp, kz, kc, kparams = jax.random.split(key, 4)
    B, T = 2, 64
    p = jax.random.normal(kp, (B, T, DIM), dtype=jnp.float32)   # points (B, T, dim)
    z = jax.random.normal(kz, (B, Z_DIM), dtype=jnp.float32)
    c = jax.random.normal(kc, (B, C_DIM), dtype=jnp.float32)
    params = make_params(kparams)

    out = decoder_forward(p, z, c, params)
    jax.block_until_ready(out)

    ref = reference(p, z, c, params)
    assert out.shape == (B, T), out.shape
    err = float(jnp.max(jnp.abs(out - ref)))
    assert jnp.allclose(out, ref, atol=1e-3, rtol=1e-3), f"max abs err {err}"
    print("KERNEL_OK")
</pallas_src>

<mosaic_0001>
module attributes {stable_mosaic.version = 11 : i64} {
  func.func @decoder_kernel(%arg0: memref<2x3x64xf32, #tpu.memory_space<vmem>>, %arg1: memref<2x8x1xf32, #tpu.memory_space<vmem>>, %arg2: memref<2x8x1xf32, #tpu.memory_space<vmem>>, %arg3: memref<704x8xf32, #tpu.memory_space<vmem>>, %arg4: memref<704x1xf32, #tpu.memory_space<vmem>>, %arg5: memref<32x3xf32, #tpu.memory_space<vmem>>, %arg6: memref<32x8xf32, #tpu.memory_space<vmem>>, %arg7: memref<32x1xf32, #tpu.memory_space<vmem>>, %arg8: memref<10x32x32xf32, #tpu.memory_space<vmem>>, %arg9: memref<10x32x1xf32, #tpu.memory_space<vmem>>, %arg10: memref<1x32xf32, #tpu.memory_space<vmem>>, %arg11: memref<1x1xf32, #tpu.memory_space<vmem>>, %arg12: memref<2x1x64xf32, #tpu.memory_space<vmem>>) attributes {dimension_semantics = [], scalar_prefetch = 0 : i64, scratch_operands = 0 : i64, tpu.core_type = #tpu.core_type<tc>} {
    %c0 = arith.constant 0 : index
    %c0_0 = arith.constant 0 : index
    %0 = vector.load %arg3[%c0, %c0_0] : memref<704x8xf32, #tpu.memory_space<vmem>>, vector<704x8xf32>
    %c0_1 = arith.constant 0 : index
    %c0_2 = arith.constant 0 : index
    %c0_3 = arith.constant 0 : index
    %1 = vector.load %arg2[%c0_1, %c0_2, %c0_3] : memref<2x8x1xf32, #tpu.memory_space<vmem>>, vector<2x8x1xf32>
    %c0_4 = arith.constant 0 : index
    %c0_5 = arith.constant 0 : index
    %2 = vector.load %arg4[%c0_4, %c0_5] : memref<704x1xf32, #tpu.memory_space<vmem>>, vector<704x1xf32>
    %3 = vector.shape_cast %0 : vector<704x8xf32> to vector<1x704x8xf32>
    %4 = vector.broadcast %3 : vector<1x704x8xf32> to vector<2x704x8xf32>
    "tpu.trace_start"() <{level = 10 : i32, message = "bmk,bkx->bmx"}> : () -> ()
    %cst = arith.constant dense<0.000000e+00> : vector<2x704x1xf32>
    %5 = tpu.matmul %4, %1, %cst {dimension_numbers = #tpu.dot_dimension_numbers<[2], [1], [1], [2], [0, 0, 0, 1, 1, 2], [0], [0]>} : vector<2x704x8xf32>, vector<2x8x1xf32>, vector<2x704x1xf32> -> vector<2x704x1xf32>
    "tpu.trace_stop"() : () -> ()
    %6 = vector.shape_cast %2 : vector<704x1xf32> to vector<1x704x1xf32>
    %7 = vector.broadcast %6 : vector<1x704x1xf32> to vector<2x704x1xf32>
    %8 = arith.addf %5, %7 : vector<2x704x1xf32>
    %c0_6 = arith.constant 0 : index
    %c0_7 = arith.constant 0 : index
    %9 = vector.load %arg5[%c0_6, %c0_7] : memref<32x3xf32, #tpu.memory_space<vmem>>, vector<32x3xf32>
    %c0_8 = arith.constant 0 : index
    %c0_9 = arith.constant 0 : index
    %c0_10 = arith.constant 0 : index
    %10 = vector.load %arg0[%c0_8, %c0_9, %c0_10] : memref<2x3x64xf32, #tpu.memory_space<vmem>>, vector<2x3x64xf32>
    %11 = vector.shape_cast %9 : vector<32x3xf32> to vector<1x32x3xf32>
    %12 = vector.broadcast %11 : vector<1x32x3xf32> to vector<2x32x3xf32>
    "tpu.trace_start"() <{level = 10 : i32, message = "boh,bht->bot"}> : () -> ()
    %cst_11 = arith.constant dense<0.000000e+00> : vector<2x32x64xf32>
    %13 = tpu.matmul %12, %10, %cst_11 {dimension_numbers = #tpu.dot_dimension_numbers<[2], [1], [1], [2], [0, 0, 0, 1, 1, 2], [0], [0]>} : vector<2x32x3xf32>, vector<2x3x64xf32>, vector<2x32x64xf32> -> vector<2x32x64xf32>
    "tpu.trace_stop"() : () -> ()
    %c0_12 = arith.constant 0 : index
    %c0_13 = arith.constant 0 : index
    %14 = vector.load %arg6[%c0_12, %c0_13] : memref<32x8xf32, #tpu.memory_space<vmem>>, vector<32x8xf32>
    %c0_14 = arith.constant 0 : index
    %c0_15 = arith.constant 0 : index
    %c0_16 = arith.constant 0 : index
    %15 = vector.load %arg1[%c0_14, %c0_15, %c0_16] : memref<2x8x1xf32, #tpu.memory_space<vmem>>, vector<2x8x1xf32>
    %c0_17 = arith.constant 0 : index
    %c0_18 = arith.constant 0 : index
    %16 = vector.load %arg7[%c0_17, %c0_18] : memref<32x1xf32, #tpu.memory_space<vmem>>, vector<32x1xf32>
    %17 = vector.shape_cast %14 : vector<32x8xf32> to vector<1x32x8xf32>
    %18 = vector.broadcast %17 : vector<1x32x8xf32> to vector<2x32x8xf32>
    "tpu.trace_start"() <{level = 10 : i32, message = "bmk,bkx->bmx"}> : () -> ()
    %cst_19 = arith.constant dense<0.000000e+00> : vector<2x32x1xf32>
    %19 = tpu.matmul %18, %15, %cst_19 {dimension_numbers = #tpu.dot_dimension_numbers<[2], [1], [1], [2], [0, 0, 0, 1, 1, 2], [0], [0]>} : vector<2x32x8xf32>, vector<2x8x1xf32>, vector<2x32x1xf32> -> vector<2x32x1xf32>
    "tpu.trace_stop"() : () -> ()
    %20 = vector.shape_cast %16 : vector<32x1xf32> to vector<1x32x1xf32>
    %21 = vector.broadcast %20 : vector<1x32x1xf32> to vector<2x32x1xf32>
    %22 = arith.addf %19, %21 : vector<2x32x1xf32>
    %23 = vector.broadcast %22 : vector<2x32x1xf32> to vector<2x32x64xf32>
    %24 = arith.addf %13, %23 : vector<2x32x64xf32>
    %25 = arith.mulf %24, %24 : vector<2x32x64xf32>
    %cst_20 = arith.constant dense<0.000000e+00> : vector<2x32xf32>
    %26 = vector.multi_reduction <add>, %25, %cst_20 [2] : vector<2x32x64xf32> to vector<2x32xf32>
    %27 = vector.shape_cast %26 : vector<2x32xf32> to vector<2x32x1xf32>
    %cst_21 = arith.constant dense<0.000000e+00> : vector<2x32xf32>
    %28 = vector.multi_reduction <add>, %24, %cst_21 [2] : vector<2x32x64xf32> to vector<2x32xf32>
    %29 = vector.shape_cast %28 : vector<2x32xf32> to vector<2x32x1xf32>
    %cst_22 = arith.constant dense<0.000000e+00> : vector<32x1xf32>
    %30 = vector.multi_reduction <add>, %29, %cst_22 [0] : vector<2x32x1xf32> to vector<32x1xf32>
    %31 = vector.shape_cast %30 : vector<32x1xf32> to vector<1x32x1xf32>
    %cst_23 = arith.constant 7.812500e-03 : f32
    %32 = vector.broadcast %cst_23 : f32 to vector<1x32x1xf32>
    %33 = arith.mulf %31, %32 : vector<1x32x1xf32>
    %cst_24 = arith.constant dense<0.000000e+00> : vector<32x1xf32>
    %34 = vector.multi_reduction <add>, %27, %cst_24 [0] : vector<2x32x1xf32> to vector<32x1xf32>
    %35 = vector.shape_cast %34 : vector<32x1xf32> to vector<1x32x1xf32>
    %cst_25 = arith.constant 7.812500e-03 : f32
    %36 = vector.broadcast %cst_25 : f32 to vector<1x32x1xf32>
    %37 = arith.mulf %35, %36 : vector<1x32x1xf32>
    %38 = arith.mulf %33, %33 : vector<1x32x1xf32>
    %39 = arith.subf %37, %38 : vector<1x32x1xf32>
    %cst_26 = arith.constant 0.000000e+00 : f32
    %40 = vector.broadcast %cst_26 : f32 to vector<1x32x1xf32>
    %41 = arith.maximumf %39, %40 : vector<1x32x1xf32>
    %cst_27 = arith.constant 9.99999974E-6 : f32
    %42 = vector.broadcast %cst_27 : f32 to vector<1x32x1xf32>
    %43 = arith.addf %41, %42 : vector<1x32x1xf32>
    %44 = math.rsqrt %43 : vector<1x32x1xf32>
    %45 = vector.extract_strided_slice %8 {offsets = [0, 0, 0], sizes = [2, 32, 1], strides = [1, 1, 1]} : vector<2x704x1xf32> to vector<2x32x1xf32>
    %46 = vector.extract_strided_slice %8 {offsets = [0, 352, 0], sizes = [2, 32, 1], strides = [1, 1, 1]} : vector<2x704x1xf32> to vector<2x32x1xf32>
    %47 = vector.broadcast %44 : vector<1x32x1xf32> to vector<2x32x1xf32>
    %48 = arith.mulf %45, %47 : vector<2x32x1xf32>
    %49 = vector.broadcast %33 : vector<1x32x1xf32> to vector<2x32x1xf32>
    %50 = arith.mulf %49, %48 : vector<2x32x1xf32>
    %51 = arith.subf %46, %50 : vector<2x32x1xf32>
    %52 = vector.broadcast %48 : vector<2x32x1xf32> to vector<2x32x64xf32>
    %53 = arith.mulf %52, %24 : vector<2x32x64xf32>
    %54 = vector.broadcast %51 : vector<2x32x1xf32> to vector<2x32x64xf32>
    %55 = arith.addf %53, %54 : vector<2x32x64xf32>
    %cst_28 = arith.constant 0.000000e+00 : f32
    %56 = vector.broadcast %cst_28 : f32 to vector<2x32x64xf32>
    %57 = arith.maximumf %55, %56 : vector<2x32x64xf32>
    %c0_29 = arith.constant 0 : index
    %c0_30 = arith.constant 0 : index
    %c0_31 = arith.constant 0 : index
    %58 = vector.load %arg8[%c0_29, %c0_30, %c0_31] : memref<10x32x32xf32, #tpu.memory_space<vmem>>, vector<1x32x32xf32>
    %59 = vector.shape_cast %58 : vector<1x32x32xf32> to vector<32x32xf32>
    %60 = vector.shape_cast %59 : vector<32x32xf32> to vector<1x32x32xf32>
    %61 = vector.broadcast %60 : vector<1x32x32xf32> to vector<2x32x32xf32>
    "tpu.trace_start"() <{level = 10 : i32, message = "boh,bht->bot"}> : () -> ()
    %cst_32 = arith.constant dense<0.000000e+00> : vector<2x32x64xf32>
    %62 = tpu.matmul %61, %57, %cst_32 {dimension_numbers = #tpu.dot_dimension_numbers<[2], [1], [1], [2], [0, 0, 0, 1, 1, 2], [0], [0]>} : vector<2x32x32xf32>, vector<2x32x64xf32>, vector<2x32x64xf32> -> vector<2x32x64xf32>
    "tpu.trace_stop"() : () -> ()
    %c0_33 = arith.constant 0 : index
    %c0_34 = arith.constant 0 : index
    %c0_35 = arith.constant 0 : index
    %63 = vector.load %arg9[%c0_33, %c0_34, %c0_35] : memref<10x32x1xf32, #tpu.memory_space<vmem>>, vector<1x32x1xf32>
    %64 = vector.shape_cast %63 : vector<1x32x1xf32> to vector<32x1xf32>
    %65 = vector.shape_cast %64 : vector<32x1xf32> to vector<1x32x1xf32>
    %66 = vector.broadcast %65 : vector<1x32x1xf32> to vector<2x32x64xf32>
    %67 = arith.addf %62, %66 : vector<2x32x64xf32>
    %68 = arith.mulf %67, %67 : vector<2x32x64xf32>
    %cst_36 = arith.constant dense<0.000000e+00> : vector<2x32xf32>
    %69 = vector.multi_reduction <add>, %68, %cst_36 [2] : vector<2x32x64xf32> to vector<2x32xf32>
    %70 = vector.shape_cast %69 : vector<2x32xf32> to vector<2x32x1xf32>
    %cst_37 = arith.constant dense<0.000000e+00> : vector<2x32xf32>
    %71 = vector.multi_reduction <add>, %67, %cst_37 [2] : vector<2x32x64xf32> to vector<2x32xf32>
    %72 = vector.shape_cast %71 : vector<2x32xf32> to vector<2x32x1xf32>
    %cst_38 = arith.constant dense<0.000000e+00> : vector<32x1xf32>
    %73 = vector.multi_reduction <add>, %72, %cst_38 [0] : vector<2x32x1xf32> to vector<32x1xf32>
    %74 = vector.shape_cast %73 : vector<32x1xf32> to vector<1x32x1xf32>
    %cst_39 = arith.constant 7.812500e-03 : f32
    %75 = vector.broadcast %cst_39 : f32 to vector<1x32x1xf32>
    %76 = arith.mulf %74, %75 : vector<1x32x1xf32>
    %cst_40 = arith.constant dense<0.000000e+00> : vector<32x1xf32>
    %77 = vector.multi_reduction <add>, %70, %cst_40 [0] : vector<2x32x1xf32> to vector<32x1xf32>
    %78 = vector.shape_cast %77 : vector<32x1xf32> to vector<1x32x1xf32>
    %cst_41 = arith.constant 7.812500e-03 : f32
    %79 = vector.broadcast %cst_41 : f32 to vector<1x32x1xf32>
    %80 = arith.mulf %78, %79 : vector<1x32x1xf32>
    %81 = arith.mulf %76, %76 : vector<1x32x1xf32>
    %82 = arith.subf %80, %81 : vector<1x32x1xf32>
    %cst_42 = arith.constant 0.000000e+00 : f32
    %83 = vector.broadcast %cst_42 : f32 to vector<1x32x1xf32>
    %84 = arith.maximumf %82, %83 : vector<1x32x1xf32>
    %cst_43 = arith.constant 9.99999974E-6 : f32
    %85 = vector.broadcast %cst_43 : f32 to vector<1x32x1xf32>
    %86 = arith.addf %84, %85 : vector<1x32x1xf32>
    %87 = math.rsqrt %86 : vector<1x32x1xf32>
    %88 = vector.extract_strided_slice %8 {offsets = [0, 32, 0], sizes = [2, 32, 1], strides = [1, 1, 1]} : vector<2x704x1xf32> to vector<2x32x1xf32>
    %89 = vector.extract_strided_slice %8 {offsets = [0, 384, 0], sizes = [2, 32, 1], strides = [1, 1, 1]} : vector<2x704x1xf32> to vector<2x32x1xf32>
    %90 = vector.broadcast %87 : vector<1x32x1xf32> to vector<2x32x1xf32>
    %91 = arith.mulf %88, %90 : vector<2x32x1xf32>
    %92 = vector.broadcast %76 : vector<1x32x1xf32> to vector<2x32x1xf32>
    %93 = arith.mulf %92, %91 : vector<2x32x1xf32>
    %94 = arith.subf %89, %93 : vector<2x32x1xf32>
    %95 = vector.broadcast %91 : vector<2x32x1xf32> to vector<2x32x64xf32>
    %96 = arith.mulf %95, %67 : vector<2x32x64xf32>
    %97 = vector.broadcast %94 : vector<2x32x1xf32> to vector<2x32x64xf32>
    %98 = arith.addf %96, %97 : vector<2x32x64xf32>
    %cst_44 = arith.constant 0.000000e+00 : f32
    %99 = vector.broadcast %cst_44 : f32 to vector<2x32x64xf32>
    %100 = arith.maximumf %98, %99 : vector<2x32x64xf32>
    %c1 = arith.constant 1 : index
    %c0_45 = arith.constant 0 : index
    %c0_46 = arith.constant 0 : index
    %101 = vector.load %arg8[%c1, %c0_45, %c0_46] : memref<10x32x32xf32, #tpu.memory_space<vmem>>, vector<1x32x32xf32>
    %102 = vector.shape_cast %101 : vector<1x32x32xf32> to vector<32x32xf32>
    %103 = vector.shape_cast %102 : vector<32x32xf32> to vector<1x32x32xf32>
    %104 = vector.broadcast %103 : vector<1x32x32xf32> to vector<2x32x32xf32>
    "tpu.trace_start"() <{level = 10 : i32, message = "boh,bht->bot"}> : () -> ()
    %cst_47 = arith.constant dense<0.000000e+00> : vector<2x32x64xf32>
    %105 = tpu.matmul %104, %100, %cst_47 {dimension_numbers = #tpu.dot_dimension_numbers<[2], [1], [1], [2], [0, 0, 0, 1, 1, 2], [0], [0]>} : vector<2x32x32xf32>, vector<2x32x64xf32>, vector<2x32x64xf32> -> vector<2x32x64xf32>
    "tpu.trace_stop"() : () -> ()
    %c1_48 = arith.constant 1 : index
    %c0_49 = arith.constant 0 : index
    %c0_50 = arith.constant 0 : index
    %106 = vector.load %arg9[%c1_48, %c0_49, %c0_50] : memref<10x32x1xf32, #tpu.memory_space<vmem>>, vector<1x32x1xf32>
    %107 = vector.shape_cast %106 : vector<1x32x1xf32> to vector<32x1xf32>
    %108 = vector.shape_cast %107 : vector<32x1xf32> to vector<1x32x1xf32>
    %109 = vector.broadcast %108 : vector<1x32x1xf32> to vector<2x32x64xf32>
    %110 = arith.addf %105, %109 : vector<2x32x64xf32>
    %111 = arith.addf %24, %110 : vector<2x32x64xf32>
    %112 = arith.mulf %111, %111 : vector<2x32x64xf32>
    %cst_51 = arith.constant dense<0.000000e+00> : vector<2x32xf32>
    %113 = vector.multi_reduction <add>, %112, %cst_51 [2] : vector<2x32x64xf32> to vector<2x32xf32>
    %114 = vector.shape_cast %113 : vector<2x32xf32> to vector<2x32x1xf32>
    %cst_52 = arith.constant dense<0.000000e+00> : vector<2x32xf32>
    %115 = vector.multi_reduction <add>, %111, %cst_52 [2] : vector<2x32x64xf32> to vector<2x32xf32>
    %116 = vector.shape_cast %115 : vector<2x32xf32> to vector<2x32x1xf32>
    %cst_53 = arith.constant dense<0.000000e+00> : vector<32x1xf32>
    %117 = vector.multi_reduction <add>, %116, %cst_53 [0] : vector<2x32x1xf32> to vector<32x1xf32>
    %118 = vector.shape_cast %117 : vector<32x1xf32> to vector<1x32x1xf32>
    %cst_54 = arith.constant 7.812500e-03 : f32
    %119 = vector.broadcast %cst_54 : f32 to vector<1x32x1xf32>
    %120 = arith.mulf %118, %119 : vector<1x32x1xf32>
    %cst_55 = arith.constant dense<0.000000e+00> : vector<32x1xf32>
    %121 = vector.multi_reduction <add>, %114, %cst_55 [0] : vector<2x32x1xf32> to vector<32x1xf32>
    %122 = vector.shape_cast %121 : vector<32x1xf32> to vector<1x32x1xf32>
    %cst_56 = arith.constant 7.812500e-03 : f32
    %123 = vector.broadcast %cst_56 : f32 to vector<1x32x1xf32>
    %124 = arith.mulf %122, %123 : vector<1x32x1xf32>
    %125 = arith.mulf %120, %120 : vector<1x32x1xf32>
    %126 = arith.subf %124, %125 : vector<1x32x1xf32>
    %cst_57 = arith.constant 0.000000e+00 : f32
    %127 = vector.broadcast %cst_57 : f32 to vector<1x32x1xf32>
    %128 = arith.maximumf %126, %127 : vector<1x32x1xf32>
    %cst_58 = arith.constant 9.99999974E-6 : f32
    %129 = vector.broadcast %cst_58 : f32 to vector<1x32x1xf32>
    %130 = arith.addf %128, %129 : vector<1x32x1xf32>
    %131 = math.rsqrt %130 : vector<1x32x1xf32>
    %132 = vector.extract_strided_slice %8 {offsets = [0, 64, 0], sizes = [2, 32, 1], strides = [1, 1, 1]} : vector<2x704x1xf32> to vector<2x32x1xf32>
    %133 = vector.extract_strided_slice %8 {offsets = [0, 416, 0], sizes = [2, 32, 1], strides = [1, 1, 1]} : vector<2x704x1xf32> to vector<2x32x1xf32>
    %134 = vector.broadcast %131 : vector<1x32x1xf32> to vector<2x32x1xf32>
    %135 = arith.mulf %132, %134 : vector<2x32x1xf32>
    %136 = vector.broadcast %120 : vector<1x32x1xf32> to vector<2x32x1xf32>
    %137 = arith.mulf %136, %135 : vector<2x32x1xf32>
    %138 = arith.subf %133, %137 : vector<2x32x1xf32>
    %139 = vector.broadcast %135 : vector<2x32x1xf32> to vector<2x32x64xf32>
    %140 = arith.mulf %139, %111 : vector<2x32x64xf32>
    %141 = vector.broadcast %138 : vector<2x32x1xf32> to vector<2x32x64xf32>
    %142 = arith.addf %140, %141 : vector<2x32x64xf32>
    %cst_59 = arith.constant 0.000000e+00 : f32
    %143 = vector.broadcast %cst_59 : f32 to vector<2x32x64xf32>
    %144 = arith.maximumf %142, %143 : vector<2x32x64xf32>
    %c2 = arith.constant 2 : index
    %c0_60 = arith.constant 0 : index
    %c0_61 = arith.constant 0 : index
    %145 = vector.load %arg8[%c2, %c0_60, %c0_61] : memref<10x32x32xf32, #tpu.memory_space<vmem>>, vector<1x32x32xf32>
    %146 = vector.shape_cast %145 : vector<1x32x32xf32> to vector<32x32xf32>
    %147 = vector.shape_cast %146 : vector<32x32xf32> to vector<1x32x32xf32>
    %148 = vector.broadcast %147 : vector<1x32x32xf32> to vector<2x32x32xf32>
    "tpu.trace_start"() <{level = 10 : i32, message = "boh,bht->bot"}> : () -> ()
    %cst_62 = arith.constant dense<0.000000e+00> : vector<2x32x64xf32>
    %149 = tpu.matmul %148, %144, %cst_62 {dimension_numbers = #tpu.dot_dimension_numbers<[2], [1], [1], [2], [0, 0, 0, 1, 1, 2], [0], [0]>} : vector<2x32x32xf32>, vector<2x32x64xf32>, vector<2x32x64xf32> -> vector<2x32x64xf32>
    "tpu.trace_stop"() : () -> ()
    %c2_63 = arith.constant 2 : index
    %c0_64 = arith.constant 0 : index
    %c0_65 = arith.constant 0 : index
    %150 = vector.load %arg9[%c2_63, %c0_64, %c0_65] : memref<10x32x1xf32, #tpu.memory_space<vmem>>, vector<1x32x1xf32>
    %151 = vector.shape_cast %150 : vector<1x32x1xf32> to vector<32x1xf32>
    %152 = vector.shape_cast %151 : vector<32x1xf32> to vector<1x32x1xf32>
    %153 = vector.broadcast %152 : vector<1x32x1xf32> to vector<2x32x64xf32>
    %154 = arith.addf %149, %153 : vector<2x32x64xf32>
    %155 = arith.mulf %154, %154 : vector<2x32x64xf32>
    %cst_66 = arith.constant dense<0.000000e+00> : vector<2x32xf32>
    %156 = vector.multi_reduction <add>, %155, %cst_66 [2] : vector<2x32x64xf32> to vector<2x32xf32>
    %157 = vector.shape_cast %156 : vector<2x32xf32> to vector<2x32x1xf32>
    %cst_67 = arith.constant dense<0.000000e+00> : vector<2x32xf32>
    %158 = vector.multi_reduction <add>, %154, %cst_67 [2] : vector<2x32x64xf32> to vector<2x32xf32>
    %159 = vector.shape_cast %158 : vector<2x32xf32> to vector<2x32x1xf32>
    %cst_68 = arith.constant dense<0.000000e+00> : vector<32x1xf32>
    %160 = vector.multi_reduction <add>, %159, %cst_68 [0] : vector<2x32x1xf32> to vector<32x1xf32>
    %161 = vector.shape_cast %160 : vector<32x1xf32> to vector<1x32x1xf32>
    %cst_69 = arith.constant 7.812500e-03 : f32
    %162 = vector.broadcast %cst_69 : f32 to vector<1x32x1xf32>
    %163 = arith.mulf %161, %162 : vector<1x32x1xf32>
    %cst_70 = arith.constant dense<0.000000e+00> : vector<32x1xf32>
    %164 = vector.multi_reduction <add>, %157, %cst_70 [0] : vector<2x32x1xf32> to vector<32x1xf32>
    %165 = vector.shape_cast %164 : vector<32x1xf32> to vector<1x32x1xf32>
    %cst_71 = arith.constant 7.812500e-03 : f32
    %166 = vector.broadcast %cst_71 : f32 to vector<1x32x1xf32>
    %167 = arith.mulf %165, %166 : vector<1x32x1xf32>
    %168 = arith.mulf %163, %163 : vector<1x32x1xf32>
    %169 = arith.subf %167, %168 : vector<1x32x1xf32>
    %cst_72 = arith.constant 0.000000e+00 : f32
    %170 = vector.broadcast %cst_72 : f32 to vector<1x32x1xf32>
    %171 = arith.maximumf %169, %170 : vector<1x32x1xf32>
    %cst_73 = arith.constant 9.99999974E-6 : f32
    %172 = vector.broadcast %cst_73 : f32 to vector<1x32x1xf32>
    %173 = arith.addf %171, %172 : vector<1x32x1xf32>
    %174 = math.rsqrt %173 : vector<1x32x1xf32>
    %175 = vector.extract_strided_slice %8 {offsets = [0, 96, 0], sizes = [2, 32, 1], strides = [1, 1, 1]} : vector<2x704x1xf32> to vector<2x32x1xf32>
    %176 = vector.extract_strided_slice %8 {offsets = [0, 448, 0], sizes = [2, 32, 1], strides = [1, 1, 1]} : vector<2x704x1xf32> to vector<2x32x1xf32>
    %177 = vector.broadcast %174 : vector<1x32x1xf32> to vector<2x32x1xf32>
    %178 = arith.mulf %175, %177 : vector<2x32x1xf32>
    %179 = vector.broadcast %163 : vector<1x32x1xf32> to vector<2x32x1xf32>
    %180 = arith.mulf %179, %178 : vector<2x32x1xf32>
    %181 = arith.subf %176, %180 : vector<2x32x1xf32>
    %182 = vector.broadcast %178 : vector<2x32x1xf32> to vector<2x32x64xf32>
    %183 = arith.mulf %182, %154 : vector<2x32x64xf32>
    %184 = vector.broadcast %181 : vector<2x32x1xf32> to vector<2x32x64xf32>
    %185 = arith.addf %183, %184 : vector<2x32x64xf32>
    %cst_74 = arith.constant 0.000000e+00 : f32
    %186 = vector.broadcast %cst_74 : f32 to vector<2x32x64xf32>
    %187 = arith.maximumf %185, %186 : vector<2x32x64xf32>
    %c3 = arith.constant 3 : index
    %c0_75 = arith.constant 0 : index
    %c0_76 = arith.constant 0 : index
    %188 = vector.load %arg8[%c3, %c0_75, %c0_76] : memref<10x32x32xf32, #tpu.memory_space<vmem>>, vector<1x32x32xf32>
    %189 = vector.shape_cast %188 : vector<1x32x32xf32> to vector<32x32xf32>
    %190 = vector.shape_cast %189 : vector<32x32xf32> to vector<1x32x32xf32>
    %191 = vector.broadcast %190 : vector<1x32x32xf32> to vector<2x32x32xf32>
    "tpu.trace_start"() <{level = 10 : i32, message = "boh,bht->bot"}> : () -> ()
    %cst_77 = arith.constant dense<0.000000e+00> : vector<2x32x64xf32>
    %192 = tpu.matmul %191, %187, %cst_77 {dimension_numbers = #tpu.dot_dimension_numbers<[2], [1], [1], [2], [0, 0, 0, 1, 1, 2], [0], [0]>} : vector<2x32x32xf32>, vector<2x32x64xf32>, vector<2x32x64xf32> -> vector<2x32x64xf32>
    "tpu.trace_stop"() : () -> ()
    %c3_78 = arith.constant 3 : index
    %c0_79 = arith.constant 0 : index
    %c0_80 = arith.constant 0 : index
    %193 = vector.load %arg9[%c3_78, %c0_79, %c0_80] : memref<10x32x1xf32, #tpu.memory_space<vmem>>, vector<1x32x1xf32>
    %194 = vector.shape_cast %193 : vector<1x32x1xf32> to vector<32x1xf32>
    %195 = vector.shape_cast %194 : vector<32x1xf32> to vector<1x32x1xf32>
    %196 = vector.broadcast %195 : vector<1x32x1xf32> to vector<2x32x64xf32>
    %197 = arith.addf %192, %196 : vector<2x32x64xf32>
    %198 = arith.addf %111, %197 : vector<2x32x64xf32>
    %199 = arith.mulf %198, %198 : vector<2x32x64xf32>
    %cst_81 = arith.constant dense<0.000000e+00> : vector<2x32xf32>
    %200 = vector.multi_reduction <add>, %199, %cst_81 [2] : vector<2x32x64xf32> to vector<2x32xf32>
    %201 = vector.shape_cast %200 : vector<2x32xf32> to vector<2x32x1xf32>
    %cst_82 = arith.constant dense<0.000000e+00> : vector<2x32xf32>
    %202 = vector.multi_reduction <add>, %198, %cst_82 [2] : vector<2x32x64xf32> to vector<2x32xf32>
    %203 = vector.shape_cast %202 : vector<2x32xf32> to vector<2x32x1xf32>
    %cst_83 = arith.constant dense<0.000000e+00> : vector<32x1xf32>
    %204 = vector.multi_reduction <add>, %203, %cst_83 [0] : vector<2x32x1xf32> to vector<32x1xf32>
    %205 = vector.shape_cast %204 : vector<32x1xf32> to vector<1x32x1xf32>
    %cst_84 = arith.constant 7.812500e-03 : f32
    %206 = vector.broadcast %cst_84 : f32 to vector<1x32x1xf32>
    %207 = arith.mulf %205, %206 : vector<1x32x1xf32>
    %cst_85 = arith.constant dense<0.000000e+00> : vector<32x1xf32>
    %208 = vector.multi_reduction <add>, %201, %cst_85 [0] : vector<2x32x1xf32> to vector<32x1xf32>
    %209 = vector.shape_cast %208 : vector<32x1xf32> to vector<1x32x1xf32>
    %cst_86 = arith.constant 7.812500e-03 : f32
    %210 = vector.broadcast %cst_86 : f32 to vector<1x32x1xf32>
    %211 = arith.mulf %209, %210 : vector<1x32x1xf32>
    %212 = arith.mulf %207, %207 : vector<1x32x1xf32>
    %213 = arith.subf %211, %212 : vector<1x32x1xf32>
    %cst_87 = arith.constant 0.000000e+00 : f32
    %214 = vector.broadcast %cst_87 : f32 to vector<1x32x1xf32>
    %215 = arith.maximumf %213, %214 : vector<1x32x1xf32>
    %cst_88 = arith.constant 9.99999974E-6 : f32
    %216 = vector.broadcast %cst_88 : f32 to vector<1x32x1xf32>
    %217 = arith.addf %215, %216 : vector<1x32x1xf32>
    %218 = math.rsqrt %217 : vector<1x32x1xf32>
    %219 = vector.extract_strided_slice %8 {offsets = [0, 128, 0], sizes = [2, 32, 1], strides = [1, 1, 1]} : vector<2x704x1xf32> to vector<2x32x1xf32>
    %220 = vector.extract_strided_slice %8 {offsets = [0, 480, 0], sizes = [2, 32, 1], strides = [1, 1, 1]} : vector<2x704x1xf32> to vector<2x32x1xf32>
    %221 = vector.broadcast %218 : vector<1x32x1xf32> to vector<2x32x1xf32>
    %222 = arith.mulf %219, %221 : vector<2x32x1xf32>
    %223 = vector.broadcast %207 : vector<1x32x1xf32> to vector<2x32x1xf32>
    %224 = arith.mulf %223, %222 : vector<2x32x1xf32>
    %225 = arith.subf %220, %224 : vector<2x32x1xf32>
    %226 = vector.broadcast %222 : vector<2x32x1xf32> to vector<2x32x64xf32>
    %227 = arith.mulf %226, %198 : vector<2x32x64xf32>
    %228 = vector.broadcast %225 : vector<2x32x1xf32> to vector<2x32x64xf32>
    %229 = arith.addf %227, %228 : vector<2x32x64xf32>
    %cst_89 = arith.constant 0.000000e+00 : f32
    %230 = vector.broadcast %cst_89 : f32 to vector<2x32x64xf32>
    %231 = arith.maximumf %229, %230 : vector<2x32x64xf32>
    %c4 = arith.constant 4 : index
    %c0_90 = arith.constant 0 : index
    %c0_91 = arith.constant 0 : index
    %232 = vector.load %arg8[%c4, %c0_90, %c0_91] : memref<10x32x32xf32, #tpu.memory_space<vmem>>, vector<1x32x32xf32>
    %233 = vector.shape_cast %232 : vector<1x32x32xf32> to vector<32x32xf32>
    %234 = vector.shape_cast %233 : vector<32x32xf32> to vector<1x32x32xf32>
    %235 = vector.broadcast %234 : vector<1x32x32xf32> to vector<2x32x32xf32>
    "tpu.trace_start"() <{level = 10 : i32, message = "boh,bht->bot"}> : () -> ()
    %cst_92 = arith.constant dense<0.000000e+00> : vector<2x32x64xf32>
    %236 = tpu.matmul %235, %231, %cst_92 {dimension_numbers = #tpu.dot_dimension_numbers<[2], [1], [1], [2], [0, 0, 0, 1, 1, 2], [0], [0]>} : vector<2x32x32xf32>, vector<2x32x64xf32>, vector<2x32x64xf32> -> vector<2x32x64xf32>
    "tpu.trace_stop"() : () -> ()
    %c4_93 = arith.constant 4 : index
    %c0_94 = arith.constant 0 : index
    %c0_95 = arith.constant 0 : index
    %237 = vector.load %arg9[%c4_93, %c0_94, %c0_95] : memref<10x32x1xf32, #tpu.memory_space<vmem>>, vector<1x32x1xf32>
    %238 = vector.shape_cast %237 : vector<1x32x1xf32> to vector<32x1xf32>
    %239 = vector.shape_cast %238 : vector<32x1xf32> to vector<1x32x1xf32>
    %240 = vector.broadcast %239 : vector<1x32x1xf32> to vector<2x32x64xf32>
    %241 = arith.addf %236, %240 : vector<2x32x64xf32>
    %242 = arith.mulf %241, %241 : vector<2x32x64xf32>
    %cst_96 = arith.constant dense<0.000000e+00> : vector<2x32xf32>
    %243 = vector.multi_reduction <add>, %242, %cst_96 [2] : vector<2x32x64xf32> to vector<2x32xf32>
    %244 = vector.shape_cast %243 : vector<2x32xf32> to vector<2x32x1xf32>
    %cst_97 = arith.constant dense<0.000000e+00> : vector<2x32xf32>
    %245 = vector.multi_reduction <add>, %241, %cst_97 [2] : vector<2x32x64xf32> to vector<2x32xf32>
    %246 = vector.shape_cast %245 : vector<2x32xf32> to vector<2x32x1xf32>
    %cst_98 = arith.constant dense<0.000000e+00> : vector<32x1xf32>
    %247 = vector.multi_reduction <add>, %246, %cst_98 [0] : vector<2x32x1xf32> to vector<32x1xf32>
    %248 = vector.shape_cast %247 : vector<32x1xf32> to vector<1x32x1xf32>
    %cst_99 = arith.constant 7.812500e-03 : f32
    %249 = vector.broadcast %cst_99 : f32 to vector<1x32x1xf32>
    %250 = arith.mulf %248, %249 : vector<1x32x1xf32>
    %cst_100 = arith.constant dense<0.000000e+00> : vector<32x1xf32>
    %251 = vector.multi_reduction <add>, %244, %cst_100 [0] : vector<2x32x1xf32> to vector<32x1xf32>
    %252 = vector.shape_cast %251 : vector<32x1xf32> to vector<1x32x1xf32>
    %cst_101 = arith.constant 7.812500e-03 : f32
    %253 = vector.broadcast %cst_101 : f32 to vector<1x32x1xf32>
    %254 = arith.mulf %252, %253 : vector<1x32x1xf32>
    %255 = arith.mulf %250, %250 : vector<1x32x1xf32>
    %256 = arith.subf %254, %255 : vector<1x32x1xf32>
    %cst_102 = arith.constant 0.000000e+00 : f32
    %257 = vector.broadcast %cst_102 : f32 to vector<1x32x1xf32>
    %258 = arith.maximumf %256, %257 : vector<1x32x1xf32>
    %cst_103 = arith.constant 9.99999974E-6 : f32
    %259 = vector.broadcast %cst_103 : f32 to vector<1x32x1xf32>
    %260 = arith.addf %258, %259 : vector<1x32x1xf32>
    %261 = math.rsqrt %260 : vector<1x32x1xf32>
    %262 = vector.extract_strided_slice %8 {offsets = [0, 160, 0], sizes = [2, 32, 1], strides = [1, 1, 1]} : vector<2x704x1xf32> to vector<2x32x1xf32>
    %263 = vector.extract_strided_slice %8 {offsets = [0, 512, 0], sizes = [2, 32, 1], strides = [1, 1, 1]} : vector<2x704x1xf32> to vector<2x32x1xf32>
    %264 = vector.broadcast %261 : vector<1x32x1xf32> to vector<2x32x1xf32>
    %265 = arith.mulf %262, %264 : vector<2x32x1xf32>
    %266 = vector.broadcast %250 : vector<1x32x1xf32> to vector<2x32x1xf32>
    %267 = arith.mulf %266, %265 : vector<2x32x1xf32>
    %268 = arith.subf %263, %267 : vector<2x32x1xf32>
    %269 = vector.broadcast %265 : vector<2x32x1xf32> to vector<2x32x64xf32>
    %270 = arith.mulf %269, %241 : vector<2x32x64xf32>
    %271 = vector.broadcast %268 : vector<2x32x1xf32> to vector<2x32x64xf32>
    %272 = arith.addf %270, %271 : vector<2x32x64xf32>
    %cst_104 = arith.constant 0.000000e+00 : f32
    %273 = vector.broadcast %cst_104 : f32 to vector<2x32x64xf32>
    %274 = arith.maximumf %272, %273 : vector<2x32x64xf32>
    %c5 = arith.constant 5 : index
    %c0_105 = arith.constant 0 : index
    %c0_106 = arith.constant 0 : index
    %275 = vector.load %arg8[%c5, %c0_105, %c0_106] : memref<10x32x32xf32, #tpu.memory_space<vmem>>, vector<1x32x32xf32>
    %276 = vector.shape_cast %275 : vector<1x32x32xf32> to vector<32x32xf32>
    %277 = vector.shape_cast %276 : vector<32x32xf32> to vector<1x32x32xf32>
    %278 = vector.broadcast %277 : vector<1x32x32xf32> to vector<2x32x32xf32>
    "tpu.trace_start"() <{level = 10 : i32, message = "boh,bht->bot"}> : () -> ()
    %cst_107 = arith.constant dense<0.000000e+00> : vector<2x32x64xf32>
    %279 = tpu.matmul %278, %274, %cst_107 {dimension_numbers = #tpu.dot_dimension_numbers<[2], [1], [1], [2], [0, 0, 0, 1, 1, 2], [0], [0]>} : vector<2x32x32xf32>, vector<2x32x64xf32>, vector<2x32x64xf32> -> vector<2x32x64xf32>
    "tpu.trace_stop"() : () -> ()
    %c5_108 = arith.constant 5 : index
    %c0_109 = arith.constant 0 : index
    %c0_110 = arith.constant 0 : index
    %280 = vector.load %arg9[%c5_108, %c0_109, %c0_110] : memref<10x32x1xf32, #tpu.memory_space<vmem>>, vector<1x32x1xf32>
    %281 = vector.shape_cast %280 : vector<1x32x1xf32> to vector<32x1xf32>
    %282 = vector.shape_cast %281 : vector<32x1xf32> to vector<1x32x1xf32>
    %283 = vector.broadcast %282 : vector<1x32x1xf32> to vector<2x32x64xf32>
    %284 = arith.addf %279, %283 : vector<2x32x64xf32>
    %285 = arith.addf %198, %284 : vector<2x32x64xf32>
    %286 = arith.mulf %285, %285 : vector<2x32x64xf32>
    %cst_111 = arith.constant dense<0.000000e+00> : vector<2x32xf32>
    %287 = vector.multi_reduction <add>, %286, %cst_111 [2] : vector<2x32x64xf32> to vector<2x32xf32>
    %288 = vector.shape_cast %287 : vector<2x32xf32> to vector<2x32x1xf32>
    %cst_112 = arith.constant dense<0.000000e+00> : vector<2x32xf32>
    %289 = vector.multi_reduction <add>, %285, %cst_112 [2] : vector<2x32x64xf32> to vector<2x32xf32>
    %290 = vector.shape_cast %289 : vector<2x32xf32> to vector<2x32x1xf32>
    %cst_113 = arith.constant dense<0.000000e+00> : vector<32x1xf32>
    %291 = vector.multi_reduction <add>, %290, %cst_113 [0] : vector<2x32x1xf32> to vector<32x1xf32>
    %292 = vector.shape_cast %291 : vector<32x1xf32> to vector<1x32x1xf32>
    %cst_114 = arith.constant 7.812500e-03 : f32
    %293 = vector.broadcast %cst_114 : f32 to vector<1x32x1xf32>
    %294 = arith.mulf %292, %293 : vector<1x32x1xf32>
    %cst_115 = arith.constant dense<0.000000e+00> : vector<32x1xf32>
    %295 = vector.multi_reduction <add>, %288, %cst_115 [0] : vector<2x32x1xf32> to vector<32x1xf32>
    %296 = vector.shape_cast %295 : vector<32x1xf32> to vector<1x32x1xf32>
    %cst_116 = arith.constant 7.812500e-03 : f32
    %297 = vector.broadcast %cst_116 : f32 to vector<1x32x1xf32>
    %298 = arith.mulf %296, %297 : vector<1x32x1xf32>
    %299 = arith.mulf %294, %294 : vector<1x32x1xf32>
    %300 = arith.subf %298, %299 : vector<1x32x1xf32>
    %cst_117 = arith.constant 0.000000e+00 : f32
    %301 = vector.broadcast %cst_117 : f32 to vector<1x32x1xf32>
    %302 = arith.maximumf %300, %301 : vector<1x32x1xf32>
    %cst_118 = arith.constant 9.99999974E-6 : f32
    %303 = vector.broadcast %cst_118 : f32 to vector<1x32x1xf32>
    %304 = arith.addf %302, %303 : vector<1x32x1xf32>
    %305 = math.rsqrt %304 : vector<1x32x1xf32>
    %306 = vector.extract_strided_slice %8 {offsets = [0, 192, 0], sizes = [2, 32, 1], strides = [1, 1, 1]} : vector<2x704x1xf32> to vector<2x32x1xf32>
    %307 = vector.extract_strided_slice %8 {offsets = [0, 544, 0], sizes = [2, 32, 1], strides = [1, 1, 1]} : vector<2x704x1xf32> to vector<2x32x1xf32>
    %308 = vector.broadcast %305 : vector<1x32x1xf32> to vector<2x32x1xf32>
    %309 = arith.mulf %306, %308 : vector<2x32x1xf32>
    %310 = vector.broadcast %294 : vector<1x32x1xf32> to vector<2x32x1xf32>
    %311 = arith.mulf %310, %309 : vector<2x32x1xf32>
    %312 = arith.subf %307, %311 : vector<2x32x1xf32>
    %313 = vector.broadcast %309 : vector<2x32x1xf32> to vector<2x32x64xf32>
    %314 = arith.mulf %313, %285 : vector<2x32x64xf32>
    %315 = vector.broadcast %312 : vector<2x32x1xf32> to vector<2x32x64xf32>
    %316 = arith.addf %314, %315 : vector<2x32x64xf32>
    %cst_119 = arith.constant 0.000000e+00 : f32
    %317 = vector.broadcast %cst_119 : f32 to vector<2x32x64xf32>
    %318 = arith.maximumf %316, %317 : vector<2x32x64xf32>
    %c6 = arith.constant 6 : index
    %c0_120 = arith.constant 0 : index
    %c0_121 = arith.constant 0 : index
    %319 = vector.load %arg8[%c6, %c0_120, %c0_121] : memref<10x32x32xf32, #tpu.memory_space<vmem>>, vector<1x32x32xf32>
    %320 = vector.shape_cast %319 : vector<1x32x32xf32> to vector<32x32xf32>
    %321 = vector.shape_cast %320 : vector<32x32xf32> to vector<1x32x32xf32>
    %322 = vector.broadcast %321 : vector<1x32x32xf32> to vector<2x32x32xf32>
    "tpu.trace_start"() <{level = 10 : i32, message = "boh,bht->bot"}> : () -> ()
    %cst_122 = arith.constant dense<0.000000e+00> : vector<2x32x64xf32>
    %323 = tpu.matmul %322, %318, %cst_122 {dimension_numbers = #tpu.dot_dimension_numbers<[2], [1], [1], [2], [0, 0, 0, 1, 1, 2], [0], [0]>} : vector<2x32x32xf32>, vector<2x32x64xf32>, vector<2x32x64xf32> -> vector<2x32x64xf32>
    "tpu.trace_stop"() : () -> ()
    %c6_123 = arith.constant 6 : index
    %c0_124 = arith.constant 0 : index
    %c0_125 = arith.constant 0 : index
    %324 = vector.load %arg9[%c6_123, %c0_124, %c0_125] : memref<10x32x1xf32, #tpu.memory_space<vmem>>, vector<1x32x1xf32>
    %325 = vector.shape_cast %324 : vector<1x32x1xf32> to vector<32x1xf32>
    %326 = vector.shape_cast %325 : vector<32x1xf32> to vector<1x32x1xf32>
    %327 = vector.broadcast %326 : vector<1x32x1xf32> to vector<2x32x64xf32>
    %328 = arith.addf %323, %327 : vector<2x32x64xf32>
    %329 = arith.mulf %328, %328 : vector<2x32x64xf32>
    %cst_126 = arith.constant dense<0.000000e+00> : vector<2x32xf32>
    %330 = vector.multi_reduction <add>, %329, %cst_126 [2] : vector<2x32x64xf32> to vector<2x32xf32>
    %331 = vector.shape_cast %330 : vector<2x32xf32> to vector<2x32x1xf32>
    %cst_127 = arith.constant dense<0.000000e+00> : vector<2x32xf32>
    %332 = vector.multi_reduction <add>, %328, %cst_127 [2] : vector<2x32x64xf32> to vector<2x32xf32>
    %333 = vector.shape_cast %332 : vector<2x32xf32> to vector<2x32x1xf32>
    %cst_128 = arith.constant dense<0.000000e+00> : vector<32x1xf32>
    %334 = vector.multi_reduction <add>, %333, %cst_128 [0] : vector<2x32x1xf32> to vector<32x1xf32>
    %335 = vector.shape_cast %334 : vector<32x1xf32> to vector<1x32x1xf32>
    %cst_129 = arith.constant 7.812500e-03 : f32
    %336 = vector.broadcast %cst_129 : f32 to vector<1x32x1xf32>
    %337 = arith.mulf %335, %336 : vector<1x32x1xf32>
    %cst_130 = arith.constant dense<0.000000e+00> : vector<32x1xf32>
    %338 = vector.multi_reduction <add>, %331, %cst_130 [0] : vector<2x32x1xf32> to vector<32x1xf32>
    %339 = vector.shape_cast %338 : vector<32x1xf32> to vector<1x32x1xf32>
    %cst_131 = arith.constant 7.812500e-03 : f32
    %340 = vector.broadcast %cst_131 : f32 to vector<1x32x1xf32>
    %341 = arith.mulf %339, %340 : vector<1x32x1xf32>
    %342 = arith.mulf %337, %337 : vector<1x32x1xf32>
    %343 = arith.subf %341, %342 : vector<1x32x1xf32>
    %cst_132 = arith.constant 0.000000e+00 : f32
    %344 = vector.broadcast %cst_132 : f32 to vector<1x32x1xf32>
    %345 = arith.maximumf %343, %344 : vector<1x32x1xf32>
    %cst_133 = arith.constant 9.99999974E-6 : f32
    %346 = vector.broadcast %cst_133 : f32 to vector<1x32x1xf32>
    %347 = arith.addf %345, %346 : vector<1x32x1xf32>
    %348 = math.rsqrt %347 : vector<1x32x1xf32>
    %349 = vector.extract_strided_slice %8 {offsets = [0, 224, 0], sizes = [2, 32, 1], strides = [1, 1, 1]} : vector<2x704x1xf32> to vector<2x32x1xf32>
    %350 = vector.extract_strided_slice %8 {offsets = [0, 576, 0], sizes = [2, 32, 1], strides = [1, 1, 1]} : vector<2x704x1xf32> to vector<2x32x1xf32>
    %351 = vector.broadcast %348 : vector<1x32x1xf32> to vector<2x32x1xf32>
    %352 = arith.mulf %349, %351 : vector<2x32x1xf32>
    %353 = vector.broadcast %337 : vector<1x32x1xf32> to vector<2x32x1xf32>
    %354 = arith.mulf %353, %352 : vector<2x32x1xf32>
    %355 = arith.subf %350, %354 : vector<2x32x1xf32>
    %356 = vector.broadcast %352 : vector<2x32x1xf32> to vector<2x32x64xf32>
    %357 = arith.mulf %356, %328 : vector<2x32x64xf32>
    %358 = vector.broadcast %355 : vector<2x32x1xf32> to vector<2x32x64xf32>
    %359 = arith.addf %357, %358 : vector<2x32x64xf32>
    %cst_134 = arith.constant 0.000000e+00 : f32
    %360 = vector.broadcast %cst_134 : f32 to vector<2x32x64xf32>
    %361 = arith.maximumf %359, %360 : vector<2x32x64xf32>
    %c7 = arith.constant 7 : index
    %c0_135 = arith.constant 0 : index
    %c0_136 = arith.constant 0 : index
    %362 = vector.load %arg8[%c7, %c0_135, %c0_136] : memref<10x32x32xf32, #tpu.memory_space<vmem>>, vector<1x32x32xf32>
    %363 = vector.shape_cast %362 : vector<1x32x32xf32> to vector<32x32xf32>
    %364 = vector.shape_cast %363 : vector<32x32xf32> to vector<1x32x32xf32>
    %365 = vector.broadcast %364 : vector<1x32x32xf32> to vector<2x32x32xf32>
    "tpu.trace_start"() <{level = 10 : i32, message = "boh,bht->bot"}> : () -> ()
    %cst_137 = arith.constant dense<0.000000e+00> : vector<2x32x64xf32>
    %366 = tpu.matmul %365, %361, %cst_137 {dimension_numbers = #tpu.dot_dimension_numbers<[2], [1], [1], [2], [0, 0, 0, 1, 1, 2], [0], [0]>} : vector<2x32x32xf32>, vector<2x32x64xf32>, vector<2x32x64xf32> -> vector<2x32x64xf32>
    "tpu.trace_stop"() : () -> ()
    %c7_138 = arith.constant 7 : index
    %c0_139 = arith.constant 0 : index
    %c0_140 = arith.constant 0 : index
    %367 = vector.load %arg9[%c7_138, %c0_139, %c0_140] : memref<10x32x1xf32, #tpu.memory_space<vmem>>, vector<1x32x1xf32>
    %368 = vector.shape_cast %367 : vector<1x32x1xf32> to vector<32x1xf32>
    %369 = vector.shape_cast %368 : vector<32x1xf32> to vector<1x32x1xf32>
    %370 = vector.broadcast %369 : vector<1x32x1xf32> to vector<2x32x64xf32>
    %371 = arith.addf %366, %370 : vector<2x32x64xf32>
    %372 = arith.addf %285, %371 : vector<2x32x64xf32>
    %373 = arith.mulf %372, %372 : vector<2x32x64xf32>
    %cst_141 = arith.constant dense<0.000000e+00> : vector<2x32xf32>
    %374 = vector.multi_reduction <add>, %373, %cst_141 [2] : vector<2x32x64xf32> to vector<2x32xf32>
    %375 = vector.shape_cast %374 : vector<2x32xf32> to vector<2x32x1xf32>
    %cst_142 = arith.constant dense<0.000000e+00> : vector<2x32xf32>
    %376 = vector.multi_reduction <add>, %372, %cst_142 [2] : vector<2x32x64xf32> to vector<2x32xf32>
    %377 = vector.shape_cast %376 : vector<2x32xf32> to vector<2x32x1xf32>
    %cst_143 = arith.constant dense<0.000000e+00> : vector<32x1xf32>
    %378 = vector.multi_reduction <add>, %377, %cst_143 [0] : vector<2x32x1xf32> to vector<32x1xf32>
    %379 = vector.shape_cast %378 : vector<32x1xf32> to vector<1x32x1xf32>
    %cst_144 = arith.constant 7.812500e-03 : f32
    %380 = vector.broadcast %cst_144 : f32 to vector<1x32x1xf32>
    %381 = arith.mulf %379, %380 : vector<1x32x1xf32>
    %cst_145 = arith.constant dense<0.000000e+00> : vector<32x1xf32>
    %382 = vector.multi_reduction <add>, %375, %cst_145 [0] : vector<2x32x1xf32> to vector<32x1xf32>
    %383 = vector.shape_cast %382 : vector<32x1xf32> to vector<1x32x1xf32>
    %cst_146 = arith.constant 7.812500e-03 : f32
    %384 = vector.broadcast %cst_146 : f32 to vector<1x32x1xf32>
    %385 = arith.mulf %383, %384 : vector<1x32x1xf32>
    %386 = arith.mulf %381, %381 : vector<1x32x1xf32>
    %387 = arith.subf %385, %386 : vector<1x32x1xf32>
    %cst_147 = arith.constant 0.000000e+00 : f32
    %388 = vector.broadcast %cst_147 : f32 to vector<1x32x1xf32>
    %389 = arith.maximumf %387, %388 : vector<1x32x1xf32>
    %cst_148 = arith.constant 9.99999974E-6 : f32
    %390 = vector.broadcast %cst_148 : f32 to vector<1x32x1xf32>
    %391 = arith.addf %389, %390 : vector<1x32x1xf32>
    %392 = math.rsqrt %391 : vector<1x32x1xf32>
    %393 = vector.extract_strided_slice %8 {offsets = [0, 256, 0], sizes = [2, 32, 1], strides = [1, 1, 1]} : vector<2x704x1xf32> to vector<2x32x1xf32>
    %394 = vector.extract_strided_slice %8 {offsets = [0, 608, 0], sizes = [2, 32, 1], strides = [1, 1, 1]} : vector<2x704x1xf32> to vector<2x32x1xf32>
    %395 = vector.broadcast %392 : vector<1x32x1xf32> to vector<2x32x1xf32>
    %396 = arith.mulf %393, %395 : vector<2x32x1xf32>
    %397 = vector.broadcast %381 : vector<1x32x1xf32> to vector<2x32x1xf32>
    %398 = arith.mulf %397, %396 : vector<2x32x1xf32>
    %399 = arith.subf %394, %398 : vector<2x32x1xf32>
    %400 = vector.broadcast %396 : vector<2x32x1xf32> to vector<2x32x64xf32>
    %401 = arith.mulf %400, %372 : vector<2x32x64xf32>
    %402 = vector.broadcast %399 : vector<2x32x1xf32> to vector<2x32x64xf32>
    %403 = arith.addf %401, %402 : vector<2x32x64xf32>
    %cst_149 = arith.constant 0.000000e+00 : f32
    %404 = vector.broadcast %cst_149 : f32 to vector<2x32x64xf32>
    %405 = arith.maximumf %403, %404 : vector<2x32x64xf32>
    %c8 = arith.constant 8 : index
    %c0_150 = arith.constant 0 : index
    %c0_151 = arith.constant 0 : index
    %406 = vector.load %arg8[%c8, %c0_150, %c0_151] : memref<10x32x32xf32, #tpu.memory_space<vmem>>, vector<1x32x32xf32>
    %407 = vector.shape_cast %406 : vector<1x32x32xf32> to vector<32x32xf32>
    %408 = vector.shape_cast %407 : vector<32x32xf32> to vector<1x32x32xf32>
    %409 = vector.broadcast %408 : vector<1x32x32xf32> to vector<2x32x32xf32>
    "tpu.trace_start"() <{level = 10 : i32, message = "boh,bht->bot"}> : () -> ()
    %cst_152 = arith.constant dense<0.000000e+00> : vector<2x32x64xf32>
    %410 = tpu.matmul %409, %405, %cst_152 {dimension_numbers = #tpu.dot_dimension_numbers<[2], [1], [1], [2], [0, 0, 0, 1, 1, 2], [0], [0]>} : vector<2x32x32xf32>, vector<2x32x64xf32>, vector<2x32x64xf32> -> vector<2x32x64xf32>
    "tpu.trace_stop"() : () -> ()
    %c8_153 = arith.constant 8 : index
    %c0_154 = arith.constant 0 : index
    %c0_155 = arith.constant 0 : index
    %411 = vector.load %arg9[%c8_153, %c0_154, %c0_155] : memref<10x32x1xf32, #tpu.memory_space<vmem>>, vector<1x32x1xf32>
    %412 = vector.shape_cast %411 : vector<1x32x1xf32> to vector<32x1xf32>
    %413 = vector.shape_cast %412 : vector<32x1xf32> to vector<1x32x1xf32>
    %414 = vector.broadcast %413 : vector<1x32x1xf32> to vector<2x32x64xf32>
    %415 = arith.addf %410, %414 : vector<2x32x64xf32>
    %416 = arith.mulf %415, %415 : vector<2x32x64xf32>
    %cst_156 = arith.constant dense<0.000000e+00> : vector<2x32xf32>
    %417 = vector.multi_reduction <add>, %416, %cst_156 [2] : vector<2x32x64xf32> to vector<2x32xf32>
    %418 = vector.shape_cast %417 : vector<2x32xf32> to vector<2x32x1xf32>
    %cst_157 = arith.constant dense<0.000000e+00> : vector<2x32xf32>
    %419 = vector.multi_reduction <add>, %415, %cst_157 [2] : vector<2x32x64xf32> to vector<2x32xf32>
    %420 = vector.shape_cast %419 : vector<2x32xf32> to vector<2x32x1xf32>
    %cst_158 = arith.constant dense<0.000000e+00> : vector<32x1xf32>
    %421 = vector.multi_reduction <add>, %420, %cst_158 [0] : vector<2x32x1xf32> to vector<32x1xf32>
    %422 = vector.shape_cast %421 : vector<32x1xf32> to vector<1x32x1xf32>
    %cst_159 = arith.constant 7.812500e-03 : f32
    %423 = vector.broadcast %cst_159 : f32 to vector<1x32x1xf32>
    %424 = arith.mulf %422, %423 : vector<1x32x1xf32>
    %cst_160 = arith.constant dense<0.000000e+00> : vector<32x1xf32>
    %425 = vector.multi_reduction <add>, %418, %cst_160 [0] : vector<2x32x1xf32> to vector<32x1xf32>
    %426 = vector.shape_cast %425 : vector<32x1xf32> to vector<1x32x1xf32>
    %cst_161 = arith.constant 7.812500e-03 : f32
    %427 = vector.broadcast %cst_161 : f32 to vector<1x32x1xf32>
    %428 = arith.mulf %426, %427 : vector<1x32x1xf32>
    %429 = arith.mulf %424, %424 : vector<1x32x1xf32>
    %430 = arith.subf %428, %429 : vector<1x32x1xf32>
    %cst_162 = arith.constant 0.000000e+00 : f32
    %431 = vector.broadcast %cst_162 : f32 to vector<1x32x1xf32>
    %432 = arith.maximumf %430, %431 : vector<1x32x1xf32>
    %cst_163 = arith.constant 9.99999974E-6 : f32
    %433 = vector.broadcast %cst_163 : f32 to vector<1x32x1xf32>
    %434 = arith.addf %432, %433 : vector<1x32x1xf32>
    %435 = math.rsqrt %434 : vector<1x32x1xf32>
    %436 = vector.extract_strided_slice %8 {offsets = [0, 288, 0], sizes = [2, 32, 1], strides = [1, 1, 1]} : vector<2x704x1xf32> to vector<2x32x1xf32>
    %437 = vector.extract_strided_slice %8 {offsets = [0, 640, 0], sizes = [2, 32, 1], strides = [1, 1, 1]} : vector<2x704x1xf32> to vector<2x32x1xf32>
    %438 = vector.broadcast %435 : vector<1x32x1xf32> to vector<2x32x1xf32>
    %439 = arith.mulf %436, %438 : vector<2x32x1xf32>
    %440 = vector.broadcast %424 : vector<1x32x1xf32> to vector<2x32x1xf32>
    %441 = arith.mulf %440, %439 : vector<2x32x1xf32>
    %442 = arith.subf %437, %441 : vector<2x32x1xf32>
    %443 = vector.broadcast %439 : vector<2x32x1xf32> to vector<2x32x64xf32>
    %444 = arith.mulf %443, %415 : vector<2x32x64xf32>
    %445 = vector.broadcast %442 : vector<2x32x1xf32> to vector<2x32x64xf32>
    %446 = arith.addf %444, %445 : vector<2x32x64xf32>
    %cst_164 = arith.constant 0.000000e+00 : f32
    %447 = vector.broadcast %cst_164 : f32 to vector<2x32x64xf32>
    %448 = arith.maximumf %446, %447 : vector<2x32x64xf32>
    %c9 = arith.constant 9 : index
    %c0_165 = arith.constant 0 : index
    %c0_166 = arith.constant 0 : index
    %449 = vector.load %arg8[%c9, %c0_165, %c0_166] : memref<10x32x32xf32, #tpu.memory_space<vmem>>, vector<1x32x32xf32>
    %450 = vector.shape_cast %449 : vector<1x32x32xf32> to vector<32x32xf32>
    %451 = vector.shape_cast %450 : vector<32x32xf32> to vector<1x32x32xf32>
    %452 = vector.broadcast %451 : vector<1x32x32xf32> to vector<2x32x32xf32>
    "tpu.trace_start"() <{level = 10 : i32, message = "boh,bht->bot"}> : () -> ()
    %cst_167 = arith.constant dense<0.000000e+00> : vector<2x32x64xf32>
    %453 = tpu.matmul %452, %448, %cst_167 {dimension_numbers = #tpu.dot_dimension_numbers<[2], [1], [1], [2], [0, 0, 0, 1, 1, 2], [0], [0]>} : vector<2x32x32xf32>, vector<2x32x64xf32>, vector<2x32x64xf32> -> vector<2x32x64xf32>
    "tpu.trace_stop"() : () -> ()
    %c9_168 = arith.constant 9 : index
    %c0_169 = arith.constant 0 : index
    %c0_170 = arith.constant 0 : index
    %454 = vector.load %arg9[%c9_168, %c0_169, %c0_170] : memref<10x32x1xf32, #tpu.memory_space<vmem>>, vector<1x32x1xf32>
    %455 = vector.shape_cast %454 : vector<1x32x1xf32> to vector<32x1xf32>
    %456 = vector.shape_cast %455 : vector<32x1xf32> to vector<1x32x1xf32>
    %457 = vector.broadcast %456 : vector<1x32x1xf32> to vector<2x32x64xf32>
    %458 = arith.addf %453, %457 : vector<2x32x64xf32>
    %459 = arith.addf %372, %458 : vector<2x32x64xf32>
    %460 = arith.mulf %459, %459 : vector<2x32x64xf32>
    %cst_171 = arith.constant dense<0.000000e+00> : vector<2x32xf32>
    %461 = vector.multi_reduction <add>, %460, %cst_171 [2] : vector<2x32x64xf32> to vector<2x32xf32>
    %462 = vector.shape_cast %461 : vector<2x32xf32> to vector<2x32x1xf32>
    %cst_172 = arith.constant dense<0.000000e+00> : vector<2x32xf32>
    %463 = vector.multi_reduction <add>, %459, %cst_172 [2] : vector<2x32x64xf32> to vector<2x32xf32>
    %464 = vector.shape_cast %463 : vector<2x32xf32> to vector<2x32x1xf32>
    %cst_173 = arith.constant dense<0.000000e+00> : vector<32x1xf32>
    %465 = vector.multi_reduction <add>, %464, %cst_173 [0] : vector<2x32x1xf32> to vector<32x1xf32>
    %466 = vector.shape_cast %465 : vector<32x1xf32> to vector<1x32x1xf32>
    %cst_174 = arith.constant 7.812500e-03 : f32
    %467 = vector.broadcast %cst_174 : f32 to vector<1x32x1xf32>
    %468 = arith.mulf %466, %467 : vector<1x32x1xf32>
    %cst_175 = arith.constant dense<0.000000e+00> : vector<32x1xf32>
    %469 = vector.multi_reduction <add>, %462, %cst_175 [0] : vector<2x32x1xf32> to vector<32x1xf32>
    %470 = vector.shape_cast %469 : vector<32x1xf32> to vector<1x32x1xf32>
    %cst_176 = arith.constant 7.812500e-03 : f32
    %471 = vector.broadcast %cst_176 : f32 to vector<1x32x1xf32>
    %472 = arith.mulf %470, %471 : vector<1x32x1xf32>
    %473 = arith.mulf %468, %468 : vector<1x32x1xf32>
    %474 = arith.subf %472, %473 : vector<1x32x1xf32>
    %cst_177 = arith.constant 0.000000e+00 : f32
    %475 = vector.broadcast %cst_177 : f32 to vector<1x32x1xf32>
    %476 = arith.maximumf %474, %475 : vector<1x32x1xf32>
    %cst_178 = arith.constant 9.99999974E-6 : f32
    %477 = vector.broadcast %cst_178 : f32 to vector<1x32x1xf32>
    %478 = arith.addf %476, %477 : vector<1x32x1xf32>
    %479 = math.rsqrt %478 : vector<1x32x1xf32>
    %480 = vector.extract_strided_slice %8 {offsets = [0, 320, 0], sizes = [2, 32, 1], strides = [1, 1, 1]} : vector<2x704x1xf32> to vector<2x32x1xf32>
    %481 = vector.extract_strided_slice %8 {offsets = [0, 672, 0], sizes = [2, 32, 1], strides = [1, 1, 1]} : vector<2x704x1xf32> to vector<2x32x1xf32>
    %482 = vector.broadcast %479 : vector<1x32x1xf32> to vector<2x32x1xf32>
    %483 = arith.mulf %480, %482 : vector<2x32x1xf32>
    %484 = vector.broadcast %468 : vector<1x32x1xf32> to vector<2x32x1xf32>
    %485 = arith.mulf %484, %483 : vector<2x32x1xf32>
    %486 = arith.subf %481, %485 : vector<2x32x1xf32>
    %487 = vector.broadcast %483 : vector<2x32x1xf32> to vector<2x32x64xf32>
    %488 = arith.mulf %487, %459 : vector<2x32x64xf32>
    %489 = vector.broadcast %486 : vector<2x32x1xf32> to vector<2x32x64xf32>
    %490 = arith.addf %488, %489 : vector<2x32x64xf32>
    %cst_179 = arith.constant 0.000000e+00 : f32
    %491 = vector.broadcast %cst_179 : f32 to vector<2x32x64xf32>
    %492 = arith.maximumf %490, %491 : vector<2x32x64xf32>
    %c0_180 = arith.constant 0 : index
    %c0_181 = arith.constant 0 : index
    %493 = vector.load %arg10[%c0_180, %c0_181] : memref<1x32xf32, #tpu.memory_space<vmem>>, vector<1x32xf32>
    %494 = vector.shape_cast %493 : vector<1x32xf32> to vector<1x1x32xf32>
    %495 = vector.broadcast %494 : vector<1x1x32xf32> to vector<2x1x32xf32>
    "tpu.trace_start"() <{level = 10 : i32, message = "boh,bht->bot"}> : () -> ()
    %cst_182 = arith.constant dense<0.000000e+00> : vector<2x1x64xf32>
    %496 = tpu.matmul %495, %492, %cst_182 {dimension_numbers = #tpu.dot_dimension_numbers<[2], [1], [1], [2], [0, 0, 0, 1, 1, 2], [0], [0]>} : vector<2x1x32xf32>, vector<2x32x64xf32>, vector<2x1x64xf32> -> vector<2x1x64xf32>
    "tpu.trace_stop"() : () -> ()
    %c0_183 = arith.constant 0 : index
    %c0_184 = arith.constant 0 : index
    %497 = vector.load %arg11[%c0_183, %c0_184] : memref<1x1xf32, #tpu.memory_space<vmem>>, vector<1x1xf32>
    %498 = vector.shape_cast %497 : vector<1x1xf32> to vector<1x1x1xf32>
    %499 = vector.broadcast %498 : vector<1x1x1xf32> to vector<2x1x64xf32>
    %500 = arith.addf %496, %499 : vector<2x1x64xf32>
    %c0_185 = arith.constant 0 : index
    %c0_186 = arith.constant 0 : index
    %c0_187 = arith.constant 0 : index
    %501 = vector.load %arg12[%c0_185, %c0_186, %c0_187] : memref<2x1x64xf32, #tpu.memory_space<vmem>>, vector<2x1x64xf32>
    tpu.vector_store %arg12[%c0_185, %c0_186, %c0_187], %500 {strides = array<i32>} : memref<2x1x64xf32, #tpu.memory_space<vmem>>, vector<2x1x64xf32>,
    return
  }
}

</mosaic_0001>

<bundles_post_ra>
// kernel: decoder_forward.1
= control target key start
LH: loop header
LB: loop body
LE: loop exit
PB: predicated region body
PF: predicated region fallthrough
CT: control target
= control target key end

     0   :  { %s8398_s0 = inlined_call_operand.vmem [shape: f32[2,3,64], index: 0, kind: input, shape index: {}]   ;;  %s8399_s1 = inlined_call_operand.vmem [shape: f32[2,8,1], index: 1, kind: input, shape index: {}]   ;;  %s8400_s2 = inlined_call_operand.vmem [shape: f32[2,8,1], index: 2, kind: input, shape index: {}]   ;;  %s8401_s3 = inlined_call_operand.vmem [shape: f32[704,8], index: 3, kind: input, shape index: {}]   ;;  %s8402_s4 = inlined_call_operand.vmem [shape: f32[704,1], index: 4, kind: input, shape index: {}]   ;;  %s8403_s5 = inlined_call_operand.vmem [shape: f32[32,3], index: 5, kind: input, shape index: {}]   ;;  %s8404_s6 = inlined_call_operand.vmem [shape: f32[32,8], index: 6, kind: input, shape index: {}]   ;;  %s8405_s7 = inlined_call_operand.vmem [shape: f32[32,1], index: 7, kind: input, shape index: {}]   ;;  %s8406_s8 = inlined_call_operand.vmem [shape: f32[10,32,32], index: 8, kind: input, shape index: {}]   ;;  %s8407_s9 = inlined_call_operand.vmem [shape: f32[10,32,1], index: 9, kind: input, shape index: {}]   ;;  %s8408_s10 = inlined_call_operand.vmem [shape: f32[1,32], index: 10, kind: input, shape index: {}]   ;;  %s8409_s11 = inlined_call_operand.<no memory space> [shape: f32[1,1], index: 11, kind: input, shape index: {}]   ;;  %s8410_s12 = inlined_call_operand.hbm [shape: f32[2,1,64], index: 12, kind: output, shape index: {}]  }
   0x1   :  { %v17_v0 = vstv %s8409_s11 }
   0x2   :  { %18 = vst [vmem:[#allocation2] sm:$0x1] %v17_v0 }
   0x3   :  { %v132_v1 = vld [vmem:[%s8400_s2] sm:$0xff]  ;;  %v113_v2 = vld [vmem:[%s8401_s3 + $0x228] sm:$0xff]  ;;  %vm222_vm0 = vcmask 64512  }
   0x4   :  { %v133_v3 = vld [vmem:[%s8400_s2 + $0x8] sm:$0xff]  ;;  %5529 = vmatpush.msra.mxu2 %v132_v1  ;;  %v1059_v4 = vld [vmem:[%s8399_s1] sm:$0xff] }
   0x5   :  { %5530 = vmatpush.msra.mxu3 %v133_v3  ;;  %5250 = vmatmul.msk.f32.vlgmr.msra.gmra.mxu2 %vm222_vm0, %v113_v2  ;;  %v1060_v5 = vld [vmem:[%s8399_s1 + $0x8] sm:$0xff] }
   0x6   :  { %5338 = vmatmul.msk.f32.vlgmr.msra.gmra.mxu3 %vm222_vm0, %v113_v2  ;;  %1092 = vmatpush.msrb.mxu2 %v1059_v4 }
   0x7   :  { %1121 = vmatpush.msrb.mxu3 %v1060_v5 }
   0x8   :  { %19 = vsyncpa [#allocation4], 0  ;;  %502 = vmatpush.msra.mxu0 %v132_v1  ;;  %783 = vmatpush.msra.mxu1 %v133_v3  ;;  %v114_v6 = vld [vmem:[%s8401_s3 + $0x230] sm:$0xff]  ;;  %v115_v7 = vld [vmem:[%s8401_s3 + $0x238] sm:$0xff]  ;;  %vm1188_vm1 = vcmask 1042432   ;;  %vm1175_vm2 = vcmask 23552  }
   0x9   :  { %v116_v8 = vld [vmem:[%s8401_s3 + $0x240] sm:$0xff]  ;;  %v117_v9 = vld [vmem:[%s8401_s3 + $0x248] sm:$0xff]  ;;  %v118_v10 = vld [vmem:[%s8401_s3 + $0x250] sm:$0xff]  ;;  %vm1261_vm3 = vcmask 523264   ;;  %s5653_s13 = smov [#allocation3]   ;;  %s5655_s15 = smov 1  }
   0xa   :  { %v44_v11 = vld [vmem:[%s8401_s3] sm:$0xff]  ;;  %v119_v12 = vld [vmem:[%s8401_s3 + $0x258] sm:$0xff]  ;;  %v45_v13 = vld [vmem:[%s8401_s3 + $0x8] sm:$0xff]  ;;  %s5167_s2 = sshll.u32 %s5653_s13, 4  ;;  %s5168_s2 = int_to_ptr.vmem [resolvable:$true] %s5167_s2 }
   0xb   :  { %5181 = vmatmul.msk.f32.vlgmr.msra.gmra.mxu0 %vm222_vm0, %v44_v11  ;;  %5269 = vmatmul.msk.f32.vlgmr.msra.gmra.mxu1 %vm222_vm0, %v44_v11  ;;  %v120_v14 = vld [vmem:[%s8401_s3 + $0x260] sm:$0xff]  ;;  %v46_v15 = vld [vmem:[%s8401_s3 + $0x10] sm:$0xff]  ;;  %v121_v16 = vld [vmem:[%s8401_s3 + $0x268] sm:$0xff] }
   0xc   :  { %v47_v17 = vld [vmem:[%s8401_s3 + $0x18] sm:$0xff]  ;;  %v122_v18 = vld [vmem:[%s8401_s3 + $0x270] sm:$0xff]  ;;  %v48_v19 = vld [vmem:[%s8401_s3 + $0x20] sm:$0xff] }
   0xd   :  { %5251 = vmatmul.msk.f32.gmra.mxu2 %vm222_vm0, %v114_v6  ;;  %v123_v20 = vld [vmem:[%s8401_s3 + $0x278] sm:$0xff]  ;;  %v49_v21 = vld [vmem:[%s8401_s3 + $0x28] sm:$0xff]  ;;  %v124_v22 = vld [vmem:[%s8401_s3 + $0x280] sm:$0xff] }
   0xe   :  { %5339 = vmatmul.msk.f32.gmra.mxu3 %vm222_vm0, %v114_v6  ;;  %v50_v23 = vld [vmem:[%s8401_s3 + $0x30] sm:$0xff]  ;;  %v125_v24 = vld [vmem:[%s8401_s3 + $0x288] sm:$0xff]  ;;  %v51_v25 = vld [vmem:[%s8401_s3 + $0x38] sm:$0xff] }
   0xf   :  { %v126_v26 = vld [vmem:[%s8401_s3 + $0x290] sm:$0xff]  ;;  %v52_v27 = vld [vmem:[%s8401_s3 + $0x40] sm:$0xff]  ;;  %v127_v28 = vld [vmem:[%s8401_s3 + $0x298] sm:$0xff] }
  0x10   :  { %v53_v29 = vld [vmem:[%s8401_s3 + $0x48] sm:$0xff]  ;;  %v128_v30 = vld [vmem:[%s8401_s3 + $0x2a0] sm:$0xff]  ;;  %v54_v31 = vld [vmem:[%s8401_s3 + $0x50] sm:$0xff] }
  0x11   :  { %v129_v32 = vld [vmem:[%s8401_s3 + $0x2a8] sm:$0xff]  ;;  %v55_v33 = vld [vmem:[%s8401_s3 + $0x58] sm:$0xff]  ;;  %v130_v36 = vld [vmem:[%s8401_s3 + $0x2b0] sm:$0xff] }
  0x12   :  { %v56_v37 = vld [vmem:[%s8401_s3 + $0x60] sm:$0xff]  ;;  %v131_v40 = vld [vmem:[%s8401_s3 + $0x2b8] sm:$0xff]  ;;  %v57_v41 = vld [vmem:[%s8401_s3 + $0x68] sm:$0xff] }
  0x13   :  { %5182 = vmatmul.msk.f32.gmra.mxu0 %vm222_vm0, %v45_v13  ;;  %5270 = vmatmul.msk.f32.gmra.mxu1 %vm222_vm0, %v45_v13  ;;  %v1055_v44 = vld [vmem:[%s8404_s6] sm:$0xff]  ;;  %v58_v45 = vld [vmem:[%s8401_s3 + $0x70] sm:$0xff]  ;;  %v1056_v48 = vld [vmem:[%s8404_s6 + $0x8] sm:$0xff] }
  0x14   :  { %v59_v49 = vld [vmem:[%s8401_s3 + $0x78] sm:$0xff]  ;;  %v1057_v52 = vld [vmem:[%s8404_s6 + $0x10] sm:$0xff]  ;;  %v60_v55 = vld [vmem:[%s8401_s3 + $0x80] sm:$0xff] }
  0x15   :  { %5252 = vmatmul.msk.f32.gmra.mxu2 %vm222_vm0, %v115_v7  ;;  %v1058_v58 = vld [vmem:[%s8404_s6 + $0x18] sm:$0xff]  ;;  %v61_v61 = vld [vmem:[%s8401_s3 + $0x88] sm:$0xff]  ;;  %v62_v2 = vld [vmem:[%s8401_s3 + $0x90] sm:$0xff] }
  0x16   :  { %5340 = vmatmul.msk.f32.gmra.mxu3 %vm222_vm0, %v115_v7  ;;  %v63_v7 = vld [vmem:[%s8401_s3 + $0x98] sm:$0xff] }
  0x1b   :  { %5183 = vmatmul.msk.f32.gmra.mxu0 %vm222_vm0, %v46_v15  ;;  %5271 = vmatmul.msk.f32.gmra.mxu1 %vm222_vm0, %v46_v15 }
  0x1d   :  { %5253 = vmatmul.msk.f32.gmra.mxu2 %vm222_vm0, %v116_v8 }
  0x1e   :  { %5341 = vmatmul.msk.f32.gmra.mxu3 %vm222_vm0, %v116_v8 }
  0x23   :  { %5184 = vmatmul.msk.f32.gmra.mxu0 %vm222_vm0, %v47_v17  ;;  %5272 = vmatmul.msk.f32.gmra.mxu1 %vm222_vm0, %v47_v17  ;;  %v65_v17 = vld [vmem:[%s8401_s3 + $0xa8] sm:$0xff] }
  0x25   :  { %5254 = vmatmul.msk.f32.gmra.mxu2 %vm222_vm0, %v117_v9 }
  0x26   :  { %5342 = vmatmul.msk.f32.gmra.mxu3 %vm222_vm0, %v117_v9 }
  0x2b   :  { %5185 = vmatmul.msk.f32.gmra.mxu0 %vm222_vm0, %v48_v19  ;;  %5273 = vmatmul.msk.f32.gmra.mxu1 %vm222_vm0, %v48_v19 }
  0x2d   :  { %5255 = vmatmul.msk.f32.gmra.mxu2 %vm222_vm0, %v118_v10 }
  0x2e   :  { %5343 = vmatmul.msk.f32.gmra.mxu3 %vm222_vm0, %v118_v10 }
  0x33   :  { %5186 = vmatmul.msk.f32.gmra.mxu0 %vm222_vm0, %v49_v21  ;;  %5274 = vmatmul.msk.f32.gmra.mxu1 %vm222_vm0, %v49_v21  ;;  %v1049_v21 = vld [vmem:[%s8403_s5] sm:$0xff] }
  0x35   :  { %5256 = vmatmul.msk.f32.gmra.mxu2 %vm222_vm0, %v119_v12 }
  0x36   :  { %5344 = vmatmul.msk.f32.gmra.mxu3 %vm222_vm0, %v119_v12  ;;  %v64_v12 = vld [vmem:[%s8401_s3 + $0xa0] sm:$0xff] }
  0x3b   :  { %5187 = vmatmul.msk.f32.gmra.mxu0 %vm222_vm0, %v50_v23  ;;  %5275 = vmatmul.msk.f32.gmra.mxu1 %vm222_vm0, %v50_v23 }
  0x3d   :  { %5257 = vmatmul.msk.f32.gmra.mxu2 %vm222_vm0, %v120_v14 }
  0x3e   :  { %5345 = vmatmul.msk.f32.gmra.mxu3 %vm222_vm0, %v120_v14 }
  0x43   :  { %5188 = vmatmul.msk.f32.gmra.mxu0 %vm222_vm0, %v51_v25  ;;  %5276 = vmatmul.msk.f32.gmra.mxu1 %vm222_vm0, %v51_v25 }
  0x45   :  { %5258 = vmatmul.msk.f32.gmra.mxu2 %vm222_vm0, %v121_v16 }
  0x46   :  { %5346 = vmatmul.msk.f32.gmra.mxu3 %vm222_vm0, %v121_v16 }
  0x4b   :  { %5189 = vmatmul.msk.f32.gmra.mxu0 %vm222_vm0, %v52_v27  ;;  %5277 = vmatmul.msk.f32.gmra.mxu1 %vm222_vm0, %v52_v27  ;;  %v1054_v27 = vld [vmem:[%s8398_s0 + $0x4] sm:$0x7] }
  0x4c   :  { %5370 = vmatpush.msk.msra.mxu3 %vm1188_vm1, %v1054_v27  ;;  %v71_v27 = vld [vmem:[%s8401_s3 + $0xd8] sm:$0xff] }
  0x4d   :  { %5259 = vmatmul.msk.f32.gmra.mxu2 %vm222_vm0, %v122_v18 }
  0x4e   :  { %5347 = vmatmul.msk.f32.gmra.mxu3 %vm222_vm0, %v122_v18 }
  0x53   :  { %5190 = vmatmul.msk.f32.gmra.mxu0 %vm222_vm0, %v53_v29  ;;  %5278 = vmatmul.msk.f32.gmra.mxu1 %vm222_vm0, %v53_v29 }
  0x55   :  { %5260 = vmatmul.msk.f32.gmra.mxu2 %vm222_vm0, %v123_v20 }
  0x56   :  { %5348 = vmatmul.msk.f32.gmra.mxu3 %vm222_vm0, %v123_v20  ;;  %v1053_v20 = vld [vmem:[%s8398_s0] sm:$0x7] }
  0x57   :  { %5365 = vmatpush.msk.msra.mxu2 %vm1188_vm1, %v1053_v20  ;;  %v5652_v20 = vmov 0   ;;  %vm1538_vm1 = vcmask 261120  }
  0x58   :  { %5535 = vset.pattern.permute.xlu0 %v5652_v20  ;;  %5537 = vset.pattern.permute.xlu2 %v5652_v20 }
  0x59   :  { %5536 = vset.pattern.permute.xlu1 %v5652_v20 }
  0x5b   :  { %5191 = vmatmul.msk.f32.gmra.mxu0 %vm222_vm0, %v54_v31  ;;  %5279 = vmatmul.msk.f32.gmra.mxu1 %vm222_vm0, %v54_v31  ;;  %v67_v31 = vld [vmem:[%s8401_s3 + $0xb8] sm:$0xff] }
  0x5d   :  { %5261 = vmatmul.msk.f32.gmra.mxu2 %vm222_vm0, %v124_v22 }
  0x5e   :  { %5349 = vmatmul.msk.f32.gmra.mxu3 %vm222_vm0, %v124_v22 }
  0x63   :  { %5192 = vmatmul.msk.f32.gmra.mxu0 %vm222_vm0, %v55_v33  ;;  %5280 = vmatmul.msk.f32.gmra.mxu1 %vm222_vm0, %v55_v33 }
  0x65   :  { %5262 = vmatmul.msk.f32.gmra.mxu2 %vm222_vm0, %v125_v24 }
  0x66   :  { %5350 = vmatmul.msk.f32.gmra.mxu3 %vm222_vm0, %v125_v24  ;;  %v66_v24 = vld [vmem:[%s8401_s3 + $0xb0] sm:$0xff] }
  0x6b   :  { %5193 = vmatmul.msk.f32.gmra.mxu0 %vm222_vm0, %v56_v37  ;;  %5281 = vmatmul.msk.f32.gmra.mxu1 %vm222_vm0, %v56_v37 }
  0x6d   :  { %5263 = vmatmul.msk.f32.gmra.mxu2 %vm222_vm0, %v126_v26 }
  0x6e   :  { %5351 = vmatmul.msk.f32.gmra.mxu3 %vm222_vm0, %v126_v26 }
  0x73   :  { %5194 = vmatmul.msk.f32.gmra.mxu0 %vm222_vm0, %v57_v41  ;;  %5282 = vmatmul.msk.f32.gmra.mxu1 %vm222_vm0, %v57_v41 }
  0x75   :  { %5264 = vmatmul.msk.f32.gmra.mxu2 %vm222_vm0, %v127_v28 }
  0x76   :  { %5352 = vmatmul.msk.f32.gmra.mxu3 %vm222_vm0, %v127_v28  ;;  %v1050_v28 = vld [vmem:[%s8403_s5 + $0x8] sm:$0xff] }
  0x7b   :  { %5195 = vmatmul.msk.f32.gmra.mxu0 %vm222_vm0, %v58_v45  ;;  %5283 = vmatmul.msk.f32.gmra.mxu1 %vm222_vm0, %v58_v45 }
  0x7d   :  { %5265 = vmatmul.msk.f32.gmra.mxu2 %vm222_vm0, %v128_v30 }
  0x7e   :  { %5353 = vmatmul.msk.f32.gmra.mxu3 %vm222_vm0, %v128_v30 }
  0x83   :  { %5196 = vmatmul.msk.f32.gmra.mxu0 %vm222_vm0, %v59_v49  ;;  %5284 = vmatmul.msk.f32.gmra.mxu1 %vm222_vm0, %v59_v49  ;;  %v69_v49 = vld [vmem:[%s8401_s3 + $0xc8] sm:$0xff] }
  0x85   :  { %5266 = vmatmul.msk.f32.gmra.mxu2 %vm222_vm0, %v129_v32 }
  0x86   :  { %5354 = vmatmul.msk.f32.gmra.mxu3 %vm222_vm0, %v129_v32 }
  0x88   :  { %v5881_v34 = vpop.f32.mrf.mxu2  ;;  %v5944_v53 = vpop.f32.mrf.mxu0 }
  0x89   :  { %8411 = vst [vmem:[#allocation6_spill] sm:$0xff] %v5881_v34  ;;  %v5883_v35 = vpop.f32.mrf.mxu3  ;;  %v5946_v54 = vpop.f32.mrf.mxu1 }
  0x8a   :  { %8412 = vst [vmem:[#allocation7_spill] sm:$0xff] %v5883_v35 }
  0x8b   :  { %5197 = vmatmul.msk.f32.gmra.mxu0 %vm222_vm0, %v60_v55  ;;  %5285 = vmatmul.msk.f32.gmra.mxu1 %vm222_vm0, %v60_v55 }
  0x8d   :  { %5267 = vmatmul.msk.f32.gmra.mxu2 %vm222_vm0, %v130_v36 }
  0x8e   :  { %5355 = vmatmul.msk.f32.gmra.mxu3 %vm222_vm0, %v130_v36 }
  0x90   :  { %v5895_v38 = vpop.f32.mrf.mxu2  ;;  %v5962_v59 = vpop.f32.mrf.mxu0 }
  0x91   :  { %8413 = vst [vmem:[#allocation8_spill] sm:$0xff] %v5895_v38  ;;  %v5897_v39 = vpop.f32.mrf.mxu3  ;;  %v5964_v60 = vpop.f32.mrf.mxu1 }
  0x92   :  { %8414 = vst [vmem:[#allocation9_spill] sm:$0xff] %v5897_v39 }
  0x93   :  { %5198 = vmatmul.msk.f32.gmra.mxu0 %vm222_vm0, %v61_v61  ;;  %5286 = vmatmul.msk.f32.gmra.mxu1 %vm222_vm0, %v61_v61 }
  0x95   :  { %5268 = vmatmul.msk.f32.gmra.mxu2 %vm222_vm0, %v131_v40 }
  0x96   :  { %5356 = vmatmul.msk.f32.gmra.mxu3 %vm222_vm0, %v131_v40  ;;  %v68_v40 = vld [vmem:[%s8401_s3 + $0xc0] sm:$0xff] }
  0x98   :  { %v5909_v42 = vpop.f32.mrf.mxu2  ;;  %v5977_v0 = vpop.f32.mrf.mxu0 }
  0x99   :  { %8415 = vst [vmem:[#allocation10_spill] sm:$0xff] %v5909_v42  ;;  %v5911_v43 = vpop.f32.mrf.mxu3  ;;  %v5979_v1 = vpop.f32.mrf.mxu1 }
  0x9a   :  { %8416 = vst [vmem:[#allocation11_spill] sm:$0xff] %v5911_v43 }
  0x9b   :  { %5199 = vmatmul.msk.f32.gmra.mxu0 %vm222_vm0, %v62_v2  ;;  %5287 = vmatmul.msk.f32.gmra.mxu1 %vm222_vm0, %v62_v2  ;;  %v70_v2 = vld [vmem:[%s8401_s3 + $0xd0] sm:$0xff] }
  0x9d   :  { %5357 = vmatmul.msk.f32.vlgmr.msrb.gmra.mxu2 %vm222_vm0, %v1055_v44 }
  0x9e   :  { %5361 = vmatmul.msk.f32.vlgmr.msrb.gmra.mxu3 %vm222_vm0, %v1055_v44 }
  0xa0   :  { %v5923_v46 = vpop.f32.mrf.mxu2  ;;  %v5990_v5 = vpop.f32.mrf.mxu0 }
  0xa1   :  { %8417 = vst [vmem:[#allocation12_spill] sm:$0xff] %v5923_v46  ;;  %v5925_v47 = vpop.f32.mrf.mxu3  ;;  %v5992_v6 = vpop.f32.mrf.mxu1 }
  0xa2   :  { %8418 = vst [vmem:[#allocation13_spill] sm:$0xff] %v5925_v47 }
  0xa3   :  { %5200 = vmatmul.msk.f32.gmra.mxu0 %vm222_vm0, %v63_v7  ;;  %5288 = vmatmul.msk.f32.gmra.mxu1 %vm222_vm0, %v63_v7 }
  0xa5   :  { %5358 = vmatmul.msk.f32.gmra.mxu2 %vm222_vm0, %v1056_v48 }
  0xa6   :  { %5362 = vmatmul.msk.f32.gmra.mxu3 %vm222_vm0, %v1056_v48 }
  0xa8   :  { %v5937_v50 = vpop.f32.mrf.mxu2  ;;  %v6003_v10 = vpop.f32.mrf.mxu0 }
  0xa9   :  { %8419 = vst [vmem:[#allocation14_spill] sm:$0xff] %v5937_v50  ;;  %v5939_v51 = vpop.f32.mrf.mxu3  ;;  %v6005_v11 = vpop.f32.mrf.mxu1 }
  0xaa   :  { %8420 = vst [vmem:[#allocation15_spill] sm:$0xff] %v5939_v51 }
  0xab   :  { %5201 = vmatmul.msk.f32.gmra.mxu0 %vm222_vm0, %v64_v12  ;;  %5289 = vmatmul.msk.f32.gmra.mxu1 %vm222_vm0, %v64_v12 }
  0xad   :  { %5359 = vmatmul.msk.f32.gmra.mxu2 %vm222_vm0, %v1057_v52 }
  0xae   :  { %5363 = vmatmul.msk.f32.gmra.mxu3 %vm222_vm0, %v1057_v52 }
  0xb0   :  { %v5955_v56 = vpop.f32.mrf.mxu2  ;;  %v6016_v15 = vpop.f32.mrf.mxu0 }
  0xb1   :  { %8421 = vst [vmem:[#allocation16_spill] sm:$0xff] %v5955_v56  ;;  %v5957_v57 = vpop.f32.mrf.mxu3  ;;  %v6018_v16 = vpop.f32.mrf.mxu1 }
  0xb2   :  { %8422 = vst [vmem:[#allocation17_spill] sm:$0xff] %v5957_v57 }
  0xb3   :  { %5202 = vmatmul.msk.f32.gmra.mxu0 %vm222_vm0, %v65_v17  ;;  %5290 = vmatmul.msk.f32.gmra.mxu1 %vm222_vm0, %v65_v17  ;;  %v1051_v17 = vld [vmem:[%s8403_s5 + $0x10] sm:$0xff] }
  0xb5   :  { %5360 = vmatmul.msk.f32.gmra.mxu2 %vm222_vm0, %v1058_v58 }
  0xb6   :  { %5364 = vmatmul.msk.f32.gmra.mxu3 %vm222_vm0, %v1058_v58 }
  0xb8   :  { %v5973_v62 = vpop.f32.mrf.mxu2  ;;  %v6036_v22 = vpop.f32.mrf.mxu0 }
  0xb9   :  { %8423 = vst [vmem:[#allocation18_spill] sm:$0xff] %v5973_v62  ;;  %v5975_v63 = vpop.f32.mrf.mxu3  ;;  %v6038_v23 = vpop.f32.mrf.mxu1 }
  0xba   :  { %8424 = vst [vmem:[#allocation19_spill] sm:$0xff] %v5975_v63 }
  0xbb   :  { %5203 = vmatmul.msk.f32.gmra.mxu0 %vm222_vm0, %v66_v24  ;;  %5291 = vmatmul.msk.f32.gmra.mxu1 %vm222_vm0, %v66_v24 }
  0xbd   :  { %5366 = vmatmul.msk.f32.vlgmr.msra.gmra.mxu2 %vm1175_vm2, %v1049_v21 }
  0xbe   :  { %5371 = vmatmul.msk.f32.vlgmr.msra.gmra.mxu3 %vm1175_vm2, %v1049_v21 }
  0xc0   :  { %v5986_v3 = vpop.f32.mrf.mxu2  ;;  %v6057_v29 = vpop.f32.mrf.mxu0 }
  0xc1   :  { %8425 = vst [vmem:[#allocation20_spill] sm:$0xff] %v5986_v3  ;;  %v5988_v4 = vpop.f32.mrf.mxu3  ;;  %v6059_v30 = vpop.f32.mrf.mxu1 }
  0xc2   :  { %8426 = vst [vmem:[#allocation21_spill] sm:$0xff] %v5988_v4 }
  0xc3   :  { %5204 = vmatmul.msk.f32.gmra.mxu0 %vm222_vm0, %v67_v31  ;;  %5292 = vmatmul.msk.f32.gmra.mxu1 %vm222_vm0, %v67_v31 }
  0xc5   :  { %5367 = vmatmul.msk.f32.gmra.mxu2 %vm1175_vm2, %v1050_v28 }
  0xc6   :  { %5372 = vmatmul.msk.f32.gmra.mxu3 %vm1175_vm2, %v1050_v28 }
  0xc8   :  { %v5999_v8 = vpop.f32.mrf.mxu2  ;;  %v6071_v36 = vpop.f32.mrf.mxu0 }
  0xc9   :  { %8427 = vst [vmem:[#allocation22_spill] sm:$0xff] %v5999_v8  ;;  %v6001_v9 = vpop.f32.mrf.mxu3  ;;  %v6073_v37 = vpop.f32.mrf.mxu1 }
  0xca   :  { %8428 = vst [vmem:[#allocation23_spill] sm:$0xff] %v6001_v9 }
  0xcb   :  { %5205 = vmatmul.msk.f32.gmra.mxu0 %vm222_vm0, %v68_v40  ;;  %5293 = vmatmul.msk.f32.gmra.mxu1 %vm222_vm0, %v68_v40  ;;  %v1052_v40 = vld [vmem:[%s8403_s5 + $0x18] sm:$0xff] }
  0xcd   :  { %5368 = vmatmul.msk.f32.gmra.mxu2 %vm1175_vm2, %v1051_v17 }
  0xce   :  { %5373 = vmatmul.msk.f32.gmra.mxu3 %vm1175_vm2, %v1051_v17  ;;  %v72_v17 = vld [vmem:[%s8401_s3 + $0xe0] sm:$0xff] }
  0xd0   :  { %v6012_v13 = vpop.f32.mrf.mxu2  ;;  %v6084_v45 = vpop.f32.mrf.mxu0 }
  0xd1   :  { %8429 = vst [vmem:[#allocation24_spill] sm:$0xff] %v6012_v13  ;;  %v6014_v14 = vpop.f32.mrf.mxu3  ;;  %v6086_v48 = vpop.f32.mrf.mxu1 }
  0xd2   :  { %8430 = vst [vmem:[#allocation25_spill] sm:$0xff] %v6014_v14 }
  0xd3   :  { %5206 = vmatmul.msk.f32.gmra.mxu0 %vm222_vm0, %v69_v49  ;;  %5294 = vmatmul.msk.f32.gmra.mxu1 %vm222_vm0, %v69_v49 }
  0xd5   :  { %5369 = vmatmul.msk.f32.gmra.mxu2 %vm1175_vm2, %v1052_v40 }
  0xd6   :  { %5374 = vmatmul.msk.f32.gmra.mxu3 %vm1175_vm2, %v1052_v40 }
  0xd8   :  { %v6025_v18 = vpop.f32.mrf.mxu2  ;;  %v6097_v58 = vpop.f32.mrf.mxu0 }
  0xd9   :  { %8431 = vst [vmem:[#allocation26_spill] sm:$0xff] %v6025_v18  ;;  %v6027_v19 = vpop.f32.mrf.mxu3  ;;  %v6099_v61 = vpop.f32.mrf.mxu1  ;;  %v1064_v18 = vld [vmem:[%s8405_s7 + $0x18] sm:$0xff] }
  0xda   :  { %8432 = vst [vmem:[#allocation27_spill] sm:$0xff] %v6027_v19  ;;  %v77_v19 = vld [vmem:[%s8401_s3 + $0x108] sm:$0xff] }
  0xdb   :  { %5207 = vmatmul.msk.f32.gmra.mxu0 %vm222_vm0, %v70_v2  ;;  %5295 = vmatmul.msk.f32.gmra.mxu1 %vm222_vm0, %v70_v2 }
  0xe0   :  { %v6045_v25 = vpop.f32.mrf.mxu2  ;;  %v6114_v21 = vpop.f32.mrf.mxu0 }
  0xe1   :  { %8433 = vst [vmem:[#allocation28_spill] sm:$0xff] %v6045_v25  ;;  %v6047_v26 = vpop.f32.mrf.mxu3  ;;  %v6116_v24 = vpop.f32.mrf.mxu1 }
  0xe2   :  { %8434 = vst [vmem:[#allocation29_spill] sm:$0xff] %v6047_v26  ;;  %v1062_v26 = vld [vmem:[%s8405_s7 + $0x8] sm:$0xff] }
  0xe3   :  { %5208 = vmatmul.msk.f32.gmra.mxu0 %vm222_vm0, %v71_v27  ;;  %5296 = vmatmul.msk.f32.gmra.mxu1 %vm222_vm0, %v71_v27 }
  0xe8   :  { %v6066_v32 = vpop.f32.mrf.mxu2  ;;  %v6132_v49 = vpop.f32.mrf.mxu0 }
  0xe9   :  { %8435 = vst [vmem:[#allocation30_spill] sm:$0xff] %v6066_v32  ;;  %v6068_v33 = vpop.f32.mrf.mxu3  ;;  %v6134_v2 = vpop.f32.mrf.mxu1 }
  0xea   :  { %8436 = vst [vmem:[#allocation31_spill] sm:$0xff] %v6068_v33  ;;  %v1061_v33 = vld [vmem:[%s8405_s7] sm:$0xff] }
  0xeb   :  { %8445 = vst [vmem:[#allocation40_spill] sm:$0xff] %v6132_v49  ;;  %5209 = vmatmul.msk.f32.gmra.mxu0 %vm222_vm0, %v72_v17  ;;  %5297 = vmatmul.msk.f32.gmra.mxu1 %vm222_vm0, %v72_v17 }
  0xec   :  { %8446 = vst [vmem:[#allocation41_spill] sm:$0xff] %v6134_v2 }
  0xf0   :  { %v6080_v41 = vpop.f32.mrf.mxu2 }
  0xf1   :  { %8437 = vst [vmem:[#allocation32_spill] sm:$0xff] %v6080_v41  ;;  %v6082_v44 = vpop.f32.mrf.mxu3  ;;  %v75_v41 = vld [vmem:[%s8401_s3 + $0xf8] sm:$0xff] }
  0xf2   :  { %8438 = vst [vmem:[#allocation33_spill] sm:$0xff] %v6082_v44  ;;  %v1063_v44 = vld [vmem:[%s8405_s7 + $0x10] sm:$0xff]  ;;  %s5169_s7 = sshll.u32 %s8410_s12, 4  ;;  %s5170_s7 = int_to_ptr.hbm [resolvable:$true] %s5169_s7 }
  0xf8   :  { %v6093_v52 = vpop.f32.mrf.mxu2 }
  0xf9   :  { %8439 = vst [vmem:[#allocation34_spill] sm:$0xff] %v6093_v52  ;;  %v6095_v55 = vpop.f32.mrf.mxu3 }
  0xfa   :  { %8440 = vst [vmem:[#allocation35_spill] sm:$0xff] %v6095_v55 }
 0x100   :  { %v6106_v7 = vpop.f32.mrf.mxu2 }
 0x101   :  { %8441 = vst [vmem:[#allocation36_spill] sm:$0xff] %v6106_v7  ;;  %v6108_v12 = vpop.f32.mrf.mxu3  ;;  %v6146_v7 = vpop.f32.mrf.mxu0 }
 0x102   :  { %8442 = vst [vmem:[#allocation37_spill] sm:$0xff] %v6108_v12  ;;  %v73_v12 = vld [vmem:[%s8401_s3 + $0xe8] sm:$0xff] }
 0x103   :  { %5210 = vmatmul.msk.f32.gmra.mxu0 %vm222_vm0, %v73_v12  ;;  %5298 = vmatmul.msk.f32.gmra.mxu1 %vm222_vm0, %v73_v12 }
 0x108   :  { %v6124_v28 = vpop.f32.mrf.mxu2 }
 0x109   :  { %8443 = vst [vmem:[#allocation38_spill] sm:$0xff] %v6124_v28  ;;  %v6126_v31 = vpop.f32.mrf.mxu3  ;;  %v6159_v17 = vpop.f32.mrf.mxu0 }
 0x10a   :  { %8444 = vst [vmem:[#allocation39_spill] sm:$0xff] %v6126_v31  ;;  %v6148_v31 = vpop.f32.mrf.mxu1 }
 0x10b   :  { %8449 = vst [vmem:[#allocation44_spill] sm:$0xff] %v6148_v31 }
 0x10c   :  { %8452 = vst [vmem:[#allocation47_spill] sm:$0xff] %v6159_v17 }
 0x110   :  { %v6142_v20 = vpop.f32.mrf.mxu2 }
 0x111   :  { %8447 = vst [vmem:[#allocation42_spill] sm:$0xff] %v6142_v20  ;;  %v6144_v27 = vpop.f32.mrf.mxu3  ;;  %v6171_v55 = vpop.f32.mrf.mxu0 }
 0x112   :  { %8448 = vst [vmem:[#allocation43_spill] sm:$0xff] %v6144_v27  ;;  %v6161_v20 = vpop.f32.mrf.mxu1  ;;  %v74_v27 = vld [vmem:[%s8401_s3 + $0xf0] sm:$0xff] }
 0x113   :  { %5211 = vmatmul.msk.f32.gmra.mxu0 %vm222_vm0, %v74_v27  ;;  %5299 = vmatmul.msk.f32.gmra.mxu1 %vm222_vm0, %v74_v27  ;;  %8453 = vst [vmem:[#allocation48_spill] sm:$0xff] %v6171_v55 }
 0x118   :  { %v6155_v40 = vpop.f32.mrf.mxu2 }
 0x119   :  { %8450 = vst [vmem:[#allocation45_spill] sm:$0xff] %v6155_v40  ;;  %v6157_v28 = vpop.f32.mrf.mxu3 }
 0x11a   :  { %8451 = vst [vmem:[#allocation46_spill] sm:$0xff] %v6157_v28  ;;  %v6173_v52 = vpop.f32.mrf.mxu1 }
 0x11b   :  { %8454 = vst [vmem:[#allocation49_spill] sm:$0xff] %v6173_v52  ;;  %5212 = vmatmul.msk.f32.gmra.mxu0 %vm222_vm0, %v75_v41  ;;  %5300 = vmatmul.msk.f32.gmra.mxu1 %vm222_vm0, %v75_v41 }
 0x120   :  { %v1094_v12 = vpop.f32.mrf.mxu2 }
 0x121   :  { %v1123_v40 = vpop.f32.mrf.mxu3  ;;  %v1095_v25 = vadd.f32 %v1094_v12, %v1061_v33  ;;  %v76_v12 = vld [vmem:[%s8401_s3 + $0x100] sm:$0xff] }
 0x122   :  { %v1124_v28 = vadd.f32 %v1123_v40, %v1061_v33  ;;  %v6185_v40 = vpop.f32.mrf.mxu1 }
 0x123   :  { %1137 = vperm.xlu0 %5535, %v1095_v25   ;;  %8456 = vst [vmem:[#allocation51_spill] sm:$0xff] %v6185_v40  ;;  %5213 = vmatmul.msk.f32.gmra.mxu0 %vm222_vm0, %v76_v12 }
 0x124   :  { %1157 = vperm.xlu1 %5536, %v1124_v28   ;;  %v6183_v28 = vpop.f32.mrf.mxu0  ;;  %5301 = vmatmul.msk.f32.gmra.mxu1 %vm222_vm0, %v76_v12 }
 0x125   :  { %8455 = vst [vmem:[#allocation50_spill] sm:$0xff] %v6183_v28 }
 0x128   :  { %v1097_v27 = vpop.f32.mrf.mxu2 }
 0x129   :  { %v1126_v33 = vpop.f32.mrf.mxu3  ;;  %v1098_v25 = vadd.f32 %v1097_v27, %v1062_v26 }
 0x12a   :  { %v1127_v41 = vadd.f32 %v1126_v33, %v1062_v26  ;;  %v6197_v3 = vpop.f32.mrf.mxu1 }
 0x12b   :  { %1142 = vperm.xlu2 %5537, %v1098_v25   ;;  %8458 = vst [vmem:[#allocation53_spill] sm:$0xff] %v6197_v3  ;;  %5214 = vmatmul.msk.f32.gmra.mxu0 %vm222_vm0, %v77_v19 }
 0x12c   :  { %v6195_v9 = vpop.f32.mrf.mxu0  ;;  %5302 = vmatmul.msk.f32.gmra.mxu1 %vm222_vm0, %v77_v19 }
 0x12d   :  { %8457 = vst [vmem:[#allocation52_spill] sm:$0xff] %v6195_v9 }
 0x130   :  { %v1100_v32 = vpop.f32.mrf.mxu2 }
 0x131   :  { %v1101_v27 = vadd.f32 %v1100_v32, %v1063_v44  ;;  %v1129_v25 = vpop.f32.mrf.mxu3 }
 0x132   :  { %v1130_v26 = vadd.f32 %v1129_v25, %v1063_v44  ;;  %v79_v25 = vld [vmem:[%s8401_s3 + $0x118] sm:$0xff] }
 0x133   :  { %1147 = vperm.xlu1 %5536, %v1101_v27   ;;  %1162 = vperm.xlu2 %5537, %v1127_v41   ;;  %v6209_v41 = vpop.f32.mrf.mxu1  ;;  %v78_v27 = vld [vmem:[%s8401_s3 + $0x110] sm:$0xff] }
 0x134   :  { %v6207_v12 = vpop.f32.mrf.mxu0  ;;  %8460 = vst [vmem:[#allocation55_spill] sm:$0xff] %v6209_v41  ;;  %5215 = vmatmul.msk.f32.gmra.mxu0 %vm222_vm0, %v78_v27  ;;  %5303 = vmatmul.msk.f32.gmra.mxu1 %vm222_vm0, %v78_v27 }
 0x135   :  { %8459 = vst [vmem:[#allocation54_spill] sm:$0xff] %v6207_v12 }
 0x138   :  { %v1103_v32 = vpop.f32.mrf.mxu2 }
 0x139   :  { %v1104_v33 = vadd.f32 %v1103_v32, %v1064_v18  ;;  %v1132_v4 = vpop.f32.mrf.mxu3 }
 0x13a   :  { %v1133_v13 = vadd.f32 %v1132_v4, %v1064_v18  ;;  %v80_v4 = vld [vmem:[%s8401_s3 + $0x120] sm:$0xff] }
 0x13b   :  { %1167 = vperm.xlu1 %5536, %v1130_v26   ;;  %1152 = vperm.xlu0 %5535, %v1104_v33   ;;  %v6218_v44 = vpop.f32.mrf.mxu1  ;;  %v81_v33 = vld [vmem:[%s8401_s3 + $0x128] sm:$0xff] }
 0x13c   :  { %v6216_v19 = vpop.f32.mrf.mxu0  ;;  %8462 = vst [vmem:[#allocation57_spill] sm:$0xff] %v6218_v44  ;;  %5216 = vmatmul.msk.f32.gmra.mxu0 %vm222_vm0, %v79_v25  ;;  %5304 = vmatmul.msk.f32.gmra.mxu1 %vm222_vm0, %v79_v25 }
 0x13d   :  { %8461 = vst [vmem:[#allocation56_spill] sm:$0xff] %v6216_v19 }
 0x140   :  { %v1209_v56 = vpop.f32.mrf.mxu2 }
 0x141   :  { %v6288_v50 = vpop.f32.mrf.mxu3 }
 0x143   :  { %1172 = vperm.xlu0 %5535, %v1133_v13   ;;  %v6227_v32 = vpop.f32.mrf.mxu1 }
 0x144   :  { %v6225_v26 = vpop.f32.mrf.mxu0  ;;  %8464 = vst [vmem:[#allocation59_spill] sm:$0xff] %v6227_v32  ;;  %5217 = vmatmul.msk.f32.gmra.mxu0 %vm222_vm0, %v80_v4  ;;  %5305 = vmatmul.msk.f32.gmra.mxu1 %vm222_vm0, %v80_v4  ;;  %v82_v4 = vld [vmem:[%s8401_s3 + $0x130] sm:$0xff] }
 0x145   :  { %8463 = vst [vmem:[#allocation58_spill] sm:$0xff] %v6225_v26 }
 0x148   :  { %v1212_v35 = vpop.f32.mrf.mxu2 }
 0x14b   :  { %v6236_v18 = vpop.f32.mrf.mxu1 }
 0x14c   :  { %v6234_v13 = vpop.f32.mrf.mxu0  ;;  %8466 = vst [vmem:[#allocation61_spill] sm:$0xff] %v6236_v18  ;;  %5218 = vmatmul.msk.f32.gmra.mxu0 %vm222_vm0, %v81_v33  ;;  %5306 = vmatmul.msk.f32.gmra.mxu1 %vm222_vm0, %v81_v33  ;;  %v83_v33 = vld [vmem:[%s8401_s3 + $0x138] sm:$0xff] }
 0x14d   :  { %8465 = vst [vmem:[#allocation60_spill] sm:$0xff] %v6234_v13 }
 0x153   :  { %v6245_v25 = vpop.f32.mrf.mxu1 }
 0x154   :  { %v6243_v27 = vpop.f32.mrf.mxu0  ;;  %8468 = vst [vmem:[#allocation63_spill] sm:$0xff] %v6245_v25  ;;  %5219 = vmatmul.msk.f32.gmra.mxu0 %vm222_vm0, %v82_v4  ;;  %5307 = vmatmul.msk.f32.gmra.mxu1 %vm222_vm0, %v82_v4  ;;  %v84_v4 = vld [vmem:[%s8401_s3 + $0x140] sm:$0xff] }
 0x155   :  { %8467 = vst [vmem:[#allocation62_spill] sm:$0xff] %v6243_v27 }
 0x15b   :  { %v6254_v8 = vpop.f32.mrf.mxu1 }
 0x15c   :  { %v6252_v14 = vpop.f32.mrf.mxu0  ;;  %8470 = vst [vmem:[#allocation65_spill] sm:$0xff] %v6254_v8  ;;  %5220 = vmatmul.msk.f32.gmra.mxu0 %vm222_vm0, %v83_v33  ;;  %5308 = vmatmul.msk.f32.gmra.mxu1 %vm222_vm0, %v83_v33  ;;  %v85_v33 = vld [vmem:[%s8401_s3 + $0x148] sm:$0xff] }
 0x15d   :  { %8469 = vst [vmem:[#allocation64_spill] sm:$0xff] %v6252_v14 }
 0x163   :  { %v6263_v62 = vpop.f32.mrf.mxu1 }
 0x164   :  { %v6261_v51 = vpop.f32.mrf.mxu0  ;;  %8472 = vst [vmem:[#allocation67_spill] sm:$0xff] %v6263_v62  ;;  %5221 = vmatmul.msk.f32.gmra.mxu0 %vm222_vm0, %v84_v4  ;;  %5309 = vmatmul.msk.f32.gmra.mxu1 %vm222_vm0, %v84_v4  ;;  %v86_v4 = vld [vmem:[%s8401_s3 + $0x150] sm:$0xff] }
 0x165   :  { %8471 = vst [vmem:[#allocation66_spill] sm:$0xff] %v6261_v51 }
 0x16b   :  { %v6272_v63 = vpop.f32.mrf.mxu1 }
 0x16c   :  { %v6270_v46 = vpop.f32.mrf.mxu0  ;;  %8474 = vst [vmem:[#allocation69_spill] sm:$0xff] %v6272_v63  ;;  %5222 = vmatmul.msk.f32.gmra.mxu0 %vm222_vm0, %v85_v33  ;;  %5310 = vmatmul.msk.f32.gmra.mxu1 %vm222_vm0, %v85_v33 }
 0x16d   :  { %8473 = vst [vmem:[#allocation68_spill] sm:$0xff] %v6270_v46 }
 0x173   :  { %v6281_v57 = vpop.f32.mrf.mxu1 }
 0x174   :  { %v6279_v47 = vpop.f32.mrf.mxu0  ;;  %8476 = vst [vmem:[#allocation71_spill] sm:$0xff] %v6281_v57  ;;  %5223 = vmatmul.msk.f32.gmra.mxu0 %vm222_vm0, %v86_v4  ;;  %5311 = vmatmul.msk.f32.gmra.mxu1 %vm222_vm0, %v86_v4 }
 0x175   :  { %8475 = vst [vmem:[#allocation70_spill] sm:$0xff] %v6279_v47  ;;  %v87_v47 = vld [vmem:[%s8401_s3 + $0x158] sm:$0xff] }
 0x17b   :  { %v6292_v42 = vpop.f32.mrf.mxu1 }
 0x17c   :  { %v6290_v43 = vpop.f32.mrf.mxu0  ;;  %8478 = vst [vmem:[#allocation73_spill] sm:$0xff] %v6292_v42  ;;  %5224 = vmatmul.msk.f32.gmra.mxu0 %vm222_vm0, %v87_v47  ;;  %5312 = vmatmul.msk.f32.gmra.mxu1 %vm222_vm0, %v87_v47  ;;  %v1244_v42 = vpop.f32.mrf.mxu3  ;;  %v88_v47 = vld [vmem:[%s8401_s3 + $0x160] sm:$0xff] }
 0x17d   :  { %8477 = vst [vmem:[#allocation72_spill] sm:$0xff] %v6290_v43 }
 0x184   :  { %5225 = vmatmul.msk.f32.gmra.mxu0 %vm222_vm0, %v88_v47  ;;  %5313 = vmatmul.msk.f32.gmra.mxu1 %vm222_vm0, %v88_v47 }
 0x185   :  { %v1143_v33 = vpop.permute.xlu2 %1142 }
 0x186   :  { %v6294_v38 = vadd.f32 %v1212_v35, %v1143_v33  ;;  %v6306_v35 = vpop.f32.mrf.mxu0  ;;  %v6308_v33 = vpop.f32.mrf.mxu1 }
 0x187   :  { %8479 = vst [vmem:[#allocation74_spill] sm:$0xff] %v6306_v35  ;;  %v89_v35 = vld [vmem:[%s8401_s3 + $0x168] sm:$0xff] }
 0x188   :  { %v1289_v4 = vsel %vm1261_vm3, %v6294_v38, 0.0  ;;  %v1254_v43 = vmul.f32 %v6294_v38, %v6294_v38  ;;  %8480 = vst [vmem:[#allocation75_spill] sm:$0xff] %v6308_v33 }
 0x189   :  { %1290 = vadd.xlane.f32.xlu0 %v1289_v4 }
 0x18a   :  { %v1265_v63 = vsel %vm1261_vm3, %v1254_v43, 0.0 }
 0x18b   :  { %1266 = vadd.xlane.f32.xlu2 %v1265_v63 }
 0x18c   :  { %5226 = vmatmul.msk.f32.gmra.mxu0 %vm222_vm0, %v89_v35  ;;  %5314 = vmatmul.msk.f32.gmra.mxu1 %vm222_vm0, %v89_v35  ;;  %v90_v35 = vld [vmem:[%s8401_s3 + $0x170] sm:$0xff] }
 0x18d   :  { %v1163_v62 = vpop.permute.xlu2 %1162 }
 0x18e   :  { %v6310_v51 = vadd.f32 %v1244_v42, %v1163_v62  ;;  %v6320_v4 = vpop.f32.mrf.mxu1  ;;  %v6322_v33 = vpop.f32.mrf.mxu0 }
 0x18f   :  { %8481 = vst [vmem:[#allocation76_spill] sm:$0xff] %v6320_v4 }
 0x190   :  { %v1258_v43 = vmul.f32 %v6310_v51, %v6310_v51  ;;  %8482 = vst [vmem:[#allocation77_spill] sm:$0xff] %v6322_v33 }
 0x192   :  { %v1277_v63 = vsel %vm1261_vm3, %v1258_v43, 0.0 }
 0x193   :  { %1278 = vadd.xlane.f32.xlu0 %v1277_v63 }
 0x194   :  { %5227 = vmatmul.msk.f32.gmra.mxu0 %vm222_vm0, %v90_v35  ;;  %5315 = vmatmul.msk.f32.gmra.mxu1 %vm222_vm0, %v90_v35  ;;  %v91_v35 = vld [vmem:[%s8401_s3 + $0x178] sm:$0xff] }
 0x195   :  { %v1138_v42 = vpop.permute.xlu0 %1137 }
 0x196   :  { %v6324_v62 = vadd.f32 %v1209_v56, %v1138_v42  ;;  %v1158_v43 = vpop.permute.xlu1 %1157  ;;  %v6333_v63 = vpop.f32.mrf.mxu1  ;;  %v1301_v56 = vsel %vm1261_vm3, %v6310_v51, 0.0 }
 0x197   :  { %8483 = vst [vmem:[#allocation78_spill] sm:$0xff] %v6333_v63  ;;  %v6335_v4 = vpop.f32.mrf.mxu0  ;;  %v1215_v42 = vpop.f32.mrf.mxu2 }
 0x198   :  { %v1286_v47 = vsel %vm1261_vm3, %v6324_v62, 0.0  ;;  %8484 = vst [vmem:[#allocation79_spill] sm:$0xff] %v6335_v4 }
 0x199   :  { %1287 = vadd.xlane.f32.xlu1 %v1286_v47 }
 0x19c   :  { %5228 = vmatmul.msk.f32.gmra.mxu0 %vm222_vm0, %v91_v35  ;;  %5316 = vmatmul.msk.f32.gmra.mxu1 %vm222_vm0, %v91_v35 }
 0x19e   :  { %v6339_v33 = vpop.f32.mrf.mxu1 }
 0x19f   :  { %8485 = vst [vmem:[#allocation80_spill] sm:$0xff] %v6339_v33  ;;  %v6352_v4 = vpop.f32.mrf.mxu0  ;;  %v1247_v33 = vpop.f32.mrf.mxu3 }
 0x1a0   :  { %8486 = vst [vmem:[#allocation81_spill] sm:$0xff] %v6352_v4  ;;  %v1218_v34 = vpop.f32.mrf.mxu2 }
 0x1a1   :  { %1302 = vadd.xlane.f32.xlu1 %v1301_v56 }
 0x1a5   :  { %v1148_v47 = vpop.permute.xlu1 %1147 }
 0x1a6   :  { %v6346_v39 = vadd.f32 %v1215_v42, %v1148_v47  ;;  %v6358_v42 = vpop.f32.mrf.mxu1 }
 0x1a7   :  { %8487 = vst [vmem:[#allocation82_spill] sm:$0xff] %v6358_v42  ;;  %v6373_v42 = vadd.f32 %v6288_v50, %v1158_v43 }
 0x1a8   :  { %v1292_v63 = vsel %vm1261_vm3, %v6346_v39, 0.0  ;;  %v1255_v56 = vmul.f32 %v6346_v39, %v6346_v39 }
 0x1a9   :  { %1293 = vadd.xlane.f32.xlu2 %v1292_v63  ;;  %v1257_v14 = vmul.f32 %v6373_v42, %v6373_v42 }
 0x1aa   :  { %v1268_v57 = vsel %vm1261_vm3, %v1255_v56, 0.0 }
 0x1ab   :  { %1269 = vadd.xlane.f32.xlu1 %v1268_v57  ;;  %v1274_v43 = vsel %vm1261_vm3, %v1257_v14, 0.0  ;;  %v1298_v14 = vsel %vm1261_vm3, %v6373_v42, 0.0 }
 0x1ad   :  { %v1168_v47 = vpop.permute.xlu1 %1167  ;;  %v1153_v46 = vpop.permute.xlu0 %1152 }
 0x1ae   :  { %v6362_v8 = vadd.f32 %v1247_v33, %v1168_v47  ;;  %v6364_v63 = vadd.f32 %v1218_v34, %v1153_v46  ;;  %v6377_v47 = vpop.f32.mrf.mxu0  ;;  %v1250_v34 = vpop.f32.mrf.mxu3 }
 0x1af   :  { %8488 = vst [vmem:[#allocation83_spill] sm:$0xff] %v6377_v47  ;;  %v6383_v27 = vpop.f32.mrf.mxu1 }
 0x1b0   :  { %v1304_v57 = vsel %vm1261_vm3, %v6362_v8, 0.0  ;;  %v1259_v56 = vmul.f32 %v6362_v8, %v6362_v8  ;;  %v1256_v4 = vmul.f32 %v6364_v63, %v6364_v63  ;;  %8489 = vst [vmem:[#allocation84_spill] sm:$0xff] %v6383_v27 }
 0x1b1   :  { %1305 = vadd.xlane.f32.xlu0 %v1304_v57  ;;  %v1253_v57 = vmul.f32 %v6324_v62, %v6324_v62 }
 0x1b2   :  { %v1280_v35 = vsel %vm1261_vm3, %v1259_v56, 0.0  ;;  %v1271_v33 = vsel %vm1261_vm3, %v1256_v4, 0.0  ;;  %v1295_v4 = vsel %vm1261_vm3, %v6364_v63, 0.0 }
 0x1b3   :  { %1281 = vadd.xlane.f32.xlu2 %v1280_v35  ;;  %1272 = vadd.xlane.f32.xlu1 %v1271_v33  ;;  %v1262_v33 = vsel %vm1261_vm3, %v1253_v57, 0.0 }
 0x1b5   :  { %v1173_v46 = vpop.permute.xlu0 %1172 }
 0x1b6   :  { %v6379_v18 = vadd.f32 %v1250_v34, %v1173_v46  ;;  %v6392_v56 = vpop.f32.mrf.mxu0 }
 0x1b7   :  { %8490 = vst [vmem:[#allocation85_spill] sm:$0xff] %v6392_v56  ;;  %v6397_v34 = vpop.f32.mrf.mxu1 }
 0x1b8   :  { %v1307_v50 = vsel %vm1261_vm3, %v6379_v18, 0.0  ;;  %v1260_v35 = vmul.f32 %v6379_v18, %v6379_v18  ;;  %8491 = vst [vmem:[#allocation86_spill] sm:$0xff] %v6397_v34 }
 0x1b9   :  { %1308 = vadd.xlane.f32.xlu0 %v1307_v50 }
 0x1ba   :  { %v1283_v46 = vsel %vm1261_vm3, %v1260_v35, 0.0 }
 0x1bb   :  { %1296 = vadd.xlane.f32.xlu2 %v1295_v4  ;;  %1275 = vadd.xlane.f32.xlu1 %v1274_v43 }
 0x1be   :  { %v6400_v50 = vpop.f32.mrf.mxu0 }
 0x1bf   :  { %8492 = vst [vmem:[#allocation87_spill] sm:$0xff] %v6400_v50  ;;  %v6404_v4 = vpop.f32.mrf.mxu1 }
 0x1c0   :  { %8493 = vst [vmem:[#allocation88_spill] sm:$0xff] %v6404_v4 }
 0x1c1   :  { %1263 = vadd.xlane.f32.xlu0 %v1262_v33 }
 0x1c3   :  { %1284 = vadd.xlane.f32.xlu2 %v1283_v46 }
 0x1c6   :  { %v6406_v43 = vpop.f32.mrf.mxu0 }
 0x1c7   :  { %8494 = vst [vmem:[#allocation89_spill] sm:$0xff] %v6406_v43  ;;  %v6408_v27 = vpop.f32.mrf.mxu1 }
 0x1c8   :  { %8495 = vst [vmem:[#allocation90_spill] sm:$0xff] %v6408_v27 }
 0x1cb   :  { %1299 = vadd.xlane.f32.xlu2 %v1298_v14 }
 0x1ce   :  { %v6410_v47 = vpop.f32.mrf.mxu0 }
 0x1cf   :  { %8496 = vst [vmem:[#allocation91_spill] sm:$0xff] %v6410_v47  ;;  %v6412_v57 = vpop.f32.mrf.mxu1 }
 0x1d0   :  { %8497 = vst [vmem:[#allocation92_spill] sm:$0xff] %v6412_v57 }
 0x1d6   :  { %v6414_v33 = vpop.f32.mrf.mxu0 }
 0x1d7   :  { %8498 = vst [vmem:[#allocation93_spill] sm:$0xff] %v6414_v33  ;;  %v6416_v35 = vpop.f32.mrf.mxu1 }
 0x1d8   :  { %8499 = vst [vmem:[#allocation94_spill] sm:$0xff] %v6416_v35 }
 0x1de   :  { %v6418_v46 = vpop.f32.mrf.mxu0 }
 0x1df   :  { %8500 = vst [vmem:[#allocation95_spill] sm:$0xff] %v6418_v46  ;;  %v6420_v50 = vpop.f32.mrf.mxu1 }
 0x1e0   :  { %8501 = vst [vmem:[#allocation96_spill] sm:$0xff] %v6420_v50 }
 0x1e6   :  { %v6422_v34 = vpop.f32.mrf.mxu0 }
 0x1e7   :  { %8502 = vst [vmem:[#allocation97_spill] sm:$0xff] %v6422_v34  ;;  %v6424_v14 = vpop.f32.mrf.mxu1 }
 0x1e8   :  { %8503 = vst [vmem:[#allocation98_spill] sm:$0xff] %v6424_v14 }
 0x1ee   :  { %v6426_v4 = vpop.f32.mrf.mxu0 }
 0x1ef   :  { %8504 = vst [vmem:[#allocation99_spill] sm:$0xff] %v6426_v4  ;;  %v6428_v43 = vpop.f32.mrf.mxu1 }
 0x1f0   :  { %8505 = vst [vmem:[#allocation100_spill] sm:$0xff] %v6428_v43 }
 0x1f6   :  { %v6432_v57 = vpop.f32.mrf.mxu0 }
 0x1f7   :  { %8506 = vst [vmem:[#allocation101_spill] sm:$0xff] %v6432_v57  ;;  %v6434_v33 = vpop.f32.mrf.mxu1 }
 0x1f8   :  { %8507 = vst [vmem:[#allocation102_spill] sm:$0xff] %v6434_v33 }
 0x1fc   :  { %v1291_v27 = vpop.xlane.xlu0 %1290 }
 0x1fe   :  { %v1267_v56 = vpop.xlane.xlu2 %1266  ;;  %v6436_v26 = vpop.f32.mrf.mxu0 }
 0x1ff   :  { %8508 = vst [vmem:[#allocation103_spill] sm:$0xff] %v6436_v26  ;;  %v6438_v13 = vpop.f32.mrf.mxu1 }
 0x200   :  { %8509 = vst [vmem:[#allocation104_spill] sm:$0xff] %v6438_v13 }
 0x206   :  { %v1279_v35 = vpop.xlane.xlu0 %1278  ;;  %v6440_v3 = vpop.f32.mrf.mxu0 }
 0x207   :  { %v1319_v32 = vadd.f32 %v1279_v35, %v1267_v56  ;;  %8510 = vst [vmem:[#allocation105_spill] sm:$0xff] %v6440_v3  ;;  %v6442_v40 = vpop.f32.mrf.mxu1 }
 0x209   :  { %v1323_v14 = vmul.f32 0.0078125, %v1319_v32 }
 0x20c   :  { %v6430_v47 = vpop.xlane.xlu1 %1287 }
 0x20f   :  { %v920_v41 = vpop.f32.mrf.mxu1 }
 0x214   :  { %v1303_v46 = vpop.xlane.xlu1 %1302 }
 0x215   :  { %v1311_v50 = vadd.f32 %v1303_v46, %v1291_v27 }
 0x217   :  { %v1315_v34 = vmul.f32 0.0078125, %v1311_v50 }
 0x219   :  { %v1327_v25 = vmul.f32 %v1315_v34, %v1315_v34 }
 0x21b   :  { %v1331_v4 = vsub.f32 %v1323_v14, %v1327_v25  ;;  %v6448_v14 = vpop.f32.mrf.mxu0 }
 0x21c   :  { %v1294_v44 = vpop.xlane.xlu2 %1293 }
 0x21d   :  { %v1335_v43 = vmax.f32 %v1331_v4, 0.0 }
 0x21e   :  { %v1270_v56 = vpop.xlane.xlu1 %1269 }
 0x21f   :  { %v1339_v19 = vadd.f32 1e-05, %v1335_v43 }
 0x221   :  { %5538 = vrsqrt.f32 %v1339_v19  ;;  %vm1358_vm5 = vweird.f32 %v1339_v19 }
 0x223   :  { %v639_v9 = vpop.f32.mrf.mxu0 }
 0x224   :  { %v1306_v33 = vpop.xlane.xlu0 %1305 }
 0x225   :  { %v1312_v57 = vadd.f32 %v1306_v33, %v1294_v44  ;;  %v135_v44 = vld [vmem:[%s8402_s4 + $0x8] sm:$0xff] }
 0x226   :  { %v1282_v27 = vpop.xlane.xlu2 %1281  ;;  %v1273_v12 = vpop.xlane.xlu1 %1272 }
 0x227   :  { %v5539_v35 = vpop.eup %5538  ;;  %v6444_v46 = vmul.f32 0.0078125, %v1312_v57  ;;  %v1320_v32 = vadd.f32 %v1282_v27, %v1270_v56  ;;  %v179_v27 = vld [vmem:[%s8402_s4 + $0x168] sm:$0xff] }
 0x228   :  { %v1353_v50 = vmul.f32 %v5539_v35, %v1339_v19  ;;  %vm1359_vm4 = vweird.f32 %v5539_v35 }
 0x229   :  { %v1324_v25 = vmul.f32 0.0078125, %v1320_v32  ;;  %v1328_v4 = vmul.f32 %v6444_v46, %v6444_v46  ;;  %vm1360_vm6 = vmor %vm1358_vm5, %vm1359_vm4 }
 0x22a   :  { %v1354_v43 = vmul.f32 %v5539_v35, %v1353_v50  ;;  %v508_v50 = vadd.f32 %v5962_v59, %v135_v44 }
 0x22b   :  { %v1332_v13 = vsub.f32 %v1324_v25, %v1328_v4 }
 0x22c   :  { %v1355_v3 = vmul.f32 0.5, %v1354_v43  ;;  %v1309_v56 = vpop.xlane.xlu0 %1308 }
 0x22d   :  { %v1336_v26 = vmax.f32 %v1332_v13, 0.0  ;;  %v789_v13 = vadd.f32 %v5964_v60, %v135_v44  ;;  %v640_v60 = vadd.f32 %v639_v9, %v179_v27 }
 0x22e   :  { %v1297_v33 = vpop.xlane.xlu2 %1296  ;;  %v1356_v28 = vsub.f32 1.5, %v1355_v3  ;;  %v6458_v3 = vadd.f32 %v920_v41, %v179_v27  ;;  %v1276_v2 = vpop.xlane.xlu1 %1275 }
 0x22f   :  { %v1340_v57 = vadd.f32 1e-05, %v1336_v26  ;;  %v1313_v25 = vadd.f32 %v1309_v56, %v1297_v33 }
 0x230   :  { %v1357_v32 = vmul.f32 %v5539_v35, %v1356_v28 }
 0x231   :  { %5540 = vrsqrt.f32 %v1340_v57  ;;  %v6462_v55 = vmul.f32 0.0078125, %v1313_v25  ;;  %vm1368_vm8 = vweird.f32 %v1340_v57 }
 0x232   :  { %v1361_v4 = vsel %vm1360_vm6, %v5539_v35, %v1357_v32 }
 0x233   :  { %v1383_v43 = vmul.f32 %v1361_v4, %v508_v50  ;;  %v6460_v26 = vmul.f32 %v1361_v4, %v789_v13  ;;  %v1329_v32 = vmul.f32 %v6462_v55, %v6462_v55 }
 0x234   :  { %v1264_v17 = vpop.xlane.xlu0 %1263 }
 0x235   :  { %v6465_v28 = vmul.f32 %v6460_v26, %v1315_v34  ;;  %1413 = vperm.xlu0 %5535, %v1383_v43   ;;  %v1391_v44 = vmul.f32 %v1383_v43, %v1315_v34  ;;  %v1318_v34 = vadd.f32 %v1276_v2, %v1264_v17  ;;  %v136_v43 = vld [vmem:[%s8402_s4 + $0x10] sm:$0xff] }
 0x236   :  { %v1285_v59 = vpop.xlane.xlu2 %1284  ;;  %v180_v17 = vld [vmem:[%s8402_s4 + $0x170] sm:$0xff] }
 0x237   :  { %v5541_v19 = vpop.eup %5540  ;;  %v1403_v35 = vsub.f32 %v6458_v3, %v6465_v28  ;;  %v1321_v33 = vadd.f32 %v1285_v59, %v1273_v12  ;;  %v1399_v13 = vsub.f32 %v640_v60, %v1391_v44  ;;  %v792_v60 = vadd.f32 %v5979_v1, %v136_v43 }
 0x238   :  { %v1363_v41 = vmul.f32 %v5541_v19, %v1340_v57  ;;  %vm1369_vm7 = vweird.f32 %v5541_v19 }
 0x239   :  { %v1325_v56 = vmul.f32 0.0078125, %v1321_v33  ;;  %vm1370_vm9 = vmor %vm1368_vm8, %vm1369_vm7 }
 0x23a   :  { %v1364_v50 = vmul.f32 %v5541_v19, %v1363_v41  ;;  %v1322_v41 = vmul.f32 0.0078125, %v1318_v34  ;;  %v137_v34 = vld [vmem:[%s8402_s4 + $0x18] sm:$0xff] }
 0x23b   :  { %v1333_v25 = vsub.f32 %v1325_v56, %v1329_v32 }
 0x23c   :  { %v1365_v4 = vmul.f32 0.5, %v1364_v50 }
 0x23d   :  { %v1337_v31 = vmax.f32 %v1333_v25, 0.0  ;;  %1461 = vperm.xlu0 %5535, %v1399_v13  }
 0x23e   :  { %v1366_v52 = vsub.f32 1.5, %v1365_v4  ;;  %v1300_v9 = vpop.xlane.xlu2 %1299 }
 0x23f   :  { %v1341_v27 = vadd.f32 1e-05, %v1337_v31  ;;  %v1310_v12 = vadd.f32 %v1300_v9, %v6430_v47  ;;  %v923_v47 = vpop.f32.mrf.mxu1 }
 0x240   :  { %v1367_v59 = vmul.f32 %v5541_v19, %v1366_v52  ;;  %v924_v1 = vadd.f32 %v923_v47, %v180_v17 }
 0x241   :  { %5542 = vrsqrt.f32 %v1341_v27  ;;  %v6476_v44 = vmul.f32 0.0078125, %v1310_v12  ;;  %vm1378_vm11 = vweird.f32 %v1341_v27 }
 0x242   :  { %v1371_v33 = vsel %vm1370_vm9, %v5541_v19, %v1367_v59 }
 0x243   :  { %v1326_v2 = vmul.f32 %v6476_v44, %v6476_v44  ;;  %v1388_v31 = vmul.f32 %v1371_v33, %v792_v60  ;;  %v795_v60 = vadd.f32 %v5992_v6, %v137_v34 }
 0x245   :  { %v1330_v56 = vsub.f32 %v1322_v41, %v1326_v2  ;;  %1438 = vperm.xlu0 %5535, %v1388_v31   ;;  %v1396_v32 = vmul.f32 %v1388_v31, %v6444_v46 }
 0x247   :  { %v5543_v52 = vpop.eup %5542  ;;  %v1334_v57 = vmax.f32 %v1330_v56, 0.0  ;;  %v1404_v25 = vsub.f32 %v924_v1, %v1396_v32 }
 0x248   :  { %v1373_v50 = vmul.f32 %v5543_v52, %v1341_v27  ;;  %vm1379_vm10 = vweird.f32 %v5543_v52 }
 0x249   :  { %v1338_v13 = vadd.f32 1e-05, %v1334_v57  ;;  %vm1380_vm12 = vmor %vm1378_vm11, %vm1379_vm10  ;;  %v134_v57 = vld [vmem:[%s8402_s4] sm:$0xff] }
 0x24a   :  { %v1374_v19 = vmul.f32 %v5543_v52, %v1373_v50  ;;  %v505_v27 = vadd.f32 %v5944_v53, %v134_v57  ;;  %v786_v50 = vadd.f32 %v5946_v54, %v134_v57  ;;  %v642_v54 = vpop.f32.mrf.mxu0 }
 0x24b   :  { %5544 = vrsqrt.f32 %v1338_v13  ;;  %vm1348_vm14 = vweird.f32 %v1338_v13 }
 0x24c   :  { %v1375_v4 = vmul.f32 0.5, %v1374_v19 }
 0x24d   :  { %1486 = vperm.xlu0 %5535, %v1404_v25   ;;  %v178_v25 = vld [vmem:[%s8402_s4 + $0x160] sm:$0xff] }
 0x24e   :  { %v1376_v9 = vsub.f32 1.5, %v1375_v4  ;;  %v918_v4 = vadd.f32 %v6442_v40, %v178_v25 }
 0x250   :  { %v1377_v12 = vmul.f32 %v5543_v52, %v1376_v9 }
 0x251   :  { %v5545_v59 = vpop.eup %5544 }
 0x252   :  { %v1343_v41 = vmul.f32 %v5545_v59, %v1338_v13  ;;  %v1381_v2 = vsel %vm1380_vm12, %v5543_v52, %v1377_v12  ;;  %vm1349_vm13 = vweird.f32 %v5545_v59  ;;  %v511_v13 = vadd.f32 %v5977_v0, %v136_v43  ;;  %v181_v0 = vld [vmem:[%s8402_s4 + $0x178] sm:$0xff]  ;;  %v645_v43 = vpop.f32.mrf.mxu0 }
 0x253   :  { %v1389_v31 = vmul.f32 %v1381_v2, %v795_v60  ;;  %vm1350_vm15 = vmor %vm1348_vm14, %vm1349_vm13  ;;  %v643_v60 = vadd.f32 %v642_v54, %v180_v17 }
 0x254   :  { %v1344_v47 = vmul.f32 %v5545_v59, %v1343_v41  ;;  %v1384_v53 = vmul.f32 %v1371_v33, %v511_v13  ;;  %v514_v41 = vadd.f32 %v5990_v5, %v137_v34  ;;  %v926_v33 = vpop.f32.mrf.mxu1  ;;  %v637_v34 = vadd.f32 %v6448_v14, %v178_v25  ;;  %v1514_v14 = vld [vmem:[%s8407_s9] sm:$0xff] }
 0x255   :  { %1443 = vperm.xlu0 %5535, %v1389_v31   ;;  %v1397_v17 = vmul.f32 %v1389_v31, %v6462_v55 }
 0x256   :  { %v1345_v56 = vmul.f32 0.5, %v1344_v47  ;;  %v1392_v40 = vmul.f32 %v1384_v53, %v6444_v46 }
 0x258   :  { %v1346_v1 = vsub.f32 1.5, %v1345_v56  ;;  %v1400_v47 = vsub.f32 %v643_v60, %v1392_v40  ;;  %v1385_v56 = vmul.f32 %v1381_v2, %v514_v41 }
 0x25a   :  { %v1347_v32 = vmul.f32 %v5545_v59, %v1346_v1  ;;  %v1393_v57 = vmul.f32 %v1385_v56, %v6462_v55  ;;  %v927_v1 = vadd.f32 %v926_v33, %v181_v0  ;;  %v1516_v55 = vld [vmem:[%s8407_s9 + $0x10] sm:$0xff] }
 0x25c   :  { %v1351_v6 = vsel %vm1350_vm15, %v5545_v59, %v1347_v32  ;;  %v1515_v59 = vld [vmem:[%s8407_s9 + $0x8] sm:$0xff]  ;;  %v1405_v32 = vsub.f32 %v927_v1, %v1397_v17 }
 0x25d   :  { %v1386_v19 = vmul.f32 %v1351_v6, %v786_v50  ;;  %v1382_v52 = vmul.f32 %v1351_v6, %v505_v27  ;;  %v1517_v27 = vld [vmem:[%s8407_s9 + $0x18] sm:$0xff] }
 0x25f   :  { %1428 = vperm.xlu1 %5536, %v1386_v19   ;;  %1408 = vperm.xlu2 %5537, %v1382_v52   ;;  %v1394_v9 = vmul.f32 %v1386_v19, %v6476_v44  ;;  %v1390_v5 = vmul.f32 %v1382_v52, %v6476_v44 }
 0x261   :  { %v1402_v12 = vsub.f32 %v918_v4, %v1394_v9  ;;  %v1398_v2 = vsub.f32 %v637_v34, %v1390_v5 }
 0x263   :  { %1476 = vperm.xlu0 %5535, %v1402_v12  }
 0x267   :  { %1418 = vperm.xlu1 %5536, %v1384_v53   ;;  %1433 = vperm.xlu2 %5537, %v6460_v26   ;;  %v646_v26 = vadd.f32 %v645_v43, %v181_v0 }
 0x269   :  { %v1401_v46 = vsub.f32 %v646_v26, %v1393_v57 }
 0x26b   :  { %1525 = vperm.xlu0 %5535, %v1515_v59  }
 0x26f   :  { %1466 = vperm.xlu1 %5536, %v1400_v47   ;;  %1423 = vperm.xlu2 %5537, %v1385_v56  }
 0x277   :  { %1491 = vperm.xlu1 %5536, %v1405_v32   ;;  %1471 = vperm.xlu2 %5537, %v1401_v46  }
 0x27f   :  { %1481 = vperm.xlu2 %5537, %v1403_v35   ;;  %1456 = vperm.xlu1 %5536, %v1398_v2  }
 0x287   :  { %1535 = vperm.xlu2 %5537, %v1517_v27   ;;  %1530 = vperm.xlu1 %5536, %v1516_v55  }
 0x28f   :  { %1520 = vperm.xlu2 %5537, %v1514_v14  }
 0x2a7   :  { %v1414_v31 = vpop.permute.xlu0 %1413 }
 0x2a8   :  { %v1447_v13 = vmul.f32 %v1414_v31, %v6294_v38 }
 0x2af   :  { %v1462_v28 = vpop.permute.xlu0 %1461 }
 0x2b0   :  { %v1495_v59 = vadd.f32 %v1462_v28, %v1447_v13 }
 0x2b2   :  { %v1503_v47 = vmax.f32 %v1495_v59, 0.0 }
 0x2b7   :  { %v1439_v50 = vpop.permute.xlu0 %1438 }
 0x2b8   :  { %v1452_v56 = vmul.f32 %v1439_v50, %v6362_v8  ;;  %v1512_v50 = vld [vmem:[%s8406_s8 + $0x10] sm:$0xff] }
 0x2b9   :  { %v1409_v44 = vpop.permute.xlu2 %1408 }
 0x2ba   :  { %v1446_v27 = vmul.f32 %v1409_v44, %v6324_v62  ;;  %v1511_v44 = vld [vmem:[%s8406_s8 + $0x8] sm:$0xff] }
 0x2bf   :  { %v1487_v9 = vpop.permute.xlu0 %1486 }
 0x2c0   :  { %v1500_v26 = vadd.f32 %v1487_v9, %v1452_v56 }
 0x2c1   :  { %v1434_v3 = vpop.permute.xlu2 %1433 }
 0x2c2   :  { %v1451_v57 = vmul.f32 %v1434_v3, %v6310_v51  ;;  %v1508_v34 = vmax.f32 %v1500_v26, 0.0  ;;  %v1510_v3 = vld [vmem:[%s8406_s8] sm:$0xff] }
 0x2c7   :  { %v1444_v40 = vpop.permute.xlu0 %1443 }
 0x2c8   :  { %v1453_v0 = vmul.f32 %v1444_v40, %v6379_v18  ;;  %v93_v40 = vld [vmem:[%s8401_s3 + $0x188] sm:$0xff] }
 0x2c9   :  { %v1424_v35 = vpop.permute.xlu2 %1423 }
 0x2ca   :  { %v1449_v6 = vmul.f32 %v1424_v35, %v6364_v63 }
 0x2d1   :  { %v1429_v19 = vpop.permute.xlu1 %1428  ;;  %v1472_v52 = vpop.permute.xlu2 %1471 }
 0x2d2   :  { %v1497_v25 = vadd.f32 %v1472_v52, %v1449_v6  ;;  %v1450_v46 = vmul.f32 %v1429_v19, %v6373_v42  ;;  %v1513_v6 = vld [vmem:[%s8406_s8 + $0x18] sm:$0xff] }
 0x2d4   :  { %v1505_v4 = vmax.f32 %v1497_v25, 0.0 }
 0x2d5   :  { %v1477_v17 = vpop.permute.xlu0 %1476 }
 0x2d6   :  { %1563 = vmatpush.msrb.mxu2 %v1505_v4  ;;  %v1498_v2 = vadd.f32 %v1477_v17, %v1450_v46  ;;  %v92_v4 = vld [vmem:[%s8401_s3 + $0x180] sm:$0xff] }
 0x2d7   :  { %5229 = vmatmul.msk.f32.gmra.mxu0 %vm222_vm0, %v92_v4  ;;  %5317 = vmatmul.msk.f32.gmra.mxu1 %vm222_vm0, %v92_v4 }
 0x2d8   :  { %v1506_v31 = vmax.f32 %v1498_v2, 0.0 }
 0x2d9   :  { %v1419_v12 = vpop.permute.xlu1 %1418  ;;  %v1482_v43 = vpop.permute.xlu2 %1481 }
 0x2da   :  { %v1448_v53 = vmul.f32 %v1419_v12, %v6346_v39  ;;  %v1499_v32 = vadd.f32 %v1482_v43, %v1451_v57  ;;  %v94_v57 = vld [vmem:[%s8401_s3 + $0x190] sm:$0xff] }
 0x2dc   :  { %v1507_v55 = vmax.f32 %v1499_v32, 0.0 }
 0x2dd   :  { %v1526_v59 = vpop.permute.xlu0 %1525 }
 0x2df   :  { %5230 = vmatmul.msk.f32.gmra.mxu0 %vm222_vm0, %v93_v40  ;;  %5318 = vmatmul.msk.f32.gmra.mxu1 %vm222_vm0, %v93_v40 }
 0x2e1   :  { %v1467_v54 = vpop.permute.xlu1 %1466  ;;  %v1536_v19 = vpop.permute.xlu2 %1535 }
 0x2e2   :  { %v1496_v60 = vadd.f32 %v1467_v54, %v1448_v53 }
 0x2e4   :  { %v1504_v41 = vmax.f32 %v1496_v60, 0.0 }
 0x2e6   :  { %1564 = vmatpush.msrb.mxu2 %v1504_v41 }
 0x2e7   :  { %5231 = vmatmul.msk.f32.gmra.mxu0 %vm222_vm0, %v94_v57  ;;  %5319 = vmatmul.msk.f32.gmra.mxu1 %vm222_vm0, %v94_v57 }
 0x2e8   :  { %1565 = vmatpush.msrb.mxu2 %v1503_v47 }
 0x2e9   :  { %v1492_v33 = vpop.permute.xlu1 %1491  ;;  %v1521_v52 = vpop.permute.xlu2 %1520 }
 0x2ea   :  { %v1501_v1 = vadd.f32 %v1492_v33, %v1453_v0 }
 0x2ec   :  { %v1509_v5 = vmax.f32 %v1501_v1, 0.0 }
 0x2ee   :  { %1592 = vmatpush.msrb.mxu3 %v1509_v5 }
 0x2f0   :  { %1593 = vmatpush.msrb.mxu3 %v1508_v34 }
 0x2f1   :  { %v1457_v14 = vpop.permute.xlu1 %1456 }
 0x2f2   :  { %v1494_v28 = vadd.f32 %v1457_v14, %v1446_v27  ;;  %1594 = vmatpush.msrb.mxu3 %v1507_v55  ;;  %v95_v27 = vld [vmem:[%s8401_s3 + $0x198] sm:$0xff] }
 0x2f3   :  { %5232 = vmatmul.msk.f32.gmra.mxu0 %vm222_vm0, %v95_v27  ;;  %5320 = vmatmul.msk.f32.gmra.mxu1 %vm222_vm0, %v95_v27 }
 0x2f4   :  { %v1502_v35 = vmax.f32 %v1494_v28, 0.0  ;;  %1595 = vmatpush.msrb.mxu3 %v1506_v31 }
 0x2f5   :  { %5379 = vmatmul.msk.f32.vlgmr.msrb.gmra.mxu3 %vm1538_vm1, %v1510_v3 }
 0x2f6   :  { %1566 = vmatpush.msrb.mxu2 %v1502_v35 }
 0x2f7   :  { %5375 = vmatmul.msk.f32.vlgmr.msrb.gmra.mxu2 %vm1538_vm1, %v1510_v3 }
 0x2f9   :  { %v1531_v1 = vpop.permute.xlu1 %1530 }
 0x2fd   :  { %5380 = vmatmul.msk.f32.gmra.mxu3 %vm1538_vm1, %v1511_v44 }
 0x2ff   :  { %5376 = vmatmul.msk.f32.gmra.mxu2 %vm1538_vm1, %v1511_v44 }
 0x305   :  { %5381 = vmatmul.msk.f32.gmra.mxu3 %vm1538_vm1, %v1512_v50 }
 0x307   :  { %5377 = vmatmul.msk.f32.gmra.mxu2 %vm1538_vm1, %v1512_v50 }
 0x30d   :  { %5382 = vmatmul.msk.f32.gmra.mxu3 %vm1538_vm1, %v1513_v6 }
 0x30f   :  { %5378 = vmatmul.msk.f32.gmra.mxu2 %vm1538_vm1, %v1513_v6 }
 0x378   :  { %v1597_v25 = vpop.f32.mrf.mxu3 }
 0x379   :  { %v6555_v9 = vadd.f32 %v1597_v25, %v1521_v52 }
 0x37a   :  { %v1568_v12 = vpop.f32.mrf.mxu2 }
 0x37b   :  { %v6559_v13 = vadd.f32 %v1568_v12, %v1521_v52  ;;  %v1653_v53 = vsel %vm1261_vm3, %v6555_v9, 0.0 }
 0x37c   :  { %1654 = vadd.xlane.f32.xlu0 %v1653_v53 }
 0x37d   :  { %v1641_v54 = vsel %vm1261_vm3, %v6559_v13, 0.0 }
 0x37e   :  { %1642 = vadd.xlane.f32.xlu1 %v1641_v54 }
 0x380   :  { %v1600_v60 = vpop.f32.mrf.mxu3 }
 0x381   :  { %v6568_v41 = vadd.f32 %v1600_v60, %v1526_v59  ;;  %v1613_v60 = vmul.f32 %v6555_v9, %v6555_v9 }
 0x382   :  { %v1571_v47 = vpop.f32.mrf.mxu2 }
 0x383   :  { %v6572_v56 = vadd.f32 %v1571_v47, %v1526_v59  ;;  %v1656_v43 = vsel %vm1261_vm3, %v6568_v41, 0.0  ;;  %v1614_v17 = vmul.f32 %v6568_v41, %v6568_v41  ;;  %v1609_v59 = vmul.f32 %v6559_v13, %v6559_v13 }
 0x384   :  { %v1629_v47 = vsel %vm1261_vm3, %v1613_v60, 0.0 }
 0x385   :  { %v1644_v0 = vsel %vm1261_vm3, %v6572_v56, 0.0  ;;  %v1610_v33 = vmul.f32 %v6572_v56, %v6572_v56  ;;  %v1632_v34 = vsel %vm1261_vm3, %v1614_v17, 0.0  ;;  %v1617_v40 = vsel %vm1261_vm3, %v1609_v59, 0.0 }
 0x386   :  { %1645 = vadd.xlane.f32.xlu2 %v1644_v0  ;;  %1657 = vadd.xlane.f32.xlu1 %v1656_v43 }
 0x387   :  { %v1620_v26 = vsel %vm1261_vm3, %v1610_v33, 0.0 }
 0x388   :  { %1621 = vadd.xlane.f32.xlu0 %v1620_v26  ;;  %v1603_v46 = vpop.f32.mrf.mxu3 }
 0x389   :  { %v6596_v55 = vadd.f32 %v1603_v46, %v1531_v1 }
 0x38a   :  { %v1574_v32 = vpop.f32.mrf.mxu2 }
 0x38b   :  { %v6588_v5 = vadd.f32 %v1574_v32, %v1531_v1  ;;  %v1615_v35 = vmul.f32 %v6596_v55, %v6596_v55  ;;  %v1659_v50 = vsel %vm1261_vm3, %v6596_v55, 0.0 }
 0x38d   :  { %v1611_v2 = vmul.f32 %v6588_v5, %v6588_v5  ;;  %v1647_v14 = vsel %vm1261_vm3, %v6588_v5, 0.0  ;;  %v1635_v52 = vsel %vm1261_vm3, %v1615_v35, 0.0 }
 0x38e   :  { %1633 = vadd.xlane.f32.xlu2 %v1632_v34 }
 0x38f   :  { %v1623_v31 = vsel %vm1261_vm3, %v1611_v2, 0.0 }
 0x390   :  { %1648 = vadd.xlane.f32.xlu0 %v1647_v14  ;;  %1624 = vadd.xlane.f32.xlu1 %v1623_v31  ;;  %v1606_v44 = vpop.f32.mrf.mxu3 }
 0x391   :  { %v6609_v6 = vadd.f32 %v1606_v44, %v1536_v19 }
 0x392   :  { %v1577_v28 = vpop.f32.mrf.mxu2 }
 0x393   :  { %v6603_v3 = vadd.f32 %v1577_v28, %v1536_v19  ;;  %v1616_v12 = vmul.f32 %v6609_v6, %v6609_v6  ;;  %v1662_v19 = vsel %vm1261_vm3, %v6609_v6, 0.0 }
 0x395   :  { %v1650_v25 = vsel %vm1261_vm3, %v6603_v3, 0.0  ;;  %v1612_v4 = vmul.f32 %v6603_v3, %v6603_v3  ;;  %v1638_v54 = vsel %vm1261_vm3, %v1616_v12, 0.0 }
 0x396   :  { %1660 = vadd.xlane.f32.xlu2 %v1659_v50 }
 0x397   :  { %v1626_v53 = vsel %vm1261_vm3, %v1612_v4, 0.0 }
 0x398   :  { %1636 = vadd.xlane.f32.xlu0 %v1635_v52  ;;  %1651 = vadd.xlane.f32.xlu1 %v1650_v25 }
 0x39e   :  { %1627 = vadd.xlane.f32.xlu2 %v1626_v53 }
 0x3a0   :  { %1663 = vadd.xlane.f32.xlu0 %v1662_v19  ;;  %1639 = vadd.xlane.f32.xlu1 %v1638_v54 }
 0x3a6   :  { %1618 = vadd.xlane.f32.xlu2 %v1617_v40 }
 0x3a8   :  { %1630 = vadd.xlane.f32.xlu1 %v1629_v47 }
 0x3ef   :  { %v1655_v43 = vpop.xlane.xlu0 %1654 }
 0x3f1   :  { %v1643_v0 = vpop.xlane.xlu1 %1642 }
 0x3f9   :  { %v1646_v33 = vpop.xlane.xlu2 %1645  ;;  %v1658_v26 = vpop.xlane.xlu1 %1657 }
 0x3fa   :  { %v1666_v1 = vadd.f32 %v1658_v26, %v1646_v33 }
 0x3fb   :  { %v1622_v57 = vpop.xlane.xlu0 %1621 }
 0x3fc   :  { %v6628_v17 = vmul.f32 0.0078125, %v1666_v1 }
 0x3fe   :  { %v1682_v14 = vmul.f32 %v6628_v17, %v6628_v17 }
 0x401   :  { %v1634_v46 = vpop.xlane.xlu2 %1633 }
 0x402   :  { %v1674_v32 = vadd.f32 %v1634_v46, %v1622_v57 }
 0x403   :  { %v1649_v34 = vpop.xlane.xlu0 %1648  ;;  %v1625_v2 = vpop.xlane.xlu1 %1624 }
 0x404   :  { %v1678_v27 = vmul.f32 0.0078125, %v1674_v32  ;;  %v6636_v32 = vpop.f32.mrf.mxu0 }
 0x406   :  { %v1686_v31 = vsub.f32 %v1678_v27, %v1682_v14 }
 0x408   :  { %v1690_v28 = vmax.f32 %v1686_v31, 0.0 }
 0x409   :  { %v1661_v35 = vpop.xlane.xlu2 %1660 }
 0x40a   :  { %v1694_v44 = vadd.f32 1e-05, %v1690_v28  ;;  %v1667_v50 = vadd.f32 %v1661_v35, %v1649_v34  ;;  %v1665_v34 = vadd.f32 %v1655_v43, %v1643_v0  ;;  %v6645_v28 = vld [vmem:[%s8402_s4 + $0x28] sm:$0xff] }
 0x40b   :  { %v1637_v52 = vpop.xlane.xlu0 %1636  ;;  %v1652_v25 = vpop.xlane.xlu1 %1651 }
 0x40c   :  { %5546 = vrsqrt.f32 %v1694_v44  ;;  %v6632_v4 = vmul.f32 0.0078125, %v1667_v50  ;;  %v1675_v12 = vadd.f32 %v1637_v52, %v1625_v2  ;;  %v6647_v50 = vmul.f32 0.0078125, %v1665_v34 }
 0x40d   :  { %vm1713_vm4 = vweird.f32 %v1694_v44 }
 0x40e   :  { %v1683_v53 = vmul.f32 %v6632_v4, %v6632_v4  ;;  %v1679_v19 = vmul.f32 0.0078125, %v1675_v12 }
 0x410   :  { %v1687_v54 = vsub.f32 %v1679_v19, %v1683_v53  ;;  %v520_v53 = vadd.f32 %v6016_v15, %v6645_v28  ;;  %v651_v15 = vpop.f32.mrf.mxu0 }
 0x411   :  { %v1628_v59 = vpop.xlane.xlu2 %1627 }
 0x412   :  { %v5547_v60 = vpop.eup %5546  ;;  %v1691_v40 = vmax.f32 %v1687_v54, 0.0 }
 0x413   :  { %v1708_v47 = vmul.f32 %v5547_v60, %v1694_v44  ;;  %v1664_v33 = vpop.xlane.xlu0 %1663  ;;  %v1640_v26 = vpop.xlane.xlu1 %1639  ;;  %vm1714_vm2 = vweird.f32 %v5547_v60 }
 0x414   :  { %v1695_v57 = vadd.f32 1e-05, %v1691_v40  ;;  %v1668_v1 = vadd.f32 %v1664_v33, %v1652_v25  ;;  %v1676_v2 = vadd.f32 %v1640_v26, %v1628_v59  ;;  %vm1715_vm5 = vmor %vm1713_vm4, %vm1714_vm2  ;;  %v929_v40 = vpop.f32.mrf.mxu1  ;;  %v1681_v33 = vmul.f32 %v6647_v50, %v6647_v50 }
 0x415   :  { %v1709_v46 = vmul.f32 %v5547_v60, %v1708_v47 }
 0x416   :  { %5548 = vrsqrt.f32 %v1695_v57  ;;  %v6638_v27 = vmul.f32 0.0078125, %v1668_v1  ;;  %v1680_v52 = vmul.f32 0.0078125, %v1676_v2  ;;  %vm1723_vm7 = vweird.f32 %v1695_v57 }
 0x417   :  { %v1710_v14 = vmul.f32 0.5, %v1709_v46  ;;  %v6659_v46 = vld [vmem:[%s8402_s4 + $0x188] sm:$0xff] }
 0x418   :  { %v1684_v31 = vmul.f32 %v6638_v27, %v6638_v27 }
 0x419   :  { %v1711_v35 = vsub.f32 1.5, %v1710_v14  ;;  %v1619_v0 = vpop.xlane.xlu2 %1618 }
 0x41a   :  { %v1688_v19 = vsub.f32 %v1680_v52, %v1684_v31 }
 0x41b   :  { %v1631_v43 = vpop.xlane.xlu1 %1630  ;;  %v1712_v25 = vmul.f32 %v5547_v60, %v1711_v35 }
 0x41c   :  { %v5549_v12 = vpop.eup %5548  ;;  %v1673_v54 = vadd.f32 %v1631_v43, %v1619_v0  ;;  %v1692_v34 = vmax.f32 %v1688_v19, 0.0  ;;  %v140_v19 = vld [vmem:[%s8402_s4 + $0x30] sm:$0xff] }
 0x41d   :  { %v1718_v59 = vmul.f32 %v5549_v12, %v1695_v57  ;;  %v6651_v47 = vsel %vm1715_vm5, %v5547_v60, %v1712_v25  ;;  %v652_v60 = vadd.f32 %v651_v15, %v6659_v46  ;;  %vm1724_vm6 = vweird.f32 %v5549_v12 }
 0x41e   :  { %v1677_v26 = vmul.f32 0.0078125, %v1673_v54  ;;  %v1738_v44 = vmul.f32 %v6651_v47, %v520_v53  ;;  %v6663_v0 = vadd.f32 1e-05, %v1692_v34  ;;  %v6665_v53 = vpop.f32.mrf.mxu1  ;;  %vm1725_vm8 = vmor %vm1723_vm7, %vm1724_vm6 }
 0x41f   :  { %v1719_v1 = vmul.f32 %v5549_v12, %v1718_v59 }
 0x420   :  { %v1685_v2 = vsub.f32 %v1677_v26, %v1681_v33  ;;  %1768 = vperm.xlu1 %5536, %v1738_v44   ;;  %v1746_v35 = vmul.f32 %v1738_v44, %v6628_v17  ;;  %v523_v26 = vadd.f32 %v6036_v22, %v140_v19  ;;  %v804_v44 = vadd.f32 %v6038_v23, %v140_v19  ;;  %v138_v22 = vld [vmem:[%s8402_s4 + $0x20] sm:$0xff] }
 0x421   :  { %v1720_v14 = vmul.f32 0.5, %v1719_v1  ;;  %v517_v19 = vadd.f32 %v6003_v10, %v138_v22  ;;  %vm1733_vm13 = vweird.f32 %v6663_v0 }
 0x422   :  { %v1689_v31 = vmax.f32 %v1685_v2, 0.0  ;;  %v1754_v25 = vsub.f32 %v652_v60, %v1746_v35 }
 0x423   :  { %v1721_v52 = vsub.f32 1.5, %v1720_v14 }
 0x424   :  { %v1693_v43 = vadd.f32 1e-05, %v1689_v31  ;;  %v184_v31 = vld [vmem:[%s8402_s4 + $0x190] sm:$0xff] }
 0x425   :  { %v1722_v54 = vmul.f32 %v5549_v12, %v1721_v52 }
 0x426   :  { %5550 = vrsqrt.f32 %v1693_v43  ;;  %v935_v60 = vpop.f32.mrf.mxu1  ;;  %vm1703_vm10 = vweird.f32 %v1693_v43 }
 0x427   :  { %5552 = vrsqrt.f32 %v6663_v0  ;;  %v1726_v59 = vsel %vm1725_vm8, %v5549_v12, %v1722_v54  ;;  %v936_v12 = vadd.f32 %v935_v60, %v184_v31 }
 0x428   :  { %1816 = vperm.xlu1 %5536, %v1754_v25   ;;  %v1739_v34 = vmul.f32 %v1726_v59, %v523_v26  ;;  %v1743_v2 = vmul.f32 %v1726_v59, %v804_v44  ;;  %v798_v59 = vadd.f32 %v6005_v11, %v138_v22  ;;  %v182_v26 = vld [vmem:[%s8402_s4 + $0x180] sm:$0xff] }
 0x42a   :  { %v1751_v52 = vmul.f32 %v1743_v2, %v6632_v4 }
 0x42c   :  { %v5551_v33 = vpop.eup %5550  ;;  %v1759_v44 = vsub.f32 %v936_v12, %v1751_v52  ;;  %v801_v12 = vadd.f32 %v6018_v16, %v6645_v28  ;;  %v5388_v28 = vld [vmem:[%s8407_s9 + $0x28] sm:$0xff] }
 0x42d   :  { %v1698_v1 = vmul.f32 %v5551_v33, %v1693_v43  ;;  %v5553_v15 = vpop.eup %5552  ;;  %vm1704_vm9 = vweird.f32 %v5551_v33 }
 0x42e   :  { %v1728_v57 = vmul.f32 %v5553_v15, %v6663_v0  ;;  %vm1705_vm11 = vmor %vm1703_vm10, %vm1704_vm9  ;;  %vm1734_vm12 = vweird.f32 %v5553_v15  ;;  %v185_v0 = vld [vmem:[%s8402_s4 + $0x198] sm:$0xff] }
 0x42f   :  { %v1699_v14 = vmul.f32 %v5551_v33, %v1698_v1  ;;  %vm1735_vm14 = vmor %vm1733_vm13, %vm1734_vm12 }
 0x430   :  { %1773 = vperm.xlu1 %5536, %v1739_v34   ;;  %v1729_v25 = vmul.f32 %v5553_v15, %v1728_v57  ;;  %v930_v57 = vadd.f32 %v929_v40, %v182_v26 }
 0x431   :  { %v1700_v35 = vmul.f32 0.5, %v1699_v14 }
 0x432   :  { %v1730_v49 = vmul.f32 0.5, %v1729_v25 }
 0x433   :  { %v1701_v23 = vsub.f32 1.5, %v1700_v35  ;;  %v649_v35 = vadd.f32 %v6636_v32, %v182_v26  ;;  %v141_v32 = vld [vmem:[%s8402_s4 + $0x38] sm:$0xff] }
 0x434   :  { %v1731_v22 = vsub.f32 1.5, %v1730_v49  ;;  %v1747_v49 = vmul.f32 %v1739_v34, %v6632_v4  ;;  %v526_v40 = vadd.f32 %v6057_v29, %v141_v32  ;;  %v933_v29 = vadd.f32 %v6665_v53, %v6659_v46 }
 0x435   :  { %v1702_v54 = vmul.f32 %v5551_v33, %v1701_v23  ;;  %v654_v23 = vpop.f32.mrf.mxu0 }
 0x436   :  { %v1732_v25 = vmul.f32 %v5553_v15, %v1731_v22 }
 0x437   :  { %v1706_v1 = vsel %vm1705_vm11, %v5551_v33, %v1702_v54  ;;  %v1742_v33 = vmul.f32 %v6651_v47, %v801_v12  ;;  %v807_v47 = vadd.f32 %v6059_v30, %v141_v32 }
 0x438   :  { %1841 = vperm.xlu1 %5536, %v1759_v44   ;;  %v1741_v14 = vmul.f32 %v1706_v1, %v798_v59  ;;  %v1737_v60 = vmul.f32 %v1706_v1, %v517_v19  ;;  %v1736_v16 = vsel %vm1735_vm14, %v5553_v15, %v1732_v25  ;;  %v938_v59 = vpop.f32.mrf.mxu1 }
 0x439   :  { %v1740_v54 = vmul.f32 %v1736_v16, %v526_v40  ;;  %v1744_v19 = vmul.f32 %v1736_v16, %v807_v47  ;;  %v1750_v30 = vmul.f32 %v1742_v33, %v6628_v17  ;;  %v939_v26 = vadd.f32 %v938_v59, %v185_v0  ;;  %v5389_v17 = vld [vmem:[%s8407_s9 + $0x30] sm:$0xff] }
 0x43a   :  { %1783 = vperm.xlu0 %5535, %v1741_v14   ;;  %1763 = vperm.xlu2 %5537, %v1737_v60   ;;  %v1749_v10 = vmul.f32 %v1741_v14, %v6647_v50  ;;  %v1745_v11 = vmul.f32 %v1737_v60, %v6647_v50  ;;  %v655_v50 = vadd.f32 %v654_v23, %v184_v31  ;;  %v5390_v60 = vld [vmem:[%s8407_s9 + $0x38] sm:$0xff] }
 0x43b   :  { %v1748_v15 = vmul.f32 %v1740_v54, %v6638_v27  ;;  %v1752_v44 = vmul.f32 %v1744_v19, %v6638_v27  ;;  %v1758_v1 = vsub.f32 %v933_v29, %v1750_v30 }
 0x43c   :  { %v1753_v43 = vsub.f32 %v649_v35, %v1745_v11  ;;  %v1757_v52 = vsub.f32 %v930_v57, %v1749_v10  ;;  %v5387_v35 = vld [vmem:[%s8407_s9 + $0x20] sm:$0xff] }
 0x43d   :  { %v657_v31 = vpop.f32.mrf.mxu0  ;;  %v1760_v14 = vsub.f32 %v939_v26, %v1752_v44 }
 0x43e   :  { %v658_v4 = vadd.f32 %v657_v31, %v185_v0 }
 0x440   :  { %1831 = vperm.xlu1 %5536, %v1757_v52   ;;  %v1756_v34 = vsub.f32 %v658_v4, %v1748_v15 }
 0x442   :  { %1793 = vperm.xlu0 %5535, %v1743_v2   ;;  %1788 = vperm.xlu2 %5537, %v1742_v33   ;;  %v1755_v2 = vsub.f32 %v655_v50, %v1747_v49 }
 0x448   :  { %1882 = vperm.xlu1 %5536, %v5388_v28  }
 0x44a   :  { %1821 = vperm.xlu0 %5535, %v1755_v2   ;;  %1798 = vperm.xlu2 %5537, %v1744_v19  }
 0x452   :  { %1778 = vperm.xlu0 %5535, %v1740_v54   ;;  %1826 = vperm.xlu2 %5537, %v1756_v34  }
 0x45a   :  { %1846 = vperm.xlu0 %5535, %v1760_v14   ;;  %1836 = vperm.xlu2 %5537, %v1758_v1  }
 0x462   :  { %1892 = vperm.xlu2 %5537, %v5390_v60   ;;  %1811 = vperm.xlu0 %5535, %v1753_v43   ;;  %v5386_v60 = vld [vmem:[%s8406_s8 + $0x38] sm:$0xff] }
 0x46a   :  { %1877 = vperm.xlu2 %5537, %v5387_v35   ;;  %1887 = vperm.xlu0 %5535, %v5389_v17  }
 0x492   :  { %v1769_v46 = vpop.permute.xlu1 %1768 }
 0x493   :  { %v1802_v50 = vmul.f32 %v1769_v46, %v6572_v56 }
 0x494   :  { %v1764_v27 = vpop.permute.xlu2 %1763 }
 0x49a   :  { %v1817_v10 = vpop.permute.xlu1 %1816 }
 0x49b   :  { %v1850_v28 = vadd.f32 %v1817_v10, %v1802_v50 }
 0x49c   :  { %v1789_v57 = vpop.permute.xlu2 %1788 }
 0x49d   :  { %v1858_v31 = vmax.f32 %v1850_v28, 0.0  ;;  %v1806_v4 = vmul.f32 %v1789_v57, %v6568_v41  ;;  %v5383_v41 = vld [vmem:[%s8406_s8 + $0x20] sm:$0xff] }
 0x49e   :  { %v96_v57 = vld [vmem:[%s8401_s3 + $0x1a0] sm:$0xff] }
 0x49f   :  { %5233 = vmatmul.msk.f32.gmra.mxu0 %vm222_vm0, %v96_v57  ;;  %5321 = vmatmul.msk.f32.gmra.mxu1 %vm222_vm0, %v96_v57 }
 0x4a2   :  { %v1774_v12 = vpop.permute.xlu1 %1773 }
 0x4a3   :  { %v1803_v25 = vmul.f32 %v1774_v12, %v6588_v5 }
 0x4a4   :  { %v1799_v22 = vpop.permute.xlu2 %1798 }
 0x4a5   :  { %v1808_v2 = vmul.f32 %v1799_v22, %v6609_v6  ;;  %v1801_v6 = vmul.f32 %v1764_v27, %v6559_v13  ;;  %v5385_v13 = vld [vmem:[%s8406_s8 + $0x30] sm:$0xff] }
 0x4aa   :  { %v1842_v33 = vpop.permute.xlu1 %1841 }
 0x4ac   :  { %v1784_v53 = vpop.permute.xlu0 %1783  ;;  %v1827_v43 = vpop.permute.xlu2 %1826 }
 0x4ad   :  { %v1805_v56 = vmul.f32 %v1784_v53, %v6555_v9  ;;  %v5384_v9 = vld [vmem:[%s8406_s8 + $0x28] sm:$0xff] }
 0x4b4   :  { %v1794_v11 = vpop.permute.xlu0 %1793  ;;  %v1837_v19 = vpop.permute.xlu2 %1836 }
 0x4b5   :  { %v1807_v40 = vmul.f32 %v1794_v11, %v6596_v55  ;;  %v1854_v34 = vadd.f32 %v1837_v19, %v1806_v4 }
 0x4b7   :  { %v1855_v5 = vadd.f32 %v1842_v33, %v1807_v40  ;;  %v1862_v30 = vmax.f32 %v1854_v34, 0.0 }
 0x4b9   :  { %v1863_v29 = vmax.f32 %v1855_v5, 0.0 }
 0x4bc   :  { %v1822_v52 = vpop.permute.xlu0 %1821  ;;  %v1893_v35 = vpop.permute.xlu2 %1892 }
 0x4bd   :  { %v1851_v49 = vadd.f32 %v1822_v52, %v1803_v25  ;;  %v97_v25 = vld [vmem:[%s8401_s3 + $0x1a8] sm:$0xff] }
 0x4be   :  { %5234 = vmatmul.msk.f32.gmra.mxu0 %vm222_vm0, %v97_v25  ;;  %5322 = vmatmul.msk.f32.gmra.mxu1 %vm222_vm0, %v97_v25 }
 0x4bf   :  { %v1859_v54 = vmax.f32 %v1851_v49, 0.0 }
 0x4c4   :  { %v1779_v23 = vpop.permute.xlu0 %1778  ;;  %v1878_v17 = vpop.permute.xlu2 %1877 }
 0x4c5   :  { %v1804_v32 = vmul.f32 %v1779_v23, %v6603_v3  ;;  %v1832_v3 = vpop.permute.xlu1 %1831 }
 0x4c6   :  { %v1853_v55 = vadd.f32 %v1832_v3, %v1805_v56 }
 0x4c7   :  { %v1852_v16 = vadd.f32 %v1827_v43, %v1804_v32 }
 0x4c8   :  { %v1861_v44 = vmax.f32 %v1853_v55, 0.0 }
 0x4c9   :  { %v1860_v47 = vmax.f32 %v1852_v16, 0.0 }
 0x4cb   :  { %1919 = vmatpush.msra.mxu2 %v1860_v47 }
 0x4cc   :  { %v1847_v0 = vpop.permute.xlu0 %1846 }
 0x4cd   :  { %v1856_v15 = vadd.f32 %v1847_v0, %v1808_v2  ;;  %1920 = vmatpush.msra.mxu2 %v1859_v54  ;;  %v1883_v43 = vpop.permute.xlu1 %1882 }
 0x4cf   :  { %v1864_v59 = vmax.f32 %v1856_v15, 0.0  ;;  %1921 = vmatpush.msra.mxu2 %v1858_v31  ;;  %v99_v15 = vld [vmem:[%s8401_s3 + $0x1b8] sm:$0xff] }
 0x4d1   :  { %1948 = vmatpush.msra.mxu3 %v1864_v59 }
 0x4d3   :  { %1949 = vmatpush.msra.mxu3 %v1863_v29 }
 0x4d4   :  { %v1812_v26 = vpop.permute.xlu0 %1811 }
 0x4d5   :  { %v1849_v1 = vadd.f32 %v1812_v26, %v1801_v6  ;;  %1950 = vmatpush.msra.mxu3 %v1862_v30 }
 0x4d7   :  { %v1857_v14 = vmax.f32 %v1849_v1, 0.0  ;;  %1951 = vmatpush.msra.mxu3 %v1861_v44 }
 0x4d8   :  { %5395 = vmatmul.msk.f32.vlgmr.msra.gmra.mxu3 %vm1538_vm1, %v5383_v41 }
 0x4d9   :  { %1922 = vmatpush.msra.mxu2 %v1857_v14 }
 0x4da   :  { %5391 = vmatmul.msk.f32.vlgmr.msra.gmra.mxu2 %vm1538_vm1, %v5383_v41 }
 0x4dc   :  { %v1888_v47 = vpop.permute.xlu0 %1887 }
 0x4e0   :  { %5396 = vmatmul.msk.f32.gmra.mxu3 %vm1538_vm1, %v5384_v9 }
 0x4e2   :  { %5392 = vmatmul.msk.f32.gmra.mxu2 %vm1538_vm1, %v5384_v9 }
 0x4e8   :  { %5397 = vmatmul.msk.f32.gmra.mxu3 %vm1538_vm1, %v5385_v13 }
 0x4ea   :  { %5393 = vmatmul.msk.f32.gmra.mxu2 %vm1538_vm1, %v5385_v13 }
 0x4f0   :  { %5398 = vmatmul.msk.f32.gmra.mxu3 %vm1538_vm1, %v5386_v60 }
 0x4f2   :  { %5394 = vmatmul.msk.f32.gmra.mxu2 %vm1538_vm1, %v5386_v60 }
 0x55b   :  { %v1953_v27 = vpop.f32.mrf.mxu3 }
 0x55c   :  { %v1954_v46 = vadd.f32 %v1953_v27, %v1878_v17 }
 0x55d   :  { %v1924_v53 = vpop.f32.mrf.mxu2 }
 0x55e   :  { %v6751_v10 = vadd.f32 %v1954_v46, %v6373_v42  ;;  %v1925_v11 = vadd.f32 %v1924_v53, %v1878_v17 }
 0x560   :  { %v6756_v22 = vadd.f32 %v1925_v11, %v6324_v62  ;;  %v2017_v12 = vsel %vm1261_vm3, %v6751_v10, 0.0  ;;  %v1977_v60 = vmul.f32 %v6751_v10, %v6751_v10 }
 0x561   :  { %2018 = vadd.xlane.f32.xlu1 %v2017_v12 }
 0x562   :  { %v2005_v52 = vsel %vm1261_vm3, %v6756_v22, 0.0  ;;  %v1973_v13 = vmul.f32 %v6756_v22, %v6756_v22  ;;  %v1993_v17 = vsel %vm1261_vm3, %v1977_v60, 0.0 }
 0x563   :  { %2006 = vadd.xlane.f32.xlu0 %v2005_v52  ;;  %v1956_v33 = vpop.f32.mrf.mxu3 }
 0x564   :  { %v1957_v42 = vadd.f32 %v1956_v33, %v1883_v43 }
 0x565   :  { %v1927_v23 = vpop.f32.mrf.mxu2 }
 0x566   :  { %v6766_v32 = vadd.f32 %v1957_v42, %v6310_v51  ;;  %v1928_v62 = vadd.f32 %v1927_v23, %v1883_v43 }
 0x568   :  { %v6771_v50 = vadd.f32 %v1928_v62, %v6294_v38  ;;  %v2020_v49 = vsel %vm1261_vm3, %v6766_v32, 0.0  ;;  %v98_v38 = vld [vmem:[%s8401_s3 + $0x1b0] sm:$0xff]  ;;  %v1978_v19 = vmul.f32 %v6766_v32, %v6766_v32 }
 0x569   :  { %5235 = vmatmul.msk.f32.gmra.mxu0 %vm222_vm0, %v98_v38  ;;  %5323 = vmatmul.msk.f32.gmra.mxu1 %vm222_vm0, %v98_v38 }
 0x56a   :  { %v2008_v16 = vsel %vm1261_vm3, %v6771_v50, 0.0  ;;  %v1974_v28 = vmul.f32 %v6771_v50, %v6771_v50  ;;  %v1996_v4 = vsel %vm1261_vm3, %v1978_v19, 0.0 }
 0x56b   :  { %v1959_v40 = vpop.f32.mrf.mxu3  ;;  %2021 = vadd.xlane.f32.xlu0 %v2020_v49  ;;  %2009 = vadd.xlane.f32.xlu2 %v2008_v16 }
 0x56c   :  { %v1984_v51 = vsel %vm1261_vm3, %v1974_v28, 0.0  ;;  %v1960_v0 = vadd.f32 %v1959_v40, %v1888_v47 }
 0x56d   :  { %v1930_v2 = vpop.f32.mrf.mxu2  ;;  %1985 = vadd.xlane.f32.xlu1 %v1984_v51 }
 0x56e   :  { %v1931_v54 = vadd.f32 %v1930_v2, %v1888_v47  ;;  %v6797_v3 = vadd.f32 %v1960_v0, %v6362_v8 }
 0x570   :  { %v6788_v31 = vadd.f32 %v1931_v54, %v6346_v39  ;;  %v1979_v8 = vmul.f32 %v6797_v3, %v6797_v3  ;;  %v2023_v30 = vsel %vm1261_vm3, %v6797_v3, 0.0 }
 0x571   :  { %5236 = vmatmul.msk.f32.gmra.mxu0 %vm222_vm0, %v99_v15  ;;  %5324 = vmatmul.msk.f32.gmra.mxu1 %vm222_vm0, %v99_v15 }
 0x572   :  { %v1975_v5 = vmul.f32 %v6788_v31, %v6788_v31  ;;  %v2011_v34 = vsel %vm1261_vm3, %v6788_v31, 0.0  ;;  %v1999_v1 = vsel %vm1261_vm3, %v1979_v8, 0.0 }
 0x573   :  { %1997 = vadd.xlane.f32.xlu2 %v1996_v4  ;;  %v1962_v39 = vpop.f32.mrf.mxu3 }
 0x574   :  { %v1987_v56 = vsel %vm1261_vm3, %v1975_v5, 0.0  ;;  %v1963_v29 = vadd.f32 %v1962_v39, %v1893_v35 }
 0x575   :  { %v1933_v59 = vpop.f32.mrf.mxu2  ;;  %1988 = vadd.xlane.f32.xlu0 %v1987_v56  ;;  %2012 = vadd.xlane.f32.xlu1 %v2011_v34 }
 0x576   :  { %v1934_v55 = vadd.f32 %v1933_v59, %v1893_v35  ;;  %v6812_v26 = vadd.f32 %v1963_v29, %v6379_v18  ;;  %v1981_v35 = vsel %vm1261_vm3, %v1973_v13, 0.0 }
 0x578   :  { %v6805_v6 = vadd.f32 %v1934_v55, %v6364_v63  ;;  %v1980_v41 = vmul.f32 %v6812_v26, %v6812_v26  ;;  %v2026_v18 = vsel %vm1261_vm3, %v6812_v26, 0.0 }
 0x57a   :  { %v2014_v44 = vsel %vm1261_vm3, %v6805_v6, 0.0  ;;  %v1976_v63 = vmul.f32 %v6805_v6, %v6805_v6  ;;  %v2002_v9 = vsel %vm1261_vm3, %v1980_v41, 0.0 }
 0x57b   :  { %2024 = vadd.xlane.f32.xlu2 %v2023_v30 }
 0x57c   :  { %v1990_v14 = vsel %vm1261_vm3, %v1976_v63, 0.0 }
 0x57d   :  { %2015 = vadd.xlane.f32.xlu0 %v2014_v44  ;;  %2000 = vadd.xlane.f32.xlu1 %v1999_v1  ;;  %v6839_v44 = vpop.f32.mrf.mxu0 }
 0x583   :  { %1991 = vadd.xlane.f32.xlu2 %v1990_v14 }
 0x585   :  { %2003 = vadd.xlane.f32.xlu0 %v2002_v9  ;;  %2027 = vadd.xlane.f32.xlu1 %v2026_v18  ;;  %v6848_v18 = vld [vmem:[%s8402_s4 + $0x48] sm:$0xff] }
 0x58b   :  { %1982 = vadd.xlane.f32.xlu2 %v1981_v35 }
 0x58d   :  { %1994 = vadd.xlane.f32.xlu0 %v1993_v17 }
 0x5d4   :  { %v2019_v46 = vpop.xlane.xlu1 %2018 }
 0x5d6   :  { %v2007_v27 = vpop.xlane.xlu0 %2006 }
 0x5d7   :  { %v2029_v1 = vadd.f32 %v2019_v46, %v2007_v27 }
 0x5d9   :  { %v6850_v60 = vmul.f32 0.0078125, %v2029_v1 }
 0x5de   :  { %v2022_v53 = vpop.xlane.xlu0 %2021  ;;  %v2010_v57 = vpop.xlane.xlu2 %2009 }
 0x5df   :  { %v2030_v12 = vadd.f32 %v2022_v53, %v2010_v57  ;;  %v532_v57 = vadd.f32 %v6084_v45, %v6848_v18  ;;  %v6864_v45 = vld [vmem:[%s8402_s4 + $0x1a8] sm:$0xff] }
 0x5e0   :  { %v1986_v11 = vpop.xlane.xlu1 %1985 }
 0x5e1   :  { %v6831_v52 = vmul.f32 0.0078125, %v2030_v12 }
 0x5e3   :  { %v2046_v25 = vmul.f32 %v6831_v52, %v6831_v52 }
 0x5e6   :  { %v1998_v43 = vpop.xlane.xlu2 %1997 }
 0x5e7   :  { %v2038_v33 = vadd.f32 %v1998_v43, %v1986_v11 }
 0x5e8   :  { %v1989_v42 = vpop.xlane.xlu0 %1988  ;;  %v2013_v23 = vpop.xlane.xlu1 %2012 }
 0x5e9   :  { %v2042_v62 = vmul.f32 0.0078125, %v2038_v33  ;;  %v6854_v33 = vpop.f32.mrf.mxu1 }
 0x5eb   :  { %v2050_v49 = vsub.f32 %v2042_v62, %v2046_v25  ;;  %v2045_v62 = vmul.f32 %v6850_v60, %v6850_v60 }
 0x5ed   :  { %v2054_v16 = vmax.f32 %v2050_v49, 0.0 }
 0x5ee   :  { %v2025_v28 = vpop.xlane.xlu2 %2024 }
 0x5ef   :  { %v2058_v40 = vadd.f32 1e-05, %v2054_v16  ;;  %v2031_v51 = vadd.f32 %v2025_v28, %v2013_v23  ;;  %v663_v28 = vpop.f32.mrf.mxu0 }
 0x5f0   :  { %v2016_v47 = vpop.xlane.xlu0 %2015  ;;  %v2001_v2 = vpop.xlane.xlu1 %2000 }
 0x5f1   :  { %5554 = vrsqrt.f32 %v2058_v40  ;;  %v6835_v38 = vmul.f32 0.0078125, %v2031_v51  ;;  %v2039_v54 = vadd.f32 %v2001_v2, %v1989_v42  ;;  %vm2077_vm2 = vweird.f32 %v2058_v40 }
 0x5f2   :  { %v664_v2 = vadd.f32 %v663_v28, %v6864_v45 }
 0x5f3   :  { %v2047_v19 = vmul.f32 %v6835_v38, %v6835_v38  ;;  %v2043_v0 = vmul.f32 0.0078125, %v2039_v54 }
 0x5f5   :  { %v2051_v4 = vsub.f32 %v2043_v0, %v2047_v19 }
 0x5f6   :  { %v1992_v5 = vpop.xlane.xlu2 %1991 }
 0x5f7   :  { %v5555_v15 = vpop.eup %5554  ;;  %v2055_v56 = vmax.f32 %v2051_v4, 0.0 }
 0x5f8   :  { %v2072_v34 = vmul.f32 %v5555_v15, %v2058_v40  ;;  %v2004_v39 = vpop.xlane.xlu0 %2003  ;;  %v2028_v59 = vpop.xlane.xlu1 %2027  ;;  %vm2078_vm15 = vweird.f32 %v5555_v15 }
 0x5f9   :  { %v2059_v55 = vadd.f32 1e-05, %v2055_v56  ;;  %v2040_v29 = vadd.f32 %v2004_v39, %v1992_v5  ;;  %v2032_v8 = vadd.f32 %v2028_v59, %v2016_v47  ;;  %vm2079_vm4 = vmor %vm2077_vm2, %vm2078_vm15  ;;  %v6868_v56 = vpop.f32.mrf.mxu1  ;;  %v144_v39 = vld [vmem:[%s8402_s4 + $0x50] sm:$0xff] }
 0x5fa   :  { %v2073_v30 = vmul.f32 %v5555_v15, %v2072_v34 }
 0x5fb   :  { %5556 = vrsqrt.f32 %v2059_v55  ;;  %v6841_v63 = vmul.f32 0.0078125, %v2032_v8  ;;  %v2044_v14 = vmul.f32 0.0078125, %v2040_v29  ;;  %vm2087_vm6 = vweird.f32 %v2059_v55 }
 0x5fc   :  { %v2074_v41 = vmul.f32 0.5, %v2073_v30  ;;  %v816_v30 = vadd.f32 %v6099_v61, %v144_v39 }
 0x5fd   :  { %v2048_v9 = vmul.f32 %v6841_v63, %v6841_v63 }
 0x5fe   :  { %v2075_v13 = vsub.f32 1.5, %v2074_v41  ;;  %v1983_v17 = vpop.xlane.xlu2 %1982 }
 0x5ff   :  { %v2052_v35 = vsub.f32 %v2044_v14, %v2048_v9  ;;  %v188_v9 = vld [vmem:[%s8402_s4 + $0x1b0] sm:$0xff] }
 0x600   :  { %v1995_v27 = vpop.xlane.xlu0 %1994  ;;  %v2076_v46 = vmul.f32 %v5555_v15, %v2075_v13 }
 0x601   :  { %v5557_v53 = vpop.eup %5556  ;;  %v2056_v11 = vmax.f32 %v2052_v35, 0.0  ;;  %v2037_v12 = vadd.f32 %v1995_v27, %v1983_v17  ;;  %v947_v13 = vpop.f32.mrf.mxu1 }
 0x602   :  { %v2082_v43 = vmul.f32 %v5557_v53, %v2059_v55  ;;  %v6856_v42 = vsel %vm2079_vm4, %v5555_v15, %v2076_v46  ;;  %vm2088_vm5 = vweird.f32 %v5557_v53  ;;  %v948_v17 = vadd.f32 %v947_v13, %v188_v9  ;;  %v142_v46 = vld [vmem:[%s8402_s4 + $0x40] sm:$0xff] }
 0x603   :  { %v2060_v23 = vadd.f32 1e-05, %v2056_v11  ;;  %v2041_v25 = vmul.f32 0.0078125, %v2037_v12  ;;  %v2102_v49 = vmul.f32 %v6856_v42, %v532_v57  ;;  %vm2089_vm7 = vmor %vm2087_vm6, %vm2088_vm5  ;;  %v529_v11 = vadd.f32 %v6071_v36, %v142_v46 }
 0x604   :  { %v2083_v16 = vmul.f32 %v5557_v53, %v2082_v43  ;;  %v810_v12 = vadd.f32 %v6073_v37, %v142_v46  ;;  %v535_v43 = vadd.f32 %v6097_v58, %v144_v39 }
 0x605   :  { %5558 = vrsqrt.f32 %v2060_v23  ;;  %v2049_v40 = vsub.f32 %v2041_v25, %v2045_v62  ;;  %2132 = vperm.xlu1 %5536, %v2102_v49   ;;  %v2110_v54 = vmul.f32 %v2102_v49, %v6831_v52  ;;  %vm2097_vm12 = vweird.f32 %v2060_v23 }
 0x606   :  { %v2084_v51 = vmul.f32 0.5, %v2083_v16 }
 0x607   :  { %v2053_v47 = vmax.f32 %v2049_v40, 0.0  ;;  %v2118_v5 = vsub.f32 %v664_v2, %v2110_v54  ;;  %v813_v54 = vadd.f32 %v6086_v48, %v6848_v18  ;;  %v189_v48 = vld [vmem:[%s8402_s4 + $0x1b8] sm:$0xff] }
 0x608   :  { %v2085_v19 = vsub.f32 1.5, %v2084_v51  ;;  %v145_v51 = vld [vmem:[%s8402_s4 + $0x58] sm:$0xff] }
 0x609   :  { %v2057_v0 = vadd.f32 1e-05, %v2053_v47  ;;  %v666_v47 = vpop.f32.mrf.mxu0  ;;  %v538_v37 = vadd.f32 %v6114_v21, %v145_v51 }
 0x60a   :  { %v2086_v34 = vmul.f32 %v5557_v53, %v2085_v19  ;;  %v667_v58 = vadd.f32 %v666_v47, %v188_v9 }
 0x60b   :  { %v5559_v4 = vpop.eup %5558  ;;  %5560 = vrsqrt.f32 %v2057_v0  ;;  %vm2067_vm9 = vweird.f32 %v2057_v0 }
 0x60c   :  { %v2092_v15 = vmul.f32 %v5559_v4, %v2060_v23  ;;  %v2090_v59 = vsel %vm2089_vm7, %v5557_v53, %v2086_v34  ;;  %vm2098_vm11 = vweird.f32 %v5559_v4 }
 0x60d   :  { %2180 = vperm.xlu1 %5536, %v2118_v5   ;;  %v2107_v41 = vmul.f32 %v2090_v59, %v816_v30  ;;  %v2103_v16 = vmul.f32 %v2090_v59, %v535_v43  ;;  %vm2099_vm13 = vmor %vm2097_vm12, %vm2098_vm11 }
 0x60e   :  { %v2093_v29 = vmul.f32 %v5559_v4, %v2092_v15 }
 0x60f   :  { %v2115_v27 = vmul.f32 %v2107_v41, %v6835_v38  ;;  %v2111_v2 = vmul.f32 %v2103_v16, %v6835_v38  ;;  %v819_v38 = vadd.f32 %v6116_v24, %v145_v51  ;;  %v5404_v24 = vld [vmem:[%s8407_s9 + $0x48] sm:$0xff] }
 0x610   :  { %v2094_v35 = vmul.f32 0.5, %v2093_v29 }
 0x611   :  { %v5561_v8 = vpop.eup %5560  ;;  %v2123_v25 = vsub.f32 %v948_v17, %v2115_v27  ;;  %v2119_v5 = vsub.f32 %v667_v58, %v2111_v2  ;;  %v669_v18 = vpop.f32.mrf.mxu0 }
 0x612   :  { %v2062_v1 = vmul.f32 %v5561_v8, %v2057_v0  ;;  %v2095_v53 = vsub.f32 1.5, %v2094_v35  ;;  %vm2068_vm8 = vweird.f32 %v5561_v8  ;;  %v2106_v0 = vmul.f32 %v6856_v42, %v813_v54  ;;  %v950_v42 = vpop.f32.mrf.mxu1  ;;  %v5405_v35 = vld [vmem:[%s8407_s9 + $0x50] sm:$0xff] }
 0x613   :  { %vm2069_vm10 = vmor %vm2067_vm9, %vm2068_vm8  ;;  %v670_v39 = vadd.f32 %v669_v18, %v189_v48  ;;  %v951_v29 = vadd.f32 %v950_v42, %v189_v48 }
 0x614   :  { %v2063_v14 = vmul.f32 %v5561_v8, %v2062_v1  ;;  %v2096_v62 = vmul.f32 %v5559_v4, %v2095_v53  ;;  %v945_v1 = vadd.f32 %v6868_v56, %v6864_v45 }
 0x615   :  { %2157 = vperm.xlu1 %5536, %v2107_v41   ;;  %v2114_v41 = vmul.f32 %v2106_v0, %v6831_v52  ;;  %v5403_v52 = vld [vmem:[%s8407_s9 + $0x40] sm:$0xff] }
 0x616   :  { %v2064_v55 = vmul.f32 0.5, %v2063_v14  ;;  %v2100_v36 = vsel %vm2099_vm13, %v5559_v4, %v2096_v62  ;;  %v186_v4 = vld [vmem:[%s8402_s4 + $0x1a0] sm:$0xff] }
 0x617   :  { %v2104_v19 = vmul.f32 %v2100_v36, %v538_v37  ;;  %v942_v21 = vadd.f32 %v6854_v33, %v186_v4  ;;  %v2108_v34 = vmul.f32 %v2100_v36, %v819_v38  ;;  %v661_v9 = vadd.f32 %v6839_v44, %v186_v4 }
 0x618   :  { %v2065_v61 = vsub.f32 1.5, %v2064_v55  ;;  %v2122_v13 = vsub.f32 %v945_v1, %v2114_v41  ;;  %v5406_v55 = vld [vmem:[%s8407_s9 + $0x58] sm:$0xff]  ;;  %v100_v1 = vld [vmem:[%s8401_s3 + $0x1c0] sm:$0xff] }
 0x619   :  { %v2112_v59 = vmul.f32 %v2104_v19, %v6841_v63  ;;  %5237 = vmatmul.msk.f32.gmra.mxu0 %vm222_vm0, %v100_v1  ;;  %5325 = vmatmul.msk.f32.gmra.mxu1 %vm222_vm0, %v100_v1 }
 0x61a   :  { %v2066_v57 = vmul.f32 %v5561_v8, %v2065_v61 }
 0x61b   :  { %v2120_v33 = vsub.f32 %v670_v39, %v2112_v59  ;;  %v5399_v39 = vld [vmem:[%s8406_s8 + $0x40] sm:$0xff] }
 0x61c   :  { %v2070_v49 = vsel %vm2069_vm10, %v5561_v8, %v2066_v57  ;;  %v2116_v8 = vmul.f32 %v2108_v34, %v6841_v63 }
 0x61d   :  { %2205 = vperm.xlu1 %5536, %v2123_v25   ;;  %v2105_v28 = vmul.f32 %v2070_v49, %v810_v12  ;;  %v2101_v40 = vmul.f32 %v2070_v49, %v529_v11 }
 0x61e   :  { %v2124_v30 = vsub.f32 %v951_v29, %v2116_v8  ;;  %v5400_v8 = vld [vmem:[%s8406_s8 + $0x48] sm:$0xff] }
 0x61f   :  { %2147 = vperm.xlu2 %5537, %v2105_v28   ;;  %2127 = vperm.xlu0 %5535, %v2101_v40   ;;  %v2113_v23 = vmul.f32 %v2105_v28, %v6850_v60  ;;  %v2109_v14 = vmul.f32 %v2101_v40, %v6850_v60 }
 0x621   :  { %v2121_v15 = vsub.f32 %v942_v21, %v2113_v23  ;;  %v2117_v63 = vsub.f32 %v661_v9, %v2109_v14 }
 0x625   :  { %2142 = vperm.xlu1 %5536, %v2104_v19  }
 0x627   :  { %2152 = vperm.xlu0 %5535, %v2106_v0   ;;  %2185 = vperm.xlu2 %5537, %v2119_v5  }
 0x62d   :  { %2195 = vperm.xlu1 %5536, %v2121_v15  }
 0x62f   :  { %2137 = vperm.xlu0 %5535, %v2103_v16   ;;  %2162 = vperm.xlu2 %5537, %v2108_v34  }
 0x635   :  { %2246 = vperm.xlu1 %5536, %v5404_v24   ;;  %v5401_v24 = vld [vmem:[%s8406_s8 + $0x50] sm:$0xff] }
 0x637   :  { %2210 = vperm.xlu2 %5537, %v2124_v30   ;;  %2190 = vperm.xlu0 %5535, %v2120_v33   ;;  %v5402_v33 = vld [vmem:[%s8406_s8 + $0x58] sm:$0xff] }
 0x63f   :  { %2175 = vperm.xlu2 %5537, %v2117_v63   ;;  %2200 = vperm.xlu0 %5535, %v2122_v13  }
 0x647   :  { %2251 = vperm.xlu2 %5537, %v5405_v35   ;;  %2256 = vperm.xlu0 %5535, %v5406_v55   ;;  %v101_v35 = vld [vmem:[%s8401_s3 + $0x1c8] sm:$0xff] }
 0x648   :  { %5238 = vmatmul.msk.f32.gmra.mxu0 %vm222_vm0, %v101_v35  ;;  %5326 = vmatmul.msk.f32.gmra.mxu1 %vm222_vm0, %v101_v35 }
 0x64f   :  { %2241 = vperm.xlu0 %5535, %v5403_v52  }
 0x677   :  { %v2133_v44 = vpop.permute.xlu1 %2132 }
 0x678   :  { %v2166_v36 = vmul.f32 %v2133_v44, %v6771_v50 }
 0x679   :  { %v2148_v60 = vpop.permute.xlu2 %2147 }
 0x67a   :  { %v2169_v21 = vmul.f32 %v2148_v60, %v6751_v10 }
 0x67f   :  { %v2181_v45 = vpop.permute.xlu1 %2180 }
 0x680   :  { %v2214_v54 = vadd.f32 %v2181_v45, %v2166_v36 }
 0x681   :  { %v2186_v56 = vpop.permute.xlu2 %2185 }
 0x682   :  { %v2222_v38 = vmax.f32 %v2214_v54, 0.0 }
 0x687   :  { %v2158_v17 = vpop.permute.xlu1 %2157 }
 0x688   :  { %v2171_v53 = vmul.f32 %v2158_v17, %v6797_v3 }
 0x689   :  { %v2163_v27 = vpop.permute.xlu2 %2162 }
 0x68a   :  { %v2172_v61 = vmul.f32 %v2163_v27, %v6812_v26 }
 0x68f   :  { %v2206_v46 = vpop.permute.xlu1 %2205 }
 0x690   :  { %v2219_v12 = vadd.f32 %v2206_v46, %v2171_v53 }
 0x691   :  { %v2128_v57 = vpop.permute.xlu0 %2127  ;;  %v2211_v11 = vpop.permute.xlu2 %2210 }
 0x692   :  { %v2220_v43 = vadd.f32 %v2211_v11, %v2172_v61  ;;  %v2227_v62 = vmax.f32 %v2219_v12, 0.0  ;;  %v2165_v19 = vmul.f32 %v2128_v57, %v6756_v22  ;;  %v102_v11 = vld [vmem:[%s8401_s3 + $0x1d0] sm:$0xff] }
 0x693   :  { %5239 = vmatmul.msk.f32.gmra.mxu0 %vm222_vm0, %v102_v11  ;;  %5327 = vmatmul.msk.f32.gmra.mxu1 %vm222_vm0, %v102_v11 }
 0x694   :  { %v2228_v25 = vmax.f32 %v2220_v43, 0.0 }
 0x696   :  { %2312 = vmatpush.msrb.mxu3 %v2228_v25 }
 0x697   :  { %v2143_v28 = vpop.permute.xlu1 %2142 }
 0x698   :  { %2313 = vmatpush.msrb.mxu3 %v2227_v62  ;;  %v2168_v51 = vmul.f32 %v2143_v28, %v6805_v6  ;;  %v103_v28 = vld [vmem:[%s8401_s3 + $0x1d8] sm:$0xff] }
 0x699   :  { %v2153_v49 = vpop.permute.xlu0 %2152  ;;  %v2176_v2 = vpop.permute.xlu2 %2175 }
 0x69a   :  { %v2213_v5 = vadd.f32 %v2176_v2, %v2165_v19  ;;  %v2170_v15 = vmul.f32 %v2153_v49, %v6766_v32 }
 0x69b   :  { %5240 = vmatmul.msk.f32.gmra.mxu0 %vm222_vm0, %v103_v28  ;;  %5328 = vmatmul.msk.f32.gmra.mxu1 %vm222_vm0, %v103_v28 }
 0x69c   :  { %v2221_v48 = vmax.f32 %v2213_v5, 0.0 }
 0x69f   :  { %v2196_v4 = vpop.permute.xlu1 %2195 }
 0x6a0   :  { %v2217_v18 = vadd.f32 %v2196_v4, %v2169_v21 }
 0x6a1   :  { %v2138_v16 = vpop.permute.xlu0 %2137  ;;  %v2252_v61 = vpop.permute.xlu2 %2251 }
 0x6a2   :  { %v2167_v40 = vmul.f32 %v2138_v16, %v6788_v31  ;;  %v2225_v29 = vmax.f32 %v2217_v18, 0.0 }
 0x6a4   :  { %v2215_v37 = vadd.f32 %v2186_v56, %v2167_v40 }
 0x6a6   :  { %v2223_v23 = vmax.f32 %v2215_v37, 0.0 }
 0x6a7   :  { %v2247_v55 = vpop.permute.xlu1 %2246 }
 0x6a9   :  { %v2191_v47 = vpop.permute.xlu0 %2190 }
 0x6aa   :  { %v2216_v58 = vadd.f32 %v2191_v47, %v2168_v51 }
 0x6ac   :  { %v2224_v0 = vmax.f32 %v2216_v58, 0.0 }
 0x6ae   :  { %2283 = vmatpush.msrb.mxu2 %v2224_v0 }
 0x6b0   :  { %2284 = vmatpush.msrb.mxu2 %v2223_v23 }
 0x6b1   :  { %v2201_v34 = vpop.permute.xlu0 %2200 }
 0x6b2   :  { %v2218_v42 = vadd.f32 %v2201_v34, %v2170_v15  ;;  %2285 = vmatpush.msrb.mxu2 %v2222_v38 }
 0x6b4   :  { %v2226_v59 = vmax.f32 %v2218_v42, 0.0  ;;  %2286 = vmatpush.msrb.mxu2 %v2221_v48 }
 0x6b5   :  { %5407 = vmatmul.msk.f32.vlgmr.msrb.gmra.mxu2 %vm1538_vm1, %v5399_v39 }
 0x6b6   :  { %2314 = vmatpush.msrb.mxu3 %v2226_v59 }
 0x6b8   :  { %2315 = vmatpush.msrb.mxu3 %v2225_v29 }
 0x6b9   :  { %5411 = vmatmul.msk.f32.vlgmr.msrb.gmra.mxu3 %vm1538_vm1, %v5399_v39  ;;  %v2257_v30 = vpop.permute.xlu0 %2256 }
 0x6bd   :  { %5408 = vmatmul.msk.f32.gmra.mxu2 %vm1538_vm1, %v5400_v8 }
 0x6c1   :  { %5412 = vmatmul.msk.f32.gmra.mxu3 %vm1538_vm1, %v5400_v8  ;;  %v2242_v41 = vpop.permute.xlu0 %2241 }
 0x6c5   :  { %5409 = vmatmul.msk.f32.gmra.mxu2 %vm1538_vm1, %v5401_v24 }
 0x6c9   :  { %5413 = vmatmul.msk.f32.gmra.mxu3 %vm1538_vm1, %v5401_v24 }
 0x6cd   :  { %5410 = vmatmul.msk.f32.gmra.mxu2 %vm1538_vm1, %v5402_v33 }
 0x6d1   :  { %5414 = vmatmul.msk.f32.gmra.mxu3 %vm1538_vm1, %v5402_v33 }
 0x738   :  { %v2288_v14 = vpop.f32.mrf.mxu2 }
 0x739   :  { %v6953_v9 = vadd.f32 %v2288_v14, %v2242_v41 }
 0x73b   :  { %v2361_v13 = vsel %vm1261_vm3, %v6953_v9, 0.0  ;;  %v2329_v0 = vmul.f32 %v6953_v9, %v6953_v9 }
 0x73c   :  { %2362 = vadd.xlane.f32.xlu2 %v2361_v13  ;;  %v2317_v63 = vpop.f32.mrf.mxu3 }
 0x73d   :  { %v2337_v5 = vsel %vm1261_vm3, %v2329_v0, 0.0  ;;  %v7013_v21 = vadd.f32 %v2317_v63, %v2242_v41  ;;  %v7039_v0 = vld [vmem:[%s8402_s4 + $0x68] sm:$0xff] }
 0x73f   :  { %v2333_v48 = vmul.f32 %v7013_v21, %v7013_v21  ;;  %v2373_v18 = vsel %vm1261_vm3, %v7013_v21, 0.0 }
 0x740   :  { %v2291_v52 = vpop.f32.mrf.mxu2 }
 0x741   :  { %v6962_v44 = vadd.f32 %v2291_v52, %v2247_v55  ;;  %v2349_v42 = vsel %vm1261_vm3, %v2333_v48, 0.0  ;;  %v544_v48 = vadd.f32 %v6146_v7, %v7039_v0  ;;  %v7055_v7 = vld [vmem:[%s8402_s4 + $0x1c8] sm:$0xff] }
 0x743   :  { %v2364_v60 = vsel %vm1261_vm3, %v6962_v44, 0.0  ;;  %v2330_v45 = vmul.f32 %v6962_v44, %v6962_v44 }
 0x744   :  { %v2320_v56 = vpop.f32.mrf.mxu3  ;;  %2365 = vadd.xlane.f32.xlu0 %v2364_v60 }
 0x745   :  { %v6968_v17 = vadd.f32 %v2320_v56, %v2247_v55  ;;  %v2340_v27 = vsel %vm1261_vm3, %v2330_v45, 0.0 }
 0x746   :  { %2341 = vadd.xlane.f32.xlu1 %v2340_v27 }
 0x747   :  { %v2376_v46 = vsel %vm1261_vm3, %v6968_v17, 0.0  ;;  %v2334_v53 = vmul.f32 %v6968_v17, %v6968_v17 }
 0x748   :  { %v2294_v57 = vpop.f32.mrf.mxu2  ;;  %2377 = vadd.xlane.f32.xlu2 %v2376_v46 }
 0x749   :  { %v6978_v12 = vadd.f32 %v2294_v57, %v2252_v61  ;;  %v2352_v43 = vsel %vm1261_vm3, %v2334_v53, 0.0 }
 0x74b   :  { %v2331_v25 = vmul.f32 %v6978_v12, %v6978_v12  ;;  %v2367_v16 = vsel %vm1261_vm3, %v6978_v12, 0.0 }
 0x74c   :  { %v2323_v62 = vpop.f32.mrf.mxu3  ;;  %2353 = vadd.xlane.f32.xlu0 %v2352_v43 }
 0x74d   :  { %v6985_v49 = vadd.f32 %v2323_v62, %v2252_v61  ;;  %v2343_v40 = vsel %vm1261_vm3, %v2331_v25, 0.0 }
 0x74e   :  { %2368 = vadd.xlane.f32.xlu1 %v2367_v16 }
 0x74f   :  { %v2335_v47 = vmul.f32 %v6985_v49, %v6985_v49  ;;  %v2379_v37 = vsel %vm1261_vm3, %v6985_v49, 0.0 }
 0x750   :  { %v2297_v51 = vpop.f32.mrf.mxu2  ;;  %2344 = vadd.xlane.f32.xlu2 %v2343_v40 }
 0x751   :  { %v6997_v36 = vadd.f32 %v2297_v51, %v2257_v30  ;;  %v2355_v2 = vsel %vm1261_vm3, %v2335_v47, 0.0 }
 0x753   :  { %v2370_v19 = vsel %vm1261_vm3, %v6997_v36, 0.0  ;;  %v2332_v15 = vmul.f32 %v6997_v36, %v6997_v36 }
 0x754   :  { %v2326_v58 = vpop.f32.mrf.mxu3  ;;  %2380 = vadd.xlane.f32.xlu0 %v2379_v37 }
 0x755   :  { %v7002_v54 = vadd.f32 %v2326_v58, %v2257_v30  ;;  %v2346_v34 = vsel %vm1261_vm3, %v2332_v15, 0.0  ;;  %v7032_v58 = vpop.f32.mrf.mxu0 }
 0x756   :  { %2356 = vadd.xlane.f32.xlu1 %v2355_v2 }
 0x757   :  { %v2336_v23 = vmul.f32 %v7002_v54, %v7002_v54  ;;  %v2382_v4 = vsel %vm1261_vm3, %v7002_v54, 0.0 }
 0x758   :  { %2371 = vadd.xlane.f32.xlu2 %v2370_v19 }
 0x759   :  { %v2358_v38 = vsel %vm1261_vm3, %v2336_v23, 0.0 }
 0x75c   :  { %2338 = vadd.xlane.f32.xlu0 %v2337_v5 }
 0x75e   :  { %2383 = vadd.xlane.f32.xlu1 %v2382_v4 }
 0x760   :  { %2359 = vadd.xlane.f32.xlu2 %v2358_v38 }
 0x764   :  { %2347 = vadd.xlane.f32.xlu0 %v2346_v34 }
 0x766   :  { %2374 = vadd.xlane.f32.xlu1 %v2373_v18 }
 0x768   :  { %2350 = vadd.xlane.f32.xlu2 %v2349_v42 }
 0x7af   :  { %v2363_v39 = vpop.xlane.xlu2 %2362 }
 0x7b7   :  { %v2366_v59 = vpop.xlane.xlu0 %2365 }
 0x7b9   :  { %v2342_v29 = vpop.xlane.xlu1 %2341 }
 0x7bb   :  { %v2378_v8 = vpop.xlane.xlu2 %2377 }
 0x7bc   :  { %v2386_v24 = vadd.f32 %v2378_v8, %v2366_v59  ;;  %v7045_v8 = vpop.f32.mrf.mxu1 }
 0x7be   :  { %v7024_v33 = vmul.f32 0.0078125, %v2386_v24 }
 0x7bf   :  { %v2354_v30 = vpop.xlane.xlu0 %2353 }
 0x7c0   :  { %v2394_v1 = vadd.f32 %v2354_v30, %v2342_v29  ;;  %v2402_v14 = vmul.f32 %v7024_v33, %v7024_v33 }
 0x7c1   :  { %v2369_v41 = vpop.xlane.xlu1 %2368 }
 0x7c2   :  { %v2398_v13 = vmul.f32 0.0078125, %v2394_v1 }
 0x7c3   :  { %v2345_v63 = vpop.xlane.xlu2 %2344 }
 0x7c4   :  { %v2406_v35 = vsub.f32 %v2398_v13, %v2402_v14 }
 0x7c6   :  { %v2410_v55 = vmax.f32 %v2406_v35, 0.0 }
 0x7c7   :  { %v2381_v52 = vpop.xlane.xlu0 %2380 }
 0x7c8   :  { %v2414_v60 = vadd.f32 1e-05, %v2410_v55  ;;  %v2387_v45 = vadd.f32 %v2381_v52, %v2369_v41 }
 0x7c9   :  { %v2357_v56 = vpop.xlane.xlu1 %2356 }
 0x7ca   :  { %5562 = vrsqrt.f32 %v2414_v60  ;;  %v7028_v27 = vmul.f32 0.0078125, %v2387_v45  ;;  %v2395_v46 = vadd.f32 %v2357_v56, %v2345_v63  ;;  %vm2433_vm15 = vweird.f32 %v2414_v60 }
 0x7cb   :  { %v2372_v53 = vpop.xlane.xlu2 %2371 }
 0x7cc   :  { %v2403_v61 = vmul.f32 %v7028_v27, %v7028_v27  ;;  %v2399_v57 = vmul.f32 0.0078125, %v2395_v46 }
 0x7ce   :  { %v2407_v11 = vsub.f32 %v2399_v57, %v2403_v61 }
 0x7cf   :  { %v2339_v43 = vpop.xlane.xlu0 %2338 }
 0x7d0   :  { %v5563_v25 = vpop.eup %5562  ;;  %v2411_v62 = vmax.f32 %v2407_v11, 0.0 }
 0x7d1   :  { %v2428_v16 = vmul.f32 %v5563_v25, %v2414_v60  ;;  %v2384_v28 = vpop.xlane.xlu1 %2383  ;;  %vm2434_vm14 = vweird.f32 %v5563_v25 }
 0x7d2   :  { %v2415_v40 = vadd.f32 1e-05, %v2411_v62  ;;  %v2388_v51 = vadd.f32 %v2384_v28, %v2372_v53  ;;  %vm2435_vm2 = vmor %vm2433_vm15, %vm2434_vm14  ;;  %v148_v28 = vld [vmem:[%s8402_s4 + $0x70] sm:$0xff] }
 0x7d3   :  { %v2429_v47 = vmul.f32 %v5563_v25, %v2428_v16  ;;  %v2360_v37 = vpop.xlane.xlu2 %2359 }
 0x7d4   :  { %5564 = vrsqrt.f32 %v2415_v40  ;;  %v7034_v19 = vmul.f32 0.0078125, %v2388_v51  ;;  %vm2443_vm5 = vweird.f32 %v2415_v40 }
 0x7d5   :  { %v2430_v2 = vmul.f32 0.5, %v2429_v47 }
 0x7d6   :  { %v2404_v42 = vmul.f32 %v7034_v19, %v7034_v19 }
 0x7d7   :  { %v2431_v5 = vsub.f32 1.5, %v2430_v2  ;;  %v2348_v23 = vpop.xlane.xlu0 %2347 }
 0x7d8   :  { %v2396_v4 = vadd.f32 %v2360_v37, %v2348_v23  ;;  %v828_v37 = vadd.f32 %v6161_v20, %v148_v28  ;;  %v146_v20 = vld [vmem:[%s8402_s4 + $0x60] sm:$0xff] }
 0x7d9   :  { %v2375_v38 = vpop.xlane.xlu1 %2374  ;;  %v2432_v15 = vmul.f32 %v5563_v25, %v2431_v5 }
 0x7da   :  { %v5565_v34 = vpop.eup %5564  ;;  %v2400_v18 = vmul.f32 0.0078125, %v2396_v4  ;;  %v2385_v59 = vadd.f32 %v2375_v38, %v2363_v39  ;;  %v675_v39 = vpop.f32.mrf.mxu0 }
 0x7db   :  { %v2438_v29 = vmul.f32 %v5565_v34, %v2415_v40  ;;  %v2351_v24 = vpop.xlane.xlu2 %2350  ;;  %v7047_v30 = vsel %vm2435_vm2, %v5563_v25, %v2432_v15  ;;  %v676_v46 = vadd.f32 %v675_v39, %v7055_v7  ;;  %v7061_v25 = vpop.f32.mrf.mxu1  ;;  %vm2444_vm4 = vweird.f32 %v5565_v34  ;;  %v192_v15 = vld [vmem:[%s8402_s4 + $0x1d0] sm:$0xff]  ;;  %v8512_v39 = vld [vmem:[#allocation41_spill] sm:$0xff] }
 0x7dc   :  { %v2408_v1 = vsub.f32 %v2400_v18, %v2404_v42  ;;  %v7049_v41 = vmul.f32 0.0078125, %v2385_v59  ;;  %v2393_v14 = vadd.f32 %v2351_v24, %v2339_v43  ;;  %v2458_v13 = vmul.f32 %v7047_v30, %v544_v48  ;;  %vm2445_vm6 = vmor %vm2443_vm5, %vm2444_vm4 }
 0x7dd   :  { %v2439_v63 = vmul.f32 %v5565_v34, %v2438_v29 }
 0x7de   :  { %v2412_v35 = vmax.f32 %v2408_v1, 0.0  ;;  %v2397_v55 = vmul.f32 0.0078125, %v2393_v14  ;;  %v2401_v52 = vmul.f32 %v7049_v41, %v7049_v41  ;;  %2488 = vperm.xlu0 %5535, %v2458_v13   ;;  %v2466_v53 = vmul.f32 %v2458_v13, %v7024_v33  ;;  %v8511_v13 = vld [vmem:[#allocation40_spill] sm:$0xff] }
 0x7df   :  { %v2440_v60 = vmul.f32 0.5, %v2439_v63  ;;  %v541_v63 = vadd.f32 %v8511_v13, %v146_v20 }
 0x7e0   :  { %v2416_v45 = vadd.f32 1e-05, %v2412_v35  ;;  %v2405_v56 = vsub.f32 %v2397_v55, %v2401_v52  ;;  %v2474_v43 = vsub.f32 %v676_v46, %v2466_v53  ;;  %v822_v35 = vadd.f32 %v8512_v39, %v146_v20  ;;  %v8513_v53 = vld [vmem:[#allocation49_spill] sm:$0xff] }
 0x7e1   :  { %v2441_v61 = vsub.f32 1.5, %v2440_v60 }
 0x7e2   :  { %5566 = vrsqrt.f32 %v2416_v45  ;;  %v2409_v57 = vmax.f32 %v2405_v56, 0.0  ;;  %vm2453_vm11 = vweird.f32 %v2416_v45  ;;  %v149_v56 = vld [vmem:[%s8402_s4 + $0x78] sm:$0xff] }
 0x7e3   :  { %v2442_v62 = vmul.f32 %v5565_v34, %v2441_v61  ;;  %v959_v40 = vpop.f32.mrf.mxu1  ;;  %v831_v61 = vadd.f32 %v8513_v53, %v149_v56 }
 0x7e4   :  { %v2413_v11 = vadd.f32 1e-05, %v2409_v57  ;;  %v960_v18 = vadd.f32 %v959_v40, %v192_v15 }
 0x7e5   :  { %v2446_v47 = vsel %vm2445_vm6, %v5565_v34, %v2442_v62  ;;  %v8515_v62 = vld [vmem:[#allocation47_spill] sm:$0xff] }
 0x7e6   :  { %5568 = vrsqrt.f32 %v2413_v11  ;;  %2536 = vperm.xlu0 %5535, %v2474_v43   ;;  %v2463_v23 = vmul.f32 %v2446_v47, %v828_v37  ;;  %vm2423_vm9 = vweird.f32 %v2413_v11 }
 0x7e8   :  { %v5567_v16 = vpop.eup %5566  ;;  %v2471_v42 = vmul.f32 %v2463_v23, %v7028_v27 }
 0x7e9   :  { %v2448_v51 = vmul.f32 %v5567_v16, %v2416_v45  ;;  %vm2454_vm8 = vweird.f32 %v5567_v16  ;;  %v190_v45 = vld [vmem:[%s8402_s4 + $0x1c0] sm:$0xff] }
 0x7ea   :  { %v2479_v24 = vsub.f32 %v960_v18, %v2471_v42  ;;  %vm2455_vm12 = vmor %vm2453_vm11, %vm2454_vm8  ;;  %v954_v37 = vadd.f32 %v7045_v8, %v190_v45  ;;  %v193_v8 = vld [vmem:[%s8402_s4 + $0x1d8] sm:$0xff]  ;;  %v673_v13 = vadd.f32 %v7032_v58, %v190_v45 }
 0x7eb   :  { %v2449_v2 = vmul.f32 %v5567_v16, %v2448_v51  ;;  %v547_v51 = vadd.f32 %v8515_v62, %v148_v28  ;;  %v8516_v28 = vld [vmem:[#allocation48_spill] sm:$0xff] }
 0x7ec   :  { %v5569_v5 = vpop.eup %5568  ;;  %v550_v40 = vadd.f32 %v8516_v28, %v149_v56 }
 0x7ed   :  { %v2450_v4 = vmul.f32 0.5, %v2449_v2  ;;  %v2418_v38 = vmul.f32 %v5569_v5, %v2413_v11  ;;  %vm2424_vm7 = vweird.f32 %v5569_v5  ;;  %v8514_v11 = vld [vmem:[#allocation44_spill] sm:$0xff] }
 0x7ee   :  { %2513 = vperm.xlu0 %5535, %v2463_v23   ;;  %vm2425_vm10 = vmor %vm2423_vm9, %vm2424_vm7  ;;  %v825_v43 = vadd.f32 %v8514_v11, %v7039_v0  ;;  %v678_v23 = vpop.f32.mrf.mxu0 }
 0x7ef   :  { %v2419_v48 = vmul.f32 %v5569_v5, %v2418_v38  ;;  %v2451_v59 = vsub.f32 1.5, %v2450_v4  ;;  %v679_v4 = vadd.f32 %v678_v23, %v192_v15  ;;  %v5420_v15 = vld [vmem:[%s8407_s9 + $0x68] sm:$0xff] }
 0x7f0   :  { %v2462_v2 = vmul.f32 %v7047_v30, %v825_v43 }
 0x7f1   :  { %v2420_v29 = vmul.f32 0.5, %v2419_v48  ;;  %v2452_v1 = vmul.f32 %v5567_v16, %v2451_v59 }
 0x7f3   :  { %v2421_v34 = vsub.f32 1.5, %v2420_v29  ;;  %v2456_v46 = vsel %vm2455_vm12, %v5567_v16, %v2452_v1  ;;  %v2459_v16 = vmul.f32 %v2446_v47, %v547_v51  ;;  %v962_v47 = vpop.f32.mrf.mxu1  ;;  %v2470_v1 = vmul.f32 %v2462_v2, %v7024_v33  ;;  %v5419_v33 = vld [vmem:[%s8407_s9 + $0x60] sm:$0xff] }
 0x7f4   :  { %v2464_v57 = vmul.f32 %v2456_v46, %v831_v61  ;;  %v2460_v18 = vmul.f32 %v2456_v46, %v550_v40  ;;  %v963_v59 = vadd.f32 %v962_v47, %v193_v8 }
 0x7f5   :  { %v2422_v14 = vmul.f32 %v5569_v5, %v2421_v34  ;;  %v2467_v0 = vmul.f32 %v2459_v16, %v7028_v27 }
 0x7f6   :  { %2561 = vperm.xlu0 %5535, %v2479_v24   ;;  %v681_v30 = vpop.f32.mrf.mxu0  ;;  %v2468_v27 = vmul.f32 %v2460_v18, %v7034_v19  ;;  %v2472_v29 = vmul.f32 %v2464_v57, %v7034_v19  ;;  %v957_v24 = vadd.f32 %v7061_v25, %v7055_v7  ;;  %v5422_v19 = vld [vmem:[%s8407_s9 + $0x78] sm:$0xff] }
 0x7f7   :  { %v2426_v55 = vsel %vm2425_vm10, %v5569_v5, %v2422_v14  ;;  %v2475_v48 = vsub.f32 %v679_v4, %v2467_v0  ;;  %v682_v42 = vadd.f32 %v681_v30, %v193_v8 }
 0x7f8   :  { %v2461_v52 = vmul.f32 %v2426_v55, %v822_v35  ;;  %v2457_v60 = vmul.f32 %v2426_v55, %v541_v63  ;;  %v2480_v34 = vsub.f32 %v963_v59, %v2472_v29  ;;  %v2478_v63 = vsub.f32 %v957_v24, %v2470_v1  ;;  %v5421_v35 = vld [vmem:[%s8407_s9 + $0x70] sm:$0xff]  ;;  %v5418_v59 = vld [vmem:[%s8406_s8 + $0x78] sm:$0xff] }
 0x7f9   :  { %v2476_v20 = vsub.f32 %v682_v42, %v2468_v27 }
 0x7fa   :  { %2503 = vperm.xlu2 %5537, %v2461_v52   ;;  %2483 = vperm.xlu1 %5536, %v2457_v60   ;;  %v2469_v5 = vmul.f32 %v2461_v52, %v7049_v41  ;;  %v2465_v14 = vmul.f32 %v2457_v60, %v7049_v41 }
 0x7fc   :  { %v2477_v38 = vsub.f32 %v954_v37, %v2469_v5  ;;  %v2473_v39 = vsub.f32 %v673_v13, %v2465_v14 }
 0x7fe   :  { %2518 = vperm.xlu0 %5535, %v2464_v57  }
 0x802   :  { %2493 = vperm.xlu2 %5537, %v2459_v16   ;;  %2508 = vperm.xlu1 %5536, %v2462_v2  }
 0x806   :  { %2551 = vperm.xlu0 %5535, %v2477_v38  }
 0x80a   :  { %2541 = vperm.xlu2 %5537, %v2475_v48   ;;  %2498 = vperm.xlu1 %5536, %v2460_v18  }
 0x80e   :  { %2602 = vperm.xlu0 %5535, %v5420_v15  }
 0x812   :  { %2566 = vperm.xlu2 %5537, %v2480_v34   ;;  %2546 = vperm.xlu1 %5536, %v2476_v20   ;;  %v104_v20 = vld [vmem:[%s8401_s3 + $0x1e0] sm:$0xff] }
 0x813   :  { %5241 = vmatmul.msk.f32.gmra.mxu0 %vm222_vm0, %v104_v20  ;;  %5329 = vmatmul.msk.f32.gmra.mxu1 %vm222_vm0, %v104_v20 }
 0x81a   :  { %2556 = vperm.xlu1 %5536, %v2478_v63   ;;  %2531 = vperm.xlu2 %5537, %v2473_v39  }
 0x822   :  { %2612 = vperm.xlu1 %5536, %v5422_v19   ;;  %2607 = vperm.xlu2 %5537, %v5421_v35   ;;  %v105_v19 = vld [vmem:[%s8401_s3 + $0x1e8] sm:$0xff] }
 0x823   :  { %5242 = vmatmul.msk.f32.gmra.mxu0 %vm222_vm0, %v105_v19  ;;  %5330 = vmatmul.msk.f32.gmra.mxu1 %vm222_vm0, %v105_v19 }
 0x82a   :  { %2597 = vperm.xlu1 %5536, %v5419_v33  }
 0x850   :  { %v2489_v58 = vpop.permute.xlu0 %2488 }
 0x851   :  { %v2522_v23 = vmul.f32 %v2489_v58, %v6962_v44 }
 0x854   :  { %v2504_v41 = vpop.permute.xlu2 %2503 }
 0x855   :  { %v2525_v8 = vmul.f32 %v2504_v41, %v7013_v21  ;;  %v5417_v21 = vld [vmem:[%s8406_s8 + $0x70] sm:$0xff] }
 0x858   :  { %v2537_v7 = vpop.permute.xlu0 %2536 }
 0x85c   :  { %v2494_v25 = vpop.permute.xlu2 %2493 }
 0x85d   :  { %v2523_v2 = vmul.f32 %v2494_v25, %v6978_v12 }
 0x860   :  { %v2514_v55 = vpop.permute.xlu0 %2513 }
 0x861   :  { %v2527_v53 = vmul.f32 %v2514_v55, %v6985_v49 }
 0x864   :  { %v2542_v52 = vpop.permute.xlu2 %2541 }
 0x865   :  { %v2571_v4 = vadd.f32 %v2542_v52, %v2523_v2 }
 0x867   :  { %v2579_v40 = vmax.f32 %v2571_v4, 0.0 }
 0x868   :  { %v2562_v60 = vpop.permute.xlu0 %2561 }
 0x869   :  { %v2575_v11 = vadd.f32 %v2562_v60, %v2527_v53  ;;  %v106_v60 = vld [vmem:[%s8401_s3 + $0x1f0] sm:$0xff] }
 0x86a   :  { %5243 = vmatmul.msk.f32.gmra.mxu0 %vm222_vm0, %v106_v60  ;;  %5331 = vmatmul.msk.f32.gmra.mxu1 %vm222_vm0, %v106_v60 }
 0x86b   :  { %v2583_v45 = vmax.f32 %v2575_v11, 0.0 }
 0x86c   :  { %v2484_v56 = vpop.permute.xlu1 %2483  ;;  %v2567_v57 = vpop.permute.xlu2 %2566 }
 0x86d   :  { %v2521_v38 = vmul.f32 %v2484_v56, %v6953_v9  ;;  %v5415_v9 = vld [vmem:[%s8406_s8 + $0x60] sm:$0xff] }
 0x870   :  { %v2519_v46 = vpop.permute.xlu0 %2518 }
 0x871   :  { %v2528_v61 = vmul.f32 %v2519_v46, %v7002_v54  ;;  %v2570_v54 = vadd.f32 %v2537_v7, %v2522_v23 }
 0x873   :  { %v2576_v43 = vadd.f32 %v2567_v57, %v2528_v61  ;;  %v2578_v30 = vmax.f32 %v2570_v54, 0.0 }
 0x874   :  { %v2509_v62 = vpop.permute.xlu1 %2508  ;;  %v2532_v0 = vpop.permute.xlu2 %2531 }
 0x875   :  { %v2584_v51 = vmax.f32 %v2576_v43, 0.0  ;;  %v2569_v48 = vadd.f32 %v2532_v0, %v2521_v38  ;;  %v2526_v12 = vmul.f32 %v2509_v62, %v6968_v17  ;;  %v5416_v17 = vld [vmem:[%s8406_s8 + $0x68] sm:$0xff] }
 0x877   :  { %2668 = vmatpush.msra.mxu3 %v2584_v51  ;;  %v2577_v47 = vmax.f32 %v2569_v48, 0.0 }
 0x878   :  { %v2552_v18 = vpop.permute.xlu0 %2551 }
 0x879   :  { %2669 = vmatpush.msra.mxu3 %v2583_v45  ;;  %v2573_v44 = vadd.f32 %v2552_v18, %v2525_v8 }
 0x87b   :  { %v2581_v27 = vmax.f32 %v2573_v44, 0.0 }
 0x87c   :  { %v2499_v37 = vpop.permute.xlu1 %2498  ;;  %v2608_v46 = vpop.permute.xlu2 %2607 }
 0x87d   :  { %v2524_v16 = vmul.f32 %v2499_v37, %v6997_v36  ;;  %v107_v37 = vld [vmem:[%s8401_s3 + $0x1f8] sm:$0xff] }
 0x87e   :  { %5244 = vmatmul.msk.f32.gmra.mxu0 %vm222_vm0, %v107_v37  ;;  %5332 = vmatmul.msk.f32.gmra.mxu1 %vm222_vm0, %v107_v37 }
 0x880   :  { %v2603_v33 = vpop.permute.xlu0 %2602 }
 0x884   :  { %v2547_v5 = vpop.permute.xlu1 %2546 }
 0x885   :  { %v2572_v49 = vadd.f32 %v2547_v5, %v2524_v16 }
 0x887   :  { %v2580_v28 = vmax.f32 %v2572_v49, 0.0 }
 0x889   :  { %2639 = vmatpush.msra.mxu2 %v2580_v28 }
 0x88b   :  { %2640 = vmatpush.msra.mxu2 %v2579_v40 }
 0x88c   :  { %v2557_v36 = vpop.permute.xlu1 %2556 }
 0x88d   :  { %v2574_v15 = vadd.f32 %v2557_v36, %v2526_v12  ;;  %2641 = vmatpush.msra.mxu2 %v2578_v30 }
 0x88f   :  { %v2582_v42 = vmax.f32 %v2574_v15, 0.0  ;;  %2642 = vmatpush.msra.mxu2 %v2577_v47 }
 0x890   :  { %5423 = vmatmul.msk.f32.vlgmr.msra.gmra.mxu2 %vm1538_vm1, %v5415_v9 }
 0x891   :  { %2670 = vmatpush.msra.mxu3 %v2582_v42 }
 0x893   :  { %2671 = vmatpush.msra.mxu3 %v2581_v27 }
 0x894   :  { %5427 = vmatmul.msk.f32.vlgmr.msra.gmra.mxu3 %vm1538_vm1, %v5415_v9  ;;  %v2613_v29 = vpop.permute.xlu1 %2612 }
 0x898   :  { %5424 = vmatmul.msk.f32.gmra.mxu2 %vm1538_vm1, %v5416_v17 }
 0x89c   :  { %5428 = vmatmul.msk.f32.gmra.mxu3 %vm1538_vm1, %v5416_v17  ;;  %v2598_v34 = vpop.permute.xlu1 %2597 }
 0x8a0   :  { %5425 = vmatmul.msk.f32.gmra.mxu2 %vm1538_vm1, %v5417_v21 }
 0x8a4   :  { %5429 = vmatmul.msk.f32.gmra.mxu3 %vm1538_vm1, %v5417_v21 }
 0x8a8   :  { %5426 = vmatmul.msk.f32.gmra.mxu2 %vm1538_vm1, %v5418_v59 }
 0x8ac   :  { %5430 = vmatmul.msk.f32.gmra.mxu3 %vm1538_vm1, %v5418_v59 }
 0x913   :  { %v2644_v24 = vpop.f32.mrf.mxu2 }
 0x914   :  { %v2645_v1 = vadd.f32 %v2644_v24, %v2598_v34 }
 0x916   :  { %v7147_v14 = vadd.f32 %v2645_v1, %v6756_v22 }
 0x917   :  { %v2673_v13 = vpop.f32.mrf.mxu3 }
 0x918   :  { %v2674_v63 = vadd.f32 %v2673_v13, %v2598_v34  ;;  %v2725_v39 = vsel %vm1261_vm3, %v7147_v14, 0.0  ;;  %v2693_v36 = vmul.f32 %v7147_v14, %v7147_v14 }
 0x919   :  { %2726 = vadd.xlane.f32.xlu1 %v2725_v39 }
 0x91a   :  { %v7155_v35 = vadd.f32 %v2674_v63, %v6751_v10  ;;  %v2701_v47 = vsel %vm1261_vm3, %v2693_v36, 0.0 }
 0x91b   :  { %v2647_v58 = vpop.f32.mrf.mxu2 }
 0x91c   :  { %v2648_v22 = vadd.f32 %v2647_v58, %v2603_v33  ;;  %v2737_v41 = vsel %vm1261_vm3, %v7155_v35, 0.0  ;;  %v2697_v18 = vmul.f32 %v7155_v35, %v7155_v35 }
 0x91d   :  { %2738 = vadd.xlane.f32.xlu0 %v2737_v41 }
 0x91e   :  { %v7162_v7 = vadd.f32 %v2648_v22, %v6771_v50  ;;  %v2713_v30 = vsel %vm1261_vm3, %v2697_v18, 0.0 }
 0x91f   :  { %v2676_v25 = vpop.f32.mrf.mxu3 }
 0x920   :  { %v2677_v55 = vadd.f32 %v2676_v25, %v2603_v33  ;;  %v2728_v10 = vsel %vm1261_vm3, %v7162_v7, 0.0  ;;  %v2694_v52 = vmul.f32 %v7162_v7, %v7162_v7 }
 0x921   :  { %2729 = vadd.xlane.f32.xlu2 %v2728_v10 }
 0x922   :  { %v7172_v56 = vadd.f32 %v2677_v55, %v6766_v32  ;;  %v2704_v61 = vsel %vm1261_vm3, %v2694_v52, 0.0 }
 0x923   :  { %v2650_v53 = vpop.f32.mrf.mxu2 }
 0x924   :  { %v2651_v50 = vadd.f32 %v2650_v53, %v2608_v46  ;;  %v2740_v57 = vsel %vm1261_vm3, %v7172_v56, 0.0  ;;  %v2698_v11 = vmul.f32 %v7172_v56, %v7172_v56 }
 0x925   :  { %2705 = vadd.xlane.f32.xlu0 %v2704_v61  ;;  %2741 = vadd.xlane.f32.xlu1 %v2740_v57  ;;  %v7233_v57 = vpop.f32.mrf.mxu0 }
 0x926   :  { %v7182_v32 = vadd.f32 %v2651_v50, %v6788_v31  ;;  %v2716_v51 = vsel %vm1261_vm3, %v2698_v11, 0.0 }
 0x927   :  { %v2679_v43 = vpop.f32.mrf.mxu3 }
 0x928   :  { %v2680_v62 = vadd.f32 %v2679_v43, %v2608_v46  ;;  %v2695_v45 = vmul.f32 %v7182_v32, %v7182_v32  ;;  %v2731_v5 = vsel %vm1261_vm3, %v7182_v32, 0.0 }
 0x929   :  { %2717 = vadd.xlane.f32.xlu2 %v2716_v51 }
 0x92a   :  { %v7193_v31 = vadd.f32 %v2680_v62, %v6797_v3  ;;  %v2707_v23 = vsel %vm1261_vm3, %v2695_v45, 0.0  ;;  %v7238_v45 = vld [vmem:[%s8402_s4 + $0x88] sm:$0xff] }
 0x92b   :  { %v2653_v2 = vpop.f32.mrf.mxu2 }
 0x92c   :  { %v2654_v16 = vadd.f32 %v2653_v2, %v2613_v29  ;;  %v2743_v49 = vsel %vm1261_vm3, %v7193_v31, 0.0  ;;  %v2699_v0 = vmul.f32 %v7193_v31, %v7193_v31 }
 0x92d   :  { %2732 = vadd.xlane.f32.xlu0 %v2731_v5  ;;  %2708 = vadd.xlane.f32.xlu1 %v2707_v23  ;;  %v8517_v23 = vld [vmem:[#allocation52_spill] sm:$0xff] }
 0x92e   :  { %v7199_v4 = vadd.f32 %v2654_v16, %v6805_v6  ;;  %v2719_v28 = vsel %vm1261_vm3, %v2699_v0, 0.0 }
 0x92f   :  { %v2682_v54 = vpop.f32.mrf.mxu3 }
 0x930   :  { %v2696_v3 = vmul.f32 %v7199_v4, %v7199_v4  ;;  %v2683_v38 = vadd.f32 %v2682_v54, %v2613_v29  ;;  %v2734_v48 = vsel %vm1261_vm3, %v7199_v4, 0.0  ;;  %v7244_v54 = vpop.f32.mrf.mxu1 }
 0x931   :  { %2744 = vadd.xlane.f32.xlu2 %v2743_v49  ;;  %v556_v49 = vadd.f32 %v8517_v23, %v7238_v45  ;;  %v150_v23 = vld [vmem:[%s8402_s4 + $0x80] sm:$0xff] }
 0x932   :  { %v2710_v40 = vsel %vm1261_vm3, %v2696_v3, 0.0  ;;  %v7210_v6 = vadd.f32 %v2683_v38, %v6812_v26 }
 0x934   :  { %v2746_v8 = vsel %vm1261_vm3, %v7210_v6, 0.0  ;;  %v2700_v12 = vmul.f32 %v7210_v6, %v7210_v6 }
 0x935   :  { %2720 = vadd.xlane.f32.xlu0 %v2719_v28  ;;  %2711 = vadd.xlane.f32.xlu1 %v2710_v40 }
 0x936   :  { %v2722_v26 = vsel %vm1261_vm3, %v2700_v12, 0.0 }
 0x939   :  { %2735 = vadd.xlane.f32.xlu2 %v2734_v48 }
 0x93d   :  { %2747 = vadd.xlane.f32.xlu0 %v2746_v8  ;;  %2714 = vadd.xlane.f32.xlu1 %v2713_v30  ;;  %v7252_v8 = vld [vmem:[%s8402_s4 + $0x1e8] sm:$0xff]  ;;  %v687_v30 = vpop.f32.mrf.mxu0 }
 0x941   :  { %2723 = vadd.xlane.f32.xlu2 %v2722_v26 }
 0x949   :  { %2702 = vadd.xlane.f32.xlu2 %v2701_v47 }
 0x98c   :  { %v2727_v44 = vpop.xlane.xlu1 %2726 }
 0x990   :  { %v2739_v15 = vpop.xlane.xlu0 %2738 }
 0x991   :  { %v2749_v0 = vadd.f32 %v2739_v15, %v2727_v44 }
 0x993   :  { %v7254_v12 = vmul.f32 0.0078125, %v2749_v0 }
 0x994   :  { %v2730_v9 = vpop.xlane.xlu2 %2729 }
 0x998   :  { %v2706_v42 = vpop.xlane.xlu0 %2705  ;;  %v2742_v27 = vpop.xlane.xlu1 %2741 }
 0x999   :  { %v2750_v17 = vadd.f32 %v2742_v27, %v2730_v9  ;;  %v688_v9 = vadd.f32 %v687_v30, %v7252_v8 }
 0x99b   :  { %v7225_v21 = vmul.f32 0.0078125, %v2750_v17 }
 0x99c   :  { %v2718_v59 = vpop.xlane.xlu2 %2717 }
 0x99d   :  { %v2758_v29 = vadd.f32 %v2718_v59, %v2706_v42  ;;  %v2766_v20 = vmul.f32 %v7225_v21, %v7225_v21  ;;  %v2765_v59 = vmul.f32 %v7254_v12, %v7254_v12 }
 0x99f   :  { %v2762_v34 = vmul.f32 0.0078125, %v2758_v29 }
 0x9a0   :  { %v2733_v24 = vpop.xlane.xlu0 %2732  ;;  %v2709_v58 = vpop.xlane.xlu1 %2708 }
 0x9a1   :  { %v2770_v1 = vsub.f32 %v2762_v34, %v2766_v20 }
 0x9a3   :  { %v2774_v13 = vmax.f32 %v2770_v1, 0.0 }
 0x9a4   :  { %v2745_v63 = vpop.xlane.xlu2 %2744 }
 0x9a5   :  { %v2778_v39 = vadd.f32 1e-05, %v2774_v13  ;;  %v2751_v19 = vadd.f32 %v2745_v63, %v2733_v24  ;;  %v7262_v13 = vpop.f32.mrf.mxu1 }
 0x9a7   :  { %5570 = vrsqrt.f32 %v2778_v39  ;;  %v7229_v33 = vmul.f32 0.0078125, %v2751_v19  ;;  %vm2797_vm14 = vweird.f32 %v2778_v39  ;;  %v152_v19 = vld [vmem:[%s8402_s4 + $0x90] sm:$0xff] }
 0x9a8   :  { %v2721_v22 = vpop.xlane.xlu0 %2720  ;;  %v2712_v62 = vpop.xlane.xlu1 %2711 }
 0x9a9   :  { %v2759_v41 = vadd.f32 %v2721_v22, %v2709_v58  ;;  %v2767_v55 = vmul.f32 %v7229_v33, %v7229_v33 }
 0x9ab   :  { %v2763_v25 = vmul.f32 0.0078125, %v2759_v41 }
 0x9ac   :  { %v2736_v10 = vpop.xlane.xlu2 %2735 }
 0x9ad   :  { %v5571_v52 = vpop.eup %5570  ;;  %v2771_v60 = vsub.f32 %v2763_v25, %v2767_v55  ;;  %v8518_v25 = vld [vmem:[#allocation54_spill] sm:$0xff] }
 0x9ae   :  { %v2792_v46 = vmul.f32 %v5571_v52, %v2778_v39  ;;  %vm2798_vm13 = vweird.f32 %v5571_v52  ;;  %v559_v55 = vadd.f32 %v8518_v25, %v152_v19 }
 0x9af   :  { %v2775_v53 = vmax.f32 %v2771_v60, 0.0  ;;  %vm2799_vm15 = vmor %vm2797_vm14, %vm2798_vm13 }
 0x9b0   :  { %v2793_v50 = vmul.f32 %v5571_v52, %v2792_v46  ;;  %v2748_v61 = vpop.xlane.xlu0 %2747  ;;  %v2715_v47 = vpop.xlane.xlu1 %2714 }
 0x9b1   :  { %v2779_v11 = vadd.f32 1e-05, %v2775_v53  ;;  %v2752_v51 = vadd.f32 %v2748_v61, %v2736_v10  ;;  %v8519_v10 = vld [vmem:[#allocation55_spill] sm:$0xff] }
 0x9b2   :  { %v2794_v43 = vmul.f32 0.5, %v2793_v50  ;;  %v196_v53 = vld [vmem:[%s8402_s4 + $0x1f0] sm:$0xff]  ;;  %v971_v50 = vpop.f32.mrf.mxu1 }
 0x9b3   :  { %5572 = vrsqrt.f32 %v2779_v11  ;;  %v7242_v3 = vmul.f32 0.0078125, %v2752_v51  ;;  %vm2807_vm4 = vweird.f32 %v2779_v11 }
 0x9b4   :  { %v2795_v37 = vsub.f32 1.5, %v2794_v43  ;;  %v2724_v2 = vpop.xlane.xlu2 %2723 }
 0x9b5   :  { %v2760_v16 = vadd.f32 %v2724_v2, %v2712_v62  ;;  %v2768_v26 = vmul.f32 %v7242_v3, %v7242_v3 }
 0x9b6   :  { %v2796_v5 = vmul.f32 %v5571_v52, %v2795_v37 }
 0x9b7   :  { %v2764_v40 = vmul.f32 0.0078125, %v2760_v16 }
 0x9b8   :  { %v7246_v38 = vsel %vm2799_vm15, %v5571_v52, %v2796_v5  ;;  %v840_v52 = vadd.f32 %v8519_v10, %v152_v19 }
 0x9b9   :  { %v5573_v28 = vpop.eup %5572  ;;  %v2822_v48 = vmul.f32 %v7246_v38, %v556_v49  ;;  %v2772_v15 = vsub.f32 %v2764_v40, %v2768_v26  ;;  %v8520_v40 = vld [vmem:[#allocation50_spill] sm:$0xff] }
 0x9ba   :  { %v2802_v18 = vmul.f32 %v5573_v28, %v2779_v11  ;;  %vm2808_vm2 = vweird.f32 %v5573_v28  ;;  %v972_v11 = vadd.f32 %v971_v50, %v196_v53  ;;  %v194_v26 = vld [vmem:[%s8402_s4 + $0x1e0] sm:$0xff]  ;;  %v974_v50 = vpop.f32.mrf.mxu1 }
 0x9bb   :  { %2852 = vperm.xlu1 %5536, %v2822_v48   ;;  %v2830_v42 = vmul.f32 %v2822_v48, %v7225_v21  ;;  %v2776_v34 = vmax.f32 %v2772_v15, 0.0  ;;  %vm2809_vm5 = vmor %vm2807_vm4, %vm2808_vm2  ;;  %v553_v48 = vadd.f32 %v8520_v40, %v150_v23 }
 0x9bc   :  { %v2803_v36 = vmul.f32 %v5573_v28, %v2802_v18  ;;  %v2703_v44 = vpop.xlane.xlu2 %2702  ;;  %v8521_v18 = vld [vmem:[#allocation51_spill] sm:$0xff] }
 0x9bd   :  { %v2757_v27 = vadd.f32 %v2715_v47, %v2703_v44  ;;  %v2838_v24 = vsub.f32 %v688_v9, %v2830_v42  ;;  %v2780_v58 = vadd.f32 1e-05, %v2776_v34  ;;  %v834_v30 = vadd.f32 %v8521_v18, %v150_v23  ;;  %v8522_v34 = vld [vmem:[#allocation53_spill] sm:$0xff] }
 0x9be   :  { %v2804_v17 = vmul.f32 0.5, %v2803_v36  ;;  %v966_v47 = vadd.f32 %v7244_v54, %v194_v26  ;;  %v685_v42 = vadd.f32 %v7233_v57, %v194_v26  ;;  %v153_v57 = vld [vmem:[%s8402_s4 + $0x98] sm:$0xff] }
 0x9bf   :  { %v2761_v29 = vmul.f32 0.0078125, %v2757_v27  ;;  %vm2817_vm10 = vweird.f32 %v2780_v58 }
 0x9c0   :  { %v2805_v20 = vsub.f32 1.5, %v2804_v17 }
 0x9c1   :  { %v2769_v1 = vsub.f32 %v2761_v29, %v2765_v59 }
 0x9c2   :  { %v2806_v63 = vmul.f32 %v5573_v28, %v2805_v20 }
 0x9c3   :  { %v2773_v39 = vmax.f32 %v2769_v1, 0.0  ;;  %2900 = vperm.xlu1 %5536, %v2838_v24   ;;  %v837_v24 = vadd.f32 %v8522_v34, %v7238_v45  ;;  %v690_v1 = vpop.f32.mrf.mxu0 }
 0x9c4   :  { %v2810_v41 = vsel %vm2809_vm5, %v5573_v28, %v2806_v63 }
 0x9c5   :  { %v2777_v22 = vadd.f32 1e-05, %v2773_v39  ;;  %v2823_v60 = vmul.f32 %v2810_v41, %v559_v55  ;;  %v2827_v46 = vmul.f32 %v2810_v41, %v840_v52  ;;  %v2826_v54 = vmul.f32 %v7246_v38, %v837_v24  ;;  %v8523_v38 = vld [vmem:[#allocation56_spill] sm:$0xff]  ;;  %v8524_v41 = vld [vmem:[#allocation57_spill] sm:$0xff] }
 0x9c6   :  { %v691_v39 = vadd.f32 %v690_v1, %v196_v53  ;;  %v843_v25 = vadd.f32 %v8524_v41, %v153_v57 }
 0x9c7   :  { %5574 = vrsqrt.f32 %v2777_v22  ;;  %v2835_v43 = vmul.f32 %v2827_v46, %v7229_v33  ;;  %vm2787_vm7 = vweird.f32 %v2777_v22  ;;  %v2831_v45 = vmul.f32 %v2823_v60, %v7229_v33 }
 0x9c8   :  { %5576 = vrsqrt.f32 %v2780_v58 }
 0x9c9   :  { %v2843_v2 = vsub.f32 %v972_v11, %v2835_v43  ;;  %v2839_v55 = vsub.f32 %v691_v39, %v2831_v45  ;;  %v2834_v11 = vmul.f32 %v2826_v54, %v7225_v21  ;;  %v5437_v21 = vld [vmem:[%s8407_s9 + $0x90] sm:$0xff] }
 0x9cb   :  { %2857 = vperm.xlu1 %5536, %v2823_v60  }
 0x9cd   :  { %v5575_v61 = vpop.eup %5574 }
 0x9ce   :  { %v2782_v62 = vmul.f32 %v5575_v61, %v2777_v22  ;;  %v5577_v51 = vpop.eup %5576  ;;  %vm2788_vm6 = vweird.f32 %v5575_v61  ;;  %v562_v22 = vadd.f32 %v8523_v38, %v153_v57 }
 0x9cf   :  { %v2812_v16 = vmul.f32 %v5577_v51, %v2780_v58  ;;  %vm2789_vm8 = vmor %vm2787_vm7, %vm2788_vm6  ;;  %vm2818_vm9 = vweird.f32 %v5577_v51  ;;  %v197_v58 = vld [vmem:[%s8402_s4 + $0x1f8] sm:$0xff] }
 0x9d0   :  { %v2783_v37 = vmul.f32 %v5575_v61, %v2782_v62  ;;  %vm2819_vm11 = vmor %vm2817_vm10, %vm2818_vm9  ;;  %v975_v43 = vadd.f32 %v974_v50, %v197_v58 }
 0x9d1   :  { %v2813_v0 = vmul.f32 %v5577_v51, %v2812_v16  ;;  %v5435_v16 = vld [vmem:[%s8407_s9 + $0x80] sm:$0xff] }
 0x9d2   :  { %v2784_v5 = vmul.f32 0.5, %v2783_v37 }
 0x9d3   :  { %2925 = vperm.xlu1 %5536, %v2843_v2   ;;  %v2814_v9 = vmul.f32 0.5, %v2813_v0  ;;  %v5438_v2 = vld [vmem:[%s8407_s9 + $0x98] sm:$0xff] }
 0x9d4   :  { %v2785_v49 = vsub.f32 1.5, %v2784_v5 }
 0x9d5   :  { %v2815_v20 = vsub.f32 1.5, %v2814_v9 }
 0x9d6   :  { %v2786_v28 = vmul.f32 %v5575_v61, %v2785_v49 }
 0x9d7   :  { %v2816_v63 = vmul.f32 %v5577_v51, %v2815_v20 }
 0x9d8   :  { %v2790_v36 = vsel %vm2789_vm8, %v5575_v61, %v2786_v28  ;;  %v969_v61 = vadd.f32 %v7262_v13, %v7252_v8 }
 0x9d9   :  { %v2825_v44 = vmul.f32 %v2790_v36, %v834_v30  ;;  %v2821_v15 = vmul.f32 %v2790_v36, %v553_v48  ;;  %v2820_v19 = vsel %vm2819_vm11, %v5577_v51, %v2816_v63 }
 0x9da   :  { %v2824_v10 = vmul.f32 %v2820_v19, %v562_v22  ;;  %v2828_v52 = vmul.f32 %v2820_v19, %v843_v25  ;;  %v2842_v51 = vsub.f32 %v969_v61, %v2834_v11  ;;  %v108_v61 = vld [vmem:[%s8401_s3 + $0x200] sm:$0xff] }
 0x9db   :  { %2867 = vperm.xlu0 %5535, %v2825_v44   ;;  %2847 = vperm.xlu2 %5537, %v2821_v15   ;;  %v2833_v27 = vmul.f32 %v2825_v44, %v7254_v12  ;;  %v2829_v17 = vmul.f32 %v2821_v15, %v7254_v12  ;;  %v5436_v12 = vld [vmem:[%s8407_s9 + $0x88] sm:$0xff] }
 0x9dc   :  { %v2832_v33 = vmul.f32 %v2824_v10, %v7242_v3  ;;  %v2836_v62 = vmul.f32 %v2828_v52, %v7242_v3  ;;  %5245 = vmatmul.msk.f32.gmra.mxu0 %vm222_vm0, %v108_v61  ;;  %5333 = vmatmul.msk.f32.gmra.mxu1 %vm222_vm0, %v108_v61 }
 0x9dd   :  { %v2841_v59 = vsub.f32 %v966_v47, %v2833_v27  ;;  %v2837_v29 = vsub.f32 %v685_v42, %v2829_v17 }
 0x9de   :  { %v2844_v37 = vsub.f32 %v975_v43, %v2836_v62 }
 0x9df   :  { %2915 = vperm.xlu1 %5536, %v2841_v59  }
 0x9e3   :  { %2877 = vperm.xlu0 %5535, %v2827_v46   ;;  %2872 = vperm.xlu2 %5537, %v2826_v54   ;;  %v693_v46 = vpop.f32.mrf.mxu0 }
 0x9e4   :  { %v694_v53 = vadd.f32 %v693_v46, %v197_v58  ;;  %v5432_v58 = vld [vmem:[%s8406_s8 + $0x88] sm:$0xff]  ;;  %v5433_v46 = vld [vmem:[%s8406_s8 + $0x90] sm:$0xff] }
 0x9e6   :  { %v2840_v60 = vsub.f32 %v694_v53, %v2832_v33  ;;  %v5434_v53 = vld [vmem:[%s8406_s8 + $0x98] sm:$0xff] }
 0x9e7   :  { %2966 = vperm.xlu1 %5536, %v5436_v12  }
 0x9eb   :  { %2905 = vperm.xlu0 %5535, %v2839_v55   ;;  %2882 = vperm.xlu2 %5537, %v2828_v52  }
 0x9f3   :  { %2862 = vperm.xlu0 %5535, %v2824_v10   ;;  %2910 = vperm.xlu2 %5537, %v2840_v60   ;;  %v5431_v10 = vld [vmem:[%s8406_s8 + $0x80] sm:$0xff] }
 0x9fb   :  { %2930 = vperm.xlu0 %5535, %v2844_v37   ;;  %2920 = vperm.xlu2 %5537, %v2842_v51  }
 0xa03   :  { %2976 = vperm.xlu2 %5537, %v5438_v2   ;;  %2895 = vperm.xlu0 %5535, %v2837_v29  }
 0xa0b   :  { %2961 = vperm.xlu2 %5537, %v5435_v16   ;;  %2971 = vperm.xlu0 %5535, %v5437_v21   ;;  %v109_v21 = vld [vmem:[%s8401_s3 + $0x208] sm:$0xff] }
 0xa0c   :  { %5246 = vmatmul.msk.f32.gmra.mxu0 %vm222_vm0, %v109_v21  ;;  %5334 = vmatmul.msk.f32.gmra.mxu1 %vm222_vm0, %v109_v21 }
 0xa2d   :  { %v2853_v8 = vpop.permute.xlu1 %2852 }
 0xa2e   :  { %v2886_v47 = vmul.f32 %v2853_v8, %v7162_v7 }
 0xa35   :  { %v2848_v3 = vpop.permute.xlu2 %2847  ;;  %v2901_v23 = vpop.permute.xlu1 %2900 }
 0xa36   :  { %v2934_v9 = vadd.f32 %v2901_v23, %v2886_v47  ;;  %v2885_v38 = vmul.f32 %v2848_v3, %v7147_v14 }
 0xa38   :  { %v2942_v34 = vmax.f32 %v2934_v9, 0.0 }
 0xa3d   :  { %v2873_v5 = vpop.permute.xlu2 %2872  ;;  %v2858_v28 = vpop.permute.xlu1 %2857 }
 0xa3e   :  { %v2887_v30 = vmul.f32 %v2858_v28, %v7182_v32  ;;  %v2890_v24 = vmul.f32 %v2873_v5, %v7172_v56  ;;  %v110_v28 = vld [vmem:[%s8401_s3 + $0x210] sm:$0xff] }
 0xa3f   :  { %5247 = vmatmul.msk.f32.gmra.mxu0 %vm222_vm0, %v110_v28  ;;  %5335 = vmatmul.msk.f32.gmra.mxu1 %vm222_vm0, %v110_v28 }
 0xa45   :  { %v2883_v0 = vpop.permute.xlu2 %2882  ;;  %v2926_v36 = vpop.permute.xlu1 %2925 }
 0xa46   :  { %v2892_v17 = vmul.f32 %v2883_v0, %v7210_v6 }
 0xa4d   :  { %v2868_v13 = vpop.permute.xlu0 %2867  ;;  %v2911_v48 = vpop.permute.xlu2 %2910 }
 0xa4e   :  { %v2889_v57 = vmul.f32 %v2868_v13, %v7155_v35 }
 0xa51   :  { %v2916_v63 = vpop.permute.xlu1 %2915 }
 0xa52   :  { %v2937_v45 = vadd.f32 %v2916_v63, %v2889_v57 }
 0xa54   :  { %v2945_v25 = vmax.f32 %v2937_v45, 0.0 }
 0xa55   :  { %v2878_v49 = vpop.permute.xlu0 %2877  ;;  %v2921_v29 = vpop.permute.xlu2 %2920 }
 0xa56   :  { %v2891_v42 = vmul.f32 %v2878_v49, %v7193_v31  ;;  %v2938_v12 = vadd.f32 %v2921_v29, %v2890_v24 }
 0xa58   :  { %v2939_v54 = vadd.f32 %v2926_v36, %v2891_v42  ;;  %v2946_v22 = vmax.f32 %v2938_v12, 0.0 }
 0xa59   :  { %v2967_v2 = vpop.permute.xlu1 %2966 }
 0xa5a   :  { %v2947_v19 = vmax.f32 %v2939_v54, 0.0 }
 0xa5d   :  { %v2906_v40 = vpop.permute.xlu0 %2905  ;;  %v2977_v33 = vpop.permute.xlu2 %2976 }
 0xa5e   :  { %v2935_v44 = vadd.f32 %v2906_v40, %v2887_v30 }
 0xa60   :  { %v2943_v59 = vmax.f32 %v2935_v44, 0.0  ;;  %v111_v44 = vld [vmem:[%s8401_s3 + $0x218] sm:$0xff] }
 0xa61   :  { %5248 = vmatmul.msk.f32.gmra.mxu0 %vm222_vm0, %v111_v44  ;;  %5336 = vmatmul.msk.f32.gmra.mxu1 %vm222_vm0, %v111_v44 }
 0xa65   :  { %v2863_v18 = vpop.permute.xlu0 %2862  ;;  %v2962_v60 = vpop.permute.xlu2 %2961 }
 0xa66   :  { %v2888_v26 = vmul.f32 %v2863_v18, %v7199_v4 }
 0xa68   :  { %v2936_v15 = vadd.f32 %v2911_v48, %v2888_v26 }
 0xa6a   :  { %v2944_v27 = vmax.f32 %v2936_v15, 0.0 }
 0xa6c   :  { %3003 = vmatpush.msrb.mxu2 %v2944_v27 }
 0xa6d   :  { %v2931_v20 = vpop.permute.xlu0 %2930 }
 0xa6e   :  { %v2940_v1 = vadd.f32 %v2931_v20, %v2892_v17  ;;  %3004 = vmatpush.msrb.mxu2 %v2943_v59 }
 0xa70   :  { %v2948_v39 = vmax.f32 %v2940_v1, 0.0  ;;  %3005 = vmatpush.msrb.mxu2 %v2942_v34 }
 0xa72   :  { %3032 = vmatpush.msrb.mxu3 %v2948_v39 }
 0xa74   :  { %3033 = vmatpush.msrb.mxu3 %v2947_v19 }
 0xa75   :  { %v2896_v41 = vpop.permute.xlu0 %2895 }
 0xa76   :  { %v2933_v55 = vadd.f32 %v2896_v41, %v2885_v38  ;;  %3034 = vmatpush.msrb.mxu3 %v2946_v22 }
 0xa78   :  { %v2941_v52 = vmax.f32 %v2933_v55, 0.0  ;;  %3035 = vmatpush.msrb.mxu3 %v2945_v25 }
 0xa79   :  { %5443 = vmatmul.msk.f32.vlgmr.msrb.gmra.mxu3 %vm1538_vm1, %v5431_v10 }
 0xa7a   :  { %3006 = vmatpush.msrb.mxu2 %v2941_v52 }
 0xa7b   :  { %5439 = vmatmul.msk.f32.vlgmr.msrb.gmra.mxu2 %vm1538_vm1, %v5431_v10 }
 0xa7d   :  { %v2972_v40 = vpop.permute.xlu0 %2971 }
 0xa81   :  { %5444 = vmatmul.msk.f32.gmra.mxu3 %vm1538_vm1, %v5432_v58 }
 0xa83   :  { %5440 = vmatmul.msk.f32.gmra.mxu2 %vm1538_vm1, %v5432_v58 }
 0xa89   :  { %5445 = vmatmul.msk.f32.gmra.mxu3 %vm1538_vm1, %v5433_v46 }
 0xa8b   :  { %5441 = vmatmul.msk.f32.gmra.mxu2 %vm1538_vm1, %v5433_v46 }
 0xa91   :  { %5446 = vmatmul.msk.f32.gmra.mxu3 %vm1538_vm1, %v5434_v53 }
 0xa93   :  { %5442 = vmatmul.msk.f32.gmra.mxu2 %vm1538_vm1, %v5434_v53 }
 0xafc   :  { %v3037_v50 = vpop.f32.mrf.mxu3 }
 0xafd   :  { %v7345_v11 = vadd.f32 %v3037_v50, %v2962_v60 }
 0xafe   :  { %v3008_v43 = vpop.f32.mrf.mxu2 }
 0xaff   :  { %v7349_v62 = vadd.f32 %v3008_v43, %v2962_v60  ;;  %v3093_v51 = vsel %vm1261_vm3, %v7345_v11, 0.0  ;;  %v3053_v19 = vmul.f32 %v7345_v11, %v7345_v11 }
 0xb00   :  { %3094 = vadd.xlane.f32.xlu1 %v3093_v51 }
 0xb01   :  { %v3081_v37 = vsel %vm1261_vm3, %v7349_v62, 0.0  ;;  %v3049_v45 = vmul.f32 %v7349_v62, %v7349_v62  ;;  %v3069_v22 = vsel %vm1261_vm3, %v3053_v19, 0.0 }
 0xb02   :  { %3082 = vadd.xlane.f32.xlu0 %v3081_v37 }
 0xb03   :  { %v3057_v38 = vsel %vm1261_vm3, %v3049_v45, 0.0 }
 0xb04   :  { %v3040_v16 = vpop.f32.mrf.mxu3 }
 0xb05   :  { %v7358_v3 = vadd.f32 %v3040_v16, %v2967_v2 }
 0xb06   :  { %v3011_v8 = vpop.f32.mrf.mxu2 }
 0xb07   :  { %v7362_v13 = vadd.f32 %v3011_v8, %v2967_v2  ;;  %v3096_v23 = vsel %vm1261_vm3, %v7358_v3, 0.0  ;;  %v3054_v48 = vmul.f32 %v7358_v3, %v7358_v3 }
 0xb09   :  { %v3084_v5 = vsel %vm1261_vm3, %v7362_v13, 0.0  ;;  %v3050_v49 = vmul.f32 %v7362_v13, %v7362_v13  ;;  %v3072_v36 = vsel %vm1261_vm3, %v3054_v48, 0.0 }
 0xb0a   :  { %3085 = vadd.xlane.f32.xlu2 %v3084_v5  ;;  %3097 = vadd.xlane.f32.xlu0 %v3096_v23 }
 0xb0b   :  { %v3060_v0 = vsel %vm1261_vm3, %v3050_v49, 0.0 }
 0xb0c   :  { %3061 = vadd.xlane.f32.xlu1 %v3060_v0  ;;  %v3043_v18 = vpop.f32.mrf.mxu3 }
 0xb0d   :  { %v7386_v15 = vadd.f32 %v3043_v18, %v2972_v40 }
 0xb0e   :  { %v3014_v30 = vpop.f32.mrf.mxu2 }
 0xb0f   :  { %v7378_v26 = vadd.f32 %v3014_v30, %v2972_v40  ;;  %v3055_v59 = vmul.f32 %v7386_v15, %v7386_v15  ;;  %v3099_v20 = vsel %vm1261_vm3, %v7386_v15, 0.0 }
 0xb11   :  { %v3051_v47 = vmul.f32 %v7378_v26, %v7378_v26  ;;  %v3087_v9 = vsel %vm1261_vm3, %v7378_v26, 0.0  ;;  %v3075_v24 = vsel %vm1261_vm3, %v3055_v59, 0.0 }
 0xb12   :  { %3073 = vadd.xlane.f32.xlu2 %v3072_v36 }
 0xb13   :  { %v3063_v42 = vsel %vm1261_vm3, %v3051_v47, 0.0 }
 0xb14   :  { %3088 = vadd.xlane.f32.xlu1 %v3087_v9  ;;  %3064 = vadd.xlane.f32.xlu0 %v3063_v42  ;;  %v3046_v29 = vpop.f32.mrf.mxu3 }
 0xb15   :  { %v7399_v34 = vadd.f32 %v3046_v29, %v2977_v33  ;;  %v7426_v29 = vpop.f32.mrf.mxu0 }
 0xb16   :  { %v3017_v27 = vpop.f32.mrf.mxu2 }
 0xb17   :  { %v7393_v17 = vadd.f32 %v3017_v27, %v2977_v33  ;;  %v3056_v63 = vmul.f32 %v7399_v34, %v7399_v34  ;;  %v3102_v12 = vsel %vm1261_vm3, %v7399_v34, 0.0 }
 0xb19   :  { %v3090_v54 = vsel %vm1261_vm3, %v7393_v17, 0.0  ;;  %v3052_v1 = vmul.f32 %v7393_v17, %v7393_v17  ;;  %v3078_v39 = vsel %vm1261_vm3, %v3056_v63, 0.0 }
 0xb1a   :  { %3100 = vadd.xlane.f32.xlu2 %v3099_v20 }
 0xb1b   :  { %v3066_v57 = vsel %vm1261_vm3, %v3052_v1, 0.0 }
 0xb1c   :  { %3076 = vadd.xlane.f32.xlu1 %v3075_v24  ;;  %3091 = vadd.xlane.f32.xlu0 %v3090_v54 }
 0xb22   :  { %3067 = vadd.xlane.f32.xlu2 %v3066_v57  ;;  %v7435_v57 = vld [vmem:[%s8402_s4 + $0xa8] sm:$0xff] }
 0xb24   :  { %3103 = vadd.xlane.f32.xlu1 %v3102_v12  ;;  %3079 = vadd.xlane.f32.xlu0 %v3078_v39 }
 0xb2a   :  { %3058 = vadd.xlane.f32.xlu2 %v3057_v38 }
 0xb2c   :  { %3070 = vadd.xlane.f32.xlu0 %v3069_v22 }
 0xb73   :  { %v3095_v25 = vpop.xlane.xlu1 %3094 }
 0xb75   :  { %v3083_v41 = vpop.xlane.xlu0 %3082 }
 0xb76   :  { %v3105_v20 = vadd.f32 %v3095_v25, %v3083_v41  ;;  %v8525_v25 = vld [vmem:[#allocation60_spill] sm:$0xff] }
 0xb78   :  { %v7437_v39 = vmul.f32 0.0078125, %v3105_v20 }
 0xb7d   :  { %v3086_v55 = vpop.xlane.xlu2 %3085  ;;  %v3098_v10 = vpop.xlane.xlu0 %3097 }
 0xb7e   :  { %v3106_v58 = vadd.f32 %v3098_v10, %v3086_v55  ;;  %v568_v55 = vadd.f32 %v8525_v25, %v7435_v57 }
 0xb7f   :  { %v3062_v52 = vpop.xlane.xlu1 %3061 }
 0xb80   :  { %v7418_v46 = vmul.f32 0.0078125, %v3106_v58 }
 0xb82   :  { %v3122_v43 = vmul.f32 %v7418_v46, %v7418_v46 }
 0xb85   :  { %v3074_v53 = vpop.xlane.xlu2 %3073 }
 0xb86   :  { %v3114_v33 = vadd.f32 %v3074_v53, %v3062_v52  ;;  %v7441_v53 = vpop.f32.mrf.mxu1 }
 0xb87   :  { %v3089_v60 = vpop.xlane.xlu1 %3088  ;;  %v3065_v50 = vpop.xlane.xlu0 %3064 }
 0xb88   :  { %v3118_v61 = vmul.f32 0.0078125, %v3114_v33 }
 0xb8a   :  { %v3126_v51 = vsub.f32 %v3118_v61, %v3122_v43 }
 0xb8c   :  { %v3130_v37 = vmax.f32 %v3126_v51, 0.0 }
 0xb8d   :  { %v3101_v2 = vpop.xlane.xlu2 %3100 }
 0xb8e   :  { %v3134_v16 = vadd.f32 1e-05, %v3130_v37  ;;  %v3107_v21 = vadd.f32 %v3101_v2, %v3089_v60  ;;  %v7451_v37 = vld [vmem:[%s8402_s4 + $0x208] sm:$0xff]  ;;  %v699_v2 = vpop.f32.mrf.mxu0 }
 0xb8f   :  { %v3077_v8 = vpop.xlane.xlu1 %3076  ;;  %v3092_v5 = vpop.xlane.xlu0 %3091 }
 0xb90   :  { %5578 = vrsqrt.f32 %v3134_v16  ;;  %v7422_v23 = vmul.f32 0.0078125, %v3107_v21  ;;  %v3115_v49 = vadd.f32 %v3077_v8, %v3065_v50  ;;  %vm3153_vm13 = vweird.f32 %v3134_v16 }
 0xb91   :  { %v3121_v50 = vmul.f32 %v7437_v39, %v7437_v39 }
 0xb92   :  { %v3123_v0 = vmul.f32 %v7422_v23, %v7422_v23  ;;  %v3119_v28 = vmul.f32 0.0078125, %v3115_v49 }
 0xb94   :  { %v3127_v40 = vsub.f32 %v3119_v28, %v3123_v0 }
 0xb95   :  { %v3068_v48 = vpop.xlane.xlu2 %3067 }
 0xb96   :  { %v5579_v18 = vpop.eup %5578  ;;  %v3131_v30 = vmax.f32 %v3127_v40, 0.0 }
 0xb97   :  { %v3148_v36 = vmul.f32 %v5579_v18, %v3134_v16  ;;  %v3104_v47 = vpop.xlane.xlu1 %3103  ;;  %v3080_v44 = vpop.xlane.xlu0 %3079  ;;  %vm3154_vm12 = vweird.f32 %v5579_v18 }
 0xb98   :  { %v3135_v9 = vadd.f32 1e-05, %v3131_v30  ;;  %v3108_v42 = vadd.f32 %v3104_v47, %v3092_v5  ;;  %v3116_v27 = vadd.f32 %v3080_v44, %v3068_v48  ;;  %vm3155_vm14 = vmor %vm3153_vm13, %vm3154_vm12  ;;  %v700_v5 = vadd.f32 %v699_v2, %v7451_v37  ;;  %v7455_v30 = vpop.f32.mrf.mxu1  ;;  %v156_v47 = vld [vmem:[%s8402_s4 + $0xb0] sm:$0xff] }
 0xb99   :  { %v3149_v59 = vmul.f32 %v5579_v18, %v3148_v36 }
 0xb9a   :  { %5580 = vrsqrt.f32 %v3135_v9  ;;  %v7428_v24 = vmul.f32 0.0078125, %v3108_v42  ;;  %v3120_v63 = vmul.f32 0.0078125, %v3116_v27  ;;  %vm3163_vm2 = vweird.f32 %v3135_v9 }
 0xb9b   :  { %v3150_v54 = vmul.f32 0.5, %v3149_v59  ;;  %v8526_v59 = vld [vmem:[#allocation63_spill] sm:$0xff] }
 0xb9c   :  { %v3124_v1 = vmul.f32 %v7428_v24, %v7428_v24  ;;  %v852_v20 = vadd.f32 %v8526_v59, %v156_v47 }
 0xb9d   :  { %v3151_v12 = vsub.f32 1.5, %v3150_v54  ;;  %v3059_v19 = vpop.xlane.xlu2 %3058 }
 0xb9e   :  { %v3128_v45 = vsub.f32 %v3120_v63, %v3124_v1 }
 0xb9f   :  { %v3071_v38 = vpop.xlane.xlu0 %3070  ;;  %v3152_v22 = vmul.f32 %v5579_v18, %v3151_v12 }
 0xba0   :  { %v5581_v41 = vpop.eup %5580  ;;  %v3132_v10 = vmax.f32 %v3128_v45, 0.0  ;;  %v3113_v52 = vadd.f32 %v3071_v38, %v3059_v19  ;;  %v200_v45 = vld [vmem:[%s8402_s4 + $0x210] sm:$0xff]  ;;  %v983_v19 = vpop.f32.mrf.mxu1 }
 0xba1   :  { %v3158_v58 = vmul.f32 %v5581_v41, %v3135_v9  ;;  %v7443_v33 = vsel %vm3155_vm14, %v5579_v18, %v3152_v22  ;;  %vm3164_vm15 = vweird.f32 %v5581_v41  ;;  %v984_v38 = vadd.f32 %v983_v19, %v200_v45 }
 0xba2   :  { %v3136_v60 = vadd.f32 1e-05, %v3132_v10  ;;  %v3117_v61 = vmul.f32 0.0078125, %v3113_v52  ;;  %v3178_v43 = vmul.f32 %v7443_v33, %v568_v55  ;;  %vm3165_vm4 = vmor %vm3163_vm2, %vm3164_vm15  ;;  %v8527_v52 = vld [vmem:[#allocation58_spill] sm:$0xff] }
 0xba3   :  { %v3159_v51 = vmul.f32 %v5581_v41, %v3158_v58 }
 0xba4   :  { %5582 = vrsqrt.f32 %v3136_v60  ;;  %v3125_v16 = vsub.f32 %v3117_v61, %v3121_v50  ;;  %3208 = vperm.xlu1 %5536, %v3178_v43   ;;  %v3186_v49 = vmul.f32 %v3178_v43, %v7418_v46  ;;  %v8528_v50 = vld [vmem:[#allocation59_spill] sm:$0xff]  ;;  %v8529_v43 = vld [vmem:[#allocation62_spill] sm:$0xff]  ;;  %vm3173_vm9 = vweird.f32 %v3136_v60 }
 0xba5   :  { %v3160_v21 = vmul.f32 0.5, %v3159_v51  ;;  %v571_v51 = vadd.f32 %v8529_v43, %v156_v47  ;;  %v5454_v43 = vld [vmem:[%s8407_s9 + $0xb8] sm:$0xff] }
 0xba6   :  { %v3129_v8 = vmax.f32 %v3125_v16, 0.0  ;;  %v3194_v48 = vsub.f32 %v700_v5, %v3186_v49 }
 0xba7   :  { %v3161_v0 = vsub.f32 1.5, %v3160_v21 }
 0xba8   :  { %v3133_v28 = vadd.f32 1e-05, %v3129_v8  ;;  %v986_v19 = vpop.f32.mrf.mxu1 }
 0xba9   :  { %v3162_v36 = vmul.f32 %v5581_v41, %v3161_v0  ;;  %v157_v0 = vld [vmem:[%s8402_s4 + $0xb8] sm:$0xff] }
 0xbaa   :  { %v5583_v40 = vpop.eup %5582  ;;  %5584 = vrsqrt.f32 %v3133_v28  ;;  %vm3143_vm6 = vweird.f32 %v3133_v28 }
 0xbab   :  { %v3168_v18 = vmul.f32 %v5583_v40, %v3136_v60  ;;  %v3166_v42 = vsel %vm3165_vm4, %v5581_v41, %v3162_v36  ;;  %v154_v41 = vld [vmem:[%s8402_s4 + $0xa0] sm:$0xff]  ;;  %vm3174_vm8 = vweird.f32 %v5583_v40 }
 0xbac   :  { %3256 = vperm.xlu1 %5536, %v3194_v48   ;;  %v3183_v1 = vmul.f32 %v3166_v42, %v852_v20  ;;  %v565_v58 = vadd.f32 %v8527_v52, %v154_v41  ;;  %v846_v61 = vadd.f32 %v8528_v50, %v154_v41  ;;  %v3179_v8 = vmul.f32 %v3166_v42, %v571_v51  ;;  %vm3175_vm10 = vmor %vm3173_vm9, %vm3174_vm8  ;;  %v8531_v42 = vld [vmem:[#allocation61_spill] sm:$0xff]  ;;  %v5453_v51 = vld [vmem:[%s8407_s9 + $0xb0] sm:$0xff] }
 0xbad   :  { %v3169_v44 = vmul.f32 %v5583_v40, %v3168_v18  ;;  %v8530_v18 = vld [vmem:[#allocation64_spill] sm:$0xff] }
 0xbae   :  { %v3191_v22 = vmul.f32 %v3183_v1, %v7422_v23  ;;  %v574_v36 = vadd.f32 %v8530_v18, %v157_v0 }
 0xbaf   :  { %v3170_v63 = vmul.f32 0.5, %v3169_v44  ;;  %v3187_v44 = vmul.f32 %v3179_v8, %v7422_v23 }
 0xbb0   :  { %v5585_v27 = vpop.eup %5584  ;;  %v3199_v2 = vsub.f32 %v984_v38, %v3191_v22 }
 0xbb1   :  { %v3138_v54 = vmul.f32 %v5585_v27, %v3133_v28  ;;  %v3171_v25 = vsub.f32 1.5, %v3170_v63  ;;  %vm3144_vm5 = vweird.f32 %v5585_v27  ;;  %v702_v28 = vpop.f32.mrf.mxu0  ;;  %v8532_v63 = vld [vmem:[#allocation65_spill] sm:$0xff] }
 0xbb2   :  { %vm3145_vm7 = vmor %vm3143_vm6, %vm3144_vm5  ;;  %v703_v47 = vadd.f32 %v702_v28, %v200_v45  ;;  %v855_v23 = vadd.f32 %v8532_v63, %v157_v0 }
 0xbb3   :  { %v3139_v12 = vmul.f32 %v5585_v27, %v3138_v54  ;;  %v3172_v16 = vmul.f32 %v5583_v40, %v3171_v25 }
 0xbb4   :  { %3233 = vperm.xlu1 %5536, %v3183_v1   ;;  %v3195_v54 = vsub.f32 %v703_v47, %v3187_v44 }
 0xbb5   :  { %v3140_v9 = vmul.f32 0.5, %v3139_v12  ;;  %v3176_v48 = vsel %vm3175_vm10, %v5583_v40, %v3172_v16  ;;  %v198_v40 = vld [vmem:[%s8402_s4 + $0x200] sm:$0xff] }
 0xbb6   :  { %v3180_v59 = vmul.f32 %v3176_v48, %v574_v36  ;;  %v978_v1 = vadd.f32 %v7441_v53, %v198_v40  ;;  %v3184_v45 = vmul.f32 %v3176_v48, %v855_v23  ;;  %v5452_v53 = vld [vmem:[%s8407_s9 + $0xa8] sm:$0xff]  ;;  %v697_v50 = vadd.f32 %v7426_v29, %v198_v40 }
 0xbb7   :  { %v3141_v55 = vsub.f32 1.5, %v3140_v9 }
 0xbb8   :  { %v3188_v38 = vmul.f32 %v3180_v59, %v7428_v24  ;;  %v3192_v41 = vmul.f32 %v3184_v45, %v7428_v24 }
 0xbb9   :  { %v3142_v10 = vmul.f32 %v5585_v27, %v3141_v55 }
 0xbbb   :  { %v3146_v21 = vsel %vm3145_vm7, %v5585_v27, %v3142_v10  ;;  %v849_v27 = vadd.f32 %v8531_v42, %v7435_v57  ;;  %v201_v57 = vld [vmem:[%s8402_s4 + $0x218] sm:$0xff]  ;;  %v981_v10 = vadd.f32 %v7455_v30, %v7451_v37 }
 0xbbc   :  { %3281 = vperm.xlu1 %5536, %v3199_v2   ;;  %v3181_v5 = vmul.f32 %v3146_v21, %v846_v61  ;;  %v3177_v49 = vmul.f32 %v3146_v21, %v565_v58  ;;  %v987_v22 = vadd.f32 %v986_v19, %v201_v57 }
 0xbbd   :  { %v3182_v20 = vmul.f32 %v7443_v33, %v849_v27  ;;  %v705_v33 = vpop.f32.mrf.mxu0 }
 0xbbe   :  { %3223 = vperm.xlu2 %5537, %v3181_v5   ;;  %3203 = vperm.xlu0 %5535, %v3177_v49   ;;  %v3189_v60 = vmul.f32 %v3181_v5, %v7437_v39  ;;  %v706_v9 = vadd.f32 %v705_v33, %v201_v57  ;;  %v3200_v55 = vsub.f32 %v987_v22, %v3192_v41  ;;  %v5450_v41 = vld [vmem:[%s8406_s8 + $0xb8] sm:$0xff] }
 0xbbf   :  { %v3190_v52 = vmul.f32 %v3182_v20, %v7418_v46  ;;  %v3185_v58 = vmul.f32 %v3177_v49, %v7437_v39  ;;  %v5451_v46 = vld [vmem:[%s8407_s9 + $0xa0] sm:$0xff] }
 0xbc0   :  { %v3197_v12 = vsub.f32 %v978_v1, %v3189_v60  ;;  %v3196_v25 = vsub.f32 %v706_v9, %v3188_v38 }
 0xbc1   :  { %v3198_v61 = vsub.f32 %v981_v10, %v3190_v52  ;;  %v3193_v24 = vsub.f32 %v697_v50, %v3185_v58 }
 0xbc4   :  { %3218 = vperm.xlu1 %5536, %v3180_v59  }
 0xbc6   :  { %3261 = vperm.xlu2 %5537, %v3195_v54   ;;  %3228 = vperm.xlu0 %5535, %v3182_v20  }
 0xbcc   :  { %3271 = vperm.xlu1 %5536, %v3197_v12  }
 0xbce   :  { %3238 = vperm.xlu2 %5537, %v3184_v45   ;;  %3213 = vperm.xlu0 %5535, %v3179_v8  }
 0xbd4   :  { %3322 = vperm.xlu1 %5536, %v5452_v53  }
 0xbd6   :  { %3286 = vperm.xlu2 %5537, %v3200_v55   ;;  %3266 = vperm.xlu0 %5535, %v3196_v25  }
 0xbde   :  { %3276 = vperm.xlu0 %5535, %v3198_v61   ;;  %3251 = vperm.xlu2 %5537, %v3193_v24  }
 0xbe6   :  { %3332 = vperm.xlu0 %5535, %v5454_v43   ;;  %3327 = vperm.xlu2 %5537, %v5453_v51  }
 0xbee   :  { %3317 = vperm.xlu0 %5535, %v5451_v46  }
 0xc16   :  { %v3209_v29 = vpop.permute.xlu1 %3208 }
 0xc18   :  { %v3224_v39 = vpop.permute.xlu2 %3223 }
 0xc19   :  { %v3245_v57 = vmul.f32 %v3224_v39, %v7345_v11  ;;  %v5448_v11 = vld [vmem:[%s8406_s8 + $0xa8] sm:$0xff] }
 0xc1e   :  { %v3257_v37 = vpop.permute.xlu1 %3256 }
 0xc20   :  { %v3262_v30 = vpop.permute.xlu2 %3261 }
 0xc26   :  { %v3234_v2 = vpop.permute.xlu1 %3233 }
 0xc27   :  { %v3247_v8 = vmul.f32 %v3234_v2, %v7386_v15  ;;  %v3242_v15 = vmul.f32 %v3209_v29, %v7362_v13 }
 0xc28   :  { %v3239_v16 = vpop.permute.xlu2 %3238 }
 0xc29   :  { %v3248_v5 = vmul.f32 %v3239_v16, %v7399_v34  ;;  %v3290_v40 = vadd.f32 %v3257_v37, %v3242_v15 }
 0xc2b   :  { %v3298_v33 = vmax.f32 %v3290_v40, 0.0 }
 0xc2e   :  { %v3282_v21 = vpop.permute.xlu1 %3281 }
 0xc2f   :  { %v3295_v28 = vadd.f32 %v3282_v21, %v3247_v8 }
 0xc30   :  { %v3287_v49 = vpop.permute.xlu2 %3286  ;;  %v3204_v0 = vpop.permute.xlu0 %3203 }
 0xc31   :  { %v3296_v48 = vadd.f32 %v3287_v49, %v3248_v5  ;;  %v3303_v36 = vmax.f32 %v3295_v28, 0.0  ;;  %v3241_v1 = vmul.f32 %v3204_v0, %v7349_v62  ;;  %v5447_v62 = vld [vmem:[%s8406_s8 + $0xa0] sm:$0xff] }
 0xc32   :  { %v112_v5 = vld [vmem:[%s8401_s3 + $0x220] sm:$0xff] }
 0xc33   :  { %v3304_v18 = vmax.f32 %v3296_v48, 0.0  ;;  %5249 = vmatmul.msk.f32.gmra.mxu0 %vm222_vm0, %v112_v5  ;;  %5337 = vmatmul.msk.f32.gmra.mxu1 %vm222_vm0, %v112_v5 }
 0xc35   :  { %3388 = vmatpush.msra.mxu3 %v3304_v18 }
 0xc36   :  { %v3219_v42 = vpop.permute.xlu1 %3218 }
 0xc37   :  { %3389 = vmatpush.msra.mxu3 %v3303_v36  ;;  %v3244_v59 = vmul.f32 %v3219_v42, %v7393_v17 }
 0xc38   :  { %v3229_v47 = vpop.permute.xlu0 %3228  ;;  %v3252_v60 = vpop.permute.xlu2 %3251 }
 0xc39   :  { %v3289_v23 = vadd.f32 %v3252_v60, %v3241_v1 }
 0xc3b   :  { %v3297_v19 = vmax.f32 %v3289_v23, 0.0 }
 0xc3e   :  { %v3272_v45 = vpop.permute.xlu1 %3271 }
 0xc3f   :  { %v3293_v13 = vadd.f32 %v3272_v45, %v3245_v57 }
 0xc40   :  { %v3214_v44 = vpop.permute.xlu0 %3213  ;;  %v3328_v2 = vpop.permute.xlu2 %3327 }
 0xc41   :  { %v3243_v27 = vmul.f32 %v3214_v44, %v7378_v26  ;;  %v3246_v26 = vmul.f32 %v3229_v47, %v7358_v3  ;;  %v3301_v22 = vmax.f32 %v3293_v13, 0.0  ;;  %v5449_v3 = vld [vmem:[%s8406_s8 + $0xb0] sm:$0xff] }
 0xc43   :  { %v3291_v54 = vadd.f32 %v3262_v30, %v3243_v27 }
 0xc45   :  { %v3299_v12 = vmax.f32 %v3291_v54, 0.0 }
 0xc46   :  { %v3323_v61 = vpop.permute.xlu1 %3322 }
 0xc48   :  { %v3267_v20 = vpop.permute.xlu0 %3266 }
 0xc49   :  { %v3292_v34 = vadd.f32 %v3267_v20, %v3244_v59 }
 0xc4b   :  { %v3300_v63 = vmax.f32 %v3292_v34, 0.0 }
 0xc4d   :  { %3359 = vmatpush.msra.mxu2 %v3300_v63 }
 0xc4f   :  { %3360 = vmatpush.msra.mxu2 %v3299_v12 }
 0xc50   :  { %v3277_v17 = vpop.permute.xlu0 %3276 }
 0xc51   :  { %v3294_v9 = vadd.f32 %v3277_v17, %v3246_v26  ;;  %3361 = vmatpush.msra.mxu2 %v3298_v33 }
 0xc53   :  { %v3302_v38 = vmax.f32 %v3294_v9, 0.0  ;;  %3362 = vmatpush.msra.mxu2 %v3297_v19 }
 0xc54   :  { %5455 = vmatmul.msk.f32.vlgmr.msra.gmra.mxu2 %vm1538_vm1, %v5447_v62 }
 0xc55   :  { %3390 = vmatpush.msra.mxu3 %v3302_v38 }
 0xc57   :  { %3391 = vmatpush.msra.mxu3 %v3301_v22 }
 0xc58   :  { %5459 = vmatmul.msk.f32.vlgmr.msra.gmra.mxu3 %vm1538_vm1, %v5447_v62  ;;  %v3333_v53 = vpop.permute.xlu0 %3332 }
 0xc5c   :  { %5456 = vmatmul.msk.f32.gmra.mxu2 %vm1538_vm1, %v5448_v11 }
 0xc60   :  { %5460 = vmatmul.msk.f32.gmra.mxu3 %vm1538_vm1, %v5448_v11  ;;  %v3318_v25 = vpop.permute.xlu0 %3317 }
 0xc64   :  { %5457 = vmatmul.msk.f32.gmra.mxu2 %vm1538_vm1, %v5449_v3 }
 0xc68   :  { %5461 = vmatmul.msk.f32.gmra.mxu3 %vm1538_vm1, %v5449_v3 }
 0xc6c   :  { %5458 = vmatmul.msk.f32.gmra.mxu2 %vm1538_vm1, %v5450_v41 }
 0xc70   :  { %5462 = vmatmul.msk.f32.gmra.mxu3 %vm1538_vm1, %v5450_v41 }
 0xcd7   :  { %v3364_v55 = vpop.f32.mrf.mxu2 }
 0xcd8   :  { %v3365_v10 = vadd.f32 %v3364_v55, %v3318_v25 }
 0xcda   :  { %v7536_v52 = vadd.f32 %v3365_v10, %v7147_v14 }
 0xcdb   :  { %v3393_v58 = vpop.f32.mrf.mxu3 }
 0xcdc   :  { %v3445_v50 = vsel %vm1261_vm3, %v7536_v52, 0.0  ;;  %v3413_v60 = vmul.f32 %v7536_v52, %v7536_v52 }
 0xcdd   :  { %3446 = vadd.xlane.f32.xlu2 %v3445_v50 }
 0xcde   :  { %v3421_v40 = vsel %vm1261_vm3, %v3413_v60, 0.0 }
 0xcdf   :  { %v3367_v24 = vpop.f32.mrf.mxu2 }
 0xce0   :  { %v3368_v43 = vadd.f32 %v3367_v24, %v3323_v61 }
 0xce2   :  { %v7541_v51 = vadd.f32 %v3368_v43, %v7162_v7 }
 0xce3   :  { %v3396_v46 = vpop.f32.mrf.mxu3 }
 0xce4   :  { %v3397_v29 = vadd.f32 %v3396_v46, %v3323_v61  ;;  %v3448_v39 = vsel %vm1261_vm3, %v7541_v51, 0.0  ;;  %v3414_v14 = vmul.f32 %v7541_v51, %v7541_v51 }
 0xce5   :  { %3449 = vadd.xlane.f32.xlu0 %v3448_v39 }
 0xce6   :  { %v7548_v37 = vadd.f32 %v3397_v29, %v7172_v56  ;;  %v3424_v30 = vsel %vm1261_vm3, %v3414_v14, 0.0 }
 0xce7   :  { %v3370_v16 = vpop.f32.mrf.mxu2  ;;  %3425 = vadd.xlane.f32.xlu1 %v3424_v30 }
 0xce8   :  { %v3371_v21 = vadd.f32 %v3370_v16, %v3328_v2  ;;  %v3460_v7 = vsel %vm1261_vm3, %v7548_v37, 0.0  ;;  %v3418_v8 = vmul.f32 %v7548_v37, %v7548_v37 }
 0xce9   :  { %3461 = vadd.xlane.f32.xlu2 %v3460_v7 }
 0xcea   :  { %v7559_v56 = vadd.f32 %v3371_v21, %v7182_v32  ;;  %v3436_v28 = vsel %vm1261_vm3, %v3418_v8, 0.0 }
 0xceb   :  { %v3399_v49 = vpop.f32.mrf.mxu3 }
 0xcec   :  { %v3400_v0 = vadd.f32 %v3399_v49, %v3328_v2  ;;  %v3415_v48 = vmul.f32 %v7559_v56, %v7559_v56  ;;  %v3451_v36 = vsel %vm1261_vm3, %v7559_v56, 0.0 }
 0xced   :  { %3437 = vadd.xlane.f32.xlu0 %v3436_v28 }
 0xcee   :  { %v7567_v18 = vadd.f32 %v3400_v0, %v7193_v31  ;;  %v3427_v44 = vsel %vm1261_vm3, %v3415_v48, 0.0 }
 0xcef   :  { %v3373_v32 = vpop.f32.mrf.mxu2  ;;  %3452 = vadd.xlane.f32.xlu1 %v3451_v36  ;;  %v7617_v36 = vld [vmem:[%s8402_s4 + $0xc8] sm:$0xff] }
 0xcf0   :  { %v3374_v47 = vadd.f32 %v3373_v32, %v3333_v53  ;;  %v3419_v42 = vmul.f32 %v7567_v18, %v7567_v18  ;;  %v3463_v31 = vsel %vm1261_vm3, %v7567_v18, 0.0 }
 0xcf1   :  { %3428 = vadd.xlane.f32.xlu2 %v3427_v44 }
 0xcf2   :  { %v7575_v59 = vadd.f32 %v3374_v47, %v7199_v4  ;;  %v3439_v15 = vsel %vm1261_vm3, %v3419_v42, 0.0  ;;  %v3394_v4 = vadd.f32 %v3393_v58, %v3318_v25 }
 0xcf3   :  { %v3402_v27 = vpop.f32.mrf.mxu3 }
 0xcf4   :  { %v3403_v20 = vadd.f32 %v3402_v27, %v3333_v53  ;;  %v3454_v34 = vsel %vm1261_vm3, %v7575_v59, 0.0  ;;  %v3416_v12 = vmul.f32 %v7575_v59, %v7575_v59 }
 0xcf5   :  { %3464 = vadd.xlane.f32.xlu0 %v3463_v31  ;;  %v8533_v31 = vld [vmem:[#allocation68_spill] sm:$0xff] }
 0xcf6   :  { %v7581_v54 = vadd.f32 %v3403_v20, %v7210_v6  ;;  %v7593_v6 = vadd.f32 %v3394_v4, %v7155_v35  ;;  %v3430_v45 = vsel %vm1261_vm3, %v3416_v12, 0.0 }
 0xcf7   :  { %3440 = vadd.xlane.f32.xlu1 %v3439_v15  ;;  %v580_v15 = vadd.f32 %v8533_v31, %v7617_v36 }
 0xcf8   :  { %v3420_v1 = vmul.f32 %v7581_v54, %v7581_v54  ;;  %v3466_v63 = vsel %vm1261_vm3, %v7581_v54, 0.0  ;;  %v3417_v57 = vmul.f32 %v7593_v6, %v7593_v6  ;;  %v3457_v33 = vsel %vm1261_vm3, %v7593_v6, 0.0 }
 0xcf9   :  { %3455 = vadd.xlane.f32.xlu2 %v3454_v34 }
 0xcfa   :  { %v3442_v23 = vsel %vm1261_vm3, %v3420_v1, 0.0  ;;  %v3433_v26 = vsel %vm1261_vm3, %v3417_v57, 0.0 }
 0xcfd   :  { %3422 = vadd.xlane.f32.xlu0 %v3421_v40 }
 0xcff   :  { %3467 = vadd.xlane.f32.xlu1 %v3466_v63 }
 0xd01   :  { %3443 = vadd.xlane.f32.xlu2 %v3442_v23 }
 0xd05   :  { %3431 = vadd.xlane.f32.xlu0 %v3430_v45 }
 0xd07   :  { %3458 = vadd.xlane.f32.xlu1 %v3457_v33 }
 0xd09   :  { %3434 = vadd.xlane.f32.xlu2 %v3433_v26 }
 0xd50   :  { %v3447_v35 = vpop.xlane.xlu2 %3446 }
 0xd58   :  { %v3450_v17 = vpop.xlane.xlu0 %3449 }
 0xd5a   :  { %v3426_v19 = vpop.xlane.xlu1 %3425 }
 0xd5c   :  { %v3462_v13 = vpop.xlane.xlu2 %3461 }
 0xd5d   :  { %v3470_v9 = vadd.f32 %v3462_v13, %v3450_v17 }
 0xd5f   :  { %v7604_v62 = vmul.f32 0.0078125, %v3470_v9 }
 0xd60   :  { %v3438_v38 = vpop.xlane.xlu0 %3437 }
 0xd61   :  { %v3478_v22 = vadd.f32 %v3438_v38, %v3426_v19  ;;  %v3486_v41 = vmul.f32 %v7604_v62, %v7604_v62 }
 0xd62   :  { %v3453_v11 = vpop.xlane.xlu1 %3452 }
 0xd63   :  { %v3482_v3 = vmul.f32 0.0078125, %v3478_v22 }
 0xd64   :  { %v3429_v53 = vpop.xlane.xlu2 %3428 }
 0xd65   :  { %v3490_v25 = vsub.f32 %v3482_v3, %v3486_v41  ;;  %v8534_v3 = vld [vmem:[#allocation6_spill] sm:$0xff] }
 0xd67   :  { %v3494_v55 = vmax.f32 %v3490_v25, 0.0 }
 0xd68   :  { %v3465_v10 = vpop.xlane.xlu0 %3464 }
 0xd69   :  { %v3498_v58 = vadd.f32 1e-05, %v3494_v55  ;;  %v3471_v50 = vadd.f32 %v3465_v10, %v3453_v11 }
 0xd6a   :  { %v3441_v61 = vpop.xlane.xlu1 %3440 }
 0xd6b   :  { %5586 = vrsqrt.f32 %v3498_v58  ;;  %v7608_v24 = vmul.f32 0.0078125, %v3471_v50  ;;  %v3479_v43 = vadd.f32 %v3441_v61, %v3429_v53  ;;  %vm3517_vm11 = vweird.f32 %v3498_v58  ;;  %v160_v50 = vld [vmem:[%s8402_s4 + $0xd0] sm:$0xff] }
 0xd6c   :  { %v3456_v46 = vpop.xlane.xlu2 %3455 }
 0xd6d   :  { %v3487_v29 = vmul.f32 %v7608_v24, %v7608_v24  ;;  %v3483_v39 = vmul.f32 0.0078125, %v3479_v43 }
 0xd6f   :  { %v3491_v14 = vsub.f32 %v3483_v39, %v3487_v29 }
 0xd70   :  { %v3423_v30 = vpop.xlane.xlu0 %3422 }
 0xd71   :  { %v5587_v2 = vpop.eup %5586  ;;  %v3495_v16 = vmax.f32 %v3491_v14, 0.0 }
 0xd72   :  { %v3512_v21 = vmul.f32 %v5587_v2, %v3498_v58  ;;  %v3468_v7 = vpop.xlane.xlu1 %3467  ;;  %vm3518_vm0 = vweird.f32 %v5587_v2 }
 0xd73   :  { %v3499_v8 = vadd.f32 1e-05, %v3495_v16  ;;  %v3472_v5 = vadd.f32 %v3468_v7, %v3456_v46  ;;  %vm3519_vm12 = vmor %vm3517_vm11, %vm3518_vm0  ;;  %v8535_v46 = vld [vmem:[#allocation71_spill] sm:$0xff] }
 0xd74   :  { %v3513_v49 = vmul.f32 %v5587_v2, %v3512_v21  ;;  %v3444_v0 = vpop.xlane.xlu2 %3443  ;;  %v864_v29 = vadd.f32 %v8535_v46, %v160_v50 }
 0xd75   :  { %5588 = vrsqrt.f32 %v3499_v8  ;;  %v7612_v48 = vmul.f32 0.0078125, %v3472_v5  ;;  %vm3527_vm14 = vweird.f32 %v3499_v8 }
 0xd76   :  { %v3514_v28 = vmul.f32 0.5, %v3513_v49 }
 0xd77   :  { %v3488_v60 = vmul.f32 %v7612_v48, %v7612_v48 }
 0xd78   :  { %v3515_v32 = vsub.f32 1.5, %v3514_v28  ;;  %v3432_v47 = vpop.xlane.xlu0 %3431 }
 0xd79   :  { %v3480_v44 = vadd.f32 %v3444_v0, %v3432_v47  ;;  %v8536_v0 = vld [vmem:[#allocation9_spill] sm:$0xff] }
 0xd7a   :  { %v3459_v42 = vpop.xlane.xlu1 %3458  ;;  %v3516_v27 = vmul.f32 %v5587_v2, %v3515_v32  ;;  %v158_v32 = vld [vmem:[%s8402_s4 + $0xc0] sm:$0xff] }
 0xd7b   :  { %v5589_v20 = vpop.eup %5588  ;;  %v3484_v34 = vmul.f32 0.0078125, %v3480_v44  ;;  %v3469_v4 = vadd.f32 %v3459_v42, %v3447_v35  ;;  %v7633_v35 = vld [vmem:[%s8402_s4 + $0x228] sm:$0xff] }
 0xd7c   :  { %v3522_v40 = vmul.f32 %v5589_v20, %v3499_v8  ;;  %v3435_v1 = vpop.xlane.xlu2 %3434  ;;  %v7623_v63 = vsel %vm3519_vm12, %v5587_v2, %v3516_v27  ;;  %v712_v41 = vadd.f32 %v8534_v3, %v7633_v35  ;;  %vm3528_vm13 = vweird.f32 %v5589_v20  ;;  %v204_v8 = vld [vmem:[%s8402_s4 + $0x230] sm:$0xff] }
 0xd7d   :  { %v3492_v23 = vsub.f32 %v3484_v34, %v3488_v60  ;;  %v7625_v12 = vmul.f32 0.0078125, %v3469_v4  ;;  %v3477_v45 = vadd.f32 %v3435_v1, %v3423_v30  ;;  %v3542_v57 = vmul.f32 %v7623_v63, %v580_v15  ;;  %vm3529_vm15 = vmor %vm3527_vm14, %vm3528_vm13  ;;  %v8538_v15 = vld [vmem:[#allocation67_spill] sm:$0xff]  ;;  %v161_v1 = vld [vmem:[%s8402_s4 + $0xd8] sm:$0xff] }
 0xd7e   :  { %v3523_v33 = vmul.f32 %v5589_v20, %v3522_v40  ;;  %v996_v28 = vadd.f32 %v8536_v0, %v204_v8  ;;  %v858_v34 = vadd.f32 %v8538_v15, %v158_v32 }
 0xd7f   :  { %v3496_v26 = vmax.f32 %v3492_v23, 0.0  ;;  %v3485_v17 = vmul.f32 %v7625_v12, %v7625_v12  ;;  %v3481_v19 = vmul.f32 0.0078125, %v3477_v45  ;;  %3572 = vperm.xlu0 %5535, %v3542_v57   ;;  %v3550_v22 = vmul.f32 %v3542_v57, %v7604_v62  ;;  %v8539_v45 = vld [vmem:[#allocation73_spill] sm:$0xff] }
 0xd80   :  { %v3524_v13 = vmul.f32 0.5, %v3523_v33  ;;  %v867_v57 = vadd.f32 %v8539_v45, %v161_v1 }
 0xd81   :  { %v3500_v9 = vadd.f32 1e-05, %v3496_v26  ;;  %v3489_v38 = vsub.f32 %v3481_v19, %v3485_v17  ;;  %v3558_v55 = vsub.f32 %v712_v41, %v3550_v22  ;;  %v202_v26 = vld [vmem:[%s8402_s4 + $0x220] sm:$0xff]  ;;  %v989_v17 = vpop.f32.mrf.mxu1 }
 0xd82   :  { %v3525_v11 = vsub.f32 1.5, %v3524_v13  ;;  %v8540_v19 = vld [vmem:[#allocation69_spill] sm:$0xff]  ;;  %v990_v22 = vadd.f32 %v989_v17, %v202_v26 }
 0xd83   :  { %5590 = vrsqrt.f32 %v3500_v9  ;;  %v3493_v53 = vmax.f32 %v3489_v38, 0.0  ;;  %vm3537_vm7 = vweird.f32 %v3500_v9  ;;  %v861_v13 = vadd.f32 %v8540_v19, %v7617_v36 }
 0xd84   :  { %v3526_v10 = vmul.f32 %v5589_v20, %v3525_v11 }
 0xd85   :  { %v3497_v25 = vadd.f32 1e-05, %v3493_v53  ;;  %v3546_v41 = vmul.f32 %v7623_v63, %v861_v13  ;;  %v5468_v63 = vld [vmem:[%s8407_s9 + $0xc8] sm:$0xff] }
 0xd86   :  { %v3530_v43 = vsel %vm3529_vm15, %v5589_v20, %v3526_v10  ;;  %v8537_v20 = vld [vmem:[#allocation66_spill] sm:$0xff] }
 0xd87   :  { %5592 = vrsqrt.f32 %v3497_v25  ;;  %3620 = vperm.xlu0 %5535, %v3558_v55   ;;  %v3547_v30 = vmul.f32 %v3530_v43, %v864_v29  ;;  %vm3507_vm4 = vweird.f32 %v3497_v25  ;;  %v577_v31 = vadd.f32 %v8537_v20, %v158_v32  ;;  %v8542_v55 = vld [vmem:[#allocation8_spill] sm:$0xff]  ;;  %v8544_v29 = vld [vmem:[#allocation10_spill] sm:$0xff] }
 0xd88   :  { %v715_v10 = vadd.f32 %v8542_v55, %v204_v8  ;;  %v5470_v32 = vld [vmem:[%s8407_s9 + $0xd8] sm:$0xff] }
 0xd89   :  { %v5591_v58 = vpop.eup %5590  ;;  %v3555_v7 = vmul.f32 %v3547_v30, %v7608_v24 }
 0xd8a   :  { %v3532_v61 = vmul.f32 %v5591_v58, %v3500_v9  ;;  %vm3538_vm5 = vweird.f32 %v5591_v58  ;;  %v8541_v9 = vld [vmem:[#allocation70_spill] sm:$0xff] }
 0xd8b   :  { %v3563_v44 = vsub.f32 %v996_v28, %v3555_v7  ;;  %vm3539_vm8 = vmor %vm3537_vm7, %vm3538_vm5  ;;  %v583_v38 = vadd.f32 %v8541_v9, %v160_v50  ;;  %v205_v50 = vld [vmem:[%s8402_s4 + $0x238] sm:$0xff] }
 0xd8c   :  { %v3533_v39 = vmul.f32 %v5591_v58, %v3532_v61 }
 0xd8d   :  { %v5593_v14 = vpop.eup %5592  ;;  %v3543_v3 = vmul.f32 %v3530_v43, %v583_v38 }
 0xd8e   :  { %v3534_v2 = vmul.f32 0.5, %v3533_v39  ;;  %v3502_v16 = vmul.f32 %v5593_v14, %v3497_v25  ;;  %vm3508_vm2 = vweird.f32 %v5593_v14  ;;  %v718_v39 = vadd.f32 %v8544_v29, %v205_v50 }
 0xd8f   :  { %3597 = vperm.xlu0 %5535, %v3547_v30   ;;  %vm3509_vm6 = vmor %vm3507_vm4, %vm3508_vm2  ;;  %v3551_v25 = vmul.f32 %v3543_v3, %v7608_v24 }
 0xd90   :  { %v3503_v21 = vmul.f32 %v5593_v14, %v3502_v16  ;;  %v3535_v5 = vsub.f32 1.5, %v3534_v2 }
 0xd91   :  { %v3559_v36 = vsub.f32 %v715_v10, %v3551_v25 }
 0xd92   :  { %v3504_v49 = vmul.f32 0.5, %v3503_v21  ;;  %v3536_v27 = vmul.f32 %v5591_v58, %v3535_v5  ;;  %v708_v21 = vpop.f32.mrf.mxu0  ;;  %v3554_v5 = vmul.f32 %v3546_v41, %v7604_v62  ;;  %v5467_v62 = vld [vmem:[%s8407_s9 + $0xc0] sm:$0xff] }
 0xd93   :  { %v709_v7 = vadd.f32 %v708_v21, %v202_v26 }
 0xd94   :  { %v3505_v47 = vsub.f32 1.5, %v3504_v49  ;;  %v3540_v23 = vsel %vm3539_vm8, %v5591_v58, %v3536_v27  ;;  %v8543_v58 = vld [vmem:[#allocation72_spill] sm:$0xff]  ;;  %v8546_v49 = vld [vmem:[#allocation7_spill] sm:$0xff] }
 0xd95   :  { %v3548_v33 = vmul.f32 %v3540_v23, %v867_v57  ;;  %v586_v61 = vadd.f32 %v8543_v58, %v161_v1  ;;  %v993_v0 = vadd.f32 %v8546_v49, %v7633_v35 }
 0xd96   :  { %v3506_v42 = vmul.f32 %v5593_v14, %v3505_v47  ;;  %v5469_v47 = vld [vmem:[%s8407_s9 + $0xd0] sm:$0xff] }
 0xd97   :  { %3645 = vperm.xlu0 %5535, %v3563_v44   ;;  %v3544_v46 = vmul.f32 %v3540_v23, %v586_v61  ;;  %v3556_v43 = vmul.f32 %v3548_v33, %v7612_v48 }
 0xd98   :  { %v3510_v60 = vsel %vm3509_vm6, %v5593_v14, %v3506_v42  ;;  %v8545_v14 = vld [vmem:[#allocation11_spill] sm:$0xff] }
 0xd99   :  { %v3541_v4 = vmul.f32 %v3510_v60, %v577_v31  ;;  %v3545_v40 = vmul.f32 %v3510_v60, %v858_v34  ;;  %v3552_v24 = vmul.f32 %v3544_v46, %v7612_v48  ;;  %v999_v30 = vadd.f32 %v8545_v14, %v205_v50  ;;  %v5464_v14 = vld [vmem:[%s8406_s8 + $0xc8] sm:$0xff] }
 0xd9a   :  { %v3562_v48 = vsub.f32 %v993_v0, %v3554_v5 }
 0xd9b   :  { %3587 = vperm.xlu2 %5537, %v3545_v40   ;;  %3567 = vperm.xlu1 %5536, %v3541_v4   ;;  %v3553_v11 = vmul.f32 %v3545_v40, %v7625_v12  ;;  %v3564_v2 = vsub.f32 %v999_v30, %v3556_v43  ;;  %v3560_v16 = vsub.f32 %v718_v39, %v3552_v24  ;;  %v5463_v24 = vld [vmem:[%s8406_s8 + $0xc0] sm:$0xff]  ;;  %v5465_v30 = vld [vmem:[%s8406_s8 + $0xd0] sm:$0xff] }
 0xd9c   :  { %v3549_v8 = vmul.f32 %v3541_v4, %v7625_v12 }
 0xd9d   :  { %v3561_v53 = vsub.f32 %v990_v22, %v3553_v11 }
 0xd9e   :  { %v3557_v28 = vsub.f32 %v709_v7, %v3549_v8 }
 0xd9f   :  { %3602 = vperm.xlu0 %5535, %v3548_v33  }
 0xda3   :  { %3577 = vperm.xlu2 %5537, %v3543_v3   ;;  %3592 = vperm.xlu1 %5536, %v3546_v41  }
 0xda7   :  { %3635 = vperm.xlu0 %5535, %v3561_v53  }
 0xdab   :  { %3625 = vperm.xlu2 %5537, %v3559_v36   ;;  %3582 = vperm.xlu1 %5536, %v3544_v46  }
 0xdaf   :  { %3686 = vperm.xlu0 %5535, %v5468_v63  }
 0xdb3   :  { %3650 = vperm.xlu2 %5537, %v3564_v2   ;;  %3630 = vperm.xlu1 %5536, %v3560_v16   ;;  %v5466_v2 = vld [vmem:[%s8406_s8 + $0xd8] sm:$0xff] }
 0xdbb   :  { %3640 = vperm.xlu1 %5536, %v3562_v48   ;;  %3615 = vperm.xlu2 %5537, %v3557_v28  }
 0xdc3   :  { %3696 = vperm.xlu1 %5536, %v5470_v32   ;;  %3691 = vperm.xlu2 %5537, %v5469_v47  }
 0xdcb   :  { %3681 = vperm.xlu1 %5536, %v5467_v62  }
 0xdf1   :  { %v3573_v12 = vpop.permute.xlu0 %3572 }
 0xdf2   :  { %v3606_v9 = vmul.f32 %v3573_v12, %v7541_v51 }
 0xdf5   :  { %v3588_v35 = vpop.permute.xlu2 %3587 }
 0xdf6   :  { %v3609_v58 = vmul.f32 %v3588_v35, %v7593_v6 }
 0xdf9   :  { %v3621_v44 = vpop.permute.xlu0 %3620 }
 0xdfa   :  { %v3654_v3 = vadd.f32 %v3621_v44, %v3606_v9 }
 0xdfc   :  { %v3662_v61 = vmax.f32 %v3654_v3, 0.0 }
 0xdfd   :  { %v3578_v42 = vpop.permute.xlu2 %3577 }
 0xdfe   :  { %v3607_v17 = vmul.f32 %v3578_v42, %v7559_v56 }
 0xe01   :  { %v3598_v27 = vpop.permute.xlu0 %3597 }
 0xe02   :  { %v3611_v60 = vmul.f32 %v3598_v27, %v7567_v18 }
 0xe05   :  { %v3626_v20 = vpop.permute.xlu2 %3625 }
 0xe06   :  { %v3655_v38 = vadd.f32 %v3626_v20, %v3607_v17 }
 0xe08   :  { %v3663_v25 = vmax.f32 %v3655_v38, 0.0 }
 0xe09   :  { %v3646_v31 = vpop.permute.xlu0 %3645 }
 0xe0a   :  { %v3659_v1 = vadd.f32 %v3646_v31, %v3611_v60 }
 0xe0c   :  { %v3667_v33 = vmax.f32 %v3659_v1, 0.0 }
 0xe0d   :  { %v3568_v15 = vpop.permute.xlu1 %3567  ;;  %v3651_v40 = vpop.permute.xlu2 %3650 }
 0xe0e   :  { %v3605_v41 = vmul.f32 %v3568_v15, %v7536_v52 }
 0xe11   :  { %v3603_v34 = vpop.permute.xlu0 %3602 }
 0xe12   :  { %v3612_v4 = vmul.f32 %v3603_v34, %v7581_v54 }
 0xe14   :  { %v3660_v23 = vadd.f32 %v3651_v40, %v3612_v4 }
 0xe15   :  { %v3593_v45 = vpop.permute.xlu1 %3592  ;;  %v3616_v11 = vpop.permute.xlu2 %3615 }
 0xe16   :  { %v3668_v57 = vmax.f32 %v3660_v23, 0.0  ;;  %v3653_v55 = vadd.f32 %v3616_v11, %v3605_v41  ;;  %v3610_v36 = vmul.f32 %v3593_v45, %v7548_v37 }
 0xe18   :  { %3752 = vmatpush.msrb.mxu3 %v3668_v57  ;;  %v3661_v50 = vmax.f32 %v3653_v55, 0.0 }
 0xe19   :  { %v3636_v10 = vpop.permute.xlu0 %3635 }
 0xe1a   :  { %3753 = vmatpush.msrb.mxu3 %v3667_v33  ;;  %v3657_v63 = vadd.f32 %v3636_v10, %v3609_v58 }
 0xe1c   :  { %v3665_v39 = vmax.f32 %v3657_v63, 0.0 }
 0xe1d   :  { %v3583_v26 = vpop.permute.xlu1 %3582  ;;  %v3692_v31 = vpop.permute.xlu2 %3691 }
 0xe1e   :  { %v3608_v19 = vmul.f32 %v3583_v26, %v7575_v59 }
 0xe21   :  { %v3687_v48 = vpop.permute.xlu0 %3686 }
 0xe25   :  { %v3631_v13 = vpop.permute.xlu1 %3630 }
 0xe26   :  { %v3656_v22 = vadd.f32 %v3631_v13, %v3608_v19 }
 0xe28   :  { %v3664_v53 = vmax.f32 %v3656_v22, 0.0 }
 0xe2a   :  { %3723 = vmatpush.msrb.mxu2 %v3664_v53 }
 0xe2c   :  { %3724 = vmatpush.msrb.mxu2 %v3663_v25 }
 0xe2d   :  { %v3641_v46 = vpop.permute.xlu1 %3640 }
 0xe2e   :  { %v3658_v43 = vadd.f32 %v3641_v46, %v3610_v36  ;;  %3725 = vmatpush.msrb.mxu2 %v3662_v61 }
 0xe30   :  { %v3666_v29 = vmax.f32 %v3658_v43, 0.0  ;;  %3726 = vmatpush.msrb.mxu2 %v3661_v50 }
 0xe31   :  { %5471 = vmatmul.msk.f32.vlgmr.msrb.gmra.mxu2 %vm1538_vm1, %v5463_v24 }
 0xe32   :  { %3754 = vmatpush.msrb.mxu3 %v3666_v29 }
 0xe34   :  { %3755 = vmatpush.msrb.mxu3 %v3665_v39 }
 0xe35   :  { %5475 = vmatmul.msk.f32.vlgmr.msrb.gmra.mxu3 %vm1538_vm1, %v5463_v24  ;;  %v3697_v16 = vpop.permute.xlu1 %3696 }
 0xe39   :  { %5472 = vmatmul.msk.f32.gmra.mxu2 %vm1538_vm1, %v5464_v14 }
 0xe3d   :  { %5476 = vmatmul.msk.f32.gmra.mxu3 %vm1538_vm1, %v5464_v14  ;;  %v3682_v21 = vpop.permute.xlu1 %3681 }
 0xe41   :  { %5473 = vmatmul.msk.f32.gmra.mxu2 %vm1538_vm1, %v5465_v30 }
 0xe45   :  { %5477 = vmatmul.msk.f32.gmra.mxu3 %vm1538_vm1, %v5465_v30 }
 0xe49   :  { %5474 = vmatmul.msk.f32.gmra.mxu2 %vm1538_vm1, %v5466_v2 }
 0xe4d   :  { %5478 = vmatmul.msk.f32.gmra.mxu3 %vm1538_vm1, %v5466_v2 }
 0xeb4   :  { %v3728_v7 = vpop.f32.mrf.mxu2 }
 0xeb5   :  { %v7718_v8 = vadd.f32 %v3728_v7, %v3682_v21 }
 0xeb7   :  { %v3801_v5 = vsel %vm1261_vm3, %v7718_v8, 0.0  ;;  %v3769_v25 = vmul.f32 %v7718_v8, %v7718_v8 }
 0xeb8   :  { %v3757_v49 = vpop.f32.mrf.mxu3  ;;  %3802 = vadd.xlane.f32.xlu2 %v3801_v5 }
 0xeb9   :  { %v7722_v0 = vadd.f32 %v3757_v49, %v3682_v21  ;;  %v3777_v55 = vsel %vm1261_vm3, %v3769_v25, 0.0 }
 0xebb   :  { %v3813_v28 = vsel %vm1261_vm3, %v7722_v0, 0.0  ;;  %v3773_v10 = vmul.f32 %v7722_v0, %v7722_v0 }
 0xebc   :  { %3814 = vadd.xlane.f32.xlu0 %v3813_v28  ;;  %v3731_v32 = vpop.f32.mrf.mxu2 }
 0xebd   :  { %v7726_v47 = vadd.f32 %v3731_v32, %v3687_v48  ;;  %v3789_v58 = vsel %vm1261_vm3, %v3773_v10, 0.0 }
 0xebf   :  { %v3804_v62 = vsel %vm1261_vm3, %v7726_v47, 0.0  ;;  %v3770_v12 = vmul.f32 %v7726_v47, %v7726_v47 }
 0xec0   :  { %v3760_v35 = vpop.f32.mrf.mxu3  ;;  %3805 = vadd.xlane.f32.xlu1 %v3804_v62 }
 0xec1   :  { %v7732_v44 = vadd.f32 %v3760_v35, %v3687_v48  ;;  %v3780_v42 = vsel %vm1261_vm3, %v3770_v12, 0.0 }
 0xec3   :  { %v3816_v27 = vsel %vm1261_vm3, %v7732_v44, 0.0  ;;  %v3774_v20 = vmul.f32 %v7732_v44, %v7732_v44 }
 0xec4   :  { %v3734_v15 = vpop.f32.mrf.mxu2  ;;  %3781 = vadd.xlane.f32.xlu0 %v3780_v42  ;;  %3817 = vadd.xlane.f32.xlu2 %v3816_v27 }
 0xec5   :  { %v7739_v34 = vadd.f32 %v3734_v15, %v3692_v31  ;;  %v3792_v60 = vsel %vm1261_vm3, %v3774_v20, 0.0 }
 0xec7   :  { %v3771_v4 = vmul.f32 %v7739_v34, %v7739_v34  ;;  %v3807_v23 = vsel %vm1261_vm3, %v7739_v34, 0.0 }
 0xec8   :  { %v3763_v40 = vpop.f32.mrf.mxu3  ;;  %3793 = vadd.xlane.f32.xlu1 %v3792_v60 }
 0xec9   :  { %v7744_v1 = vadd.f32 %v3763_v40, %v3692_v31  ;;  %v3783_v45 = vsel %vm1261_vm3, %v3771_v4, 0.0 }
 0xecb   :  { %v3819_v26 = vsel %vm1261_vm3, %v7744_v1, 0.0  ;;  %v3775_v17 = vmul.f32 %v7744_v1, %v7744_v1 }
 0xecc   :  { %v3737_v57 = vpop.f32.mrf.mxu2  ;;  %3808 = vadd.xlane.f32.xlu0 %v3807_v23  ;;  %3784 = vadd.xlane.f32.xlu2 %v3783_v45 }
 0xecd   :  { %v7749_v33 = vadd.f32 %v3737_v57, %v3697_v16  ;;  %v3795_v9 = vsel %vm1261_vm3, %v3775_v17, 0.0 }
 0xecf   :  { %v3810_v38 = vsel %vm1261_vm3, %v7749_v33, 0.0  ;;  %v3772_v22 = vmul.f32 %v7749_v33, %v7749_v33 }
 0xed0   :  { %v3766_v19 = vpop.f32.mrf.mxu3  ;;  %3820 = vadd.xlane.f32.xlu1 %v3819_v26 }
 0xed1   :  { %v7755_v13 = vadd.f32 %v3766_v19, %v3697_v16  ;;  %v3786_v11 = vsel %vm1261_vm3, %v3772_v22, 0.0 }
 0xed3   :  { %v3776_v3 = vmul.f32 %v7755_v13, %v7755_v13  ;;  %v3822_v41 = vsel %vm1261_vm3, %v7755_v13, 0.0 }
 0xed4   :  { %3796 = vadd.xlane.f32.xlu0 %v3795_v9  ;;  %3811 = vadd.xlane.f32.xlu2 %v3810_v38  ;;  %v7787_v38 = vld [vmem:[%s8402_s4 + $0xe8] sm:$0xff] }
 0xed5   :  { %v3798_v53 = vsel %vm1261_vm3, %v3776_v3, 0.0 }
 0xed8   :  { %3787 = vadd.xlane.f32.xlu1 %v3786_v11 }
 0xedc   :  { %3823 = vadd.xlane.f32.xlu0 %v3822_v41  ;;  %3799 = vadd.xlane.f32.xlu2 %v3798_v53  ;;  %v8547_v41 = vld [vmem:[#allocation77_spill] sm:$0xff] }
 0xedd   :  { %v592_v53 = vadd.f32 %v8547_v41, %v7787_v38  ;;  %v8551_v41 = vld [vmem:[#allocation17_spill] sm:$0xff] }
 0xee0   :  { %3778 = vadd.xlane.f32.xlu1 %v3777_v55 }
 0xee4   :  { %3790 = vadd.xlane.f32.xlu2 %v3789_v58 }
 0xf2b   :  { %v3803_v61 = vpop.xlane.xlu2 %3802 }
 0xf2f   :  { %v3815_v36 = vpop.xlane.xlu0 %3814 }
 0xf30   :  { %v3825_v17 = vadd.f32 %v3815_v36, %v3803_v61 }
 0xf32   :  { %v7793_v25 = vmul.f32 0.0078125, %v3825_v17 }
 0xf33   :  { %v3806_v46 = vpop.xlane.xlu1 %3805 }
 0xf37   :  { %v3782_v50 = vpop.xlane.xlu0 %3781  ;;  %v3818_v63 = vpop.xlane.xlu2 %3817 }
 0xf38   :  { %v3826_v43 = vadd.f32 %v3818_v63, %v3806_v46 }
 0xf3a   :  { %v7774_v24 = vmul.f32 0.0078125, %v3826_v43 }
 0xf3b   :  { %v3794_v29 = vpop.xlane.xlu1 %3793 }
 0xf3c   :  { %v3834_v39 = vadd.f32 %v3794_v29, %v3782_v50  ;;  %v3842_v30 = vmul.f32 %v7774_v24, %v7774_v24  ;;  %v3841_v29 = vmul.f32 %v7793_v25, %v7793_v25 }
 0xf3e   :  { %v3838_v14 = vmul.f32 0.0078125, %v3834_v39 }
 0xf3f   :  { %v3809_v2 = vpop.xlane.xlu0 %3808  ;;  %v3785_v16 = vpop.xlane.xlu2 %3784 }
 0xf40   :  { %v3846_v21 = vsub.f32 %v3838_v14, %v3842_v30  ;;  %v7803_v14 = vld [vmem:[%s8402_s4 + $0x248] sm:$0xff] }
 0xf42   :  { %v3850_v7 = vmax.f32 %v3846_v21, 0.0 }
 0xf43   :  { %v3821_v5 = vpop.xlane.xlu1 %3820 }
 0xf44   :  { %v3854_v49 = vadd.f32 1e-05, %v3850_v7  ;;  %v3827_v28 = vadd.f32 %v3821_v5, %v3809_v2  ;;  %v8548_v5 = vld [vmem:[#allocation14_spill] sm:$0xff] }
 0xf46   :  { %5594 = vrsqrt.f32 %v3854_v49  ;;  %v7778_v48 = vmul.f32 0.0078125, %v3827_v28  ;;  %vm3873_vm10 = vweird.f32 %v3854_v49 }
 0xf47   :  { %v3797_v32 = vpop.xlane.xlu0 %3796  ;;  %v3812_v62 = vpop.xlane.xlu2 %3811 }
 0xf48   :  { %v3835_v12 = vadd.f32 %v3797_v32, %v3785_v16  ;;  %v3843_v35 = vmul.f32 %v7778_v48, %v7778_v48 }
 0xf4a   :  { %v3839_v42 = vmul.f32 0.0078125, %v3835_v12 }
 0xf4b   :  { %v3788_v15 = vpop.xlane.xlu1 %3787 }
 0xf4c   :  { %v5595_v27 = vpop.eup %5594  ;;  %v3847_v20 = vsub.f32 %v3839_v42, %v3843_v35 }
 0xf4d   :  { %v3868_v31 = vmul.f32 %v5595_v27, %v3854_v49  ;;  %vm3874_vm9 = vweird.f32 %v5595_v27  ;;  %v724_v49 = vadd.f32 %v8548_v5, %v7803_v14 }
 0xf4e   :  { %v3851_v60 = vmax.f32 %v3847_v20, 0.0  ;;  %vm3875_vm0 = vmor %vm3873_vm10, %vm3874_vm9 }
 0xf4f   :  { %v3869_v4 = vmul.f32 %v5595_v27, %v3868_v31  ;;  %v3824_v40 = vpop.xlane.xlu0 %3823  ;;  %v3800_v23 = vpop.xlane.xlu2 %3799  ;;  %v8549_v31 = vld [vmem:[#allocation79_spill] sm:$0xff] }
 0xf50   :  { %v3855_v45 = vadd.f32 1e-05, %v3851_v60  ;;  %v3828_v57 = vadd.f32 %v3824_v40, %v3812_v62  ;;  %v3836_v9 = vadd.f32 %v3800_v23, %v3788_v15  ;;  %v8550_v60 = vld [vmem:[#allocation78_spill] sm:$0xff] }
 0xf51   :  { %v3870_v26 = vmul.f32 0.5, %v3869_v4 }
 0xf52   :  { %5596 = vrsqrt.f32 %v3855_v45  ;;  %v7782_v19 = vmul.f32 0.0078125, %v3828_v57  ;;  %v3840_v55 = vmul.f32 0.0078125, %v3836_v9  ;;  %vm3883_vm12 = vweird.f32 %v3855_v45 }
 0xf53   :  { %v3871_v22 = vsub.f32 1.5, %v3870_v26  ;;  %v3779_v10 = vpop.xlane.xlu1 %3778 }
 0xf54   :  { %v3844_v11 = vmul.f32 %v7782_v19, %v7782_v19 }
 0xf55   :  { %v3872_v3 = vmul.f32 %v5595_v27, %v3871_v22 }
 0xf56   :  { %v3848_v46 = vsub.f32 %v3840_v55, %v3844_v11  ;;  %v162_v55 = vld [vmem:[%s8402_s4 + $0xe0] sm:$0xff] }
 0xf57   :  { %v3791_v58 = vpop.xlane.xlu2 %3790  ;;  %v7795_v61 = vsel %vm3875_vm0, %v5595_v27, %v3872_v3  ;;  %v164_v27 = vld [vmem:[%s8402_s4 + $0xf0] sm:$0xff] }
 0xf58   :  { %v5597_v36 = vpop.eup %5596  ;;  %v3833_v50 = vadd.f32 %v3791_v58, %v3779_v10  ;;  %v3898_v63 = vmul.f32 %v7795_v61, %v592_v53  ;;  %v3852_v2 = vmax.f32 %v3848_v46, 0.0  ;;  %v595_v15 = vadd.f32 %v8549_v31, %v164_v27 }
 0xf59   :  { %v3878_v43 = vmul.f32 %v5597_v36, %v3855_v45  ;;  %vm3884_vm11 = vweird.f32 %v5597_v36  ;;  %v876_v4 = vadd.f32 %v8550_v60, %v164_v27  ;;  %v208_v45 = vld [vmem:[%s8402_s4 + $0x250] sm:$0xff] }
 0xf5a   :  { %v3837_v39 = vmul.f32 0.0078125, %v3833_v50  ;;  %3928 = vperm.xlu2 %5537, %v3898_v63   ;;  %v3906_v21 = vmul.f32 %v3898_v63, %v7774_v24  ;;  %v3856_v62 = vadd.f32 1e-05, %v3852_v2  ;;  %vm3885_vm13 = vmor %vm3883_vm12, %vm3884_vm11  ;;  %v1008_v53 = vadd.f32 %v8551_v41, %v208_v45  ;;  %v8552_v50 = vld [vmem:[#allocation74_spill] sm:$0xff]  ;;  %v8556_v27 = vld [vmem:[#allocation76_spill] sm:$0xff] }
 0xf5b   :  { %v3879_v30 = vmul.f32 %v5597_v36, %v3878_v43  ;;  %v589_v63 = vadd.f32 %v8552_v50, %v162_v55  ;;  %v8553_v43 = vld [vmem:[#allocation75_spill] sm:$0xff] }
 0xf5c   :  { %v3845_v16 = vsub.f32 %v3837_v39, %v3841_v29  ;;  %v3914_v35 = vsub.f32 %v724_v49, %v3906_v21  ;;  %v870_v29 = vadd.f32 %v8553_v43, %v162_v55  ;;  %vm3893_vm5 = vweird.f32 %v3856_v62  ;;  %v8560_v55 = vld [vmem:[#allocation12_spill] sm:$0xff] }
 0xf5d   :  { %v3880_v7 = vmul.f32 0.5, %v3879_v30 }
 0xf5e   :  { %v3849_v28 = vmax.f32 %v3845_v16, 0.0  ;;  %v206_v16 = vld [vmem:[%s8402_s4 + $0x240] sm:$0xff] }
 0xf5f   :  { %v3881_v32 = vsub.f32 1.5, %v3880_v7  ;;  %v8554_v7 = vld [vmem:[#allocation13_spill] sm:$0xff] }
 0xf60   :  { %v3853_v12 = vadd.f32 1e-05, %v3849_v28  ;;  %v1002_v5 = vadd.f32 %v8554_v7, %v206_v16 }
 0xf61   :  { %v3882_v42 = vmul.f32 %v5597_v36, %v3881_v32 }
 0xf62   :  { %5598 = vrsqrt.f32 %v3853_v12  ;;  %3976 = vperm.xlu2 %5537, %v3914_v35   ;;  %vm3863_vm15 = vweird.f32 %v3853_v12  ;;  %v8555_v35 = vld [vmem:[#allocation16_spill] sm:$0xff] }
 0xf63   :  { %5600 = vrsqrt.f32 %v3856_v62  ;;  %v3886_v20 = vsel %vm3885_vm13, %v5597_v36, %v3882_v42  ;;  %v727_v42 = vadd.f32 %v8555_v35, %v208_v45  ;;  %v8559_v45 = vld [vmem:[#allocation81_spill] sm:$0xff] }
 0xf64   :  { %v3899_v23 = vmul.f32 %v3886_v20, %v595_v15  ;;  %v3903_v57 = vmul.f32 %v3886_v20, %v876_v4  ;;  %v873_v20 = vadd.f32 %v8556_v27, %v7787_v38  ;;  %v5484_v4 = vld [vmem:[%s8407_s9 + $0xe8] sm:$0xff]  ;;  %v8557_v38 = vld [vmem:[#allocation80_spill] sm:$0xff] }
 0xf66   :  { %v3911_v22 = vmul.f32 %v3903_v57, %v7778_v48  ;;  %v3907_v32 = vmul.f32 %v3899_v23, %v7778_v48  ;;  %v3902_v15 = vmul.f32 %v7795_v61, %v873_v20  ;;  %v165_v48 = vld [vmem:[%s8402_s4 + $0xf8] sm:$0xff] }
 0xf68   :  { %v5599_v40 = vpop.eup %5598  ;;  %v3919_v58 = vsub.f32 %v1008_v53, %v3911_v22  ;;  %v3915_v31 = vsub.f32 %v727_v42, %v3907_v32  ;;  %v3910_v50 = vmul.f32 %v3902_v15, %v7774_v24 }
 0xf69   :  { %v3858_v26 = vmul.f32 %v5599_v40, %v3853_v12  ;;  %v5601_v17 = vpop.eup %5600  ;;  %vm3864_vm14 = vweird.f32 %v5599_v40 }
 0xf6a   :  { %3933 = vperm.xlu2 %5537, %v3899_v23   ;;  %v3888_v11 = vmul.f32 %v5601_v17, %v3856_v62  ;;  %vm3865_vm2 = vmor %vm3863_vm15, %vm3864_vm14  ;;  %vm3894_vm4 = vweird.f32 %v5601_v17  ;;  %v879_v23 = vadd.f32 %v8557_v38, %v165_v48  ;;  %v209_v62 = vld [vmem:[%s8402_s4 + $0x258] sm:$0xff] }
 0xf6b   :  { %v3859_v9 = vmul.f32 %v5599_v40, %v3858_v26  ;;  %vm3895_vm6 = vmor %vm3893_vm5, %vm3894_vm4 }
 0xf6c   :  { %v3889_v36 = vmul.f32 %v5601_v17, %v3888_v11  ;;  %v598_v11 = vadd.f32 %v8559_v45, %v165_v48 }
 0xf6d   :  { %v3860_v3 = vmul.f32 0.5, %v3859_v9  ;;  %v8558_v9 = vld [vmem:[#allocation19_spill] sm:$0xff] }
 0xf6e   :  { %v3890_v21 = vmul.f32 0.5, %v3889_v36  ;;  %v1011_v22 = vadd.f32 %v8558_v9, %v209_v62 }
 0xf6f   :  { %v3861_v10 = vsub.f32 1.5, %v3860_v3 }
 0xf70   :  { %v3891_v12 = vsub.f32 1.5, %v3890_v21 }
 0xf71   :  { %v3862_v46 = vmul.f32 %v5599_v40, %v3861_v10  ;;  %v8561_v10 = vld [vmem:[#allocation18_spill] sm:$0xff] }
 0xf72   :  { %4001 = vperm.xlu2 %5537, %v3919_v58   ;;  %v3892_v60 = vmul.f32 %v5601_v17, %v3891_v12  ;;  %v730_v58 = vadd.f32 %v8561_v10, %v209_v62 }
 0xf73   :  { %v3866_v39 = vsel %vm3865_vm2, %v5599_v40, %v3862_v46 }
 0xf74   :  { %v3901_v30 = vmul.f32 %v3866_v39, %v870_v29  ;;  %v3897_v2 = vmul.f32 %v3866_v39, %v589_v63  ;;  %v3896_v40 = vsel %vm3895_vm6, %v5601_v17, %v3892_v60  ;;  %v8562_v63 = vld [vmem:[#allocation15_spill] sm:$0xff]  ;;  %v5483_v39 = vld [vmem:[%s8407_s9 + $0xe0] sm:$0xff] }
 0xf75   :  { %v3904_v26 = vmul.f32 %v3896_v40, %v879_v23  ;;  %v3900_v41 = vmul.f32 %v3896_v40, %v598_v11  ;;  %v1005_v43 = vadd.f32 %v8562_v63, %v7803_v14  ;;  %v5485_v29 = vld [vmem:[%s8407_s9 + $0xf0] sm:$0xff] }
 0xf76   :  { %3943 = vperm.xlu1 %5536, %v3901_v30   ;;  %3923 = vperm.xlu0 %5535, %v3897_v2   ;;  %v3909_v49 = vmul.f32 %v3901_v30, %v7793_v25  ;;  %v3905_v53 = vmul.f32 %v3897_v2, %v7793_v25  ;;  %v5486_v25 = vld [vmem:[%s8407_s9 + $0xf8] sm:$0xff] }
 0xf77   :  { %v3912_v61 = vmul.f32 %v3904_v26, %v7782_v19  ;;  %v3908_v17 = vmul.f32 %v3900_v41, %v7782_v19  ;;  %v3918_v19 = vsub.f32 %v1005_v43, %v3910_v50 }
 0xf78   :  { %v3917_v28 = vsub.f32 %v1002_v5, %v3909_v49 }
 0xf79   :  { %v3920_v3 = vsub.f32 %v1011_v22, %v3912_v61  ;;  %v3916_v36 = vsub.f32 %v730_v58, %v3908_v17 }
 0xf7a   :  { %3991 = vperm.xlu2 %5537, %v3917_v28  }
 0xf7e   :  { %3981 = vperm.xlu1 %5536, %v3915_v31   ;;  %3948 = vperm.xlu0 %5535, %v3902_v15  }
 0xf82   :  { %4042 = vperm.xlu2 %5537, %v5484_v4  }
 0xf86   :  { %3958 = vperm.xlu1 %5536, %v3904_v26   ;;  %3953 = vperm.xlu0 %5535, %v3903_v57   ;;  %v721_v57 = vadd.f32 %v8560_v55, %v206_v16  ;;  %v5482_v55 = vld [vmem:[%s8406_s8 + $0xf8] sm:$0xff] }
 0xf88   :  { %v3913_v46 = vsub.f32 %v721_v57, %v3905_v53  ;;  %v5481_v53 = vld [vmem:[%s8406_s8 + $0xf0] sm:$0xff] }
 0xf8e   :  { %4006 = vperm.xlu1 %5536, %v3920_v3   ;;  %3938 = vperm.xlu0 %5535, %v3900_v41  }
 0xf96   :  { %3986 = vperm.xlu0 %5535, %v3916_v36   ;;  %3971 = vperm.xlu1 %5536, %v3913_v46  }
 0xf9e   :  { %3996 = vperm.xlu0 %5535, %v3918_v19   ;;  %4047 = vperm.xlu1 %5536, %v5485_v29  }
 0xfa6   :  { %4052 = vperm.xlu0 %5535, %v5486_v25  }
 0xfae   :  { %4037 = vperm.xlu0 %5535, %v5483_v39  }
 0xfb4   :  { %v3929_v24 = vpop.permute.xlu2 %3928 }
 0xfb5   :  { %v3962_v40 = vmul.f32 %v3929_v24, %v7726_v47 }
 0xfbc   :  { %v3977_v2 = vpop.permute.xlu2 %3976 }
 0xfbd   :  { %v4010_v26 = vadd.f32 %v3977_v2, %v3962_v40 }
 0xfbf   :  { %v4018_v45 = vmax.f32 %v4010_v26, 0.0 }
 0xfc4   :  { %v3934_v7 = vpop.permute.xlu2 %3933 }
 0xfc5   :  { %v3963_v60 = vmul.f32 %v3934_v7, %v7739_v34 }
 0xfcc   :  { %v4002_v32 = vpop.permute.xlu2 %4001 }
 0xfe8   :  { %v3944_v30 = vpop.permute.xlu1 %3943  ;;  %v3924_v14 = vpop.permute.xlu0 %3923 }
 0xfe9   :  { %v3965_v62 = vmul.f32 %v3944_v30, %v7722_v0 }
 0xff0   :  { %v3982_v16 = vpop.permute.xlu1 %3981  ;;  %v3949_v21 = vpop.permute.xlu0 %3948 }
 0xff1   :  { %v4011_v38 = vadd.f32 %v3982_v16, %v3963_v60  ;;  %v3966_v34 = vmul.f32 %v3949_v21, %v7732_v44  ;;  %v5480_v44 = vld [vmem:[%s8406_s8 + $0xe8] sm:$0xff] }
 0xff3   :  { %v4019_v9 = vmax.f32 %v4011_v38, 0.0 }
 0xff8   :  { %v3959_v5 = vpop.permute.xlu1 %3958  ;;  %v3954_v49 = vpop.permute.xlu0 %3953 }
 0xff9   :  { %v3967_v28 = vmul.f32 %v3954_v49, %v7744_v1  ;;  %v3968_v12 = vmul.f32 %v3959_v5, %v7755_v13  ;;  %v3961_v13 = vmul.f32 %v3924_v14, %v7718_v8  ;;  %v5479_v8 = vld [vmem:[%s8406_s8 + $0xe0] sm:$0xff] }
 0xffb   :  { %v4015_v27 = vadd.f32 %v4002_v32, %v3967_v28 }
 0xffd   :  { %v4023_v15 = vmax.f32 %v4015_v27, 0.0 }
0x1000   :  { %v4007_v35 = vpop.permute.xlu1 %4006  ;;  %v3939_v42 = vpop.permute.xlu0 %3938 }
0x1001   :  { %v4016_v20 = vadd.f32 %v4007_v35, %v3968_v12  ;;  %v3964_v4 = vmul.f32 %v3939_v42, %v7749_v33  ;;  %v3992_v33 = vpop.permute.xlu2 %3991 }
0x1002   :  { %v4013_v3 = vadd.f32 %v3992_v33, %v3965_v62 }
0x1003   :  { %v4024_v31 = vmax.f32 %v4016_v20, 0.0 }
0x1004   :  { %v4021_v0 = vmax.f32 %v4013_v3, 0.0 }
0x1005   :  { %4108 = vmatpush.msra.mxu3 %v4024_v31 }
0x1007   :  { %4109 = vmatpush.msra.mxu3 %v4023_v15 }
0x1008   :  { %v3987_v48 = vpop.permute.xlu0 %3986  ;;  %v3972_v23 = vpop.permute.xlu1 %3971 }
0x1009   :  { %v4012_v1 = vadd.f32 %v3987_v48, %v3964_v4  ;;  %v4009_v22 = vadd.f32 %v3972_v23, %v3961_v13  ;;  %v4043_v19 = vpop.permute.xlu2 %4042 }
0x100b   :  { %v4020_v61 = vmax.f32 %v4012_v1, 0.0  ;;  %v4017_v47 = vmax.f32 %v4009_v22, 0.0 }
0x100d   :  { %4079 = vmatpush.msra.mxu2 %v4020_v61 }
0x100f   :  { %4080 = vmatpush.msra.mxu2 %v4019_v9 }
0x1010   :  { %v3997_v11 = vpop.permute.xlu0 %3996  ;;  %v4048_v21 = vpop.permute.xlu1 %4047 }
0x1011   :  { %v4014_v41 = vadd.f32 %v3997_v11, %v3966_v34  ;;  %4081 = vmatpush.msra.mxu2 %v4018_v45 }
0x1013   :  { %v4022_v17 = vmax.f32 %v4014_v41, 0.0  ;;  %4082 = vmatpush.msra.mxu2 %v4017_v47 }
0x1014   :  { %5487 = vmatmul.msk.f32.vlgmr.msra.gmra.mxu2 %vm1538_vm1, %v5479_v8 }
0x1015   :  { %4110 = vmatpush.msra.mxu3 %v4022_v17 }
0x1017   :  { %4111 = vmatpush.msra.mxu3 %v4021_v0 }
0x1018   :  { %5491 = vmatmul.msk.f32.vlgmr.msra.gmra.mxu3 %vm1538_vm1, %v5479_v8  ;;  %v4053_v57 = vpop.permute.xlu0 %4052 }
0x101c   :  { %5488 = vmatmul.msk.f32.gmra.mxu2 %vm1538_vm1, %v5480_v44 }
0x1020   :  { %5492 = vmatmul.msk.f32.gmra.mxu3 %vm1538_vm1, %v5480_v44  ;;  %v4038_v10 = vpop.permute.xlu0 %4037 }
0x1024   :  { %5489 = vmatmul.msk.f32.gmra.mxu2 %vm1538_vm1, %v5481_v53 }
0x1028   :  { %5493 = vmatmul.msk.f32.gmra.mxu3 %vm1538_vm1, %v5481_v53 }
0x102c   :  { %5490 = vmatmul.msk.f32.gmra.mxu2 %vm1538_vm1, %v5482_v55 }
0x1030   :  { %5494 = vmatmul.msk.f32.gmra.mxu3 %vm1538_vm1, %v5482_v55 }
0x1097   :  { %v4084_v58 = vpop.f32.mrf.mxu2 }
0x1098   :  { %v4085_v36 = vadd.f32 %v4084_v58, %v4038_v10 }
0x109a   :  { %v7891_v46 = vadd.f32 %v4085_v36, %v7536_v52 }
0x109b   :  { %v4113_v50 = vpop.f32.mrf.mxu3 }
0x109c   :  { %v4114_v63 = vadd.f32 %v4113_v50, %v4038_v10  ;;  %v4165_v43 = vsel %vm1261_vm3, %v7891_v46, 0.0  ;;  %v4133_v22 = vmul.f32 %v7891_v46, %v7891_v46 }
0x109d   :  { %4166 = vadd.xlane.f32.xlu0 %v4165_v43 }
0x109e   :  { %v7896_v29 = vadd.f32 %v4114_v63, %v7593_v6  ;;  %v4141_v45 = vsel %vm1261_vm3, %v4133_v22, 0.0 }
0x109f   :  { %v4087_v25 = vpop.f32.mrf.mxu2 }
0x10a0   :  { %v4088_v39 = vadd.f32 %v4087_v25, %v4043_v19  ;;  %v4177_v24 = vsel %vm1261_vm3, %v7896_v29, 0.0  ;;  %v4137_v13 = vmul.f32 %v7896_v29, %v7896_v29 }
0x10a1   :  { %4178 = vadd.xlane.f32.xlu1 %v4177_v24 }
0x10a2   :  { %v7901_v30 = vadd.f32 %v4088_v39, %v7541_v51  ;;  %v4153_v61 = vsel %vm1261_vm3, %v4137_v13, 0.0 }
0x10a3   :  { %v4116_v52 = vpop.f32.mrf.mxu3 }
0x10a4   :  { %v4117_v14 = vadd.f32 %v4116_v52, %v4043_v19  ;;  %v4168_v2 = vsel %vm1261_vm3, %v7901_v30, 0.0  ;;  %v4134_v16 = vmul.f32 %v7901_v30, %v7901_v30 }
0x10a5   :  { %4169 = vadd.xlane.f32.xlu2 %v4168_v2 }
0x10a6   :  { %v7908_v6 = vadd.f32 %v4117_v14, %v7548_v37  ;;  %v4144_v51 = vsel %vm1261_vm3, %v4134_v16, 0.0 }
0x10a7   :  { %v4090_v7 = vpop.f32.mrf.mxu2 }
0x10a8   :  { %v4091_v5 = vadd.f32 %v4090_v7, %v4048_v21  ;;  %v4180_v49 = vsel %vm1261_vm3, %v7908_v6, 0.0  ;;  %v4138_v28 = vmul.f32 %v7908_v6, %v7908_v6 }
0x10a9   :  { %4181 = vadd.xlane.f32.xlu0 %v4180_v49  ;;  %4145 = vadd.xlane.f32.xlu1 %v4144_v51 }
0x10aa   :  { %v7916_v32 = vadd.f32 %v4091_v5, %v7559_v56  ;;  %v4156_v37 = vsel %vm1261_vm3, %v4138_v28, 0.0 }
0x10ab   :  { %v4119_v12 = vpop.f32.mrf.mxu3 }
0x10ac   :  { %v4120_v35 = vadd.f32 %v4119_v12, %v4048_v21  ;;  %v4135_v42 = vmul.f32 %v7916_v32, %v7916_v32  ;;  %v4171_v60 = vsel %vm1261_vm3, %v7916_v32, 0.0 }
0x10ad   :  { %4157 = vadd.xlane.f32.xlu2 %v4156_v37  ;;  %v7967_v37 = vld [vmem:[%s8402_s4 + $0x108] sm:$0xff] }
0x10ae   :  { %v7922_v20 = vadd.f32 %v4120_v35, %v7567_v18  ;;  %v4147_v15 = vsel %vm1261_vm3, %v4135_v42, 0.0 }
0x10af   :  { %v4093_v27 = vpop.f32.mrf.mxu2 }
0x10b0   :  { %v4094_v31 = vadd.f32 %v4093_v27, %v4053_v57  ;;  %v4183_v40 = vsel %vm1261_vm3, %v7922_v20, 0.0  ;;  %v4139_v38 = vmul.f32 %v7922_v20, %v7922_v20 }
0x10b1   :  { %4148 = vadd.xlane.f32.xlu0 %v4147_v15  ;;  %4172 = vadd.xlane.f32.xlu1 %v4171_v60  ;;  %v8563_v60 = vld [vmem:[#allocation85_spill] sm:$0xff] }
0x10b2   :  { %v7928_v56 = vadd.f32 %v4094_v31, %v7575_v59  ;;  %v4159_v59 = vsel %vm1261_vm3, %v4139_v38, 0.0 }
0x10b3   :  { %v4122_v4 = vpop.f32.mrf.mxu3 }
0x10b4   :  { %v4123_v48 = vadd.f32 %v4122_v4, %v4053_v57  ;;  %v4136_v18 = vmul.f32 %v7928_v56, %v7928_v56  ;;  %v4174_v62 = vsel %vm1261_vm3, %v7928_v56, 0.0  ;;  %v604_v4 = vadd.f32 %v8563_v60, %v7967_v37  ;;  %v169_v60 = vld [vmem:[%s8402_s4 + $0x118] sm:$0xff] }
0x10b5   :  { %4184 = vadd.xlane.f32.xlu2 %v4183_v40 }
0x10b6   :  { %v7937_v1 = vadd.f32 %v4123_v48, %v7581_v54  ;;  %v4150_v23 = vsel %vm1261_vm3, %v4136_v18, 0.0 }
0x10b8   :  { %v4186_v26 = vsel %vm1261_vm3, %v7937_v1, 0.0  ;;  %v4140_v54 = vmul.f32 %v7937_v1, %v7937_v1 }
0x10b9   :  { %4151 = vadd.xlane.f32.xlu0 %v4150_v23  ;;  %4160 = vadd.xlane.f32.xlu1 %v4159_v59 }
0x10ba   :  { %v4162_v9 = vsel %vm1261_vm3, %v4140_v54, 0.0  ;;  %v7981_v54 = vld [vmem:[%s8402_s4 + $0x268] sm:$0xff] }
0x10bd   :  { %4187 = vadd.xlane.f32.xlu2 %v4186_v26 }
0x10c1   :  { %4154 = vadd.xlane.f32.xlu0 %v4153_v61  ;;  %4175 = vadd.xlane.f32.xlu1 %v4174_v62 }
0x10c5   :  { %4163 = vadd.xlane.f32.xlu2 %v4162_v9 }
0x10cd   :  { %4142 = vadd.xlane.f32.xlu2 %v4141_v45 }
0x1110   :  { %v4167_v34 = vpop.xlane.xlu0 %4166 }
0x1114   :  { %v4179_v33 = vpop.xlane.xlu1 %4178 }
0x1115   :  { %v4189_v48 = vadd.f32 %v4179_v33, %v4167_v34 }
0x1117   :  { %v7976_v61 = vmul.f32 0.0078125, %v4189_v48  ;;  %v8567_v48 = vld [vmem:[#allocation83_spill] sm:$0xff] }
0x1118   :  { %v4170_v11 = vpop.xlane.xlu2 %4169 }
0x111c   :  { %v4182_v3 = vpop.xlane.xlu0 %4181  ;;  %v4146_v47 = vpop.xlane.xlu1 %4145 }
0x111d   :  { %v4190_v41 = vadd.f32 %v4182_v3, %v4170_v11 }
0x111f   :  { %v7954_v8 = vmul.f32 0.0078125, %v4190_v41 }
0x1120   :  { %v4158_v17 = vpop.xlane.xlu2 %4157 }
0x1121   :  { %v4198_v0 = vadd.f32 %v4158_v17, %v4146_v47  ;;  %v4206_v44 = vmul.f32 %v7954_v8, %v7954_v8  ;;  %v8564_v47 = vld [vmem:[#allocation22_spill] sm:$0xff]  ;;  %v4205_v17 = vmul.f32 %v7976_v61, %v7976_v61 }
0x1122   :  { %v736_v41 = vadd.f32 %v8564_v47, %v7981_v54 }
0x1123   :  { %v4202_v53 = vmul.f32 0.0078125, %v4198_v0 }
0x1124   :  { %v4173_v55 = vpop.xlane.xlu1 %4172  ;;  %v4149_v43 = vpop.xlane.xlu0 %4148 }
0x1125   :  { %v4210_v57 = vsub.f32 %v4202_v53, %v4206_v44 }
0x1127   :  { %v4214_v10 = vmax.f32 %v4210_v57, 0.0 }
0x1128   :  { %v4185_v58 = vpop.xlane.xlu2 %4184 }
0x1129   :  { %v4218_v36 = vadd.f32 1e-05, %v4214_v10  ;;  %v4191_v50 = vadd.f32 %v4185_v58, %v4173_v55 }
0x112b   :  { %5602 = vrsqrt.f32 %v4218_v36  ;;  %v7958_v63 = vmul.f32 0.0078125, %v4191_v50  ;;  %vm4237_vm8 = vweird.f32 %v4218_v36  ;;  %v168_v50 = vld [vmem:[%s8402_s4 + $0x110] sm:$0xff] }
0x112c   :  { %v4161_v19 = vpop.xlane.xlu1 %4160  ;;  %v4152_v12 = vpop.xlane.xlu0 %4151 }
0x112d   :  { %v4199_v25 = vadd.f32 %v4161_v19, %v4149_v43  ;;  %v4207_v39 = vmul.f32 %v7958_v63, %v7958_v63 }
0x112f   :  { %v4203_v24 = vmul.f32 0.0078125, %v4199_v25  ;;  %v8565_v25 = vld [vmem:[#allocation86_spill] sm:$0xff] }
0x1130   :  { %v4188_v52 = vpop.xlane.xlu2 %4187 }
0x1131   :  { %v5603_v14 = vpop.eup %5602  ;;  %v4211_v2 = vsub.f32 %v4203_v24, %v4207_v39  ;;  %v888_v39 = vadd.f32 %v8565_v25, %v168_v50 }
0x1132   :  { %v4232_v16 = vmul.f32 %v5603_v14, %v4218_v36  ;;  %vm4238_vm7 = vweird.f32 %v5603_v14 }
0x1133   :  { %v4215_v21 = vmax.f32 %v4211_v2, 0.0  ;;  %vm4239_vm9 = vmor %vm4237_vm8, %vm4238_vm7 }
0x1134   :  { %v4233_v7 = vmul.f32 %v5603_v14, %v4232_v16  ;;  %v4176_v5 = vpop.xlane.xlu1 %4175  ;;  %v4155_v22 = vpop.xlane.xlu0 %4154 }
0x1135   :  { %v4219_v49 = vadd.f32 1e-05, %v4215_v21  ;;  %v4192_v51 = vadd.f32 %v4188_v52, %v4176_v5  ;;  %v212_v21 = vld [vmem:[%s8402_s4 + $0x270] sm:$0xff]  ;;  %v8566_v5 = vld [vmem:[#allocation25_spill] sm:$0xff] }
0x1136   :  { %v4234_v28 = vmul.f32 0.5, %v4233_v7 }
0x1137   :  { %5604 = vrsqrt.f32 %v4219_v49  ;;  %v7962_v35 = vmul.f32 0.0078125, %v4192_v51  ;;  %vm4247_vm0 = vweird.f32 %v4219_v49 }
0x1138   :  { %v4235_v42 = vsub.f32 1.5, %v4234_v28  ;;  %v4164_v27 = vpop.xlane.xlu2 %4163 }
0x1139   :  { %v4200_v31 = vadd.f32 %v4164_v27, %v4152_v12  ;;  %v4208_v18 = vmul.f32 %v7962_v35, %v7962_v35 }
0x113a   :  { %v4236_v15 = vmul.f32 %v5603_v14, %v4235_v42 }
0x113b   :  { %v4204_v40 = vmul.f32 0.0078125, %v4200_v31  ;;  %v166_v31 = vld [vmem:[%s8402_s4 + $0x100] sm:$0xff] }
0x113c   :  { %v7973_v38 = vsel %vm4239_vm9, %v5603_v14, %v4236_v15 }
0x113d   :  { %v5605_v23 = vpop.eup %5604  ;;  %v4212_v59 = vsub.f32 %v4204_v40, %v4208_v18  ;;  %v4262_v26 = vmul.f32 %v7973_v38, %v604_v4  ;;  %v601_v40 = vadd.f32 %v8567_v48, %v166_v31  ;;  %v8568_v18 = vld [vmem:[#allocation82_spill] sm:$0xff] }
0x113e   :  { %v4242_v13 = vmul.f32 %v5605_v23, %v4219_v49  ;;  %vm4248_vm10 = vweird.f32 %v5605_v23  ;;  %v1020_v49 = vadd.f32 %v8566_v5, %v212_v21  ;;  %v8577_v5 = vld [vmem:[#allocation20_spill] sm:$0xff] }
0x113f   :  { %v4216_v62 = vmax.f32 %v4212_v59, 0.0  ;;  %4292 = vperm.xlu1 %5536, %v4262_v26   ;;  %v4270_v11 = vmul.f32 %v4262_v26, %v7954_v8  ;;  %vm4249_vm11 = vmor %vm4247_vm0, %vm4248_vm10  ;;  %v8569_v59 = vld [vmem:[#allocation87_spill] sm:$0xff] }
0x1140   :  { %v4243_v9 = vmul.f32 %v5605_v23, %v4242_v13  ;;  %v4143_v45 = vpop.xlane.xlu2 %4142  ;;  %v607_v26 = vadd.f32 %v8569_v59, %v168_v50 }
0x1141   :  { %v4220_v34 = vadd.f32 1e-05, %v4216_v62  ;;  %v4197_v33 = vadd.f32 %v4155_v22, %v4143_v45  ;;  %v4278_v55 = vsub.f32 %v736_v41, %v4270_v11  ;;  %v8570_v62 = vld [vmem:[#allocation89_spill] sm:$0xff] }
0x1142   :  { %v4244_v3 = vmul.f32 0.5, %v4243_v9  ;;  %v610_v9 = vadd.f32 %v8570_v62, %v169_v60  ;;  %v210_v41 = vld [vmem:[%s8402_s4 + $0x260] sm:$0xff] }
0x1143   :  { %5606 = vrsqrt.f32 %v4220_v34  ;;  %v4201_v0 = vmul.f32 0.0078125, %v4197_v33  ;;  %vm4257_vm14 = vweird.f32 %v4220_v34 }
0x1144   :  { %v4245_v44 = vsub.f32 1.5, %v4244_v3 }
0x1145   :  { %v4209_v53 = vsub.f32 %v4201_v0, %v4205_v17  ;;  %v8571_v17 = vld [vmem:[#allocation24_spill] sm:$0xff] }
0x1146   :  { %v4246_v57 = vmul.f32 %v5605_v23, %v4245_v44  ;;  %v739_v0 = vadd.f32 %v8571_v17, %v212_v21  ;;  %v8572_v44 = vld [vmem:[#allocation84_spill] sm:$0xff] }
0x1147   :  { %v4213_v10 = vmax.f32 %v4209_v53, 0.0  ;;  %4340 = vperm.xlu1 %5536, %v4278_v55   ;;  %v885_v53 = vadd.f32 %v8572_v44, %v7967_v37  ;;  %v8573_v55 = vld [vmem:[#allocation21_spill] sm:$0xff] }
0x1148   :  { %v4250_v19 = vsel %vm4249_vm11, %v5605_v23, %v4246_v57  ;;  %v882_v23 = vadd.f32 %v8568_v18, %v166_v31  ;;  %v1014_v57 = vadd.f32 %v8573_v55, %v210_v41  ;;  %v213_v37 = vld [vmem:[%s8402_s4 + $0x278] sm:$0xff] }
0x1149   :  { %v5607_v58 = vpop.eup %5606  ;;  %v4217_v36 = vadd.f32 1e-05, %v4213_v10  ;;  %v4267_v52 = vmul.f32 %v4250_v19, %v888_v39  ;;  %v4263_v45 = vmul.f32 %v4250_v19, %v607_v26  ;;  %v4266_v10 = vmul.f32 %v7973_v38, %v885_v53  ;;  %v5500_v19 = vld [vmem:[%s8407_s9 + $0x108] sm:$0xff] }
0x114a   :  { %v4252_v43 = vmul.f32 %v5607_v58, %v4220_v34  ;;  %vm4258_vm12 = vweird.f32 %v5607_v58  ;;  %v8575_v39 = vld [vmem:[#allocation26_spill] sm:$0xff] }
0x114b   :  { %5608 = vrsqrt.f32 %v4217_v36  ;;  %v4275_v16 = vmul.f32 %v4267_v52, %v7958_v63  ;;  %vm4259_vm15 = vmor %vm4257_vm14, %vm4258_vm12  ;;  %vm4227_vm2 = vweird.f32 %v4217_v36  ;;  %v4271_v34 = vmul.f32 %v4263_v45, %v7958_v63  ;;  %v8574_v63 = vld [vmem:[#allocation88_spill] sm:$0xff] }
0x114c   :  { %v4253_v24 = vmul.f32 %v5607_v58, %v4252_v43  ;;  %v891_v50 = vadd.f32 %v8574_v63, %v169_v60 }
0x114d   :  { %v4283_v12 = vsub.f32 %v1020_v49, %v4275_v16  ;;  %v733_v49 = vadd.f32 %v8577_v5, %v210_v41 }
0x114e   :  { %v4254_v14 = vmul.f32 0.5, %v4253_v24  ;;  %v742_v24 = vadd.f32 %v8575_v39, %v213_v37 }
0x114f   :  { %4317 = vperm.xlu1 %5536, %v4267_v52   ;;  %v8576_v52 = vld [vmem:[#allocation27_spill] sm:$0xff] }
0x1150   :  { %v4255_v51 = vsub.f32 1.5, %v4254_v14  ;;  %v1023_v14 = vadd.f32 %v8576_v52, %v213_v37  ;;  %v5496_v52 = vld [vmem:[%s8406_s8 + $0x108] sm:$0xff] }
0x1151   :  { %v5609_v2 = vpop.eup %5608 }
0x1152   :  { %v4222_v7 = vmul.f32 %v5609_v2, %v4217_v36  ;;  %v4256_v27 = vmul.f32 %v5607_v58, %v4255_v51  ;;  %vm4228_vm13 = vweird.f32 %v5609_v2  ;;  %v8578_v51 = vld [vmem:[#allocation23_spill] sm:$0xff] }
0x1153   :  { %vm4229_vm4 = vmor %vm4227_vm2, %vm4228_vm13 }
0x1154   :  { %v4223_v28 = vmul.f32 %v5609_v2, %v4222_v7  ;;  %v4260_v13 = vsel %vm4259_vm15, %v5607_v58, %v4256_v27  ;;  %v4279_v58 = vsub.f32 %v739_v0, %v4271_v34  ;;  %v4274_v7 = vmul.f32 %v4266_v10, %v7954_v8  ;;  %v5502_v27 = vld [vmem:[%s8407_s9 + $0x118] sm:$0xff]  ;;  %v5499_v8 = vld [vmem:[%s8407_s9 + $0x100] sm:$0xff] }
0x1155   :  { %v4264_v3 = vmul.f32 %v4260_v13, %v610_v9  ;;  %v4268_v43 = vmul.f32 %v4260_v13, %v891_v50 }
0x1156   :  { %v4224_v42 = vmul.f32 0.5, %v4223_v28  ;;  %v1017_v28 = vadd.f32 %v8578_v51, %v7981_v54 }
0x1157   :  { %4365 = vperm.xlu1 %5536, %v4283_v12   ;;  %v4276_v38 = vmul.f32 %v4268_v43, %v7962_v35  ;;  %v4272_v25 = vmul.f32 %v4264_v3, %v7962_v35  ;;  %v5501_v35 = vld [vmem:[%s8407_s9 + $0x110] sm:$0xff] }
0x1158   :  { %v4225_v15 = vsub.f32 1.5, %v4224_v42  ;;  %v4282_v42 = vsub.f32 %v1017_v28, %v4274_v7 }
0x1159   :  { %v4280_v16 = vsub.f32 %v742_v24, %v4272_v25  ;;  %v5495_v25 = vld [vmem:[%s8406_s8 + $0x100] sm:$0xff] }
0x115a   :  { %v4226_v4 = vmul.f32 %v5609_v2, %v4225_v15 }
0x115c   :  { %v4230_v22 = vsel %vm4229_vm4, %v5609_v2, %v4226_v4  ;;  %v4284_v2 = vsub.f32 %v1023_v14, %v4276_v38  ;;  %v5497_v14 = vld [vmem:[%s8406_s8 + $0x110] sm:$0xff] }
0x115d   :  { %v4265_v33 = vmul.f32 %v4230_v22, %v882_v23  ;;  %v4261_v11 = vmul.f32 %v4230_v22, %v601_v40 }
0x115f   :  { %4307 = vperm.xlu2 %5537, %v4265_v33   ;;  %4287 = vperm.xlu0 %5535, %v4261_v11   ;;  %v4273_v47 = vmul.f32 %v4265_v33, %v7976_v61  ;;  %v4269_v21 = vmul.f32 %v4261_v11, %v7976_v61 }
0x1160   :  { %4302 = vperm.xlu1 %5536, %v4264_v3  }
0x1161   :  { %v4281_v36 = vsub.f32 %v1014_v57, %v4273_v47  ;;  %v4277_v12 = vsub.f32 %v733_v49, %v4269_v21 }
0x1167   :  { %4312 = vperm.xlu0 %5535, %v4266_v10   ;;  %4345 = vperm.xlu2 %5537, %v4279_v58  }
0x1168   :  { %4355 = vperm.xlu1 %5536, %v4281_v36  }
0x116f   :  { %4297 = vperm.xlu0 %5535, %v4263_v45   ;;  %4322 = vperm.xlu2 %5537, %v4268_v43  }
0x1170   :  { %4406 = vperm.xlu1 %5536, %v5500_v19  }
0x1177   :  { %4370 = vperm.xlu2 %5537, %v4284_v2   ;;  %4350 = vperm.xlu0 %5535, %v4280_v16   ;;  %v5498_v2 = vld [vmem:[%s8406_s8 + $0x118] sm:$0xff] }
0x117f   :  { %4335 = vperm.xlu2 %5537, %v4277_v12   ;;  %4360 = vperm.xlu0 %5535, %v4282_v42  }
0x1187   :  { %4411 = vperm.xlu2 %5537, %v5501_v35   ;;  %4416 = vperm.xlu0 %5535, %v5502_v27  }
0x118f   :  { %4401 = vperm.xlu0 %5535, %v5499_v8  }
0x11b1   :  { %v4293_v61 = vpop.permute.xlu1 %4292 }
0x11b2   :  { %v4326_v47 = vmul.f32 %v4293_v61, %v7901_v30 }
0x11b9   :  { %v4308_v54 = vpop.permute.xlu2 %4307  ;;  %v4341_v31 = vpop.permute.xlu1 %4340 }
0x11ba   :  { %v4374_v44 = vadd.f32 %v4341_v31, %v4326_v47  ;;  %v4329_v36 = vmul.f32 %v4308_v54, %v7896_v29 }
0x11bc   :  { %v4382_v63 = vmax.f32 %v4374_v44, 0.0 }
0x11c1   :  { %v4346_v15 = vpop.permute.xlu2 %4345  ;;  %v4318_v60 = vpop.permute.xlu1 %4317 }
0x11c2   :  { %v4331_v40 = vmul.f32 %v4318_v60, %v7922_v20 }
0x11c9   :  { %v4323_v4 = vpop.permute.xlu2 %4322  ;;  %v4366_v48 = vpop.permute.xlu1 %4365 }
0x11ca   :  { %v4332_v18 = vmul.f32 %v4323_v4, %v7937_v1  ;;  %v4379_v26 = vadd.f32 %v4366_v48, %v4331_v40 }
0x11cc   :  { %v4387_v9 = vmax.f32 %v4379_v26, 0.0 }
0x11d1   :  { %v4288_v23 = vpop.permute.xlu0 %4287  ;;  %v4371_v59 = vpop.permute.xlu2 %4370 }
0x11d2   :  { %v4380_v13 = vadd.f32 %v4371_v59, %v4332_v18  ;;  %v4303_v33 = vpop.permute.xlu1 %4302  ;;  %v4325_v53 = vmul.f32 %v4288_v23, %v7891_v46 }
0x11d3   :  { %v4328_v3 = vmul.f32 %v4303_v33, %v7928_v56 }
0x11d4   :  { %v4388_v62 = vmax.f32 %v4380_v13, 0.0 }
0x11d6   :  { %4472 = vmatpush.msrb.mxu3 %v4388_v62 }
0x11d8   :  { %4473 = vmatpush.msrb.mxu3 %v4387_v9 }
0x11d9   :  { %v4313_v22 = vpop.permute.xlu0 %4312  ;;  %v4336_v0 = vpop.permute.xlu2 %4335 }
0x11da   :  { %v4373_v57 = vadd.f32 %v4336_v0, %v4325_v53  ;;  %v4356_v58 = vpop.permute.xlu1 %4355  ;;  %v4330_v50 = vmul.f32 %v4313_v22, %v7908_v6 }
0x11db   :  { %v4377_v37 = vadd.f32 %v4356_v58, %v4329_v36 }
0x11dc   :  { %v4381_v19 = vmax.f32 %v4373_v57, 0.0 }
0x11dd   :  { %v4385_v24 = vmax.f32 %v4377_v37, 0.0 }
0x11e1   :  { %v4298_v45 = vpop.permute.xlu0 %4297  ;;  %v4412_v60 = vpop.permute.xlu2 %4411 }
0x11e2   :  { %v4327_v11 = vmul.f32 %v4298_v45, %v7916_v32  ;;  %v4407_v28 = vpop.permute.xlu1 %4406 }
0x11e4   :  { %v4375_v41 = vadd.f32 %v4346_v15, %v4327_v11 }
0x11e6   :  { %v4383_v10 = vmax.f32 %v4375_v41, 0.0 }
0x11e9   :  { %v4351_v34 = vpop.permute.xlu0 %4350 }
0x11ea   :  { %v4376_v17 = vadd.f32 %v4351_v34, %v4328_v3 }
0x11ec   :  { %v4384_v55 = vmax.f32 %v4376_v17, 0.0 }
0x11ee   :  { %4443 = vmatpush.msrb.mxu2 %v4384_v55 }
0x11f0   :  { %4444 = vmatpush.msrb.mxu2 %v4383_v10 }
0x11f1   :  { %v4361_v43 = vpop.permute.xlu0 %4360 }
0x11f2   :  { %v4378_v38 = vadd.f32 %v4361_v43, %v4330_v50  ;;  %4445 = vmatpush.msrb.mxu2 %v4382_v63 }
0x11f4   :  { %v4386_v39 = vmax.f32 %v4378_v38, 0.0  ;;  %4446 = vmatpush.msrb.mxu2 %v4381_v19 }
0x11f5   :  { %5503 = vmatmul.msk.f32.vlgmr.msrb.gmra.mxu2 %vm1538_vm1, %v5495_v25 }
0x11f6   :  { %4474 = vmatpush.msrb.mxu3 %v4386_v39 }
0x11f8   :  { %4475 = vmatpush.msrb.mxu3 %v4385_v24 }
0x11f9   :  { %5507 = vmatmul.msk.f32.vlgmr.msrb.gmra.mxu3 %vm1538_vm1, %v5495_v25  ;;  %v4417_v16 = vpop.permute.xlu0 %4416 }
0x11fd   :  { %5504 = vmatmul.msk.f32.gmra.mxu2 %vm1538_vm1, %v5496_v52 }
0x1201   :  { %5508 = vmatmul.msk.f32.gmra.mxu3 %vm1538_vm1, %v5496_v52  ;;  %v4402_v21 = vpop.permute.xlu0 %4401 }
0x1205   :  { %5505 = vmatmul.msk.f32.gmra.mxu2 %vm1538_vm1, %v5497_v14 }
0x1209   :  { %5509 = vmatmul.msk.f32.gmra.mxu3 %vm1538_vm1, %v5497_v14 }
0x120d   :  { %5506 = vmatmul.msk.f32.gmra.mxu2 %vm1538_vm1, %v5498_v2 }
0x1211   :  { %5510 = vmatmul.msk.f32.gmra.mxu3 %vm1538_vm1, %v5498_v2 }
0x1278   :  { %v4448_v7 = vpop.f32.mrf.mxu2 }
0x1279   :  { %v8070_v5 = vadd.f32 %v4448_v7, %v4402_v21 }
0x127b   :  { %v4521_v49 = vsel %vm1261_vm3, %v8070_v5, 0.0  ;;  %v4489_v47 = vmul.f32 %v8070_v5, %v8070_v5 }
0x127c   :  { %4522 = vadd.xlane.f32.xlu2 %v4521_v49  ;;  %v4477_v51 = vpop.f32.mrf.mxu3 }
0x127d   :  { %v4497_v41 = vsel %vm1261_vm3, %v4489_v47, 0.0  ;;  %v8115_v44 = vadd.f32 %v4477_v51, %v4402_v21 }
0x127f   :  { %v4493_v10 = vmul.f32 %v8115_v44, %v8115_v44  ;;  %v4533_v58 = vsel %vm1261_vm3, %v8115_v44, 0.0 }
0x1280   :  { %v4451_v12 = vpop.f32.mrf.mxu2 }
0x1281   :  { %v8074_v42 = vadd.f32 %v4451_v12, %v4407_v28  ;;  %v4509_v36 = vsel %vm1261_vm3, %v4493_v10, 0.0 }
0x1283   :  { %v4524_v35 = vsel %vm1261_vm3, %v8074_v42, 0.0  ;;  %v4490_v27 = vmul.f32 %v8074_v42, %v8074_v42 }
0x1284   :  { %v4480_v8 = vpop.f32.mrf.mxu3  ;;  %4525 = vadd.xlane.f32.xlu0 %v4524_v35 }
0x1285   :  { %v8080_v61 = vadd.f32 %v4480_v8, %v4407_v28  ;;  %v4500_v54 = vsel %vm1261_vm3, %v4490_v27, 0.0 }
0x1286   :  { %4501 = vadd.xlane.f32.xlu1 %v4500_v54 }
0x1287   :  { %v4536_v31 = vsel %vm1261_vm3, %v8080_v61, 0.0  ;;  %v4494_v15 = vmul.f32 %v8080_v61, %v8080_v61 }
0x1288   :  { %v4454_v4 = vpop.f32.mrf.mxu2  ;;  %4537 = vadd.xlane.f32.xlu2 %v4536_v31 }
0x1289   :  { %v8087_v48 = vadd.f32 %v4454_v4, %v4412_v60  ;;  %v4512_v40 = vsel %vm1261_vm3, %v4494_v15, 0.0 }
0x128b   :  { %v4491_v18 = vmul.f32 %v8087_v48, %v8087_v48  ;;  %v4527_v26 = vsel %vm1261_vm3, %v8087_v48, 0.0 }
0x128c   :  { %v4483_v23 = vpop.f32.mrf.mxu3  ;;  %4513 = vadd.xlane.f32.xlu0 %v4512_v40 }
0x128d   :  { %v8092_v59 = vadd.f32 %v4483_v23, %v4412_v60  ;;  %v4503_v13 = vsel %vm1261_vm3, %v4491_v18, 0.0 }
0x128e   :  { %4528 = vadd.xlane.f32.xlu1 %v4527_v26 }
0x128f   :  { %v4495_v9 = vmul.f32 %v8092_v59, %v8092_v59  ;;  %v4539_v45 = vsel %vm1261_vm3, %v8092_v59, 0.0 }
0x1290   :  { %v4457_v62 = vpop.f32.mrf.mxu2  ;;  %4504 = vadd.xlane.f32.xlu2 %v4503_v13 }
0x1291   :  { %v8099_v22 = vadd.f32 %v4457_v62, %v4417_v16  ;;  %v4515_v11 = vsel %vm1261_vm3, %v4495_v9, 0.0 }
0x1293   :  { %v4530_v34 = vsel %vm1261_vm3, %v8099_v22, 0.0  ;;  %v4492_v55 = vmul.f32 %v8099_v22, %v8099_v22 }
0x1294   :  { %v4486_v33 = vpop.f32.mrf.mxu3  ;;  %4540 = vadd.xlane.f32.xlu0 %v4539_v45 }
0x1295   :  { %v8104_v3 = vadd.f32 %v4486_v33, %v4417_v16  ;;  %v4506_v57 = vsel %vm1261_vm3, %v4492_v55, 0.0  ;;  %v8139_v33 = vld [vmem:[%s8402_s4 + $0x128] sm:$0xff] }
0x1296   :  { %4516 = vadd.xlane.f32.xlu1 %v4515_v11 }
0x1297   :  { %v4496_v17 = vmul.f32 %v8104_v3, %v8104_v3  ;;  %v4542_v0 = vsel %vm1261_vm3, %v8104_v3, 0.0 }
0x1298   :  { %4531 = vadd.xlane.f32.xlu2 %v4530_v34 }
0x1299   :  { %v4518_v53 = vsel %vm1261_vm3, %v4496_v17, 0.0 }
0x129c   :  { %4498 = vadd.xlane.f32.xlu0 %v4497_v41 }
0x129e   :  { %4543 = vadd.xlane.f32.xlu1 %v4542_v0 }
0x12a0   :  { %4519 = vadd.xlane.f32.xlu2 %v4518_v53  ;;  %v8579_v53 = vld [vmem:[#allocation93_spill] sm:$0xff] }
0x12a1   :  { %v616_v55 = vadd.f32 %v8579_v53, %v8139_v33 }
0x12a4   :  { %4507 = vadd.xlane.f32.xlu0 %v4506_v57 }
0x12a6   :  { %4534 = vadd.xlane.f32.xlu1 %v4533_v58 }
0x12a8   :  { %4510 = vadd.xlane.f32.xlu2 %v4509_v36 }
0x12ef   :  { %v4523_v63 = vpop.xlane.xlu2 %4522 }
0x12f7   :  { %v4526_v50 = vpop.xlane.xlu0 %4525 }
0x12f9   :  { %v4502_v43 = vpop.xlane.xlu1 %4501 }
0x12fb   :  { %v4538_v19 = vpop.xlane.xlu2 %4537 }
0x12fc   :  { %v4546_v37 = vadd.f32 %v4538_v19, %v4526_v50 }
0x12fe   :  { %v8126_v38 = vmul.f32 0.0078125, %v4546_v37 }
0x12ff   :  { %v4514_v25 = vpop.xlane.xlu0 %4513 }
0x1300   :  { %v4554_v39 = vadd.f32 %v4514_v25, %v4502_v43  ;;  %v4562_v52 = vmul.f32 %v8126_v38, %v8126_v38 }
0x1301   :  { %v4529_v24 = vpop.xlane.xlu1 %4528 }
0x1302   :  { %v4558_v14 = vmul.f32 0.0078125, %v4554_v39 }
0x1303   :  { %v4505_v2 = vpop.xlane.xlu2 %4504 }
0x1304   :  { %v4566_v16 = vsub.f32 %v4558_v14, %v4562_v52 }
0x1306   :  { %v4570_v21 = vmax.f32 %v4566_v16, 0.0 }
0x1307   :  { %v4541_v7 = vpop.xlane.xlu0 %4540 }
0x1308   :  { %v4574_v49 = vadd.f32 1e-05, %v4570_v21  ;;  %v4547_v51 = vadd.f32 %v4541_v7, %v4529_v24 }
0x1309   :  { %v4517_v28 = vpop.xlane.xlu1 %4516 }
0x130a   :  { %5610 = vrsqrt.f32 %v4574_v49  ;;  %v8130_v12 = vmul.f32 0.0078125, %v4547_v51  ;;  %v4555_v35 = vadd.f32 %v4517_v28, %v4505_v2  ;;  %vm4593_vm6 = vweird.f32 %v4574_v49  ;;  %v8580_v28 = vld [vmem:[#allocation30_spill] sm:$0xff] }
0x130b   :  { %v4532_v27 = vpop.xlane.xlu2 %4531 }
0x130c   :  { %v4563_v8 = vmul.f32 %v8130_v12, %v8130_v12  ;;  %v4559_v54 = vmul.f32 0.0078125, %v4555_v35 }
0x130e   :  { %v4567_v31 = vsub.f32 %v4559_v54, %v4563_v8 }
0x130f   :  { %v4499_v15 = vpop.xlane.xlu0 %4498 }
0x1310   :  { %v5611_v60 = vpop.eup %5610  ;;  %v4571_v4 = vmax.f32 %v4567_v31, 0.0 }
0x1311   :  { %v4588_v40 = vmul.f32 %v5611_v60, %v4574_v49  ;;  %v4544_v18 = vpop.xlane.xlu1 %4543  ;;  %vm4594_vm5 = vweird.f32 %v5611_v60 }
0x1312   :  { %v4575_v23 = vadd.f32 1e-05, %v4571_v4  ;;  %v4548_v26 = vadd.f32 %v4544_v18, %v4532_v27  ;;  %vm4595_vm7 = vmor %vm4593_vm6, %vm4594_vm5  ;;  %v8581_v18 = vld [vmem:[#allocation94_spill] sm:$0xff] }
0x1313   :  { %v4589_v13 = vmul.f32 %v5611_v60, %v4588_v40  ;;  %v4520_v62 = vpop.xlane.xlu2 %4519 }
0x1314   :  { %5612 = vrsqrt.f32 %v4575_v23  ;;  %v8134_v45 = vmul.f32 0.0078125, %v4548_v26  ;;  %vm4603_vm9 = vweird.f32 %v4575_v23 }
0x1315   :  { %v4590_v9 = vmul.f32 0.5, %v4589_v13 }
0x1316   :  { %v4564_v10 = vmul.f32 %v8134_v45, %v8134_v45 }
0x1317   :  { %v4591_v11 = vsub.f32 1.5, %v4590_v9  ;;  %v4508_v34 = vpop.xlane.xlu0 %4507 }
0x1318   :  { %v4556_v47 = vadd.f32 %v4520_v62, %v4508_v34 }
0x1319   :  { %v4535_v41 = vpop.xlane.xlu1 %4534  ;;  %v4592_v17 = vmul.f32 %v5611_v60, %v4591_v11 }
0x131a   :  { %v5613_v0 = vpop.eup %5612  ;;  %v4560_v57 = vmul.f32 0.0078125, %v4556_v47  ;;  %v4545_v58 = vadd.f32 %v4535_v41, %v4523_v63  ;;  %v8155_v63 = vld [vmem:[%s8402_s4 + $0x288] sm:$0xff] }
0x131b   :  { %v4598_v36 = vmul.f32 %v5613_v0, %v4575_v23  ;;  %v4511_v50 = vpop.xlane.xlu2 %4510  ;;  %v8145_v43 = vsel %vm4595_vm7, %v5611_v60, %v4592_v17  ;;  %v748_v35 = vadd.f32 %v8580_v28, %v8155_v63  ;;  %vm4604_vm8 = vweird.f32 %v5613_v0  ;;  %v172_v60 = vld [vmem:[%s8402_s4 + $0x130] sm:$0xff] }
0x131c   :  { %v4568_v19 = vsub.f32 %v4560_v57, %v4564_v10  ;;  %v8147_v37 = vmul.f32 0.0078125, %v4545_v58  ;;  %v4553_v25 = vadd.f32 %v4511_v50, %v4499_v15  ;;  %v4618_v39 = vmul.f32 %v8145_v43, %v616_v55  ;;  %vm4605_vm10 = vmor %vm4603_vm9, %vm4604_vm8  ;;  %v216_v23 = vld [vmem:[%s8402_s4 + $0x290] sm:$0xff]  ;;  %v8582_v55 = vld [vmem:[#allocation33_spill] sm:$0xff] }
0x131d   :  { %v4599_v24 = vmul.f32 %v5613_v0, %v4598_v36  ;;  %v900_v26 = vadd.f32 %v8581_v18, %v172_v60  ;;  %v1032_v57 = vadd.f32 %v8582_v55, %v216_v23  ;;  %v8588_v18 = vld [vmem:[#allocation29_spill] sm:$0xff] }
0x131e   :  { %v4572_v52 = vmax.f32 %v4568_v19, 0.0  ;;  %v4557_v14 = vmul.f32 0.0078125, %v4553_v25  ;;  %v4561_v2 = vmul.f32 %v8147_v37, %v8147_v37  ;;  %4648 = vperm.xlu0 %5535, %v4618_v39   ;;  %v4626_v49 = vmul.f32 %v4618_v39, %v8126_v38  ;;  %v8583_v19 = vld [vmem:[#allocation91_spill] sm:$0xff]  ;;  %v8584_v39 = vld [vmem:[#allocation90_spill] sm:$0xff] }
0x131f   :  { %v4600_v16 = vmul.f32 0.5, %v4599_v24 }
0x1320   :  { %v4576_v21 = vadd.f32 1e-05, %v4572_v52  ;;  %v4565_v7 = vsub.f32 %v4557_v14, %v4561_v2  ;;  %v4634_v54 = vsub.f32 %v748_v35, %v4626_v49  ;;  %v8585_v49 = vld [vmem:[#allocation96_spill] sm:$0xff] }
0x1321   :  { %v4601_v51 = vsub.f32 1.5, %v4600_v16  ;;  %v173_v16 = vld [vmem:[%s8402_s4 + $0x138] sm:$0xff] }
0x1322   :  { %5614 = vrsqrt.f32 %v4576_v21  ;;  %v4569_v27 = vmax.f32 %v4565_v7, 0.0  ;;  %vm4613_vm14 = vweird.f32 %v4576_v21  ;;  %v8586_v35 = vld [vmem:[#allocation92_spill] sm:$0xff] }
0x1323   :  { %v4602_v31 = vmul.f32 %v5613_v0, %v4601_v51  ;;  %v903_v51 = vadd.f32 %v8585_v49, %v173_v16 }
0x1324   :  { %v4573_v8 = vadd.f32 1e-05, %v4569_v27  ;;  %v897_v27 = vadd.f32 %v8586_v35, %v8139_v33  ;;  %v8589_v33 = vld [vmem:[#allocation32_spill] sm:$0xff] }
0x1325   :  { %v4606_v40 = vsel %vm4605_vm10, %v5613_v0, %v4602_v31  ;;  %v170_v0 = vld [vmem:[%s8402_s4 + $0x120] sm:$0xff] }
0x1326   :  { %5616 = vrsqrt.f32 %v4573_v8  ;;  %4696 = vperm.xlu0 %5535, %v4634_v54   ;;  %v4623_v9 = vmul.f32 %v4606_v40, %v900_v26  ;;  %vm4583_vm12 = vweird.f32 %v4573_v8  ;;  %v613_v25 = vadd.f32 %v8583_v19, %v170_v0  ;;  %v8594_v19 = vld [vmem:[#allocation31_spill] sm:$0xff] }
0x1327   :  { %v894_v24 = vadd.f32 %v8584_v39, %v170_v0  ;;  %v4622_v31 = vmul.f32 %v8145_v43, %v897_v27 }
0x1328   :  { %v5615_v15 = vpop.eup %5614  ;;  %v4631_v41 = vmul.f32 %v4623_v9, %v8130_v12 }
0x1329   :  { %v4608_v4 = vmul.f32 %v5615_v15, %v4576_v21  ;;  %vm4614_vm11 = vweird.f32 %v5615_v15 }
0x132a   :  { %v4639_v58 = vsub.f32 %v1032_v57, %v4631_v41  ;;  %vm4615_vm15 = vmor %vm4613_vm14, %vm4614_vm11 }
0x132b   :  { %v4609_v13 = vmul.f32 %v5615_v15, %v4608_v4 }
0x132c   :  { %v5617_v62 = vpop.eup %5616 }
0x132d   :  { %v4610_v11 = vmul.f32 0.5, %v4609_v13  ;;  %v4578_v34 = vmul.f32 %v5617_v62, %v4573_v8  ;;  %vm4584_vm0 = vweird.f32 %v5617_v62  ;;  %v8587_v8 = vld [vmem:[#allocation95_spill] sm:$0xff] }
0x132e   :  { %4673 = vperm.xlu0 %5535, %v4623_v9   ;;  %vm4585_vm13 = vmor %vm4583_vm12, %vm4584_vm0  ;;  %v619_v54 = vadd.f32 %v8587_v8, %v172_v60  ;;  %v751_v9 = vadd.f32 %v8589_v33, %v216_v23  ;;  %v8590_v60 = vld [vmem:[#allocation97_spill] sm:$0xff]  ;;  %v8591_v23 = vld [vmem:[#allocation34_spill] sm:$0xff] }
0x132f   :  { %v4579_v47 = vmul.f32 %v5617_v62, %v4578_v34  ;;  %v4611_v17 = vsub.f32 1.5, %v4610_v11  ;;  %v622_v11 = vadd.f32 %v8590_v60, %v173_v16  ;;  %v217_v34 = vld [vmem:[%s8402_s4 + $0x298] sm:$0xff] }
0x1330   :  { %v4619_v21 = vmul.f32 %v4606_v40, %v619_v54 }
0x1331   :  { %v4580_v53 = vmul.f32 0.5, %v4579_v47  ;;  %v4612_v50 = vmul.f32 %v5615_v15, %v4611_v17  ;;  %v5516_v47 = vld [vmem:[%s8407_s9 + $0x128] sm:$0xff]  ;;  %v754_v17 = vadd.f32 %v8591_v23, %v217_v34 }
0x1333   :  { %v4581_v10 = vsub.f32 1.5, %v4580_v53  ;;  %v4616_v7 = vsel %vm4615_vm15, %v5615_v15, %v4612_v50  ;;  %v214_v15 = vld [vmem:[%s8402_s4 + $0x280] sm:$0xff]  ;;  %v8592_v53 = vld [vmem:[#allocation35_spill] sm:$0xff] }
0x1334   :  { %v4624_v28 = vmul.f32 %v4616_v7, %v903_v51  ;;  %v1026_v26 = vadd.f32 %v8588_v18, %v214_v15  ;;  %v4620_v43 = vmul.f32 %v4616_v7, %v622_v11  ;;  %v1035_v55 = vadd.f32 %v8592_v53, %v217_v34 }
0x1335   :  { %v4582_v36 = vmul.f32 %v5617_v62, %v4581_v10  ;;  %v4630_v10 = vmul.f32 %v4622_v31, %v8126_v38  ;;  %v5515_v38 = vld [vmem:[%s8407_s9 + $0x120] sm:$0xff] }
0x1336   :  { %4721 = vperm.xlu0 %5535, %v4639_v58   ;;  %v4632_v41 = vmul.f32 %v4624_v28, %v8134_v45 }
0x1337   :  { %v4586_v52 = vsel %vm4585_vm13, %v5617_v62, %v4582_v36  ;;  %v4627_v62 = vmul.f32 %v4619_v21, %v8130_v12  ;;  %v4628_v12 = vmul.f32 %v4620_v43, %v8134_v45  ;;  %v8593_v36 = vld [vmem:[#allocation28_spill] sm:$0xff]  ;;  %vm5160_vm13 = vcmask 516096  }
0x1338   :  { %v4621_v14 = vmul.f32 %v4586_v52, %v894_v24  ;;  %v4617_v2 = vmul.f32 %v4586_v52, %v613_v25  ;;  %v4640_v57 = vsub.f32 %v1035_v55, %v4632_v41  ;;  %v745_v50 = vadd.f32 %v8593_v36, %v214_v15  ;;  %v5518_v24 = vld [vmem:[%s8407_s9 + $0x138] sm:$0xff]  ;;  %v5517_v52 = vld [vmem:[%s8407_s9 + $0x130] sm:$0xff] }
0x1339   :  { %v4635_v40 = vsub.f32 %v751_v9, %v4627_v62  ;;  %v4636_v0 = vsub.f32 %v754_v17, %v4628_v12  ;;  %v1029_v25 = vadd.f32 %v8594_v19, %v8155_v63 }
0x133a   :  { %4663 = vperm.xlu2 %5537, %v4621_v14   ;;  %4643 = vperm.xlu1 %5536, %v4617_v2   ;;  %v4629_v4 = vmul.f32 %v4621_v14, %v8147_v37  ;;  %v4625_v58 = vmul.f32 %v4617_v2, %v8147_v37 }
0x133b   :  { %v4638_v39 = vsub.f32 %v1029_v25, %v4630_v10 }
0x133c   :  { %v4637_v13 = vsub.f32 %v1026_v26, %v4629_v4  ;;  %v4633_v45 = vsub.f32 %v745_v50, %v4625_v58 }
0x133e   :  { %4678 = vperm.xlu0 %5535, %v4624_v28  }
0x1342   :  { %4653 = vperm.xlu2 %5537, %v4619_v21   ;;  %4668 = vperm.xlu1 %5536, %v4622_v31  }
0x1346   :  { %4711 = vperm.xlu0 %5535, %v4637_v13  }
0x134a   :  { %4701 = vperm.xlu2 %5537, %v4635_v40   ;;  %4658 = vperm.xlu1 %5536, %v4620_v43  }
0x134e   :  { %4762 = vperm.xlu0 %5535, %v5516_v47  }
0x1352   :  { %4726 = vperm.xlu2 %5537, %v4640_v57   ;;  %4706 = vperm.xlu1 %5536, %v4636_v0   ;;  %v5514_v57 = vld [vmem:[%s8406_s8 + $0x138] sm:$0xff] }
0x135a   :  { %4716 = vperm.xlu1 %5536, %v4638_v39   ;;  %4691 = vperm.xlu2 %5537, %v4633_v45  }
0x1362   :  { %4772 = vperm.xlu1 %5536, %v5518_v24   ;;  %4767 = vperm.xlu2 %5537, %v5517_v52  }
0x136a   :  { %4757 = vperm.xlu1 %5536, %v5515_v38  }
0x1390   :  { %v4649_v37 = vpop.permute.xlu0 %4648 }
0x1391   :  { %v4682_v33 = vmul.f32 %v4649_v37, %v8074_v42 }
0x1394   :  { %v4664_v63 = vpop.permute.xlu2 %4663 }
0x1395   :  { %v4685_v41 = vmul.f32 %v4664_v63, %v8115_v44  ;;  %v5513_v44 = vld [vmem:[%s8406_s8 + $0x130] sm:$0xff] }
0x1398   :  { %v4697_v14 = vpop.permute.xlu0 %4696 }
0x139c   :  { %v4654_v2 = vpop.permute.xlu2 %4653 }
0x139d   :  { %v4683_v26 = vmul.f32 %v4654_v2, %v8087_v48 }
0x13a0   :  { %v4674_v16 = vpop.permute.xlu0 %4673 }
0x13a1   :  { %v4687_v35 = vmul.f32 %v4674_v16, %v8092_v59 }
0x13a4   :  { %v4702_v7 = vpop.permute.xlu2 %4701 }
0x13a5   :  { %v4731_v9 = vadd.f32 %v4702_v7, %v4683_v26 }
0x13a7   :  { %v4739_v43 = vmax.f32 %v4731_v9, 0.0 }
0x13a8   :  { %v4722_v49 = vpop.permute.xlu0 %4721 }
0x13a9   :  { %v4735_v54 = vadd.f32 %v4722_v49, %v4687_v35 }
0x13ab   :  { %v4743_v15 = vmax.f32 %v4735_v54, 0.0 }
0x13ac   :  { %v4644_v51 = vpop.permute.xlu1 %4643  ;;  %v4727_v8 = vpop.permute.xlu2 %4726 }
0x13ad   :  { %v4681_v11 = vmul.f32 %v4644_v51, %v8070_v5  ;;  %v5511_v5 = vld [vmem:[%s8406_s8 + $0x120] sm:$0xff] }
0x13b0   :  { %v4679_v28 = vpop.permute.xlu0 %4678 }
0x13b1   :  { %v4688_v27 = vmul.f32 %v4679_v28, %v8104_v3  ;;  %v4730_v3 = vadd.f32 %v4697_v14, %v4682_v33 }
0x13b3   :  { %v4736_v21 = vadd.f32 %v4727_v8, %v4688_v27  ;;  %v4738_v12 = vmax.f32 %v4730_v3, 0.0 }
0x13b4   :  { %v4669_v31 = vpop.permute.xlu1 %4668  ;;  %v4692_v60 = vpop.permute.xlu2 %4691 }
0x13b5   :  { %v4744_v4 = vmax.f32 %v4736_v21, 0.0  ;;  %v4729_v34 = vadd.f32 %v4692_v60, %v4681_v11  ;;  %v4686_v48 = vmul.f32 %v4669_v31, %v8080_v61  ;;  %v5512_v61 = vld [vmem:[%s8406_s8 + $0x128] sm:$0xff] }
0x13b7   :  { %4828 = vmatpush.msra.mxu3 %v4744_v4  ;;  %v4737_v23 = vmax.f32 %v4729_v34, 0.0 }
0x13b8   :  { %v4712_v47 = vpop.permute.xlu0 %4711 }
0x13b9   :  { %4829 = vmatpush.msra.mxu3 %v4743_v15  ;;  %v4733_v42 = vadd.f32 %v4712_v47, %v4685_v41 }
0x13bb   :  { %v4741_v55 = vmax.f32 %v4733_v42, 0.0 }
0x13bc   :  { %v4659_v18 = vpop.permute.xlu1 %4658  ;;  %v4768_v7 = vpop.permute.xlu2 %4767 }
0x13bd   :  { %v4684_v13 = vmul.f32 %v4659_v18, %v8099_v22 }
0x13c0   :  { %v4763_v24 = vpop.permute.xlu0 %4762 }
0x13c4   :  { %v4707_v62 = vpop.permute.xlu1 %4706 }
0x13c5   :  { %v4732_v59 = vadd.f32 %v4707_v62, %v4684_v13 }
0x13c7   :  { %v4740_v40 = vmax.f32 %v4732_v59, 0.0 }
0x13c9   :  { %4799 = vmatpush.msra.mxu2 %v4740_v40 }
0x13cb   :  { %4800 = vmatpush.msra.mxu2 %v4739_v43 }
0x13cc   :  { %v4717_v22 = vpop.permute.xlu1 %4716 }
0x13cd   :  { %v4734_v17 = vadd.f32 %v4717_v22, %v4686_v48  ;;  %4801 = vmatpush.msra.mxu2 %v4738_v12 }
0x13cf   :  { %v4742_v53 = vmax.f32 %v4734_v17, 0.0  ;;  %4802 = vmatpush.msra.mxu2 %v4737_v23 }
0x13d0   :  { %5519 = vmatmul.msk.f32.vlgmr.msra.gmra.mxu2 %vm1538_vm1, %v5511_v5 }
0x13d1   :  { %4830 = vmatpush.msra.mxu3 %v4742_v53 }
0x13d3   :  { %4831 = vmatpush.msra.mxu3 %v4741_v55 }
0x13d4   :  { %5523 = vmatmul.msk.f32.vlgmr.msra.gmra.mxu3 %vm1538_vm1, %v5511_v5  ;;  %v4773_v0 = vpop.permute.xlu1 %4772 }
0x13d8   :  { %5520 = vmatmul.msk.f32.gmra.mxu2 %vm1538_vm1, %v5512_v61 }
0x13dc   :  { %5524 = vmatmul.msk.f32.gmra.mxu3 %vm1538_vm1, %v5512_v61  ;;  %v4758_v10 = vpop.permute.xlu1 %4757 }
0x13e0   :  { %5521 = vmatmul.msk.f32.gmra.mxu2 %vm1538_vm1, %v5513_v44 }
0x13e4   :  { %5525 = vmatmul.msk.f32.gmra.mxu3 %vm1538_vm1, %v5513_v44 }
0x13e8   :  { %5522 = vmatmul.msk.f32.gmra.mxu2 %vm1538_vm1, %v5514_v57 }
0x13ec   :  { %5526 = vmatmul.msk.f32.gmra.mxu3 %vm1538_vm1, %v5514_v57 }
0x1453   :  { %v4804_v58 = vpop.f32.mrf.mxu2 }
0x1454   :  { %v4805_v36 = vadd.f32 %v4804_v58, %v4758_v10 }
0x1456   :  { %v8243_v50 = vadd.f32 %v4805_v36, %v7891_v46 }
0x1457   :  { %v4833_v19 = vpop.f32.mrf.mxu3 }
0x1458   :  { %v4834_v25 = vadd.f32 %v4833_v19, %v4758_v10  ;;  %v4885_v39 = vsel %vm1261_vm3, %v8243_v50, 0.0  ;;  %v4853_v43 = vmul.f32 %v8243_v50, %v8243_v50 }
0x1459   :  { %4886 = vadd.xlane.f32.xlu2 %v4885_v39 }
0x145a   :  { %v8248_v45 = vadd.f32 %v4834_v25, %v7896_v29  ;;  %v4861_v34 = vsel %vm1261_vm3, %v4853_v43, 0.0 }
0x145b   :  { %v4807_v52 = vpop.f32.mrf.mxu2 }
0x145c   :  { %v4808_v38 = vadd.f32 %v4807_v52, %v4763_v24  ;;  %v4897_v37 = vsel %vm1261_vm3, %v8248_v45, 0.0  ;;  %v4857_v47 = vmul.f32 %v8248_v45, %v8248_v45 }
0x145d   :  { %4898 = vadd.xlane.f32.xlu0 %v4897_v37 }
0x145e   :  { %v8253_v63 = vadd.f32 %v4808_v38, %v7901_v30  ;;  %v4873_v41 = vsel %vm1261_vm3, %v4857_v47, 0.0 }
0x145f   :  { %v4836_v46 = vpop.f32.mrf.mxu3 }
0x1460   :  { %v4837_v14 = vadd.f32 %v4836_v46, %v4763_v24  ;;  %v4888_v2 = vsel %vm1261_vm3, %v8253_v63, 0.0  ;;  %v4854_v16 = vmul.f32 %v8253_v63, %v8253_v63 }
0x1461   :  { %4889 = vadd.xlane.f32.xlu1 %v4888_v2 }
0x1462   :  { %v8260_v29 = vadd.f32 %v4837_v14, %v7908_v6  ;;  %v4864_v28 = vsel %vm1261_vm3, %v4854_v16, 0.0 }
0x1463   :  { %v4810_v49 = vpop.f32.mrf.mxu2 }
0x1464   :  { %v4811_v51 = vadd.f32 %v4810_v49, %v4768_v7  ;;  %v4900_v30 = vsel %vm1261_vm3, %v8260_v29, 0.0  ;;  %v4858_v35 = vmul.f32 %v8260_v29, %v8260_v29 }
0x1465   :  { %4865 = vadd.xlane.f32.xlu0 %v4864_v28  ;;  %4901 = vadd.xlane.f32.xlu2 %v4900_v30 }
0x1466   :  { %v8268_v27 = vadd.f32 %v4811_v51, %v7916_v32  ;;  %v4876_v6 = vsel %vm1261_vm3, %v4858_v35, 0.0 }
0x1467   :  { %v4839_v8 = vpop.f32.mrf.mxu3 }
0x1468   :  { %v4840_v54 = vadd.f32 %v4839_v8, %v4768_v7  ;;  %v4855_v21 = vmul.f32 %v8268_v27, %v8268_v27  ;;  %v4891_v18 = vsel %vm1261_vm3, %v8268_v27, 0.0 }
0x1469   :  { %4877 = vadd.xlane.f32.xlu1 %v4876_v6 }
0x146a   :  { %v8274_v4 = vadd.f32 %v4840_v54, %v7922_v20  ;;  %v4867_v26 = vsel %vm1261_vm3, %v4855_v21, 0.0 }
0x146b   :  { %v4813_v31 = vpop.f32.mrf.mxu2 }
0x146c   :  { %v4814_v15 = vadd.f32 %v4813_v31, %v4773_v0  ;;  %v4903_v33 = vsel %vm1261_vm3, %v8274_v4, 0.0  ;;  %v4859_v20 = vmul.f32 %v8274_v4, %v8274_v4 }
0x146d   :  { %4892 = vadd.xlane.f32.xlu0 %v4891_v18  ;;  %4868 = vadd.xlane.f32.xlu2 %v4867_v26 }
0x146e   :  { %v8280_v13 = vadd.f32 %v4814_v15, %v7928_v56  ;;  %v4879_v59 = vsel %vm1261_vm3, %v4859_v20, 0.0  ;;  %v8319_v15 = vld [vmem:[%s8402_s4 + $0x148] sm:$0xff] }
0x146f   :  { %v4842_v32 = vpop.f32.mrf.mxu3 }
0x1470   :  { %v4843_v62 = vadd.f32 %v4842_v32, %v4773_v0  ;;  %v4894_v60 = vsel %vm1261_vm3, %v8280_v13, 0.0  ;;  %v4856_v56 = vmul.f32 %v8280_v13, %v8280_v13 }
0x1471   :  { %4904 = vadd.xlane.f32.xlu1 %v4903_v33 }
0x1472   :  { %v8287_v9 = vadd.f32 %v4843_v62, %v7937_v1  ;;  %v4870_v3 = vsel %vm1261_vm3, %v4856_v56, 0.0  ;;  %v8595_v62 = vld [vmem:[#allocation101_spill] sm:$0xff] }
0x1473   :  { %v628_v33 = vadd.f32 %v8595_v62, %v8319_v15 }
0x1474   :  { %v4860_v11 = vmul.f32 %v8287_v9, %v8287_v9  ;;  %v4906_v1 = vsel %vm1261_vm3, %v8287_v9, 0.0 }
0x1475   :  { %4880 = vadd.xlane.f32.xlu0 %v4879_v59  ;;  %4895 = vadd.xlane.f32.xlu2 %v4894_v60 }
0x1476   :  { %v4882_v40 = vsel %vm1261_vm3, %v4860_v11, 0.0 }
0x1479   :  { %4871 = vadd.xlane.f32.xlu1 %v4870_v3 }
0x147d   :  { %4907 = vadd.xlane.f32.xlu0 %v4906_v1  ;;  %4883 = vadd.xlane.f32.xlu2 %v4882_v40 }
0x1481   :  { %4862 = vadd.xlane.f32.xlu1 %v4861_v34 }
0x1485   :  { %4874 = vadd.xlane.f32.xlu2 %v4873_v41 }
0x14cc   :  { %v4887_v12 = vpop.xlane.xlu2 %4886 }
0x14d0   :  { %v4899_v48 = vpop.xlane.xlu0 %4898 }
0x14d1   :  { %v4909_v6 = vadd.f32 %v4899_v48, %v4887_v12  ;;  %v8335_v12 = vld [vmem:[%s8402_s4 + $0x2a8] sm:$0xff] }
0x14d3   :  { %v8325_v20 = vmul.f32 0.0078125, %v4909_v6 }
0x14d4   :  { %v4890_v22 = vpop.xlane.xlu1 %4889 }
0x14d5   :  { %v4925_v47 = vmul.f32 %v8325_v20, %v8325_v20 }
0x14d8   :  { %v4866_v23 = vpop.xlane.xlu0 %4865  ;;  %v4902_v42 = vpop.xlane.xlu2 %4901 }
0x14d9   :  { %v4910_v17 = vadd.f32 %v4902_v42, %v4890_v22 }
0x14db   :  { %v8306_v5 = vmul.f32 0.0078125, %v4910_v17 }
0x14dc   :  { %v4878_v53 = vpop.xlane.xlu1 %4877 }
0x14dd   :  { %v4918_v55 = vadd.f32 %v4878_v53, %v4866_v23  ;;  %v4926_v44 = vmul.f32 %v8306_v5, %v8306_v5  ;;  %v8596_v53 = vld [vmem:[#allocation38_spill] sm:$0xff] }
0x14df   :  { %v4922_v61 = vmul.f32 0.0078125, %v4918_v55  ;;  %v760_v55 = vadd.f32 %v8596_v53, %v8335_v12  ;;  %v177_v53 = vld [vmem:[%s8402_s4 + $0x158] sm:$0xff] }
0x14e0   :  { %v4893_v57 = vpop.xlane.xlu0 %4892  ;;  %v4869_v0 = vpop.xlane.xlu2 %4868 }
0x14e1   :  { %v4930_v10 = vsub.f32 %v4922_v61, %v4926_v44 }
0x14e3   :  { %v4934_v58 = vmax.f32 %v4930_v10, 0.0 }
0x14e4   :  { %v4905_v36 = vpop.xlane.xlu1 %4904 }
0x14e5   :  { %v4938_v19 = vadd.f32 1e-05, %v4934_v58  ;;  %v4911_v25 = vadd.f32 %v4905_v36, %v4893_v57  ;;  %v176_v36 = vld [vmem:[%s8402_s4 + $0x150] sm:$0xff] }
0x14e7   :  { %5618 = vrsqrt.f32 %v4938_v19  ;;  %v8310_v39 = vmul.f32 0.0078125, %v4911_v25  ;;  %vm4957_vm2 = vweird.f32 %v4938_v19  ;;  %v8597_v25 = vld [vmem:[#allocation103_spill] sm:$0xff] }
0x14e8   :  { %v4881_v24 = vpop.xlane.xlu0 %4880  ;;  %v4896_v52 = vpop.xlane.xlu2 %4895 }
0x14e9   :  { %v4919_v38 = vadd.f32 %v4881_v24, %v4869_v0  ;;  %v4927_v37 = vmul.f32 %v8310_v39, %v8310_v39  ;;  %v631_v24 = vadd.f32 %v8597_v25, %v176_v36 }
0x14eb   :  { %v4923_v46 = vmul.f32 0.0078125, %v4919_v38 }
0x14ec   :  { %v4872_v7 = vpop.xlane.xlu1 %4871 }
0x14ed   :  { %v5619_v14 = vpop.eup %5618  ;;  %v4931_v2 = vsub.f32 %v4923_v46, %v4927_v37 }
0x14ee   :  { %v4952_v16 = vmul.f32 %v5619_v14, %v4938_v19  ;;  %vm4958_vm3 = vweird.f32 %v5619_v14 }
0x14ef   :  { %v4935_v49 = vmax.f32 %v4931_v2, 0.0  ;;  %vm4959_vm4 = vmor %vm4957_vm2, %vm4958_vm3 }
0x14f0   :  { %v4953_v51 = vmul.f32 %v5619_v14, %v4952_v16  ;;  %v4908_v28 = vpop.xlane.xlu0 %4907  ;;  %v4884_v30 = vpop.xlane.xlu2 %4883 }
0x14f1   :  { %v4939_v35 = vadd.f32 1e-05, %v4935_v49  ;;  %v4912_v8 = vadd.f32 %v4908_v28, %v4896_v52  ;;  %v4920_v31 = vadd.f32 %v4884_v30, %v4872_v7  ;;  %v8598_v52 = vld [vmem:[#allocation102_spill] sm:$0xff] }
0x14f2   :  { %v4954_v54 = vmul.f32 0.5, %v4953_v51  ;;  %v912_v38 = vadd.f32 %v8598_v52, %v176_v36  ;;  %v220_v51 = vld [vmem:[%s8402_s4 + $0x2b0] sm:$0xff]  ;;  %v8607_v52 = vld [vmem:[#allocation45_spill] sm:$0xff] }
0x14f3   :  { %5620 = vrsqrt.f32 %v4939_v35  ;;  %v8314_v21 = vmul.f32 0.0078125, %v4912_v8  ;;  %v4924_v59 = vmul.f32 0.0078125, %v4920_v31  ;;  %vm4967_vm6 = vweird.f32 %v4939_v35 }
0x14f4   :  { %v4955_v18 = vsub.f32 1.5, %v4954_v54  ;;  %v4863_v60 = vpop.xlane.xlu1 %4862  ;;  %v174_v54 = vld [vmem:[%s8402_s4 + $0x140] sm:$0xff] }
0x14f5   :  { %v4928_v26 = vmul.f32 %v8314_v21, %v8314_v21 }
0x14f6   :  { %v4956_v32 = vmul.f32 %v5619_v14, %v4955_v18 }
0x14f7   :  { %v4932_v1 = vsub.f32 %v4924_v59, %v4928_v26 }
0x14f8   :  { %v4875_v56 = vpop.xlane.xlu2 %4874  ;;  %v8327_v3 = vsel %vm4959_vm4, %v5619_v14, %v4956_v32  ;;  %v8600_v32 = vld [vmem:[#allocation99_spill] sm:$0xff] }
0x14f9   :  { %v5621_v11 = vpop.eup %5620  ;;  %v4917_v40 = vadd.f32 %v4875_v56, %v4863_v60  ;;  %v4982_v43 = vmul.f32 %v8327_v3, %v628_v33  ;;  %v4936_v22 = vmax.f32 %v4932_v1, 0.0  ;;  %v625_v62 = vadd.f32 %v8600_v32, %v174_v54  ;;  %v8601_v33 = vld [vmem:[#allocation98_spill] sm:$0xff] }
0x14fa   :  { %v4962_v34 = vmul.f32 %v5621_v11, %v4939_v35  ;;  %vm4968_vm5 = vweird.f32 %v5621_v11  ;;  %v8599_v35 = vld [vmem:[#allocation43_spill] sm:$0xff]  ;;  %v906_v59 = vadd.f32 %v8601_v33, %v174_v54  ;;  %v218_v1 = vld [vmem:[%s8402_s4 + $0x2a0] sm:$0xff] }
0x14fb   :  { %v4921_v41 = vmul.f32 0.0078125, %v4917_v40  ;;  %5012 = vperm.xlu2 %5537, %v4982_v43   ;;  %v4990_v42 = vmul.f32 %v4982_v43, %v8306_v5  ;;  %v4940_v57 = vadd.f32 1e-05, %v4936_v22  ;;  %vm4969_vm7 = vmor %vm4967_vm6, %vm4968_vm5  ;;  %v1044_v8 = vadd.f32 %v8599_v35, %v220_v51  ;;  %v8602_v43 = vld [vmem:[#allocation37_spill] sm:$0xff]  ;;  %v8603_v22 = vld [vmem:[#allocation100_spill] sm:$0xff] }
0x14fc   :  { %v4963_v48 = vmul.f32 %v5621_v11, %v4962_v34  ;;  %v1038_v34 = vadd.f32 %v8602_v43, %v218_v1 }
0x14fd   :  { %v4929_v23 = vsub.f32 %v4921_v41, %v4925_v47  ;;  %v4998_v10 = vsub.f32 %v760_v55, %v4990_v42  ;;  %vm4977_vm11 = vweird.f32 %v4940_v57 }
0x14fe   :  { %v4964_v17 = vmul.f32 0.5, %v4963_v48 }
0x14ff   :  { %v4933_v61 = vmax.f32 %v4929_v23, 0.0  ;;  %v909_v23 = vadd.f32 %v8603_v22, %v8319_v15 }
0x1500   :  { %v4965_v44 = vsub.f32 1.5, %v4964_v17 }
0x1501   :  { %v4937_v0 = vadd.f32 1e-05, %v4933_v61  ;;  %v4986_v42 = vmul.f32 %v8327_v3, %v909_v23 }
0x1502   :  { %v4966_v58 = vmul.f32 %v5621_v11, %v4965_v44  ;;  %v8604_v44 = vld [vmem:[#allocation42_spill] sm:$0xff] }
0x1503   :  { %5622 = vrsqrt.f32 %v4937_v0  ;;  %5060 = vperm.xlu2 %5537, %v4998_v10   ;;  %vm4947_vm9 = vweird.f32 %v4937_v0  ;;  %v8605_v10 = vld [vmem:[#allocation105_spill] sm:$0xff] }
0x1504   :  { %5624 = vrsqrt.f32 %v4940_v57  ;;  %v4970_v19 = vsel %vm4969_vm7, %v5621_v11, %v4966_v58  ;;  %v634_v15 = vadd.f32 %v8605_v10, %v177_v53  ;;  %v8606_v58 = vld [vmem:[#allocation104_spill] sm:$0xff] }
0x1505   :  { %v4983_v46 = vmul.f32 %v4970_v19, %v631_v24  ;;  %v4987_v14 = vmul.f32 %v4970_v19, %v912_v38  ;;  %v915_v36 = vadd.f32 %v8606_v58, %v177_v53  ;;  %v221_v24 = vld [vmem:[%s8402_s4 + $0x2b8] sm:$0xff] }
0x1507   :  { %v4995_v49 = vmul.f32 %v4987_v14, %v8310_v39  ;;  %v4991_v55 = vmul.f32 %v4983_v46, %v8310_v39  ;;  %v766_v39 = vadd.f32 %v8607_v52, %v221_v24 }
0x1509   :  { %v5623_v37 = vpop.eup %5622  ;;  %v5003_v31 = vsub.f32 %v1044_v8, %v4995_v49  ;;  %v5110_v8 = vld [vmem:[#allocation2] sm:$0x1] }
0x150a   :  { %v4942_v2 = vmul.f32 %v5623_v37, %v4937_v0  ;;  %v5625_v16 = vpop.eup %5624  ;;  %vm4948_vm8 = vweird.f32 %v5623_v37  ;;  %v763_v0 = vadd.f32 %v8604_v44, %v220_v51 }
0x150b   :  { %5017 = vperm.xlu2 %5537, %v4983_v46   ;;  %v4972_v28 = vmul.f32 %v5625_v16, %v4940_v57  ;;  %vm4949_vm10 = vmor %vm4947_vm9, %vm4948_vm8  ;;  %vm4978_vm0 = vweird.f32 %v5625_v16  ;;  %v4994_v46 = vmul.f32 %v4986_v42, %v8306_v5 }
0x150c   :  { %v4943_v7 = vmul.f32 %v5623_v37, %v4942_v2  ;;  %vm4979_vm12 = vmor %vm4977_vm11, %vm4978_vm0  ;;  %v4999_v3 = vsub.f32 %v763_v0, %v4991_v55 }
0x150d   :  { %v4973_v18 = vmul.f32 %v5625_v16, %v4972_v28 }
0x150e   :  { %v4944_v30 = vmul.f32 0.5, %v4943_v7 }
0x150f   :  { %v4974_v40 = vmul.f32 0.5, %v4973_v18 }
0x1510   :  { %v4945_v6 = vsub.f32 1.5, %v4944_v30  ;;  %v8610_v30 = vld [vmem:[#allocation36_spill] sm:$0xff] }
0x1511   :  { %v4975_v48 = vsub.f32 1.5, %v4974_v40  ;;  %v757_v35 = vadd.f32 %v8610_v30, %v218_v1 }
0x1512   :  { %v4946_v26 = vmul.f32 %v5623_v37, %v4945_v6 }
0x1513   :  { %5085 = vperm.xlu2 %5537, %v5003_v31   ;;  %v4976_v17 = vmul.f32 %v5625_v16, %v4975_v48 }
0x1514   :  { %v4950_v60 = vsel %vm4949_vm10, %v5623_v37, %v4946_v26 }
0x1515   :  { %v4985_v56 = vmul.f32 %v4950_v60, %v906_v59  ;;  %v4981_v11 = vmul.f32 %v4950_v60, %v625_v62  ;;  %v4980_v61 = vsel %vm4979_vm12, %v5625_v16, %v4976_v17  ;;  %v8609_v16 = vld [vmem:[#allocation46_spill] sm:$0xff] }
0x1516   :  { %v4988_v19 = vmul.f32 %v4980_v61, %v915_v36  ;;  %v4984_v25 = vmul.f32 %v4980_v61, %v634_v15  ;;  %v1047_v7 = vadd.f32 %v8609_v16, %v221_v24 }
0x1517   :  { %5027 = vperm.xlu0 %5535, %v4985_v56   ;;  %5007 = vperm.xlu1 %5536, %v4981_v11   ;;  %v4993_v47 = vmul.f32 %v4985_v56, %v8325_v20  ;;  %v4989_v28 = vmul.f32 %v4981_v11, %v8325_v20 }
0x1518   :  { %v4992_v57 = vmul.f32 %v4984_v25, %v8314_v21  ;;  %v4996_v37 = vmul.f32 %v4988_v19, %v8314_v21 }
0x1519   :  { %v5001_v41 = vsub.f32 %v1038_v34, %v4993_v47  ;;  %v4997_v54 = vsub.f32 %v757_v35, %v4989_v28 }
0x151a   :  { %v5000_v38 = vsub.f32 %v766_v39, %v4992_v57  ;;  %v5004_v49 = vsub.f32 %v1047_v7, %v4996_v37 }
0x151b   :  { %5075 = vperm.xlu2 %5537, %v5001_v41  }
0x151f   :  { %5037 = vperm.xlu0 %5535, %v4987_v14   ;;  %5032 = vperm.xlu1 %5536, %v4986_v42   ;;  %v8608_v14 = vld [vmem:[#allocation39_spill] sm:$0xff] }
0x1520   :  { %v1041_v2 = vadd.f32 %v8608_v14, %v8335_v12 }
0x1522   :  { %v5002_v51 = vsub.f32 %v1041_v2, %v4994_v46 }
0x1527   :  { %5065 = vperm.xlu0 %5535, %v4999_v3   ;;  %5042 = vperm.xlu1 %5536, %v4988_v19  }
0x152f   :  { %5022 = vperm.xlu0 %5535, %v4984_v25   ;;  %5070 = vperm.xlu1 %5536, %v5000_v38  }
0x1537   :  { %5090 = vperm.xlu0 %5535, %v5004_v49   ;;  %5080 = vperm.xlu1 %5536, %v5002_v51  }
0x153f   :  { %5113 = vperm.xlu1 %5536, %v5110_v8   ;;  %5055 = vperm.xlu0 %5535, %v4997_v54  }
0x1555   :  { %v5013_v21 = vpop.permute.xlu2 %5012 }
0x1556   :  { %v5046_v56 = vmul.f32 %v5013_v21, %v8253_v63 }
0x155d   :  { %v5061_v31 = vpop.permute.xlu2 %5060 }
0x155e   :  { %v5094_v43 = vadd.f32 %v5061_v31, %v5046_v56 }
0x1560   :  { %v5102_v22 = vmax.f32 %v5094_v43, 0.0 }
0x1565   :  { %v5018_v26 = vpop.permute.xlu2 %5017 }
0x1566   :  { %v5047_v60 = vmul.f32 %v5018_v26, %v8268_v27 }
0x156d   :  { %v5086_v11 = vpop.permute.xlu2 %5085 }
0x1575   :  { %v5076_v61 = vpop.permute.xlu2 %5075 }
0x1589   :  { %v5028_v6 = vpop.permute.xlu0 %5027  ;;  %v5008_v5 = vpop.permute.xlu1 %5007 }
0x158a   :  { %v5049_v27 = vmul.f32 %v5028_v6, %v8248_v45  ;;  %v5109_v45 = vld [vmem:[%s8408_s10] sm:$0x1]  ;;  %s5654_s10 = smov 16  }
0x1591   :  { %v5038_v18 = vpop.permute.xlu0 %5037  ;;  %v5033_v12 = vpop.permute.xlu1 %5032 }
0x1592   :  { %v5051_v34 = vmul.f32 %v5038_v18, %v8274_v4  ;;  %v5097_v4 = vadd.f32 %v5076_v61, %v5049_v27 }
0x1594   :  { %v5099_v17 = vadd.f32 %v5086_v11, %v5051_v34  ;;  %v5105_v15 = vmax.f32 %v5097_v4, 0.0 }
0x1596   :  { %v5107_v44 = vmax.f32 %v5099_v17, 0.0 }
0x1599   :  { %v5066_v32 = vpop.permute.xlu0 %5065  ;;  %v5043_v62 = vpop.permute.xlu1 %5042 }
0x159a   :  { %v5095_v1 = vadd.f32 %v5066_v32, %v5047_v60  ;;  %v5052_v48 = vmul.f32 %v5043_v62, %v8287_v9  ;;  %v5045_v9 = vmul.f32 %v5008_v5, %v8243_v50 }
0x159c   :  { %v5103_v41 = vmax.f32 %v5095_v1, 0.0 }
0x15a1   :  { %v5023_v33 = vpop.permute.xlu0 %5022  ;;  %v5071_v59 = vpop.permute.xlu1 %5070 }
0x15a2   :  { %v5048_v20 = vmul.f32 %v5023_v33, %v8280_v13  ;;  %v5050_v13 = vmul.f32 %v5033_v12, %v8260_v29 }
0x15a4   :  { %v5096_v40 = vadd.f32 %v5071_v59, %v5048_v20 }
0x15a6   :  { %v5104_v47 = vmax.f32 %v5096_v40, 0.0 }
0x15a8   :  { %5132 = vmatpush.msrb.mxu2 %v5104_v47 }
0x15a9   :  { %v5091_v23 = vpop.permute.xlu0 %5090  ;;  %v5081_v42 = vpop.permute.xlu1 %5080 }
0x15aa   :  { %v5100_v63 = vadd.f32 %v5091_v23, %v5052_v48  ;;  %5133 = vmatpush.msrb.mxu2 %v5103_v41  ;;  %v5098_v55 = vadd.f32 %v5081_v42, %v5050_v13 }
0x15ac   :  { %v5108_v53 = vmax.f32 %v5100_v63, 0.0  ;;  %5134 = vmatpush.msrb.mxu2 %v5102_v22  ;;  %v5106_v0 = vmax.f32 %v5098_v55, 0.0 }
0x15ae   :  { %5152 = vmatpush.msrb.mxu3 %v5108_v53 }
0x15b0   :  { %5153 = vmatpush.msrb.mxu3 %v5107_v44 }
0x15b1   :  { %v5056_v10 = vpop.permute.xlu0 %5055  ;;  %v5114_v36 = vpop.permute.xlu1 %5113 }
0x15b2   :  { %v5093_v58 = vadd.f32 %v5056_v10, %v5045_v9  ;;  %5154 = vmatpush.msrb.mxu3 %v5106_v0  ;;  %v5116_v3 = vperm.slane %v5114_v36, 0 }
0x15b4   :  { %v5101_v29 = vmax.f32 %v5093_v58, 0.0  ;;  %5155 = vmatpush.msrb.mxu3 %v5105_v15 }
0x15b5   :  { %5528 = vmatmul.msk.f32.vlgmr.msrb.gmra.mxu3 %vm1538_vm1, %v5109_v45 }
0x15b6   :  { %5135 = vmatpush.msrb.mxu2 %v5101_v29 }
0x15b7   :  { %5527 = vmatmul.msk.f32.vlgmr.msrb.gmra.mxu2 %vm1538_vm1, %v5109_v45 }
0x1638   :  { %v5157_v50 = vpop.f32.mrf.mxu3 }
0x1639   :  { %v5158_v19 = vadd.f32 %v5157_v50, %v5116_v3 }
0x163a   :  { %v5137_v25 = vpop.f32.mrf.mxu2 }
0x163b   :  { %5162 = vst.msk [vmem:[#allocation3 + $0x1] sm:$0x1] %vm5160_vm13, %v5158_v19  ;;  %v5138_v24 = vadd.f32 %v5137_v25, %v5116_v3 }
0x163d   :  { %5161 = vst.msk [vmem:[#allocation3] sm:$0x1] %vm5160_vm13, %v5138_v24 }
0x163e   :  { %5175 = dma.vmem_to_hbm [thread:$0]  %s5168_s2, 32, %s5170_s7, [#allocation4], %s5654_s10, %s5654_s10, %s5655_s15  }
0x163f   :  { %5650 = dma.done.wait [#allocation4], 32  }
0x1640   :  { %5651 = vsyncadd [#allocation4], 4294967264 }
0x1641   :  { %5180 = vsyncpa [#allocation4], 1 }

</bundles_post_ra>
